<compile_context>
chip_gen: v7x
topology: tpu7x:2x2x1
jax: 0.10.0
libtpu: 0.0.40
codegen_flags: <defaults>
</compile_context>

<pallas_src>
import jax
import jax.numpy as jnp
from jax import lax
from jax.experimental import pallas as pl
from jax.experimental.pallas import tpu as pltpu


# ----------------------------------------------------------------------------
# Kernel 1: fused im2col 3x3 conv (+bias) + 2x2 max-pool
# ----------------------------------------------------------------------------
def _conv3x3_pool_kernel(p_ref, w_ref, b_ref, o_ref, hp_ref):
    # p_ref : (1, strip, W, 9*Cin)  3x3 patches for `strip` conv-output rows
    # w_ref : (9*Cin, Cout)         taps flattened (dy, dx, ci) row-major
    # b_ref : (1, Cout)
    # o_ref : (1, strip//2, W//2, Cout)   pooled output row-strip
    # hp_ref: ((strip//2) * W, Cout)      scratch: row-pooled, flat (r, w)
    _, strip, W, KC = p_ref.shape
    Cout = w_ref.shape[1]
    half = strip // 2

    # conv: one MXU matmul over the full 3x3 x Cin contraction, written once.
    patches = p_ref[0].reshape(strip * W, KC)
    acc = jnp.dot(patches, w_ref[...], preferred_element_type=jnp.float32)
    acc = acc + b_ref[...]                                    # (strip*W, Cout)

    # 2x2 max-pool, stage 1: adjacent row pairs (aligned value slices).
    acc = acc.reshape(half, 2 * W, Cout)
    hp_ref[...] = jnp.maximum(acc[:, :W, :], acc[:, W:, :]).reshape(half * W, Cout)

    # stage 2: adjacent column pairs via stride-2 sublane reads.
    P = half * (W // 2)
    pooled = jnp.maximum(hp_ref[pl.ds(0, P, 2), :], hp_ref[pl.ds(1, P, 2), :])
    o_ref[0] = pooled.reshape(half, W // 2, Cout)


def _extract_patches_3x3(x_nhwc):
    """(N, H, W, C) -> (N, H, W, 9*C): zero-padded 3x3 neighborhoods.

    Tap order is (dy, dx) row-major with channel fastest, matching
    w_hwio.reshape(9*Cin, Cout)."""
    N, H, W, C = x_nhwc.shape
    xp = jnp.pad(x_nhwc, ((0, 0), (1, 1), (1, 1), (0, 0)))
    slabs = [xp[:, dy:dy + H, dx:dx + W, :] for dy in range(3) for dx in range(3)]
    return jnp.concatenate(slabs, axis=-1)


def conv3x3_pool(x_nhwc, w_col, b, *, strip=32):
    """y = maxpool2x2(conv3x3(x, pad=1) + b);  x: (N,H,W,Cin) -> (N,H/2,W/2,Cout)."""
    N, H, W, Cin = x_nhwc.shape
    KC, Cout = w_col.shape
    assert KC == 9 * Cin
    strip = min(strip, H)
    assert H % strip == 0 and strip % 2 == 0 and W % 2 == 0
    patches = _extract_patches_3x3(x_nhwc)                # (N, H, W, 9*Cin)
    b2 = b.reshape(1, Cout)
    half = strip // 2
    return pl.pallas_call(
        _conv3x3_pool_kernel,
        out_shape=jax.ShapeDtypeStruct((N, H // 2, W // 2, Cout), jnp.float32),
        grid_spec=pltpu.PrefetchScalarGridSpec(
            num_scalar_prefetch=0,
            grid=(N, H // strip),
            in_specs=[
                pl.BlockSpec((1, strip, W, KC), lambda n, s: (n, s, 0, 0)),
                pl.BlockSpec((KC, Cout), lambda n, s: (0, 0)),
                pl.BlockSpec((1, Cout), lambda n, s: (0, 0)),
            ],
            out_specs=pl.BlockSpec((1, half, W // 2, Cout),
                                   lambda n, s: (n, s, 0, 0)),
            scratch_shapes=[pltpu.VMEM((half * W, Cout), jnp.float32)],
        ),
        compiler_params=pltpu.CompilerParams(
            dimension_semantics=("parallel", "parallel"),
            vmem_limit_bytes=48 * 1024 * 1024),
    )(patches, w_col, b2)


# ----------------------------------------------------------------------------
# Kernel 2: fc1 image part  y = x @ w.T  with lane-dense (M, tk) weight blocks.
# K is split into `k_splits` parallel partial sums (both TCs on v7x) with
# `n_inner` arbitrary accumulation steps each; partials summed in the wrapper.
# ----------------------------------------------------------------------------
def _fc_partial_kernel(x_ref, w_ref, o_ref):
    @pl.when(pl.program_id(1) == 0)
    def _():
        o_ref[...] = jnp.zeros_like(o_ref)
    o_ref[0] += lax.dot_general(
        x_ref[...], w_ref[...],
        dimension_numbers=(((1,), (1,)), ((), ())),
        preferred_element_type=jnp.float32)


def fc_no_bias(x, w, *, tk=8192, k_splits=2):
    """y = x @ w.T;  x: (N, K), w: (M, K)."""
    N, K = x.shape
    M = w.shape[0]
    if K % (k_splits * tk) != 0:          # fallback: whole K in one block
        k_splits, tk = 1, K
    n_inner = K // (k_splits * tk)
    partial = pl.pallas_call(
        _fc_partial_kernel,
        out_shape=jax.ShapeDtypeStruct((k_splits, N, M), jnp.float32),
        grid_spec=pltpu.PrefetchScalarGridSpec(
            num_scalar_prefetch=0,
            grid=(k_splits, n_inner),
            in_specs=[
                pl.BlockSpec((N, tk), lambda p, k: (0, p * n_inner + k)),
                pl.BlockSpec((M, tk), lambda p, k: (0, p * n_inner + k)),
            ],
            out_specs=pl.BlockSpec((1, N, M), lambda p, k: (p, 0, 0)),
        ),
        compiler_params=pltpu.CompilerParams(
            dimension_semantics=("parallel", "arbitrary")),
    )(x, w)
    return jnp.sum(partial, axis=0)


# ----------------------------------------------------------------------------
# Parameters + model wrapper, matching FullWavModel.forward
# ----------------------------------------------------------------------------
def init_params(key, num_types):
    ks = jax.random.split(key, 8)
    return {
        "conv1_w": jax.random.normal(ks[0], (16, 2, 3, 3), jnp.float32) * 0.05,
        "conv1_b": jax.random.normal(ks[1], (16,), jnp.float32) * 0.05,
        "conv2_w": jax.random.normal(ks[2], (32, 16, 3, 3), jnp.float32) * 0.05,
        "conv2_b": jax.random.normal(ks[3], (32,), jnp.float32) * 0.05,
        "fcnums_w": jax.random.normal(ks[4], (32, 3), jnp.float32) * 0.05,
        "fcnums_b": jax.random.normal(ks[5], (32,), jnp.float32) * 0.05,
        "fc1_w": jax.random.normal(ks[6], (num_types, 32768 + 32), jnp.float32) * 0.01,
        "fc1_b": jax.random.normal(ks[7], (num_types,), jnp.float32) * 0.01,
    }


def prepare_params(params):
    """One-time repack of PyTorch-layout weights into kernel-friendly layouts
    (done at param-load time, outside the jitted forward)."""
    num_types = params["fc1_w"].shape[0]
    # OIHW -> ((dy*3+dx)*Cin, Cout), matching the im2col patch order.
    w1 = jnp.transpose(params["conv1_w"], (2, 3, 1, 0)).reshape(9 * 2, 16)
    w2 = jnp.transpose(params["conv2_w"], (2, 3, 1, 0)).reshape(9 * 16, 32)
    # fc1 image columns: NCHW flatten order -> NHWC flatten order, so no
    # runtime transpose is needed before the flatten.
    w_img = params["fc1_w"][:, :32768].reshape(num_types, 32, 32, 32)  # (M,C,H,W)
    w_img = jnp.transpose(w_img, (0, 2, 3, 1)).reshape(num_types, 32768)
    return {
        "w1_col": w1, "conv1_b": params["conv1_b"],
        "w2_col": w2, "conv2_b": params["conv2_b"],
        "fc1_w_img": w_img,
        "fc1_w_nums": params["fc1_w"][:, 32768:],
        "fc1_b": params["fc1_b"],
        "fcnums_w": params["fcnums_w"],
        "fcnums_b": params["fcnums_b"],
    }


def full_wav_model_forward(p, image, diameter, abs_mag, albedo, wav):
    # image, wav: NCHW (PyTorch convention). torch.cat(..., dim=0) = batch concat.
    img_in = jnp.concatenate([image, wav], axis=0)            # (N, 2, H, W)
    x = jnp.transpose(img_in, (0, 2, 3, 1))                   # NHWC
    x = conv3x3_pool(x, p["w1_col"], p["conv1_b"])            # (N, H/2, W/2, 16)
    x = conv3x3_pool(x, p["w2_col"], p["conv2_b"])            # (N, H/4, W/4, 32)
    x_flat = x.reshape(x.shape[0], -1)                        # NHWC flatten (free)
    img_logits = fc_no_bias(x_flat, p["fc1_w_img"])           # (N, num_types)
    # fcNums and the 32 "nums" columns of fc1 are ~400 FLOPs: plain JAX.
    nums = jnp.stack([diameter.reshape(-1), abs_mag.reshape(-1),
                      albedo.reshape(-1)], axis=1)            # (N, 3)
    nums = nums @ p["fcnums_w"].T + p["fcnums_b"]             # (N, 32)
    return img_logits + nums @ p["fc1_w_nums"].T + p["fc1_b"]


# Pure-JAX reference (XLA, PyTorch-layout params) for a correctness cross-check.
def reference_forward(params, image, diameter, abs_mag, albedo, wav):
    img_in = jnp.concatenate([image, wav], axis=0)

    def conv(x, w, b):
        y = jax.lax.conv_general_dilated(
            x, w, (1, 1), ((1, 1), (1, 1)),
            dimension_numbers=("NCHW", "OIHW", "NCHW"))
        return y + b.reshape(1, -1, 1, 1)

    def pool(x):
        return jax.lax.reduce_window(x, -jnp.inf, jax.lax.max,
                                     (1, 1, 2, 2), (1, 1, 2, 2), "VALID")

    x = pool(conv(img_in, params["conv1_w"], params["conv1_b"]))
    x = pool(conv(x, params["conv2_w"], params["conv2_b"]))
    x = x.reshape(x.shape[0], -1)
    nums = jnp.stack([diameter.reshape(-1), abs_mag.reshape(-1),
                      albedo.reshape(-1)], axis=1)
    nums = nums @ params["fcnums_w"].T + params["fcnums_b"]
    feat = jnp.concatenate([x, nums], axis=1)
    return feat @ params["fc1_w"].T + params["fc1_b"]


if __name__ == "__main__":
    num_types = 8
    # fc1.in_features = 32*32*32 + 32 = 32800 implies 128x128 spatial inputs.
    H = W = 128
    key = jax.random.PRNGKey(0)
    k_img, k_wav, k_d, k_m, k_a, k_p = jax.random.split(key, 6)
    image = jax.random.normal(k_img, (1, 2, H, W), jnp.float32)
    wav = jax.random.normal(k_wav, (1, 2, H, W), jnp.float32)
    diameter = jax.random.normal(k_d, (2,), jnp.float32)   # batch after cat = 2
    abs_mag = jax.random.normal(k_m, (2,), jnp.float32)
    albedo = jax.random.normal(k_a, (2,), jnp.float32)
    params = init_params(k_p, num_types)
    prep = prepare_params(params)

    logits = jax.jit(full_wav_model_forward)(
        prep, image, diameter, abs_mag, albedo, wav)
    logits = jax.block_until_ready(logits)

    ref = reference_forward(params, image, diameter, abs_mag, albedo, wav)
    assert logits.shape == (2, num_types), logits.shape
    assert jnp.allclose(logits, ref, rtol=5e-2, atol=5e-2), (logits, ref)
    print("KERNEL_OK")
</pallas_src>

<mosaic_0001>
module attributes {stable_mosaic.version = 11 : i64} {
  func.func @_conv3x3_pool_kernel(%arg0: i32, %arg1: i32, %arg2: memref<1x32x128x18xf32, #tpu.memory_space<vmem>>, %arg3: memref<18x16xf32, #tpu.memory_space<vmem>>, %arg4: memref<1x16xf32, #tpu.memory_space<vmem>>, %arg5: memref<1x16x64x16xf32, #tpu.memory_space<vmem>>, %arg6: memref<2048x16xf32, #tpu.memory_space<vmem>>) attributes {dimension_semantics = [#tpu.dimension_semantics<parallel>, #tpu.dimension_semantics<parallel>], iteration_bounds = array<i64: 2, 4>, scalar_prefetch = 0 : i64, scratch_operands = 1 : i64, tpu.core_type = #tpu.core_type<tc>, window_params = [{transform_indices = @transform_0, window_bounds = array<i64: 1, 32, 128, 18>}, {pipeline_mode = #tpu.pipeline_mode<synchronous>, transform_indices = @transform_1, window_bounds = array<i64: 18, 16>}, {pipeline_mode = #tpu.pipeline_mode<synchronous>, transform_indices = @transform_2, window_bounds = array<i64: 1, 16>}, {transform_indices = @transform_3, window_bounds = array<i64: 1, 16, 64, 16>}]} {
    %c0 = arith.constant 0 : index
    %c0_0 = arith.constant 0 : index
    %c0_1 = arith.constant 0 : index
    %c0_2 = arith.constant 0 : index
    %0 = vector.load %arg2[%c0, %c0_0, %c0_1, %c0_2] : memref<1x32x128x18xf32, #tpu.memory_space<vmem>>, vector<1x32x128x18xf32>
    %1 = vector.shape_cast %0 : vector<1x32x128x18xf32> to vector<32x128x18xf32>
    %2 = vector.shape_cast %1 : vector<32x128x18xf32> to vector<4096x18xf32>
    %c0_3 = arith.constant 0 : index
    %c0_4 = arith.constant 0 : index
    %3 = vector.load %arg3[%c0_3, %c0_4] : memref<18x16xf32, #tpu.memory_space<vmem>>, vector<18x16xf32>
    %cst = arith.constant dense<0.000000e+00> : vector<4096x16xf32>
    %4 = tpu.matmul %2, %3, %cst {dimension_numbers = #tpu.dot_dimension_numbers<[1], [0], [0], [1], [0, 0, 1, 1], [], []>} : vector<4096x18xf32>, vector<18x16xf32>, vector<4096x16xf32> -> vector<4096x16xf32>
    %c0_5 = arith.constant 0 : index
    %c0_6 = arith.constant 0 : index
    %5 = vector.load %arg4[%c0_5, %c0_6] : memref<1x16xf32, #tpu.memory_space<vmem>>, vector<1x16xf32>
    %6 = vector.broadcast %5 : vector<1x16xf32> to vector<4096x16xf32>
    %7 = arith.addf %4, %6 : vector<4096x16xf32>
    %8 = vector.shape_cast %7 : vector<4096x16xf32> to vector<16x256x16xf32>
    %9 = vector.extract_strided_slice %8 {offsets = [0, 0, 0], sizes = [16, 128, 16], strides = [1, 1, 1]} : vector<16x256x16xf32> to vector<16x128x16xf32>
    %10 = vector.extract_strided_slice %8 {offsets = [0, 128, 0], sizes = [16, 128, 16], strides = [1, 1, 1]} : vector<16x256x16xf32> to vector<16x128x16xf32>
    %11 = arith.maximumf %9, %10 : vector<16x128x16xf32>
    %12 = vector.shape_cast %11 : vector<16x128x16xf32> to vector<2048x16xf32>
    %c0_7 = arith.constant 0 : index
    %c0_8 = arith.constant 0 : index
    %13 = vector.load %arg6[%c0_7, %c0_8] : memref<2048x16xf32, #tpu.memory_space<vmem>>, vector<2048x16xf32>
    tpu.vector_store %arg6[%c0_7, %c0_8], %12 {strides = array<i32>} : memref<2048x16xf32, #tpu.memory_space<vmem>>, vector<2048x16xf32>,
    %c0_9 = arith.constant 0 : index
    %c0_10 = arith.constant 0 : index
    %14 = tpu.strided_load %arg6[%c0_9, %c0_10] {strides = array<i32: 2, 1>} : memref<2048x16xf32, #tpu.memory_space<vmem>>, vector<1024x16xf32>
    %c1 = arith.constant 1 : index
    %c0_11 = arith.constant 0 : index
    %15 = tpu.strided_load %arg6[%c1, %c0_11] {strides = array<i32: 2, 1>} : memref<2048x16xf32, #tpu.memory_space<vmem>>, vector<1024x16xf32>
    %16 = arith.maximumf %14, %15 : vector<1024x16xf32>
    %17 = vector.shape_cast %16 : vector<1024x16xf32> to vector<16x64x16xf32>
    %c0_12 = arith.constant 0 : index
    %c0_13 = arith.constant 0 : index
    %c0_14 = arith.constant 0 : index
    %c0_15 = arith.constant 0 : index
    %18 = vector.load %arg5[%c0_12, %c0_13, %c0_14, %c0_15] : memref<1x16x64x16xf32, #tpu.memory_space<vmem>>, vector<1x16x64x16xf32>
    %19 = vector.shape_cast %18 : vector<1x16x64x16xf32> to vector<16x64x16xf32>
    %20 = vector.shape_cast %17 : vector<16x64x16xf32> to vector<1x16x64x16xf32>
    tpu.vector_store %arg5[%c0_12, %c0_13, %c0_14, %c0_15], %20 {strides = array<i32>} : memref<1x16x64x16xf32, #tpu.memory_space<vmem>>, vector<1x16x64x16xf32>,
    return
  }
  func.func @transform_0(%arg0: i32, %arg1: i32) -> (i32, i32, i32, i32) {
    %c0_i32 = arith.constant 0 : i32
    %c0_i32_0 = arith.constant 0 : i32
    %c0_i32_1 = arith.constant 0 : i32
    return %arg0, %arg1, %c0_i32, %c0_i32_0 : i32, i32, i32, i32
  }
  func.func @transform_1(%arg0: i32, %arg1: i32) -> (i32, i32) {
    %c0_i32 = arith.constant 0 : i32
    %c0_i32_0 = arith.constant 0 : i32
    %c0_i32_1 = arith.constant 0 : i32
    return %c0_i32, %c0_i32_0 : i32, i32
  }
  func.func @transform_2(%arg0: i32, %arg1: i32) -> (i32, i32) {
    %c0_i32 = arith.constant 0 : i32
    %c0_i32_0 = arith.constant 0 : i32
    %c0_i32_1 = arith.constant 0 : i32
    return %c0_i32, %c0_i32_0 : i32, i32
  }
  func.func @transform_3(%arg0: i32, %arg1: i32) -> (i32, i32, i32, i32) {
    %c0_i32 = arith.constant 0 : i32
    %c0_i32_0 = arith.constant 0 : i32
    %c0_i32_1 = arith.constant 0 : i32
    return %arg0, %arg1, %c0_i32, %c0_i32_0 : i32, i32, i32, i32
  }
}

module attributes {stable_mosaic.version = 11 : i64} {
  func.func @_conv3x3_pool_kernel(%arg0: i32, %arg1: i32, %arg2: memref<1x32x64x144xf32, #tpu.memory_space<vmem>>, %arg3: memref<144x32xf32, #tpu.memory_space<vmem>>, %arg4: memref<1x32xf32, #tpu.memory_space<vmem>>, %arg5: memref<1x16x32x32xf32, #tpu.memory_space<vmem>>, %arg6: memref<1024x32xf32, #tpu.memory_space<vmem>>) attributes {dimension_semantics = [#tpu.dimension_semantics<parallel>, #tpu.dimension_semantics<parallel>], iteration_bounds = array<i64: 2, 2>, scalar_prefetch = 0 : i64, scratch_operands = 1 : i64, tpu.core_type = #tpu.core_type<tc>, window_params = [{transform_indices = @transform_0, window_bounds = array<i64: 1, 32, 64, 144>}, {pipeline_mode = #tpu.pipeline_mode<synchronous>, transform_indices = @transform_1, window_bounds = array<i64: 144, 32>}, {pipeline_mode = #tpu.pipeline_mode<synchronous>, transform_indices = @transform_2, window_bounds = array<i64: 1, 32>}, {transform_indices = @transform_3, window_bounds = array<i64: 1, 16, 32, 32>}]} {
    %c0 = arith.constant 0 : index
    %c0_0 = arith.constant 0 : index
    %c0_1 = arith.constant 0 : index
    %c0_2 = arith.constant 0 : index
    %0 = vector.load %arg2[%c0, %c0_0, %c0_1, %c0_2] : memref<1x32x64x144xf32, #tpu.memory_space<vmem>>, vector<1x32x64x144xf32>
    %1 = vector.shape_cast %0 : vector<1x32x64x144xf32> to vector<32x64x144xf32>
    %2 = vector.shape_cast %1 : vector<32x64x144xf32> to vector<2048x144xf32>
    %c0_3 = arith.constant 0 : index
    %c0_4 = arith.constant 0 : index
    %3 = vector.load %arg3[%c0_3, %c0_4] : memref<144x32xf32, #tpu.memory_space<vmem>>, vector<144x32xf32>
    %cst = arith.constant dense<0.000000e+00> : vector<2048x32xf32>
    %4 = tpu.matmul %2, %3, %cst {dimension_numbers = #tpu.dot_dimension_numbers<[1], [0], [0], [1], [0, 0, 1, 1], [], []>} : vector<2048x144xf32>, vector<144x32xf32>, vector<2048x32xf32> -> vector<2048x32xf32>
    %c0_5 = arith.constant 0 : index
    %c0_6 = arith.constant 0 : index
    %5 = vector.load %arg4[%c0_5, %c0_6] : memref<1x32xf32, #tpu.memory_space<vmem>>, vector<1x32xf32>
    %6 = vector.broadcast %5 : vector<1x32xf32> to vector<2048x32xf32>
    %7 = arith.addf %4, %6 : vector<2048x32xf32>
    %8 = vector.shape_cast %7 : vector<2048x32xf32> to vector<16x128x32xf32>
    %9 = vector.extract_strided_slice %8 {offsets = [0, 0, 0], sizes = [16, 64, 32], strides = [1, 1, 1]} : vector<16x128x32xf32> to vector<16x64x32xf32>
    %10 = vector.extract_strided_slice %8 {offsets = [0, 64, 0], sizes = [16, 64, 32], strides = [1, 1, 1]} : vector<16x128x32xf32> to vector<16x64x32xf32>
    %11 = arith.maximumf %9, %10 : vector<16x64x32xf32>
    %12 = vector.shape_cast %11 : vector<16x64x32xf32> to vector<1024x32xf32>
    %c0_7 = arith.constant 0 : index
    %c0_8 = arith.constant 0 : index
    %13 = vector.load %arg6[%c0_7, %c0_8] : memref<1024x32xf32, #tpu.memory_space<vmem>>, vector<1024x32xf32>
    tpu.vector_store %arg6[%c0_7, %c0_8], %12 {strides = array<i32>} : memref<1024x32xf32, #tpu.memory_space<vmem>>, vector<1024x32xf32>,
    %c0_9 = arith.constant 0 : index
    %c0_10 = arith.constant 0 : index
    %14 = tpu.strided_load %arg6[%c0_9, %c0_10] {strides = array<i32: 2, 1>} : memref<1024x32xf32, #tpu.memory_space<vmem>>, vector<512x32xf32>
    %c1 = arith.constant 1 : index
    %c0_11 = arith.constant 0 : index
    %15 = tpu.strided_load %arg6[%c1, %c0_11] {strides = array<i32: 2, 1>} : memref<1024x32xf32, #tpu.memory_space<vmem>>, vector<512x32xf32>
    %16 = arith.maximumf %14, %15 : vector<512x32xf32>
    %17 = vector.shape_cast %16 : vector<512x32xf32> to vector<16x32x32xf32>
    %c0_12 = arith.constant 0 : index
    %c0_13 = arith.constant 0 : index
    %c0_14 = arith.constant 0 : index
    %c0_15 = arith.constant 0 : index
    %18 = vector.load %arg5[%c0_12, %c0_13, %c0_14, %c0_15] : memref<1x16x32x32xf32, #tpu.memory_space<vmem>>, vector<1x16x32x32xf32>
    %19 = vector.shape_cast %18 : vector<1x16x32x32xf32> to vector<16x32x32xf32>
    %20 = vector.shape_cast %17 : vector<16x32x32xf32> to vector<1x16x32x32xf32>
    tpu.vector_store %arg5[%c0_12, %c0_13, %c0_14, %c0_15], %20 {strides = array<i32>} : memref<1x16x32x32xf32, #tpu.memory_space<vmem>>, vector<1x16x32x32xf32>,
    return
  }
  func.func @transform_0(%arg0: i32, %arg1: i32) -> (i32, i32, i32, i32) {
    %c0_i32 = arith.constant 0 : i32
    %c0_i32_0 = arith.constant 0 : i32
    %c0_i32_1 = arith.constant 0 : i32
    return %arg0, %arg1, %c0_i32, %c0_i32_0 : i32, i32, i32, i32
  }
  func.func @transform_1(%arg0: i32, %arg1: i32) -> (i32, i32) {
    %c0_i32 = arith.constant 0 : i32
    %c0_i32_0 = arith.constant 0 : i32
    %c0_i32_1 = arith.constant 0 : i32
    return %c0_i32, %c0_i32_0 : i32, i32
  }
  func.func @transform_2(%arg0: i32, %arg1: i32) -> (i32, i32) {
    %c0_i32 = arith.constant 0 : i32
    %c0_i32_0 = arith.constant 0 : i32
    %c0_i32_1 = arith.constant 0 : i32
    return %c0_i32, %c0_i32_0 : i32, i32
  }
  func.func @transform_3(%arg0: i32, %arg1: i32) -> (i32, i32, i32, i32) {
    %c0_i32 = arith.constant 0 : i32
    %c0_i32_0 = arith.constant 0 : i32
    %c0_i32_1 = arith.constant 0 : i32
    return %arg0, %arg1, %c0_i32, %c0_i32_0 : i32, i32, i32, i32
  }
}

module attributes {stable_mosaic.version = 11 : i64} {
  func.func @_fc_partial_kernel(%arg0: i32, %arg1: i32, %arg2: memref<2x8192xf32, #tpu.memory_space<vmem>>, %arg3: memref<8x8192xf32, #tpu.memory_space<vmem>>, %arg4: memref<1x2x8xf32, #tpu.memory_space<vmem>>) attributes {dimension_semantics = [#tpu.dimension_semantics<parallel>, #tpu.dimension_semantics<arbitrary>], iteration_bounds = array<i64: 2, 2>, scalar_prefetch = 0 : i64, scratch_operands = 0 : i64, tpu.core_type = #tpu.core_type<tc>, window_params = [{transform_indices = @transform_0, window_bounds = array<i64: 2, 8192>}, {transform_indices = @transform_1, window_bounds = array<i64: 8, 8192>}, {transform_indices = @transform_2, window_bounds = array<i64: 1, 2, 8>}]} {
    %c0_i32 = arith.constant 0 : i32
    %0 = arith.cmpi eq, %arg1, %c0_i32 : i32
    %1 = arith.extui %0 : i1 to i32
    %c0_i32_0 = arith.constant 0 : i32
    %2 = arith.cmpi ne, %1, %c0_i32_0 : i32
    scf.if %2 {
      %cst_10 = arith.constant 0.000000e+00 : f32
      %12 = vector.broadcast %cst_10 : f32 to vector<1x2x8xf32>
      %c0_11 = arith.constant 0 : index
      %c0_12 = arith.constant 0 : index
      %c0_13 = arith.constant 0 : index
      %13 = vector.load %arg4[%c0_11, %c0_12, %c0_13] : memref<1x2x8xf32, #tpu.memory_space<vmem>>, vector<1x2x8xf32>
      tpu.vector_store %arg4[%c0_11, %c0_12, %c0_13], %12 {strides = array<i32>} : memref<1x2x8xf32, #tpu.memory_space<vmem>>, vector<1x2x8xf32>,
    } else {
    }
    %c0 = arith.constant 0 : index
    %c0_1 = arith.constant 0 : index
    %c0_2 = arith.constant 0 : index
    %3 = vector.load %arg4[%c0, %c0_1, %c0_2] : memref<1x2x8xf32, #tpu.memory_space<vmem>>, vector<1x2x8xf32>
    %4 = vector.shape_cast %3 : vector<1x2x8xf32> to vector<2x8xf32>
    %c0_3 = arith.constant 0 : index
    %c0_4 = arith.constant 0 : index
    %5 = vector.load %arg2[%c0_3, %c0_4] : memref<2x8192xf32, #tpu.memory_space<vmem>>, vector<2x8192xf32>
    %c0_5 = arith.constant 0 : index
    %c0_6 = arith.constant 0 : index
    %6 = vector.load %arg3[%c0_5, %c0_6] : memref<8x8192xf32, #tpu.memory_space<vmem>>, vector<8x8192xf32>
    %cst = arith.constant dense<0.000000e+00> : vector<2x8xf32>
    %7 = tpu.matmul %5, %6, %cst {dimension_numbers = #tpu.dot_dimension_numbers<[1], [1], [0], [0], [0, 0, 1, 0], [], []>} : vector<2x8192xf32>, vector<8x8192xf32>, vector<2x8xf32> -> vector<2x8xf32>
    %8 = arith.addf %4, %7 : vector<2x8xf32>
    %c0_7 = arith.constant 0 : index
    %c0_8 = arith.constant 0 : index
    %c0_9 = arith.constant 0 : index
    %9 = vector.load %arg4[%c0_7, %c0_8, %c0_9] : memref<1x2x8xf32, #tpu.memory_space<vmem>>, vector<1x2x8xf32>
    %10 = vector.shape_cast %9 : vector<1x2x8xf32> to vector<2x8xf32>
    %11 = vector.shape_cast %8 : vector<2x8xf32> to vector<1x2x8xf32>
    tpu.vector_store %arg4[%c0_7, %c0_8, %c0_9], %11 {strides = array<i32>} : memref<1x2x8xf32, #tpu.memory_space<vmem>>, vector<1x2x8xf32>,
    return
  }
  func.func @transform_0(%arg0: i32, %arg1: i32) -> (i32, i32) {
    %c2_i32 = arith.constant 2 : i32
    %0 = arith.muli %arg0, %c2_i32 : i32
    %1 = arith.addi %0, %arg1 : i32
    %c0_i32 = arith.constant 0 : i32
    %c0_i32_0 = arith.constant 0 : i32
    return %c0_i32, %1 : i32, i32
  }
  func.func @transform_1(%arg0: i32, %arg1: i32) -> (i32, i32) {
    %c2_i32 = arith.constant 2 : i32
    %0 = arith.muli %arg0, %c2_i32 : i32
    %1 = arith.addi %0, %arg1 : i32
    %c0_i32 = arith.constant 0 : i32
    %c0_i32_0 = arith.constant 0 : i32
    return %c0_i32, %1 : i32, i32
  }
  func.func @transform_2(%arg0: i32, %arg1: i32) -> (i32, i32, i32) {
    %c0_i32 = arith.constant 0 : i32
    %c0_i32_0 = arith.constant 0 : i32
    %c0_i32_1 = arith.constant 0 : i32
    return %arg0, %c0_i32, %c0_i32_0 : i32, i32, i32
  }
}

</mosaic_0001>

<bundles_post_ra>
// kernel: full_wav_model_forward.3
= control target key start
LH: loop header
LB: loop body
LE: loop exit
PB: predicated region body
PF: predicated region fallthrough
CT: control target
= control target key end

     0   :  { %8 = vsyncpa [#allocation4], 0  ;;  %s11426_s0 = inlined_call_operand.hbm [shape: f32[2,128,128,18], index: 0, kind: input, shape index: {}]   ;;  %s11427_s1 = inlined_call_operand.vmem [shape: f32[18,16], index: 1, kind: input, shape index: {}]   ;;  %s11428_s2 = inlined_call_operand.vmem [shape: f32[1,16], index: 2, kind: input, shape index: {}]   ;;  %s11429_s3 = inlined_call_operand.vmem [shape: f32[2,64,64,16], index: 3, kind: output, shape index: {}]  }
   0x1   :  { %10 = vsyncpa [#allocation4 + $0x1], 0  ;;  %s8321_s12 = smov 0   ;;  %s8323_s13 = smov 0  }
   0x2   :  { %s8325_s14 = smov 0   ;;  %s8327_s15 = smov 0  }
   0x3   :  { %s8329_s16 = smov 0   ;;  %s8331_s17 = smov 0  }
   0x4   :  { %s8333_s18 = smov 0   ;;  %s8335_s19 = smov 0  }
   0x5 LB: > { %s6294_s20 = sadd.s32 4294967295, %s8296_s19   ;;  %s25_s21 = sadd.s32 1, %s8288_s17  ;;  %s8296_s19 = sphi %s8335_s19, %s16_s19   ;;  %s8292_s18 = sphi %s8333_s18, %s11441_s18   ;;  %s8288_s17 = sphi %s8331_s17, %s11440_s17   ;;  %s8284_s16 = sphi %s8329_s16, %s11439_s16   ;;  %s8280_s15 = sphi %s8327_s15, %s11438_s15   ;;  %s8276_s14 = sphi %s8325_s14, %s11437_s14   ;;  %s8272_s13 = sphi %s8323_s13, %s11436_s13   ;;  %s8268_s12 = sphi %s8321_s12, %s11435_s12  }
   0x6   : > { %p26_p0 = scmp.ge.s32.totalorder %s25_s21, 4  ;;  %s28_s22 = sadd.s32 1, %s8292_s18 }
   0x7   : > { %s37_s23 = sadd.s32 1, %s8276_s14  ;;  %p44_p1 = scmp.ne.s32.totalorder %s8276_s14, %s8272_s13 }
   0x8   : > { %s11443_s21 = smov (%p26_p0, %s25_s21), 0  ;;  %s11445_s22 = smov (!%p26_p0, %s28_s22), %s8292_s18 }
   0x9   : > { %s33_s24 = ssub.s32 %s8288_s17, %s11443_s21  ;;  %p45_p2 = scmp.eq.s32.totalorder %s8296_s19, 0 }
   0xa   : > { %p30_p3 = scmp.ge.s32.totalorder %s11445_s22, 2  ;;  %p50_p4 = scmp.ne.s32.totalorder %s8272_s13, %s8268_s12 }
   0xb   : > { %p8372_p5 = por %p45_p2, %p44_p1  ;;  %p51_p6 = scmp.eq.s32.totalorder %s6294_s20, 0 }
   0xc   : > { %s11447_s22 = smov (%p30_p3, %s11445_s22), 0  ;;  %p8129_p8 = scmp.lt.s32.totalorder %s8296_s19, 8 }
   0xd   : > { %p8378_p7 = por %p51_p6, %p50_p4  ;;  %s32_s27 = ssub.s32 %s8292_s18, %s11447_s22 }
   0xe   : > { %s34_s28 = sor.u32 %s33_s24, %s32_s27  ;;  %s150_s29 = sand.u32 1, %s8276_s14  }
   0xf   : > { %p35_p9 = scmp.eq.s32.totalorder %s34_s28, 0  ;;  %s6298_s30 = sshll.u32 %s150_s29, 12 }
  0x10   : > { %s6825_s4 = sshll.u32 %s8288_s17, 9  ;;  %s6301_s6 = sshll.u32 %s8292_s18, 11 }
  0x11   : > { %s8388_s5 = scalar_select %p35_p9, %s8276_s14, %s37_s23  }
  0x12   : > { %s161_s7 = sadd.s32 %s6825_s4, %s6301_s6  ;;  %s154_s8 = scalar_lea.vmem [#allocation3], %s6298_s30 }
  0x13   : > { %s164_s9 = sshll.u32 %s154_s8, 4  ;;  %s6302_s10 = sshll.u32 %s161_s7, 7  ;;  %s8391_s9 = int_to_ptr.vmem [resolvable:$true] %s164_s9 }
  0x14   : > { %s8396_s20 = scalar_lea.hbm %s11426_s0, %s6302_s10  ;;  %p8402_p10 = pnand %p8129_p8, %p8372_p5 }
  0x15   : > { %s8407_s24 = scalar_lea.sflag [#allocation4], %s150_s29  ;;  %s8200_s27 = scalar_lea.hbm %s8396_s20, 65536 }
  0x16   : > { %p8201_p12 = scmp.ne.s32.totalorder %s8396_s20, %s8200_s27  ;;  %p8202_p13 = pneg %p8402_p10 }
  0x17   : > { %s8205_s30 = scalar_lea.hbm %s11426_s0, 524288  ;;  %p8206_p2 = scmp.lt.u32.totalorder %s8396_s20, %s11426_s0 }
  0x18   : > { %p8203_p0 = pnand %p8202_p13, %p8201_p12  ;;  %p8207_p3 = scmp.lt.u32.totalorder %s8205_s30, %s8200_s27 }
  0x19   : > { %p8209_p5 = scmp.lt.u32.totalorder %s8200_s27, %s8396_s20 }
  0x1a   : > { %p8204_p1 = pneg %p8203_p0  ;;  %p8208_p4 = por %p8207_p3, %p8206_p2 }
  0x1c   : > { %p8210_p6 = por %p8209_p5, %p8208_p4 }
  0x1e   : > { %p8211_p8 = pnand %p8210_p6, %p8204_p1 }
  0x20   : > { %8214 = shalt.err (!%p8211_p8)
}
  0x21   : > { %s8215_s29 = scalar_lea.vmem %s8391_s9, 65536  ;;  %s8298_s7 = smov [#allocation3]  }
  0x22   : > { %p8216_p9 = scmp.ne.s32.totalorder %s8391_s9, %s8215_s29  ;;  %s8220_s8 = sshll.u32 %s8298_s7, 4  ;;  %s8221_s8 = int_to_ptr.vmem [resolvable:$false] %s8220_s8 }
  0x23   : > { %s8222_s10 = scalar_lea.vmem %s8221_s8, 131072  ;;  %p8223_p11 = scmp.lt.s32.totalorder %s8391_s9, %s8221_s8 }
  0x24   : > { %p8218_p12 = pnand %p8216_p9, %p8202_p13  ;;  %p8224_p2 = scmp.lt.s32.totalorder %s8222_s10, %s8215_s29 }
  0x26   : > { %p8219_p0 = pneg %p8218_p12  ;;  %p8225_p3 = por %p8224_p2, %p8223_p11 }
  0x28   : > { %p8226_p4 = pnand %p8225_p3, %p8219_p0 }
  0x2a   : > { %8229 = shalt.err (!%p8226_p4)
}
  0x2b   : > { %s8299_s11 = smov 128   ;;  %s8300_s12 = smov 8  }
  0x2c   : > { %8128 = dma.hbm_to_vmem [thread:$0]  (!%p8402_p10), %s8396_s20, 65536, %s8391_s9, %s8407_s24, %s8299_s11, %s8299_s11, %s8300_s12  }
  0x2d   : > { %p172_p13 = scmp.lt.s32.totalorder %s8296_s19, 9  ;;  %p11433_p1 = scmp.ge.s32.totalorder %s8296_s19, 1 }
  0x2f   : > { %p173_p5 = pnand %p11433_p1, %p172_p13 }
  0x30   : > { %s178_s27 = sand.u32 (!%p173_p5), 1, %s8272_s13  }
  0x31   : > { %176 = sbr.rel (%p173_p5) target bundleno = 805 (0x325), region = 32  ;;  %s6304_s25 = sshll.u32 (!%p173_p5), %s178_s27, 12 }
  0x32   : > { %s179_s28 = scalar_lea.sflag (!%p173_p5), [#allocation4], %s178_s27  ;;  %s8439_s30 = scalar_lea.vmem (!%p173_p5), [#allocation3], %s6304_s25 }
  0x38   : > { %8263 = dma.done.wait (%p8378_p7), %s179_s28, 65536  }
  0x39   : > { %8265 = vsyncadd (%p8378_p7), %s179_s28, 4294901760  ;;  %vm744_vm0 = vcmask 146432   ;;  %v734_v0 = vld [vmem:[%s11427_s1] sm:$0xff]  ;;  %v735_v1 = vld [vmem:[%s11427_s1 + $0x8] sm:$0xff]  ;;  %vm2281_vm1 = vcmask 1041408   ;;  %s6305_s6 = sshll.u32 %s8280_s15, 4 }
  0x3a   : > { %v8115_v2 = vpack.c.bf16 %v735_v1, %v734_v0  ;;  %v222_v3 = vld [vmem:[%s8439_s30] sm:$0xff]  ;;  %v736_v5 = vld [vmem:[%s11427_s1 + $0x10] sm:$0x3]  ;;  %v224_v8 = vld [vmem:[%s8439_s30 + $0x10] sm:$0xff]  ;;  %p212_p7 = scmp.lt.s32.totalorder %s8284_s16, 1  ;;  %p9004_p10 = scmp.lt.s32.totalorder %s6305_s6, 63 }
  0x3b   : > { %v478_v4 = vld [vmem:[%s8439_s30 + $0x800] sm:$0xff]  ;;  %7347 = vmatprep.mubr.msk.f32.mxu0 %vm744_vm0, %v222_v3  ;;  %v223_v6 = vld [vmem:[%s8439_s30 + $0x8] sm:$0xff]  ;;  %v480_v9 = vld [vmem:[%s8439_s30 + $0x810] sm:$0xff]  ;;  %vm5166_vm2 = vcmask 130048  }
  0x3c   : > { %7731 = vmatprep.mubr.msk.f32.mxu1 %vm744_vm0, %v478_v4  ;;  %8116 = vmatprep.subr.bf16.mxu0 %v8115_v2  ;;  %v479_v7 = vld [vmem:[%s8439_s30 + $0x808] sm:$0xff]  ;;  %v225_v10 = vld [vmem:[%s8439_s30 + $0x18] sm:$0xff]  ;;  %v226_v12 = vld [vmem:[%s8439_s30 + $0x20] sm:$0xff]  ;;  %s11449_s16 = smov (!%p212_p7, %s8284_s16), 1  ;;  %s11451_s6 = smov (!%p9004_p10, %s6305_s6), 63 }
  0x3d   : > { %8119 = vmatprep.subr.bf16.mxu1 %v8115_v2  ;;  %8118 = vmatpush3.bf16.msra.mxu0 %v8115_v2  ;;  %v481_v11 = vld [vmem:[%s8439_s30 + $0x818] sm:$0xff]  ;;  %v482_v13 = vld [vmem:[%s8439_s30 + $0x820] sm:$0xff]  ;;  %v227_v14 = vld [vmem:[%s8439_s30 + $0x28] sm:$0xff]  ;;  %s6306_s8 = sshll.u32 %s11451_s6, 3  ;;  %s6307_s10 = sshll.u32 %s11449_s16, 9 }
  0x3e   : > { %8121 = vmatpush3.bf16.msra.mxu1 %v8115_v2  ;;  %7345 = vmatprep.subr.msk.mxu0 %vm2281_vm1, %v736_v5  ;;  %v483_v15 = vld [vmem:[%s8439_s30 + $0x828] sm:$0xff]  ;;  %v228_v16 = vld [vmem:[%s8439_s30 + $0x30] sm:$0xff]  ;;  %v229_v18 = vld [vmem:[%s8439_s30 + $0x38] sm:$0xff]  ;;  %s9076_s16 = sadd.s32 %s6307_s10, %s6306_s8 }
  0x3f   : > { %8120 = vmatprep.subr.msk.mxu1 %vm2281_vm1, %v736_v5  ;;  %v484_v17 = vld [vmem:[%s8439_s30 + $0x830] sm:$0xff]  ;;  %v485_v19 = vld [vmem:[%s8439_s30 + $0x838] sm:$0xff]  ;;  %v230_v20 = vld [vmem:[%s8439_s30 + $0x40] sm:$0xff]  ;;  %s6308_s11 = sshll.u32 %s9076_s16, 3 }
  0x40   : > { %v486_v21 = vld [vmem:[%s8439_s30 + $0x840] sm:$0xff]  ;;  %v231_v22 = vld [vmem:[%s8439_s30 + $0x48] sm:$0xff]  ;;  %v232_v24 = vld [vmem:[%s8439_s30 + $0x50] sm:$0xff]  ;;  %s9114_s25 = scalar_lea.vmem %s11429_s3, %s6308_s11 }
  0x41   : > { %7346 = vmatpush3.msk.msra.mxu0 %vm2281_vm1, %v736_v5  ;;  %v487_v23 = vld [vmem:[%s8439_s30 + $0x848] sm:$0xff]  ;;  %v488_v25 = vld [vmem:[%s8439_s30 + $0x850] sm:$0xff]  ;;  %v233_v26 = vld [vmem:[%s8439_s30 + $0x58] sm:$0xff] }
  0x42   : > { %8122 = vmatpush3.msk.msra.mxu1 %vm2281_vm1, %v736_v5  ;;  %7348 = vmatmul.mubr.msk.f32.vlgmr.msra.gmra.mrb[0].mxu0 %vm744_vm0, %v223_v6  ;;  %v489_v27 = vld [vmem:[%s8439_s30 + $0x858] sm:$0xff]  ;;  %v234_v28 = vld [vmem:[%s8439_s30 + $0x60] sm:$0xff]  ;;  %v235_v30 = vld [vmem:[%s8439_s30 + $0x68] sm:$0xff] }
  0x43   : > { %7732 = vmatmul.mubr.msk.f32.vlgmr.msra.gmra.mrb[0].mxu1 %vm744_vm0, %v479_v7  ;;  %7350 = vmatprep.mubr.msk.f32.mxu0 %vm744_vm0, %v224_v8  ;;  %v490_v29 = vld [vmem:[%s8439_s30 + $0x860] sm:$0xff]  ;;  %v491_v31 = vld [vmem:[%s8439_s30 + $0x868] sm:$0xff]  ;;  %v236_v32 = vld [vmem:[%s8439_s30 + $0x70] sm:$0xff] }
  0x44   : > { %7734 = vmatprep.mubr.msk.f32.mxu1 %vm744_vm0, %v480_v9  ;;  %v492_v33 = vld [vmem:[%s8439_s30 + $0x870] sm:$0xff]  ;;  %v237_v34 = vld [vmem:[%s8439_s30 + $0x78] sm:$0xff]  ;;  %v238_v36 = vld [vmem:[%s8439_s30 + $0x80] sm:$0xff] }
  0x45   : > { %v493_v35 = vld [vmem:[%s8439_s30 + $0x878] sm:$0xff]  ;;  %v494_v37 = vld [vmem:[%s8439_s30 + $0x880] sm:$0xff]  ;;  %v239_v38 = vld [vmem:[%s8439_s30 + $0x88] sm:$0xff] }
  0x46   : > { %7351 = vmatmul.mubr.msk.f32.gmra.mrb[2].mxu0 %vm744_vm0, %v225_v10  ;;  %v495_v39 = vld [vmem:[%s8439_s30 + $0x888] sm:$0xff]  ;;  %v240_v40 = vld [vmem:[%s8439_s30 + $0x90] sm:$0xff]  ;;  %v241_v42 = vld [vmem:[%s8439_s30 + $0x98] sm:$0xff] }
  0x47   : > { %7735 = vmatmul.mubr.msk.f32.gmra.mrb[2].mxu1 %vm744_vm0, %v481_v11  ;;  %7353 = vmatprep.mubr.msk.f32.mxu0 %vm744_vm0, %v226_v12  ;;  %v496_v41 = vld [vmem:[%s8439_s30 + $0x890] sm:$0xff]  ;;  %v497_v43 = vld [vmem:[%s8439_s30 + $0x898] sm:$0xff]  ;;  %v242_v44 = vld [vmem:[%s8439_s30 + $0xa0] sm:$0xff] }
  0x48   : > { %7737 = vmatprep.mubr.msk.f32.mxu1 %vm744_vm0, %v482_v13  ;;  %v498_v45 = vld [vmem:[%s8439_s30 + $0x8a0] sm:$0xff]  ;;  %v243_v46 = vld [vmem:[%s8439_s30 + $0xa8] sm:$0xff]  ;;  %v244_v48 = vld [vmem:[%s8439_s30 + $0xb0] sm:$0xff] }
  0x49   : > { %v499_v47 = vld [vmem:[%s8439_s30 + $0x8a8] sm:$0xff]  ;;  %v500_v49 = vld [vmem:[%s8439_s30 + $0x8b0] sm:$0xff]  ;;  %v245_v50 = vld [vmem:[%s8439_s30 + $0xb8] sm:$0xff] }
  0x4a   : > { %7354 = vmatmul.mubr.msk.f32.gmra.mrb[4].mxu0 %vm744_vm0, %v227_v14  ;;  %v501_v51 = vld [vmem:[%s8439_s30 + $0x8b8] sm:$0xff]  ;;  %v246_v52 = vld [vmem:[%s8439_s30 + $0xc0] sm:$0xff]  ;;  %v247_v54 = vld [vmem:[%s8439_s30 + $0xc8] sm:$0xff] }
  0x4b   : > { %7738 = vmatmul.mubr.msk.f32.gmra.mrb[4].mxu1 %vm744_vm0, %v483_v15  ;;  %7356 = vmatprep.mubr.msk.f32.mxu0 %vm744_vm0, %v228_v16  ;;  %v502_v53 = vld [vmem:[%s8439_s30 + $0x8c0] sm:$0xff]  ;;  %v503_v55 = vld [vmem:[%s8439_s30 + $0x8c8] sm:$0xff]  ;;  %v248_v56 = vld [vmem:[%s8439_s30 + $0xd0] sm:$0xff] }
  0x4c   : > { %7740 = vmatprep.mubr.msk.f32.mxu1 %vm744_vm0, %v484_v17  ;;  %v504_v57 = vld [vmem:[%s8439_s30 + $0x8d0] sm:$0xff]  ;;  %v249_v58 = vld [vmem:[%s8439_s30 + $0xd8] sm:$0xff]  ;;  %v250_v60 = vld [vmem:[%s8439_s30 + $0xe0] sm:$0xff] }
  0x4d   : > { %v505_v59 = vld [vmem:[%s8439_s30 + $0x8d8] sm:$0xff]  ;;  %v506_v61 = vld [vmem:[%s8439_s30 + $0x8e0] sm:$0xff]  ;;  %v251_v62 = vld [vmem:[%s8439_s30 + $0xe8] sm:$0xff] }
  0x4e   : > { %7357 = vmatmul.mubr.msk.f32.gmra.mrb[6].mxu0 %vm744_vm0, %v229_v18  ;;  %v507_v63 = vld [vmem:[%s8439_s30 + $0x8e8] sm:$0xff]  ;;  %v252_v0 = vld [vmem:[%s8439_s30 + $0xf0] sm:$0xff]  ;;  %v253_v2 = vld [vmem:[%s8439_s30 + $0xf8] sm:$0xff] }
  0x4f   : > { %7741 = vmatmul.mubr.msk.f32.gmra.mrb[6].mxu1 %vm744_vm0, %v485_v19  ;;  %7359 = vmatprep.mubr.msk.f32.mxu0 %vm744_vm0, %v230_v20  ;;  %v508_v1 = vld [vmem:[%s8439_s30 + $0x8f0] sm:$0xff]  ;;  %v509_v3 = vld [vmem:[%s8439_s30 + $0x8f8] sm:$0xff]  ;;  %v254_v4 = vld [vmem:[%s8439_s30 + $0x100] sm:$0xff] }
  0x50   : > { %7743 = vmatprep.mubr.msk.f32.mxu1 %vm744_vm0, %v486_v21  ;;  %v510_v5 = vld [vmem:[%s8439_s30 + $0x900] sm:$0xff]  ;;  %v255_v6 = vld [vmem:[%s8439_s30 + $0x108] sm:$0xff]  ;;  %v256_v8 = vld [vmem:[%s8439_s30 + $0x110] sm:$0xff] }
  0x51   : > { %v511_v7 = vld [vmem:[%s8439_s30 + $0x908] sm:$0xff]  ;;  %v512_v9 = vld [vmem:[%s8439_s30 + $0x910] sm:$0xff]  ;;  %v257_v10 = vld [vmem:[%s8439_s30 + $0x118] sm:$0xff] }
  0x52   : > { %7360 = vmatmul.mubr.msk.f32.gmra.mrb[8].mxu0 %vm744_vm0, %v231_v22  ;;  %v513_v11 = vld [vmem:[%s8439_s30 + $0x918] sm:$0xff]  ;;  %v258_v12 = vld [vmem:[%s8439_s30 + $0x120] sm:$0xff]  ;;  %v259_v14 = vld [vmem:[%s8439_s30 + $0x128] sm:$0xff] }
  0x53   : > { %7744 = vmatmul.mubr.msk.f32.gmra.mrb[8].mxu1 %vm744_vm0, %v487_v23  ;;  %7362 = vmatprep.mubr.msk.f32.mxu0 %vm744_vm0, %v232_v24  ;;  %v514_v13 = vld [vmem:[%s8439_s30 + $0x920] sm:$0xff]  ;;  %v515_v15 = vld [vmem:[%s8439_s30 + $0x928] sm:$0xff]  ;;  %v260_v16 = vld [vmem:[%s8439_s30 + $0x130] sm:$0xff] }
  0x54   : > { %7746 = vmatprep.mubr.msk.f32.mxu1 %vm744_vm0, %v488_v25  ;;  %v516_v17 = vld [vmem:[%s8439_s30 + $0x930] sm:$0xff]  ;;  %v261_v18 = vld [vmem:[%s8439_s30 + $0x138] sm:$0xff]  ;;  %v262_v20 = vld [vmem:[%s8439_s30 + $0x140] sm:$0xff] }
  0x55   : > { %v517_v19 = vld [vmem:[%s8439_s30 + $0x938] sm:$0xff]  ;;  %v518_v21 = vld [vmem:[%s8439_s30 + $0x940] sm:$0xff]  ;;  %v263_v22 = vld [vmem:[%s8439_s30 + $0x148] sm:$0xff] }
  0x56   : > { %7363 = vmatmul.mubr.msk.f32.gmra.mrb[10].mxu0 %vm744_vm0, %v233_v26  ;;  %v519_v23 = vld [vmem:[%s8439_s30 + $0x948] sm:$0xff]  ;;  %v264_v24 = vld [vmem:[%s8439_s30 + $0x150] sm:$0xff]  ;;  %v265_v26 = vld [vmem:[%s8439_s30 + $0x158] sm:$0xff] }
  0x57   : > { %7747 = vmatmul.mubr.msk.f32.gmra.mrb[10].mxu1 %vm744_vm0, %v489_v27  ;;  %7365 = vmatprep.mubr.msk.f32.mxu0 %vm744_vm0, %v234_v28  ;;  %v520_v25 = vld [vmem:[%s8439_s30 + $0x950] sm:$0xff]  ;;  %v521_v27 = vld [vmem:[%s8439_s30 + $0x958] sm:$0xff]  ;;  %v266_v28 = vld [vmem:[%s8439_s30 + $0x160] sm:$0xff] }
  0x58   : > { %7749 = vmatprep.mubr.msk.f32.mxu1 %vm744_vm0, %v490_v29  ;;  %v522_v29 = vld [vmem:[%s8439_s30 + $0x960] sm:$0xff] }
  0x5a   : > { %7366 = vmatmul.mubr.msk.f32.gmra.mrb[12].mxu0 %vm744_vm0, %v235_v30  ;;  %v267_v30 = vld [vmem:[%s8439_s30 + $0x168] sm:$0xff] }
  0x5b   : > { %7750 = vmatmul.mubr.msk.f32.gmra.mrb[12].mxu1 %vm744_vm0, %v491_v31  ;;  %7368 = vmatprep.mubr.msk.f32.mxu0 %vm744_vm0, %v236_v32  ;;  %v523_v31 = vld [vmem:[%s8439_s30 + $0x968] sm:$0xff]  ;;  %v268_v32 = vld [vmem:[%s8439_s30 + $0x170] sm:$0xff] }
  0x5c   : > { %7752 = vmatprep.mubr.msk.f32.mxu1 %vm744_vm0, %v492_v33  ;;  %v524_v33 = vld [vmem:[%s8439_s30 + $0x970] sm:$0xff] }
  0x5e   : > { %7369 = vmatmul.mubr.msk.f32.gmra.mrb[14].mxu0 %vm744_vm0, %v237_v34  ;;  %v269_v34 = vld [vmem:[%s8439_s30 + $0x178] sm:$0xff] }
  0x5f   : > { %7753 = vmatmul.mubr.msk.f32.gmra.mrb[14].mxu1 %vm744_vm0, %v493_v35  ;;  %7371 = vmatprep.mubr.msk.f32.mxu0 %vm744_vm0, %v238_v36  ;;  %v525_v35 = vld [vmem:[%s8439_s30 + $0x978] sm:$0xff]  ;;  %v270_v36 = vld [vmem:[%s8439_s30 + $0x180] sm:$0xff] }
  0x60   : > { %7755 = vmatprep.mubr.msk.f32.mxu1 %vm744_vm0, %v494_v37  ;;  %v526_v37 = vld [vmem:[%s8439_s30 + $0x980] sm:$0xff] }
  0x62   : > { %7372 = vmatmul.mubr.msk.f32.gmra.mrb[16].mxu0 %vm744_vm0, %v239_v38  ;;  %v271_v38 = vld [vmem:[%s8439_s30 + $0x188] sm:$0xff] }
  0x63   : > { %7756 = vmatmul.mubr.msk.f32.gmra.mrb[16].mxu1 %vm744_vm0, %v495_v39  ;;  %7374 = vmatprep.mubr.msk.f32.mxu0 %vm744_vm0, %v240_v40  ;;  %v527_v39 = vld [vmem:[%s8439_s30 + $0x988] sm:$0xff]  ;;  %v272_v40 = vld [vmem:[%s8439_s30 + $0x190] sm:$0xff] }
  0x64   : > { %7758 = vmatprep.mubr.msk.f32.mxu1 %vm744_vm0, %v496_v41  ;;  %v528_v41 = vld [vmem:[%s8439_s30 + $0x990] sm:$0xff] }
  0x66   : > { %7375 = vmatmul.mubr.msk.f32.gmra.mrb[18].mxu0 %vm744_vm0, %v241_v42  ;;  %v273_v42 = vld [vmem:[%s8439_s30 + $0x198] sm:$0xff] }
  0x67   : > { %7759 = vmatmul.mubr.msk.f32.gmra.mrb[18].mxu1 %vm744_vm0, %v497_v43  ;;  %7377 = vmatprep.mubr.msk.f32.mxu0 %vm744_vm0, %v242_v44  ;;  %v529_v43 = vld [vmem:[%s8439_s30 + $0x998] sm:$0xff]  ;;  %v274_v44 = vld [vmem:[%s8439_s30 + $0x1a0] sm:$0xff] }
  0x68   : > { %7761 = vmatprep.mubr.msk.f32.mxu1 %vm744_vm0, %v498_v45  ;;  %v530_v45 = vld [vmem:[%s8439_s30 + $0x9a0] sm:$0xff] }
  0x6a   : > { %7378 = vmatmul.mubr.msk.f32.gmra.mrb[20].mxu0 %vm744_vm0, %v243_v46  ;;  %v275_v46 = vld [vmem:[%s8439_s30 + $0x1a8] sm:$0xff] }
  0x6b   : > { %7762 = vmatmul.mubr.msk.f32.gmra.mrb[20].mxu1 %vm744_vm0, %v499_v47  ;;  %7380 = vmatprep.mubr.msk.f32.mxu0 %vm744_vm0, %v244_v48  ;;  %v531_v47 = vld [vmem:[%s8439_s30 + $0x9a8] sm:$0xff]  ;;  %v276_v48 = vld [vmem:[%s8439_s30 + $0x1b0] sm:$0xff] }
  0x6c   : > { %7764 = vmatprep.mubr.msk.f32.mxu1 %vm744_vm0, %v500_v49  ;;  %v532_v49 = vld [vmem:[%s8439_s30 + $0x9b0] sm:$0xff] }
  0x6e   : > { %7381 = vmatmul.mubr.msk.f32.gmra.mrb[22].mxu0 %vm744_vm0, %v245_v50  ;;  %v277_v50 = vld [vmem:[%s8439_s30 + $0x1b8] sm:$0xff] }
  0x6f   : > { %7765 = vmatmul.mubr.msk.f32.gmra.mrb[22].mxu1 %vm744_vm0, %v501_v51  ;;  %7383 = vmatprep.mubr.msk.f32.mxu0 %vm744_vm0, %v246_v52  ;;  %v533_v51 = vld [vmem:[%s8439_s30 + $0x9b8] sm:$0xff]  ;;  %v278_v52 = vld [vmem:[%s8439_s30 + $0x1c0] sm:$0xff] }
  0x70   : > { %7767 = vmatprep.mubr.msk.f32.mxu1 %vm744_vm0, %v502_v53  ;;  %v534_v53 = vld [vmem:[%s8439_s30 + $0x9c0] sm:$0xff] }
  0x72   : > { %7384 = vmatmul.mubr.msk.f32.gmra.mrb[24].mxu0 %vm744_vm0, %v247_v54  ;;  %v279_v54 = vld [vmem:[%s8439_s30 + $0x1c8] sm:$0xff] }
  0x73   : > { %7768 = vmatmul.mubr.msk.f32.gmra.mrb[24].mxu1 %vm744_vm0, %v503_v55  ;;  %7386 = vmatprep.mubr.msk.f32.mxu0 %vm744_vm0, %v248_v56  ;;  %v535_v55 = vld [vmem:[%s8439_s30 + $0x9c8] sm:$0xff]  ;;  %v280_v56 = vld [vmem:[%s8439_s30 + $0x1d0] sm:$0xff] }
  0x74   : > { %7770 = vmatprep.mubr.msk.f32.mxu1 %vm744_vm0, %v504_v57  ;;  %v536_v57 = vld [vmem:[%s8439_s30 + $0x9d0] sm:$0xff] }
  0x76   : > { %7387 = vmatmul.mubr.msk.f32.gmra.mrb[26].mxu0 %vm744_vm0, %v249_v58  ;;  %v281_v58 = vld [vmem:[%s8439_s30 + $0x1d8] sm:$0xff] }
  0x77   : > { %7771 = vmatmul.mubr.msk.f32.gmra.mrb[26].mxu1 %vm744_vm0, %v505_v59  ;;  %7389 = vmatprep.mubr.msk.f32.mxu0 %vm744_vm0, %v250_v60  ;;  %v537_v59 = vld [vmem:[%s8439_s30 + $0x9d8] sm:$0xff]  ;;  %v282_v60 = vld [vmem:[%s8439_s30 + $0x1e0] sm:$0xff] }
  0x78   : > { %7773 = vmatprep.mubr.msk.f32.mxu1 %vm744_vm0, %v506_v61  ;;  %v538_v61 = vld [vmem:[%s8439_s30 + $0x9e0] sm:$0xff] }
  0x7a   : > { %7390 = vmatmul.mubr.msk.f32.gmra.mrb[28].mxu0 %vm744_vm0, %v251_v62  ;;  %v283_v62 = vld [vmem:[%s8439_s30 + $0x1e8] sm:$0xff] }
  0x7b   : > { %7774 = vmatmul.mubr.msk.f32.gmra.mrb[28].mxu1 %vm744_vm0, %v507_v63  ;;  %7392 = vmatprep.mubr.msk.f32.mxu0 %vm744_vm0, %v252_v0  ;;  %v539_v63 = vld [vmem:[%s8439_s30 + $0x9e8] sm:$0xff]  ;;  %v284_v0 = vld [vmem:[%s8439_s30 + $0x1f0] sm:$0xff] }
  0x7c   : > { %7776 = vmatprep.mubr.msk.f32.mxu1 %vm744_vm0, %v508_v1  ;;  %v540_v1 = vld [vmem:[%s8439_s30 + $0x9f0] sm:$0xff] }
  0x7e   : > { %7393 = vmatmul.mubr.msk.f32.gmra.mrb[30].mxu0 %vm744_vm0, %v253_v2  ;;  %v285_v2 = vld [vmem:[%s8439_s30 + $0x1f8] sm:$0xff] }
  0x7f   : > { %7777 = vmatmul.mubr.msk.f32.gmra.mrb[30].mxu1 %vm744_vm0, %v509_v3  ;;  %7395 = vmatprep.mubr.msk.f32.mxu0 %vm744_vm0, %v254_v4  ;;  %v541_v3 = vld [vmem:[%s8439_s30 + $0x9f8] sm:$0xff]  ;;  %v286_v4 = vld [vmem:[%s8439_s30 + $0x200] sm:$0xff] }
  0x80   : > { %7779 = vmatprep.mubr.msk.f32.mxu1 %vm744_vm0, %v510_v5  ;;  %v542_v5 = vld [vmem:[%s8439_s30 + $0xa00] sm:$0xff] }
  0x82   : > { %7396 = vmatmul.mubr.msk.f32.gmra.mrb[32].mxu0 %vm744_vm0, %v255_v6  ;;  %v287_v6 = vld [vmem:[%s8439_s30 + $0x208] sm:$0xff] }
  0x83   : > { %7780 = vmatmul.mubr.msk.f32.gmra.mrb[32].mxu1 %vm744_vm0, %v511_v7  ;;  %7398 = vmatprep.mubr.msk.f32.mxu0 %vm744_vm0, %v256_v8  ;;  %v543_v7 = vld [vmem:[%s8439_s30 + $0xa08] sm:$0xff]  ;;  %v288_v8 = vld [vmem:[%s8439_s30 + $0x210] sm:$0xff] }
  0x84   : > { %7782 = vmatprep.mubr.msk.f32.mxu1 %vm744_vm0, %v512_v9  ;;  %v544_v9 = vld [vmem:[%s8439_s30 + $0xa10] sm:$0xff] }
  0x86   : > { %7399 = vmatmul.mubr.msk.f32.gmra.mrb[34].mxu0 %vm744_vm0, %v257_v10  ;;  %v289_v10 = vld [vmem:[%s8439_s30 + $0x218] sm:$0xff] }
  0x87   : > { %7783 = vmatmul.mubr.msk.f32.gmra.mrb[34].mxu1 %vm744_vm0, %v513_v11  ;;  %7401 = vmatprep.mubr.msk.f32.mxu0 %vm744_vm0, %v258_v12  ;;  %v545_v11 = vld [vmem:[%s8439_s30 + $0xa18] sm:$0xff]  ;;  %v290_v12 = vld [vmem:[%s8439_s30 + $0x220] sm:$0xff] }
  0x88   : > { %7785 = vmatprep.mubr.msk.f32.mxu1 %vm744_vm0, %v514_v13  ;;  %v546_v13 = vld [vmem:[%s8439_s30 + $0xa20] sm:$0xff] }
  0x8a   : > { %7402 = vmatmul.mubr.msk.f32.gmra.mrb[36].mxu0 %vm744_vm0, %v259_v14  ;;  %v291_v14 = vld [vmem:[%s8439_s30 + $0x228] sm:$0xff] }
  0x8b   : > { %7786 = vmatmul.mubr.msk.f32.gmra.mrb[36].mxu1 %vm744_vm0, %v515_v15  ;;  %7404 = vmatprep.mubr.msk.f32.mxu0 %vm744_vm0, %v260_v16  ;;  %v547_v15 = vld [vmem:[%s8439_s30 + $0xa28] sm:$0xff]  ;;  %v292_v16 = vld [vmem:[%s8439_s30 + $0x230] sm:$0xff] }
  0x8c   : > { %7788 = vmatprep.mubr.msk.f32.mxu1 %vm744_vm0, %v516_v17  ;;  %v548_v17 = vld [vmem:[%s8439_s30 + $0xa30] sm:$0xff] }
  0x8e   : > { %7405 = vmatmul.mubr.msk.f32.gmra.mrb[38].mxu0 %vm744_vm0, %v261_v18  ;;  %v293_v18 = vld [vmem:[%s8439_s30 + $0x238] sm:$0xff] }
  0x8f   : > { %7789 = vmatmul.mubr.msk.f32.gmra.mrb[38].mxu1 %vm744_vm0, %v517_v19  ;;  %7407 = vmatprep.mubr.msk.f32.mxu0 %vm744_vm0, %v262_v20  ;;  %v549_v19 = vld [vmem:[%s8439_s30 + $0xa38] sm:$0xff]  ;;  %v294_v20 = vld [vmem:[%s8439_s30 + $0x240] sm:$0xff] }
  0x90   : > { %7791 = vmatprep.mubr.msk.f32.mxu1 %vm744_vm0, %v518_v21  ;;  %v550_v21 = vld [vmem:[%s8439_s30 + $0xa40] sm:$0xff] }
  0x92   : > { %7408 = vmatmul.mubr.msk.f32.gmra.mrb[40].mxu0 %vm744_vm0, %v263_v22  ;;  %v295_v22 = vld [vmem:[%s8439_s30 + $0x248] sm:$0xff] }
  0x93   : > { %7792 = vmatmul.mubr.msk.f32.gmra.mrb[40].mxu1 %vm744_vm0, %v519_v23  ;;  %7410 = vmatprep.mubr.msk.f32.mxu0 %vm744_vm0, %v264_v24  ;;  %v551_v23 = vld [vmem:[%s8439_s30 + $0xa48] sm:$0xff]  ;;  %v296_v24 = vld [vmem:[%s8439_s30 + $0x250] sm:$0xff] }
  0x94   : > { %7794 = vmatprep.mubr.msk.f32.mxu1 %vm744_vm0, %v520_v25  ;;  %v552_v25 = vld [vmem:[%s8439_s30 + $0xa50] sm:$0xff] }
  0x96   : > { %7411 = vmatmul.mubr.msk.f32.gmra.mrb[42].mxu0 %vm744_vm0, %v265_v26  ;;  %v297_v26 = vld [vmem:[%s8439_s30 + $0x258] sm:$0xff] }
  0x97   : > { %7795 = vmatmul.mubr.msk.f32.gmra.mrb[42].mxu1 %vm744_vm0, %v521_v27  ;;  %7413 = vmatprep.mubr.msk.f32.mxu0 %vm744_vm0, %v266_v28  ;;  %v553_v27 = vld [vmem:[%s8439_s30 + $0xa58] sm:$0xff]  ;;  %v298_v28 = vld [vmem:[%s8439_s30 + $0x260] sm:$0xff] }
  0x98   : > { %7797 = vmatprep.mubr.msk.f32.mxu1 %vm744_vm0, %v522_v29  ;;  %v554_v29 = vld [vmem:[%s8439_s30 + $0xa60] sm:$0xff] }
  0x9a   : > { %7414 = vmatmul.mubr.msk.f32.gmra.mrb[44].mxu0 %vm744_vm0, %v267_v30  ;;  %v299_v30 = vld [vmem:[%s8439_s30 + $0x268] sm:$0xff] }
  0x9b   : > { %7798 = vmatmul.mubr.msk.f32.gmra.mrb[44].mxu1 %vm744_vm0, %v523_v31  ;;  %7416 = vmatprep.mubr.msk.f32.mxu0 %vm744_vm0, %v268_v32  ;;  %v555_v31 = vld [vmem:[%s8439_s30 + $0xa68] sm:$0xff]  ;;  %v300_v32 = vld [vmem:[%s8439_s30 + $0x270] sm:$0xff] }
  0x9c   : > { %7800 = vmatprep.mubr.msk.f32.mxu1 %vm744_vm0, %v524_v33  ;;  %v556_v33 = vld [vmem:[%s8439_s30 + $0xa70] sm:$0xff] }
  0x9e   : > { %7417 = vmatmul.mubr.msk.f32.gmra.mrb[46].mxu0 %vm744_vm0, %v269_v34  ;;  %v301_v34 = vld [vmem:[%s8439_s30 + $0x278] sm:$0xff] }
  0x9f   : > { %7801 = vmatmul.mubr.msk.f32.gmra.mrb[46].mxu1 %vm744_vm0, %v525_v35  ;;  %7419 = vmatprep.mubr.msk.f32.mxu0 %vm744_vm0, %v270_v36  ;;  %v557_v35 = vld [vmem:[%s8439_s30 + $0xa78] sm:$0xff]  ;;  %v302_v36 = vld [vmem:[%s8439_s30 + $0x280] sm:$0xff] }
  0xa0   : > { %7803 = vmatprep.mubr.msk.f32.mxu1 %vm744_vm0, %v526_v37  ;;  %v558_v37 = vld [vmem:[%s8439_s30 + $0xa80] sm:$0xff] }
  0xa2   : > { %7420 = vmatmul.mubr.msk.f32.gmra.mrb[48].mxu0 %vm744_vm0, %v271_v38  ;;  %v303_v38 = vld [vmem:[%s8439_s30 + $0x288] sm:$0xff] }
  0xa3   : > { %7804 = vmatmul.mubr.msk.f32.gmra.mrb[48].mxu1 %vm744_vm0, %v527_v39  ;;  %7422 = vmatprep.mubr.msk.f32.mxu0 %vm744_vm0, %v272_v40  ;;  %v559_v39 = vld [vmem:[%s8439_s30 + $0xa88] sm:$0xff]  ;;  %v304_v40 = vld [vmem:[%s8439_s30 + $0x290] sm:$0xff] }
  0xa4   : > { %7806 = vmatprep.mubr.msk.f32.mxu1 %vm744_vm0, %v528_v41  ;;  %v560_v41 = vld [vmem:[%s8439_s30 + $0xa90] sm:$0xff] }
  0xa6   : > { %7423 = vmatmul.mubr.msk.f32.gmra.mrb[50].mxu0 %vm744_vm0, %v273_v42  ;;  %v305_v42 = vld [vmem:[%s8439_s30 + $0x298] sm:$0xff] }
  0xa7   : > { %7807 = vmatmul.mubr.msk.f32.gmra.mrb[50].mxu1 %vm744_vm0, %v529_v43  ;;  %7425 = vmatprep.mubr.msk.f32.mxu0 %vm744_vm0, %v274_v44  ;;  %v561_v43 = vld [vmem:[%s8439_s30 + $0xa98] sm:$0xff]  ;;  %v306_v44 = vld [vmem:[%s8439_s30 + $0x2a0] sm:$0xff] }
  0xa8   : > { %7809 = vmatprep.mubr.msk.f32.mxu1 %vm744_vm0, %v530_v45  ;;  %v562_v45 = vld [vmem:[%s8439_s30 + $0xaa0] sm:$0xff] }
  0xaa   : > { %7426 = vmatmul.mubr.msk.f32.gmra.mrb[52].mxu0 %vm744_vm0, %v275_v46  ;;  %v307_v46 = vld [vmem:[%s8439_s30 + $0x2a8] sm:$0xff] }
  0xab   : > { %7810 = vmatmul.mubr.msk.f32.gmra.mrb[52].mxu1 %vm744_vm0, %v531_v47  ;;  %7428 = vmatprep.mubr.msk.f32.mxu0 %vm744_vm0, %v276_v48  ;;  %v563_v47 = vld [vmem:[%s8439_s30 + $0xaa8] sm:$0xff]  ;;  %v308_v48 = vld [vmem:[%s8439_s30 + $0x2b0] sm:$0xff] }
  0xac   : > { %7812 = vmatprep.mubr.msk.f32.mxu1 %vm744_vm0, %v532_v49  ;;  %v564_v49 = vld [vmem:[%s8439_s30 + $0xab0] sm:$0xff] }
  0xae   : > { %7429 = vmatmul.mubr.msk.f32.gmra.mrb[54].mxu0 %vm744_vm0, %v277_v50  ;;  %v309_v50 = vld [vmem:[%s8439_s30 + $0x2b8] sm:$0xff] }
  0xaf   : > { %7813 = vmatmul.mubr.msk.f32.gmra.mrb[54].mxu1 %vm744_vm0, %v533_v51  ;;  %7431 = vmatprep.mubr.msk.f32.mxu0 %vm744_vm0, %v278_v52  ;;  %v565_v51 = vld [vmem:[%s8439_s30 + $0xab8] sm:$0xff]  ;;  %v310_v52 = vld [vmem:[%s8439_s30 + $0x2c0] sm:$0xff] }
  0xb0   : > { %7815 = vmatprep.mubr.msk.f32.mxu1 %vm744_vm0, %v534_v53  ;;  %v566_v53 = vld [vmem:[%s8439_s30 + $0xac0] sm:$0xff] }
  0xb2   : > { %7432 = vmatmul.mubr.msk.f32.gmra.mrb[56].mxu0 %vm744_vm0, %v279_v54  ;;  %v311_v54 = vld [vmem:[%s8439_s30 + $0x2c8] sm:$0xff] }
  0xb3   : > { %7816 = vmatmul.mubr.msk.f32.gmra.mrb[56].mxu1 %vm744_vm0, %v535_v55  ;;  %7434 = vmatprep.mubr.msk.f32.mxu0 %vm744_vm0, %v280_v56  ;;  %v567_v55 = vld [vmem:[%s8439_s30 + $0xac8] sm:$0xff]  ;;  %v312_v56 = vld [vmem:[%s8439_s30 + $0x2d0] sm:$0xff] }
  0xb4   : > { %7818 = vmatprep.mubr.msk.f32.mxu1 %vm744_vm0, %v536_v57  ;;  %v568_v57 = vld [vmem:[%s8439_s30 + $0xad0] sm:$0xff] }
  0xb6   : > { %7435 = vmatmul.mubr.msk.f32.gmra.mrb[58].mxu0 %vm744_vm0, %v281_v58  ;;  %v313_v58 = vld [vmem:[%s8439_s30 + $0x2d8] sm:$0xff] }
  0xb7   : > { %7819 = vmatmul.mubr.msk.f32.gmra.mrb[58].mxu1 %vm744_vm0, %v537_v59  ;;  %7437 = vmatprep.mubr.msk.f32.mxu0 %vm744_vm0, %v282_v60  ;;  %v569_v59 = vld [vmem:[%s8439_s30 + $0xad8] sm:$0xff]  ;;  %v314_v60 = vld [vmem:[%s8439_s30 + $0x2e0] sm:$0xff] }
  0xb8   : > { %7821 = vmatprep.mubr.msk.f32.mxu1 %vm744_vm0, %v538_v61  ;;  %v570_v61 = vld [vmem:[%s8439_s30 + $0xae0] sm:$0xff] }
  0xba   : > { %7438 = vmatmul.mubr.msk.f32.gmra.mrb[60].mxu0 %vm744_vm0, %v283_v62  ;;  %v315_v62 = vld [vmem:[%s8439_s30 + $0x2e8] sm:$0xff] }
  0xbb   : > { %7822 = vmatmul.mubr.msk.f32.gmra.mrb[60].mxu1 %vm744_vm0, %v539_v63  ;;  %7440 = vmatprep.mubr.msk.f32.mxu0 %vm744_vm0, %v284_v0  ;;  %v571_v63 = vld [vmem:[%s8439_s30 + $0xae8] sm:$0xff]  ;;  %v316_v0 = vld [vmem:[%s8439_s30 + $0x2f0] sm:$0xff] }
  0xbc   : > { %7824 = vmatprep.mubr.msk.f32.mxu1 %vm744_vm0, %v540_v1  ;;  %v572_v1 = vld [vmem:[%s8439_s30 + $0xaf0] sm:$0xff] }
  0xbe   : > { %7441 = vmatmul.mubr.msk.f32.gmra.mrb[62].mxu0 %vm744_vm0, %v285_v2  ;;  %v317_v2 = vld [vmem:[%s8439_s30 + $0x2f8] sm:$0xff] }
  0xbf   : > { %7825 = vmatmul.mubr.msk.f32.gmra.mrb[62].mxu1 %vm744_vm0, %v541_v3  ;;  %7443 = vmatprep.mubr.msk.f32.mxu0 %vm744_vm0, %v286_v4  ;;  %v573_v3 = vld [vmem:[%s8439_s30 + $0xaf8] sm:$0xff]  ;;  %v318_v4 = vld [vmem:[%s8439_s30 + $0x300] sm:$0xff] }
  0xc0   : > { %7827 = vmatprep.mubr.msk.f32.mxu1 %vm744_vm0, %v542_v5  ;;  %v574_v5 = vld [vmem:[%s8439_s30 + $0xb00] sm:$0xff] }
  0xc2   : > { %7444 = vmatmul.mubr.msk.f32.gmra.mrb[64].mxu0 %vm744_vm0, %v287_v6  ;;  %v319_v6 = vld [vmem:[%s8439_s30 + $0x308] sm:$0xff] }
  0xc3   : > { %7828 = vmatmul.mubr.msk.f32.gmra.mrb[64].mxu1 %vm744_vm0, %v543_v7  ;;  %7446 = vmatprep.mubr.msk.f32.mxu0 %vm744_vm0, %v288_v8  ;;  %v575_v7 = vld [vmem:[%s8439_s30 + $0xb08] sm:$0xff]  ;;  %v320_v8 = vld [vmem:[%s8439_s30 + $0x310] sm:$0xff] }
  0xc4   : > { %7830 = vmatprep.mubr.msk.f32.mxu1 %vm744_vm0, %v544_v9  ;;  %v576_v9 = vld [vmem:[%s8439_s30 + $0xb10] sm:$0xff] }
  0xc6   : > { %7447 = vmatmul.mubr.msk.f32.gmra.mrb[66].mxu0 %vm744_vm0, %v289_v10  ;;  %v321_v10 = vld [vmem:[%s8439_s30 + $0x318] sm:$0xff] }
  0xc7   : > { %7831 = vmatmul.mubr.msk.f32.gmra.mrb[66].mxu1 %vm744_vm0, %v545_v11  ;;  %7449 = vmatprep.mubr.msk.f32.mxu0 %vm744_vm0, %v290_v12  ;;  %v577_v11 = vld [vmem:[%s8439_s30 + $0xb18] sm:$0xff]  ;;  %v322_v12 = vld [vmem:[%s8439_s30 + $0x320] sm:$0xff] }
  0xc8   : > { %7833 = vmatprep.mubr.msk.f32.mxu1 %vm744_vm0, %v546_v13  ;;  %v578_v13 = vld [vmem:[%s8439_s30 + $0xb20] sm:$0xff] }
  0xca   : > { %7450 = vmatmul.mubr.msk.f32.gmra.mrb[68].mxu0 %vm744_vm0, %v291_v14  ;;  %v323_v14 = vld [vmem:[%s8439_s30 + $0x328] sm:$0xff] }
  0xcb   : > { %7834 = vmatmul.mubr.msk.f32.gmra.mrb[68].mxu1 %vm744_vm0, %v547_v15  ;;  %7452 = vmatprep.mubr.msk.f32.mxu0 %vm744_vm0, %v292_v16  ;;  %v579_v15 = vld [vmem:[%s8439_s30 + $0xb28] sm:$0xff]  ;;  %v324_v16 = vld [vmem:[%s8439_s30 + $0x330] sm:$0xff] }
  0xcc   : > { %7836 = vmatprep.mubr.msk.f32.mxu1 %vm744_vm0, %v548_v17  ;;  %v580_v17 = vld [vmem:[%s8439_s30 + $0xb30] sm:$0xff] }
  0xce   : > { %7453 = vmatmul.mubr.msk.f32.gmra.mrb[70].mxu0 %vm744_vm0, %v293_v18  ;;  %v325_v18 = vld [vmem:[%s8439_s30 + $0x338] sm:$0xff] }
  0xcf   : > { %7837 = vmatmul.mubr.msk.f32.gmra.mrb[70].mxu1 %vm744_vm0, %v549_v19  ;;  %7455 = vmatprep.mubr.msk.f32.mxu0 %vm744_vm0, %v294_v20  ;;  %v581_v19 = vld [vmem:[%s8439_s30 + $0xb38] sm:$0xff]  ;;  %v326_v20 = vld [vmem:[%s8439_s30 + $0x340] sm:$0xff] }
  0xd0   : > { %7839 = vmatprep.mubr.msk.f32.mxu1 %vm744_vm0, %v550_v21  ;;  %v582_v21 = vld [vmem:[%s8439_s30 + $0xb40] sm:$0xff] }
  0xd2   : > { %7456 = vmatmul.mubr.msk.f32.gmra.mrb[72].mxu0 %vm744_vm0, %v295_v22  ;;  %v327_v22 = vld [vmem:[%s8439_s30 + $0x348] sm:$0xff] }
  0xd3   : > { %7840 = vmatmul.mubr.msk.f32.gmra.mrb[72].mxu1 %vm744_vm0, %v551_v23  ;;  %7458 = vmatprep.mubr.msk.f32.mxu0 %vm744_vm0, %v296_v24  ;;  %v583_v23 = vld [vmem:[%s8439_s30 + $0xb48] sm:$0xff]  ;;  %v328_v24 = vld [vmem:[%s8439_s30 + $0x350] sm:$0xff] }
  0xd4   : > { %7842 = vmatprep.mubr.msk.f32.mxu1 %vm744_vm0, %v552_v25  ;;  %v584_v25 = vld [vmem:[%s8439_s30 + $0xb50] sm:$0xff] }
  0xd6   : > { %7459 = vmatmul.mubr.msk.f32.gmra.mrb[74].mxu0 %vm744_vm0, %v297_v26  ;;  %v329_v26 = vld [vmem:[%s8439_s30 + $0x358] sm:$0xff] }
  0xd7   : > { %7843 = vmatmul.mubr.msk.f32.gmra.mrb[74].mxu1 %vm744_vm0, %v553_v27  ;;  %7461 = vmatprep.mubr.msk.f32.mxu0 %vm744_vm0, %v298_v28  ;;  %v585_v27 = vld [vmem:[%s8439_s30 + $0xb58] sm:$0xff]  ;;  %v330_v28 = vld [vmem:[%s8439_s30 + $0x360] sm:$0xff] }
  0xd8   : > { %7845 = vmatprep.mubr.msk.f32.mxu1 %vm744_vm0, %v554_v29  ;;  %v586_v29 = vld [vmem:[%s8439_s30 + $0xb60] sm:$0xff] }
  0xda   : > { %7462 = vmatmul.mubr.msk.f32.gmra.mrb[76].mxu0 %vm744_vm0, %v299_v30 }
  0xdb   : > { %7846 = vmatmul.mubr.msk.f32.gmra.mrb[76].mxu1 %vm744_vm0, %v555_v31  ;;  %7464 = vmatprep.mubr.msk.f32.mxu0 %vm744_vm0, %v300_v32 }
  0xdc   : > { %7848 = vmatprep.mubr.msk.f32.mxu1 %vm744_vm0, %v556_v33 }
  0xde   : > { %7465 = vmatmul.mubr.msk.f32.gmra.mrb[78].mxu0 %vm744_vm0, %v301_v34  ;;  %v331_v34 = vld [vmem:[%s8439_s30 + $0x368] sm:$0xff] }
  0xdf   : > { %7849 = vmatmul.mubr.msk.f32.gmra.mrb[78].mxu1 %vm744_vm0, %v557_v35  ;;  %7467 = vmatprep.mubr.msk.f32.mxu0 %vm744_vm0, %v302_v36  ;;  %v587_v35 = vld [vmem:[%s8439_s30 + $0xb68] sm:$0xff]  ;;  %v332_v36 = vld [vmem:[%s8439_s30 + $0x370] sm:$0xff] }
  0xe0   : > { %7851 = vmatprep.mubr.msk.f32.mxu1 %vm744_vm0, %v558_v37  ;;  %v588_v37 = vld [vmem:[%s8439_s30 + $0xb70] sm:$0xff] }
  0xe2   : > { %7468 = vmatmul.mubr.msk.f32.gmra.mrb[80].mxu0 %vm744_vm0, %v303_v38 }
  0xe3   : > { %7852 = vmatmul.mubr.msk.f32.gmra.mrb[80].mxu1 %vm744_vm0, %v559_v39  ;;  %7470 = vmatprep.mubr.msk.f32.mxu0 %vm744_vm0, %v304_v40 }
  0xe4   : > { %7854 = vmatprep.mubr.msk.f32.mxu1 %vm744_vm0, %v560_v41 }
  0xe6   : > { %7471 = vmatmul.mubr.msk.f32.gmra.mrb[82].mxu0 %vm744_vm0, %v305_v42  ;;  %v333_v42 = vld [vmem:[%s8439_s30 + $0x378] sm:$0xff] }
  0xe7   : > { %7855 = vmatmul.mubr.msk.f32.gmra.mrb[82].mxu1 %vm744_vm0, %v561_v43  ;;  %7473 = vmatprep.mubr.msk.f32.mxu0 %vm744_vm0, %v306_v44  ;;  %v589_v43 = vld [vmem:[%s8439_s30 + $0xb78] sm:$0xff]  ;;  %v334_v44 = vld [vmem:[%s8439_s30 + $0x380] sm:$0xff] }
  0xe8   : > { %7857 = vmatprep.mubr.msk.f32.mxu1 %vm744_vm0, %v562_v45  ;;  %v590_v45 = vld [vmem:[%s8439_s30 + $0xb80] sm:$0xff] }
  0xea   : > { %7474 = vmatmul.mubr.msk.f32.gmra.mrb[84].mxu0 %vm744_vm0, %v307_v46 }
  0xeb   : > { %7858 = vmatmul.mubr.msk.f32.gmra.mrb[84].mxu1 %vm744_vm0, %v563_v47  ;;  %7476 = vmatprep.mubr.msk.f32.mxu0 %vm744_vm0, %v308_v48 }
  0xec   : > { %7860 = vmatprep.mubr.msk.f32.mxu1 %vm744_vm0, %v564_v49 }
  0xee   : > { %7477 = vmatmul.mubr.msk.f32.gmra.mrb[86].mxu0 %vm744_vm0, %v309_v50  ;;  %v335_v50 = vld [vmem:[%s8439_s30 + $0x388] sm:$0xff] }
  0xef   : > { %7861 = vmatmul.mubr.msk.f32.gmra.mrb[86].mxu1 %vm744_vm0, %v565_v51  ;;  %7479 = vmatprep.mubr.msk.f32.mxu0 %vm744_vm0, %v310_v52  ;;  %v591_v51 = vld [vmem:[%s8439_s30 + $0xb88] sm:$0xff]  ;;  %v336_v52 = vld [vmem:[%s8439_s30 + $0x390] sm:$0xff] }
  0xf0   : > { %7863 = vmatprep.mubr.msk.f32.mxu1 %vm744_vm0, %v566_v53  ;;  %v592_v53 = vld [vmem:[%s8439_s30 + $0xb90] sm:$0xff] }
  0xf2   : > { %7480 = vmatmul.mubr.msk.f32.gmra.mrb[88].mxu0 %vm744_vm0, %v311_v54 }
  0xf3   : > { %7864 = vmatmul.mubr.msk.f32.gmra.mrb[88].mxu1 %vm744_vm0, %v567_v55  ;;  %7482 = vmatprep.mubr.msk.f32.mxu0 %vm744_vm0, %v312_v56 }
  0xf4   : > { %7866 = vmatprep.mubr.msk.f32.mxu1 %vm744_vm0, %v568_v57 }
  0xf6   : > { %7483 = vmatmul.mubr.msk.f32.gmra.mrb[90].mxu0 %vm744_vm0, %v313_v58  ;;  %v337_v58 = vld [vmem:[%s8439_s30 + $0x398] sm:$0xff] }
  0xf7   : > { %7867 = vmatmul.mubr.msk.f32.gmra.mrb[90].mxu1 %vm744_vm0, %v569_v59  ;;  %7485 = vmatprep.mubr.msk.f32.mxu0 %vm744_vm0, %v314_v60  ;;  %v593_v59 = vld [vmem:[%s8439_s30 + $0xb98] sm:$0xff]  ;;  %v338_v60 = vld [vmem:[%s8439_s30 + $0x3a0] sm:$0xff] }
  0xf8   : > { %7869 = vmatprep.mubr.msk.f32.mxu1 %vm744_vm0, %v570_v61  ;;  %v594_v61 = vld [vmem:[%s8439_s30 + $0xba0] sm:$0xff] }
  0xfa   : > { %7486 = vmatmul.mubr.msk.f32.gmra.mrb[92].mxu0 %vm744_vm0, %v315_v62 }
  0xfb   : > { %7870 = vmatmul.mubr.msk.f32.gmra.mrb[92].mxu1 %vm744_vm0, %v571_v63  ;;  %7488 = vmatprep.mubr.msk.f32.mxu0 %vm744_vm0, %v316_v0 }
  0xfc   : > { %7872 = vmatprep.mubr.msk.f32.mxu1 %vm744_vm0, %v572_v1 }
  0xfe   : > { %7489 = vmatmul.mubr.msk.f32.gmra.mrb[94].mxu0 %vm744_vm0, %v317_v2  ;;  %v339_v2 = vld [vmem:[%s8439_s30 + $0x3a8] sm:$0xff] }
  0xff   : > { %7873 = vmatmul.mubr.msk.f32.gmra.mrb[94].mxu1 %vm744_vm0, %v573_v3  ;;  %7491 = vmatprep.mubr.msk.f32.mxu0 %vm744_vm0, %v318_v4  ;;  %v595_v3 = vld [vmem:[%s8439_s30 + $0xba8] sm:$0xff]  ;;  %v340_v4 = vld [vmem:[%s8439_s30 + $0x3b0] sm:$0xff] }
 0x100   : > { %7875 = vmatprep.mubr.msk.f32.mxu1 %vm744_vm0, %v574_v5  ;;  %v596_v5 = vld [vmem:[%s8439_s30 + $0xbb0] sm:$0xff] }
 0x102   : > { %7492 = vmatmul.mubr.msk.f32.gmra.mrb[96].mxu0 %vm744_vm0, %v319_v6 }
 0x103   : > { %7876 = vmatmul.mubr.msk.f32.gmra.mrb[96].mxu1 %vm744_vm0, %v575_v7  ;;  %7494 = vmatprep.mubr.msk.f32.mxu0 %vm744_vm0, %v320_v8 }
 0x104   : > { %7878 = vmatprep.mubr.msk.f32.mxu1 %vm744_vm0, %v576_v9 }
 0x106   : > { %7495 = vmatmul.mubr.msk.f32.gmra.mrb[98].mxu0 %vm744_vm0, %v321_v10  ;;  %v341_v10 = vld [vmem:[%s8439_s30 + $0x3b8] sm:$0xff] }
 0x107   : > { %7879 = vmatmul.mubr.msk.f32.gmra.mrb[98].mxu1 %vm744_vm0, %v577_v11  ;;  %7497 = vmatprep.mubr.msk.f32.mxu0 %vm744_vm0, %v322_v12  ;;  %v597_v11 = vld [vmem:[%s8439_s30 + $0xbb8] sm:$0xff]  ;;  %v342_v12 = vld [vmem:[%s8439_s30 + $0x3c0] sm:$0xff] }
 0x108   : > { %7881 = vmatprep.mubr.msk.f32.mxu1 %vm744_vm0, %v578_v13  ;;  %v598_v13 = vld [vmem:[%s8439_s30 + $0xbc0] sm:$0xff] }
 0x10a   : > { %7498 = vmatmul.mubr.msk.f32.gmra.mrb[100].mxu0 %vm744_vm0, %v323_v14 }
 0x10b   : > { %7882 = vmatmul.mubr.msk.f32.gmra.mrb[100].mxu1 %vm744_vm0, %v579_v15  ;;  %7500 = vmatprep.mubr.msk.f32.mxu0 %vm744_vm0, %v324_v16 }
 0x10c   : > { %7884 = vmatprep.mubr.msk.f32.mxu1 %vm744_vm0, %v580_v17 }
 0x10e   : > { %7501 = vmatmul.mubr.msk.f32.gmra.mrb[102].mxu0 %vm744_vm0, %v325_v18  ;;  %v343_v18 = vld [vmem:[%s8439_s30 + $0x3c8] sm:$0xff] }
 0x10f   : > { %7885 = vmatmul.mubr.msk.f32.gmra.mrb[102].mxu1 %vm744_vm0, %v581_v19  ;;  %7503 = vmatprep.mubr.msk.f32.mxu0 %vm744_vm0, %v326_v20  ;;  %v599_v19 = vld [vmem:[%s8439_s30 + $0xbc8] sm:$0xff]  ;;  %v344_v20 = vld [vmem:[%s8439_s30 + $0x3d0] sm:$0xff] }
 0x110   : > { %7887 = vmatprep.mubr.msk.f32.mxu1 %vm744_vm0, %v582_v21  ;;  %v600_v21 = vld [vmem:[%s8439_s30 + $0xbd0] sm:$0xff] }
 0x112   : > { %7504 = vmatmul.mubr.msk.f32.gmra.mrb[104].mxu0 %vm744_vm0, %v327_v22 }
 0x113   : > { %7888 = vmatmul.mubr.msk.f32.gmra.mrb[104].mxu1 %vm744_vm0, %v583_v23  ;;  %7506 = vmatprep.mubr.msk.f32.mxu0 %vm744_vm0, %v328_v24  ;;  %v9011_v24 = vld [vmem:[%s11428_s2] ss:$0 sm:$0xff] }
 0x114   : > { %7890 = vmatprep.mubr.msk.f32.mxu1 %vm744_vm0, %v584_v25 }
 0x115   : > { %v8886_v30 = vpop.f32.mrb[0].mxu0 }
 0x116   : > { %v8888_v31 = vpop.f32.mrb[0].mxu1  ;;  %v8890_v32 = vpop.f32.mrb[1].mxu0  ;;  %7507 = vmatmul.mubr.msk.f32.gmra.mrb[106].mxu0 %vm744_vm0, %v329_v26 }
 0x117   : > { %v8893_v33 = vpop.f32.mrb[1].mxu1  ;;  %7891 = vmatmul.mubr.msk.f32.gmra.mrb[106].mxu1 %vm744_vm0, %v585_v27  ;;  %7509 = vmatprep.mubr.msk.f32.mxu0 %vm744_vm0, %v330_v28  ;;  %v345_v27 = vld [vmem:[%s8439_s30 + $0x3d8] sm:$0xff] }
 0x118   : > { %7893 = vmatprep.mubr.msk.f32.mxu1 %vm744_vm0, %v586_v29  ;;  %v601_v28 = vld [vmem:[%s8439_s30 + $0xbd8] sm:$0xff]  ;;  %v346_v29 = vld [vmem:[%s8439_s30 + $0x3e0] sm:$0xff] }
 0x119   : > { %v8902_v38 = vpop.f32.mrb[2].mxu0 }
 0x11a   : > { %v8904_v39 = vpop.f32.mrb[2].mxu1  ;;  %v8906_v40 = vpop.f32.mrb[3].mxu0  ;;  %7510 = vmatmul.mubr.msk.f32.gmra.mrb[108].mxu0 %vm744_vm0, %v331_v34  ;;  %v602_v34 = vld [vmem:[%s8439_s30 + $0xbe0] sm:$0xff] }
 0x11b   : > { %v8909_v41 = vpop.f32.mrb[3].mxu1  ;;  %7894 = vmatmul.mubr.msk.f32.gmra.mrb[108].mxu1 %vm744_vm0, %v587_v35  ;;  %7512 = vmatprep.mubr.msk.f32.mxu0 %vm744_vm0, %v332_v36  ;;  %v2357_v35 = vadd.f32 %v8886_v30, %v9011_v24  ;;  %v3637_v36 = vadd.f32 %v8888_v31, %v9011_v24 }
 0x11c   : > { %7896 = vmatprep.mubr.msk.f32.mxu1 %vm744_vm0, %v588_v37 }
 0x11d   : > { %v8918_v46 = vpop.f32.mrb[4].mxu0 }
 0x11e   : > { %v8920_v47 = vpop.f32.mrb[4].mxu1  ;;  %v8922_v48 = vpop.f32.mrb[5].mxu0  ;;  %7513 = vmatmul.mubr.msk.f32.gmra.mrb[110].mxu0 %vm744_vm0, %v333_v42 }
 0x11f   : > { %v8925_v49 = vpop.f32.mrb[5].mxu1  ;;  %7897 = vmatmul.mubr.msk.f32.gmra.mrb[110].mxu1 %vm744_vm0, %v589_v43  ;;  %7515 = vmatprep.mubr.msk.f32.mxu0 %vm744_vm0, %v334_v44  ;;  %v2352_v43 = vadd.f32 %v9011_v24, %v8890_v32 }
 0x120   : > { %7899 = vmatprep.mubr.msk.f32.mxu1 %vm744_vm0, %v590_v45 }
 0x121   : > { %v8934_v54 = vpop.f32.mrb[6].mxu0 }
 0x122   : > { %v8936_v55 = vpop.f32.mrb[6].mxu1  ;;  %v8938_v56 = vpop.f32.mrb[7].mxu0  ;;  %7516 = vmatmul.mubr.msk.f32.gmra.mrb[112].mxu0 %vm744_vm0, %v335_v50  ;;  %v3632_v50 = vadd.f32 %v9011_v24, %v8893_v33  ;;  %v3647_v33 = vadd.f32 %v8904_v39, %v9011_v24 }
 0x123   : > { %v8941_v57 = vpop.f32.mrb[7].mxu1  ;;  %7900 = vmatmul.mubr.msk.f32.gmra.mrb[112].mxu1 %vm744_vm0, %v591_v51  ;;  %7518 = vmatprep.mubr.msk.f32.mxu0 %vm744_vm0, %v336_v52  ;;  %v347_v52 = vld [vmem:[%s8439_s30 + $0x3e8] sm:$0xff] }
 0x124   : > { %7902 = vmatprep.mubr.msk.f32.mxu1 %vm744_vm0, %v592_v53  ;;  %v603_v53 = vld [vmem:[%s8439_s30 + $0xbe8] sm:$0xff] }
 0x125   : > { %v8950_v62 = vpop.f32.mrb[8].mxu0 }
 0x126   : > { %v8952_v63 = vpop.f32.mrb[8].mxu1  ;;  %v8954_v0 = vpop.f32.mrb[9].mxu0  ;;  %7519 = vmatmul.mubr.msk.f32.gmra.mrb[114].mxu0 %vm744_vm0, %v337_v58 }
 0x127   : > { %v8957_v1 = vpop.f32.mrb[9].mxu1  ;;  %7903 = vmatmul.mubr.msk.f32.gmra.mrb[114].mxu1 %vm744_vm0, %v593_v59  ;;  %7521 = vmatprep.mubr.msk.f32.mxu0 %vm744_vm0, %v338_v60  ;;  %v348_v60 = vld [vmem:[%s8439_s30 + $0x3f0] sm:$0xff] }
 0x128   : > { %7905 = vmatprep.mubr.msk.f32.mxu1 %vm744_vm0, %v594_v61  ;;  %v604_v61 = vld [vmem:[%s8439_s30 + $0xbf0] sm:$0xff] }
 0x129   : > { %v8966_v6 = vpop.f32.mrb[10].mxu0 }
 0x12a   : > { %v8968_v7 = vpop.f32.mrb[10].mxu1  ;;  %v8970_v8 = vpop.f32.mrb[11].mxu0  ;;  %7522 = vmatmul.mubr.msk.f32.gmra.mrb[116].mxu0 %vm744_vm0, %v339_v2  ;;  %v2367_v2 = vadd.f32 %v8902_v38, %v9011_v24 }
 0x12b   : > { %v8973_v9 = vpop.f32.mrb[11].mxu1  ;;  %7906 = vmatmul.mubr.msk.f32.gmra.mrb[116].mxu1 %vm744_vm0, %v595_v3  ;;  %7524 = vmatprep.mubr.msk.f32.mxu0 %vm744_vm0, %v340_v4 }
 0x12c   : > { %7908 = vmatprep.mubr.msk.f32.mxu1 %vm744_vm0, %v596_v5 }
 0x12d   : > { %v8982_v14 = vpop.f32.mrb[12].mxu0 }
 0x12e   : > { %v8984_v15 = vpop.f32.mrb[12].mxu1  ;;  %v8986_v16 = vpop.f32.mrb[13].mxu0  ;;  %7525 = vmatmul.mubr.msk.f32.gmra.mrb[118].mxu0 %vm744_vm0, %v341_v10 }
 0x12f   : > { %v8989_v17 = vpop.f32.mrb[13].mxu1  ;;  %7909 = vmatmul.mubr.msk.f32.gmra.mrb[118].mxu1 %vm744_vm0, %v597_v11  ;;  %7527 = vmatprep.mubr.msk.f32.mxu0 %vm744_vm0, %v342_v12  ;;  %v2362_v11 = vadd.f32 %v9011_v24, %v8906_v40  ;;  %v3642_v40 = vadd.f32 %v9011_v24, %v8909_v41  ;;  %v606_v41 = vld [vmem:[%s8439_s30 + $0xc00] sm:$0xff] }
 0x130   : > { %7911 = vmatprep.mubr.msk.f32.mxu1 %vm744_vm0, %v598_v13 }
 0x131   : > { %v9000_v22 = vpop.f32.mrb[14].mxu0 }
 0x132   : > { %v9002_v23 = vpop.f32.mrb[14].mxu1  ;;  %v9013_v25 = vpop.f32.mrb[15].mxu0  ;;  %7528 = vmatmul.mubr.msk.f32.gmra.mrb[120].mxu0 %vm744_vm0, %v343_v18 }
 0x133   : > { %v9016_v26 = vpop.f32.mrb[15].mxu1  ;;  %7912 = vmatmul.mubr.msk.f32.gmra.mrb[120].mxu1 %vm744_vm0, %v599_v19  ;;  %7530 = vmatprep.mubr.msk.f32.mxu0 %vm744_vm0, %v344_v20  ;;  %v349_v20 = vld [vmem:[%s8439_s30 + $0x3f8] sm:$0xff] }
 0x134   : > { %7914 = vmatprep.mubr.msk.f32.mxu1 %vm744_vm0, %v600_v21  ;;  %v605_v21 = vld [vmem:[%s8439_s30 + $0xbf8] sm:$0xff] }
 0x135   : > { %v7373_v37 = vpop.f32.mrb[16].mxu0 }
 0x136   : > { %v7757_v42 = vpop.f32.mrb[16].mxu1  ;;  %v2437_v44 = vadd.f32 %v7373_v37, %v9011_v24  ;;  %v2431_v30 = vpop.f32.mrb[17].mxu0  ;;  %7531 = vmatmul.mubr.msk.f32.gmra.mrb[122].mxu0 %vm744_vm0, %v345_v27 }
 0x137   : > { %v3717_v45 = vadd.f32 %v7757_v42, %v9011_v24  ;;  %v3711_v31 = vpop.f32.mrb[17].mxu1  ;;  %7915 = vmatmul.mubr.msk.f32.gmra.mrb[122].mxu1 %vm744_vm0, %v601_v28  ;;  %v2432_v32 = vadd.f32 %v9011_v24, %v2431_v30  ;;  %7533 = vmatprep.mubr.msk.f32.mxu0 %vm744_vm0, %v346_v29  ;;  %v350_v29 = vld [vmem:[%s8439_s30 + $0x400] sm:$0xff] }
 0x138   : > { %v3712_v51 = vadd.f32 %v9011_v24, %v3711_v31  ;;  %7917 = vmatprep.mubr.msk.f32.mxu1 %vm744_vm0, %v602_v34  ;;  %v4911_v58 = vmax.f32 %v2357_v35, %v2437_v44  ;;  %v2377_v34 = vadd.f32 %v8918_v46, %v9011_v24  ;;  %v3657_v35 = vadd.f32 %v8920_v47, %v9011_v24 }
 0x139   : > { %v5039_v59 = vmax.f32 %v3637_v36, %v3717_v45  ;;  %v4910_v3 = vmax.f32 %v2352_v43, %v2432_v32  ;;  %v7376_v5 = vpop.f32.mrb[18].mxu0  ;;  %v2372_v44 = vadd.f32 %v9011_v24, %v8922_v48  ;;  %v3652_v48 = vadd.f32 %v9011_v24, %v8925_v49  ;;  %v351_v32 = vld [vmem:[%s8439_s30 + $0x408] sm:$0xff] }
 0x13a   : > { %v5038_v4 = vmax.f32 %v3632_v50, %v3712_v51  ;;  %v7760_v10 = vpop.f32.mrb[18].mxu1  ;;  %5168 = vst.msk [vmem:[#allocation2 + $0x8] sm:$0xff] %vm5166_vm2, %v4911_v58  ;;  %v2447_v38 = vadd.f32 %v7376_v5, %v9011_v24  ;;  %v2441_v39 = vpop.f32.mrb[19].mxu0  ;;  %7534 = vmatmul.mubr.msk.f32.gmra.mrb[124].mxu0 %vm744_vm0, %v347_v52  ;;  %v607_v51 = vld [vmem:[%s8439_s30 + $0xc08] sm:$0xff]  ;;  %v352_v58 = vld [vmem:[%s8439_s30 + $0x410] sm:$0xff]  ;;  %v2387_v49 = vadd.f32 %v8934_v54, %v9011_v24 }
 0x13b   : > { %5296 = vst.msk [vmem:[#allocation2 + $0x408] sm:$0xff] %vm5166_vm2, %v5039_v59  ;;  %v3727_v12 = vadd.f32 %v7760_v10, %v9011_v24  ;;  %v3721_v13 = vpop.f32.mrb[19].mxu1  ;;  %7918 = vmatmul.mubr.msk.f32.gmra.mrb[124].mxu1 %vm744_vm0, %v603_v53  ;;  %5167 = vst.msk [vmem:[#allocation2] sm:$0xff] %vm5166_vm2, %v4910_v3  ;;  %v2442_v18 = vadd.f32 %v9011_v24, %v2441_v39  ;;  %7536 = vmatprep.mubr.msk.f32.mxu0 %vm744_vm0, %v348_v60  ;;  %v608_v59 = vld [vmem:[%s8439_s30 + $0xc10] sm:$0xff] }
 0x13c   : > { %5295 = vst.msk [vmem:[#allocation2 + $0x400] sm:$0xff] %vm5166_vm2, %v5038_v4  ;;  %v3722_v19 = vadd.f32 %v9011_v24, %v3721_v13  ;;  %7920 = vmatprep.mubr.msk.f32.mxu1 %vm744_vm0, %v604_v61  ;;  %v4913_v27 = vmax.f32 %v2367_v2, %v2447_v38  ;;  %v3667_v60 = vadd.f32 %v8936_v55, %v9011_v24 }
 0x13d   : > { %v5041_v28 = vmax.f32 %v3647_v33, %v3727_v12  ;;  %v4912_v36 = vmax.f32 %v2362_v11, %v2442_v18  ;;  %v7379_v42 = vpop.f32.mrb[20].mxu0  ;;  %v2382_v4 = vadd.f32 %v9011_v24, %v8938_v56  ;;  %v3662_v56 = vadd.f32 %v9011_v24, %v8941_v57  ;;  %v353_v57 = vld [vmem:[%s8439_s30 + $0x418] sm:$0xff] }
 0x13e   : > { %v5040_v37 = vmax.f32 %v3642_v40, %v3722_v19  ;;  %v7763_v43 = vpop.f32.mrb[20].mxu1  ;;  %5170 = vst.msk [vmem:[#allocation2 + $0x18] sm:$0xff] %vm5166_vm2, %v4913_v27  ;;  %v2457_v45 = vadd.f32 %v7379_v42, %v9011_v24  ;;  %v2451_v30 = vpop.f32.mrb[21].mxu0  ;;  %7537 = vmatmul.mubr.msk.f32.gmra.mrb[126].mxu0 %vm744_vm0, %v349_v20  ;;  %v9126_v38 = vadd.f32 %v8950_v62, %v9011_v24  ;;  %v609_v18 = vld [vmem:[%s8439_s30 + $0xc18] sm:$0xff]  ;;  %v354_v27 = vld [vmem:[%s8439_s30 + $0x420] sm:$0xff] }
 0x13f   : > { %5298 = vst.msk [vmem:[#allocation2 + $0x418] sm:$0xff] %vm5166_vm2, %v5041_v28  ;;  %v3737_v46 = vadd.f32 %v7763_v43, %v9011_v24  ;;  %v3731_v47 = vpop.f32.mrb[21].mxu1  ;;  %7921 = vmatmul.mubr.msk.f32.gmra.mrb[126].mxu1 %vm744_vm0, %v605_v21  ;;  %5169 = vst.msk [vmem:[#allocation2 + $0x10] sm:$0xff] %vm5166_vm2, %v4912_v36  ;;  %v2452_v31 = vadd.f32 %v9011_v24, %v2451_v30  ;;  %7539 = vmatprep.mubr.msk.f32.mxu0 %vm744_vm0, %v350_v29  ;;  %v610_v28 = vld [vmem:[%s8439_s30 + $0xc20] sm:$0xff] }
 0x140   : > { %5297 = vst.msk [vmem:[#allocation2 + $0x410] sm:$0xff] %vm5166_vm2, %v5040_v37  ;;  %v3732_v50 = vadd.f32 %v9011_v24, %v3731_v47  ;;  %7923 = vmatprep.mubr.msk.f32.mxu1 %vm744_vm0, %v606_v41  ;;  %v4915_v52 = vmax.f32 %v2377_v34, %v2457_v45  ;;  %v3677_v29 = vadd.f32 %v8952_v63, %v9011_v24 }
 0x141   : > { %v5043_v53 = vmax.f32 %v3657_v35, %v3737_v46  ;;  %v4914_v61 = vmax.f32 %v2372_v44, %v2452_v31  ;;  %v7382_v33 = vpop.f32.mrb[22].mxu0  ;;  %v9141_v41 = vadd.f32 %v9011_v24, %v8954_v0  ;;  %v9145_v34 = vadd.f32 %v9011_v24, %v8957_v1 }
 0x142   : > { %v5042_v2 = vmax.f32 %v3652_v48, %v3732_v50  ;;  %v7766_v3 = vpop.f32.mrb[22].mxu1  ;;  %v5423_v5 = vld [vmem:[#allocation2] ss:$2 sm:$0xff]  ;;  %v5679_v10 = vld [vmem:[#allocation2 + $0x1] ss:$2 sm:$0xff]  ;;  %5172 = vst.msk [vmem:[#allocation2 + $0x28] sm:$0xff] %vm5166_vm2, %v4915_v52  ;;  %v2467_v54 = vadd.f32 %v7382_v33, %v9011_v24  ;;  %7540 = vmatmul.mubr.msk.f32.gmra.mrb[128].mxu0 %vm744_vm0, %v351_v32  ;;  %v9160_v45 = vadd.f32 %v8966_v6, %v9011_v24 }
 0x143   : > { %v5551_v11 = vld [vmem:[#allocation2 + $0x400] ss:$2 sm:$0xff]  ;;  %5300 = vst.msk [vmem:[#allocation2 + $0x428] sm:$0xff] %vm5166_vm2, %v5043_v53  ;;  %v3747_v55 = vadd.f32 %v7766_v3, %v9011_v24  ;;  %7924 = vmatmul.mubr.msk.f32.gmra.mrb[128].mxu1 %vm744_vm0, %v607_v51  ;;  %v5934_v12 = vmax.f32 %v5423_v5, %v5679_v10  ;;  %v5807_v39 = vld [vmem:[#allocation2 + $0x401] ss:$2 sm:$0xff]  ;;  %5171 = vst.msk [vmem:[#allocation2 + $0x20] sm:$0xff] %vm5166_vm2, %v4914_v61  ;;  %7542 = vmatprep.mubr.msk.f32.mxu0 %vm744_vm0, %v352_v58 }
 0x144   : > { %5299 = vst.msk [vmem:[#allocation2 + $0x420] sm:$0xff] %vm5166_vm2, %v5042_v2  ;;  %v2461_v13 = vpop.f32.mrb[23].mxu0  ;;  %v3741_v40 = vpop.f32.mrb[23].mxu1  ;;  %7926 = vmatprep.mubr.msk.f32.mxu1 %vm744_vm0, %v608_v59  ;;  %v5998_v19 = vmax.f32 %v5551_v11, %v5807_v39  ;;  %v4917_v62 = vmax.f32 %v2387_v49, %v2467_v54  ;;  %v355_v50 = vld [vmem:[%s8439_s30 + $0x428] sm:$0xff]  ;;  %v356_v58 = vld [vmem:[%s8439_s30 + $0x430] sm:$0xff]  ;;  %v3687_v49 = vadd.f32 %v8968_v7, %v9011_v24  ;;  %v357_v39 = vld [vmem:[%s8439_s30 + $0x438] sm:$0xff] }
 0x145   : > { %v5045_v20 = vmax.f32 %v3667_v60, %v3747_v55  ;;  %v2462_v21 = vadd.f32 %v9011_v24, %v2461_v13  ;;  %6062 = vst.msk [vmem:[%s9114_s25] sm:$0xff] %vm5166_vm2, %v5934_v12  ;;  %v3742_v35 = vadd.f32 %v9011_v24, %v3741_v40  ;;  %v7385_v36 = vpop.f32.mrb[24].mxu0  ;;  %v611_v32 = vld [vmem:[%s8439_s30 + $0xc28] sm:$0xff]  ;;  %v612_v59 = vld [vmem:[%s8439_s30 + $0xc30] sm:$0xff]  ;;  %v9175_v60 = vadd.f32 %v9011_v24, %v8970_v8  ;;  %v613_v13 = vld [vmem:[%s8439_s30 + $0xc38] sm:$0xff] }
 0x146   : > { %v7769_v37 = vpop.f32.mrb[24].mxu1  ;;  %6126 = vst.msk [vmem:[%s9114_s25 + $0x200] sm:$0xff] %vm5166_vm2, %v5998_v19  ;;  %v5425_v42 = vld [vmem:[#allocation2 + $0x10] ss:$2 sm:$0xff]  ;;  %v5681_v43 = vld [vmem:[#allocation2 + $0x11] ss:$2 sm:$0xff]  ;;  %v2477_v0 = vadd.f32 %v7385_v36, %v9011_v24  ;;  %7543 = vmatmul.mubr.msk.f32.gmra.mrb[130].mxu0 %vm744_vm0, %v353_v57  ;;  %v9179_v61 = vadd.f32 %v9011_v24, %v8973_v9  ;;  %v9196_v11 = vadd.f32 %v8982_v14, %v9011_v24 }
 0x147   : > { %v5553_v44 = vld [vmem:[#allocation2 + $0x410] ss:$2 sm:$0xff]  ;;  %5174 = vst.msk [vmem:[#allocation2 + $0x38] sm:$0xff] %vm5166_vm2, %v4917_v62  ;;  %5302 = vst.msk [vmem:[#allocation2 + $0x438] sm:$0xff] %vm5166_vm2, %v5045_v20  ;;  %v4916_v63 = vmax.f32 %v2382_v4, %v2462_v21  ;;  %v3757_v1 = vadd.f32 %v7769_v37, %v9011_v24  ;;  %7927 = vmatmul.mubr.msk.f32.gmra.mrb[130].mxu1 %vm744_vm0, %v609_v18  ;;  %v5935_v46 = vmax.f32 %v5425_v42, %v5681_v43  ;;  %v5809_v30 = vld [vmem:[#allocation2 + $0x411] ss:$2 sm:$0xff] }
 0x148   : > { %v5044_v47 = vmax.f32 %v3662_v56, %v3742_v35  ;;  %v2471_v48 = vpop.f32.mrb[25].mxu0  ;;  %v3751_v31 = vpop.f32.mrb[25].mxu1  ;;  %7545 = vmatprep.mubr.msk.f32.mxu0 %vm744_vm0, %v354_v27  ;;  %7929 = vmatprep.mubr.msk.f32.mxu1 %vm744_vm0, %v610_v28  ;;  %v5999_v51 = vmax.f32 %v5553_v44, %v5809_v30  ;;  %v4919_v6 = vmax.f32 %v9126_v38, %v2477_v0  ;;  %v358_v19 = vld [vmem:[%s8439_s30 + $0x440] sm:$0xff]  ;;  %v359_v36 = vld [vmem:[%s8439_s30 + $0x448] sm:$0xff] }
 0x149   : > { %5173 = vst.msk [vmem:[#allocation2 + $0x30] sm:$0xff] %vm5166_vm2, %v4916_v63  ;;  %v5047_v52 = vmax.f32 %v3677_v29, %v3757_v1  ;;  %v2472_v53 = vadd.f32 %v9011_v24, %v2471_v48  ;;  %6063 = vst.msk [vmem:[%s9114_s25 + $0x8] sm:$0xff] %vm5166_vm2, %v5935_v46  ;;  %v3752_v2 = vadd.f32 %v9011_v24, %v3751_v31  ;;  %v7388_v33 = vpop.f32.mrb[26].mxu0  ;;  %v614_v62 = vld [vmem:[%s8439_s30 + $0xc40] sm:$0xff]  ;;  %v615_v37 = vld [vmem:[%s8439_s30 + $0xc48] sm:$0xff] }
 0x14a   : > { %5301 = vst.msk [vmem:[#allocation2 + $0x430] sm:$0xff] %vm5166_vm2, %v5044_v47  ;;  %v7772_v3 = vpop.f32.mrb[26].mxu1  ;;  %6127 = vst.msk [vmem:[%s9114_s25 + $0x208] sm:$0xff] %vm5166_vm2, %v5999_v51  ;;  %v5427_v4 = vld [vmem:[#allocation2 + $0x20] ss:$2 sm:$0xff]  ;;  %v2487_v9 = vadd.f32 %v7388_v33, %v9011_v24  ;;  %7546 = vmatmul.mubr.msk.f32.gmra.mrb[132].mxu0 %vm744_vm0, %v355_v50  ;;  %v2481_v38 = vpop.f32.mrb[27].mxu0  ;;  %v3697_v20 = vadd.f32 %v8984_v15, %v9011_v24  ;;  %v2412_v21 = vadd.f32 %v9011_v24, %v8986_v16 }
 0x14b   : > { %v5683_v7 = vld [vmem:[#allocation2 + $0x21] ss:$2 sm:$0xff]  ;;  %v5555_v5 = vld [vmem:[#allocation2 + $0x420] ss:$2 sm:$0xff]  ;;  %5176 = vst.msk [vmem:[#allocation2 + $0x48] sm:$0xff] %vm5166_vm2, %v4919_v6  ;;  %5304 = vst.msk [vmem:[#allocation2 + $0x448] sm:$0xff] %vm5166_vm2, %v5047_v52  ;;  %v4918_v8 = vmax.f32 %v9141_v41, %v2472_v53  ;;  %v3767_v10 = vadd.f32 %v7772_v3, %v9011_v24  ;;  %7930 = vmatmul.mubr.msk.f32.gmra.mrb[132].mxu1 %vm744_vm0, %v611_v32  ;;  %v5046_v56 = vmax.f32 %v9145_v34, %v3752_v2 }
 0x14c   : > { %v5936_v54 = vmax.f32 %v5427_v4, %v5683_v7  ;;  %v5811_v55 = vld [vmem:[#allocation2 + $0x421] ss:$2 sm:$0xff]  ;;  %v3761_v12 = vpop.f32.mrb[27].mxu1  ;;  %7548 = vmatprep.mubr.msk.f32.mxu0 %vm744_vm0, %v356_v58  ;;  %7932 = vmatprep.mubr.msk.f32.mxu1 %vm744_vm0, %v612_v59  ;;  %v4921_v14 = vmax.f32 %v9160_v45, %v2487_v9  ;;  %v2482_v18 = vadd.f32 %v9011_v24, %v2481_v38  ;;  %v360_v1 = vld [vmem:[%s8439_s30 + $0x450] sm:$0xff]  ;;  %v617_v2 = vld [vmem:[%s8439_s30 + $0xc58] sm:$0xff] }
 0x14d   : > { %v6000_v40 = vmax.f32 %v5555_v5, %v5811_v55  ;;  %5175 = vst.msk [vmem:[#allocation2 + $0x40] sm:$0xff] %vm5166_vm2, %v4918_v8  ;;  %v5049_v57 = vmax.f32 %v3687_v49, %v3767_v10  ;;  %v3692_v27 = vadd.f32 %v9011_v24, %v8989_v17  ;;  %5303 = vst.msk [vmem:[#allocation2 + $0x440] sm:$0xff] %vm5166_vm2, %v5046_v56  ;;  %v7391_v29 = vpop.f32.mrb[28].mxu0  ;;  %v616_v50 = vld [vmem:[%s8439_s30 + $0xc50] sm:$0xff]  ;;  %v362_v5 = vld [vmem:[%s8439_s30 + $0x460] sm:$0xff] }
 0x14e   : > { %6064 = vst.msk [vmem:[%s9114_s25 + $0x10] sm:$0xff] %vm5166_vm2, %v5936_v54  ;;  %v3762_v28 = vadd.f32 %v9011_v24, %v3761_v12  ;;  %v7775_v41 = vpop.f32.mrb[28].mxu1  ;;  %5178 = vst.msk [vmem:[#allocation2 + $0x58] sm:$0xff] %vm5166_vm2, %v4921_v14  ;;  %v4920_v15 = vmax.f32 %v9175_v60, %v2482_v18  ;;  %v2497_v16 = vadd.f32 %v7391_v29, %v9011_v24  ;;  %v2491_v34 = vpop.f32.mrb[29].mxu0  ;;  %7549 = vmatmul.mubr.msk.f32.gmra.mrb[134].mxu0 %vm744_vm0, %v357_v39  ;;  %v618_v54 = vld [vmem:[%s8439_s30 + $0xc60] sm:$0xff]  ;;  %v363_v14 = vld [vmem:[%s8439_s30 + $0x468] sm:$0xff] }
 0x14f   : > { %6128 = vst.msk [vmem:[%s9114_s25 + $0x210] sm:$0xff] %vm5166_vm2, %v6000_v40  ;;  %5306 = vst.msk [vmem:[#allocation2 + $0x458] sm:$0xff] %vm5166_vm2, %v5049_v57  ;;  %v3777_v17 = vadd.f32 %v7775_v41, %v9011_v24  ;;  %v3771_v35 = vpop.f32.mrb[29].mxu1  ;;  %7933 = vmatmul.mubr.msk.f32.gmra.mrb[134].mxu1 %vm744_vm0, %v613_v13  ;;  %v2492_v63 = vadd.f32 %v9011_v24, %v2491_v34  ;;  %7551 = vmatprep.mubr.msk.f32.mxu0 %vm744_vm0, %v358_v19  ;;  %v619_v57 = vld [vmem:[%s8439_s30 + $0xc68] sm:$0xff] }
 0x150   : > { %v5429_v42 = vld [vmem:[#allocation2 + $0x30] ss:$2 sm:$0xff]  ;;  %v5685_v43 = vld [vmem:[#allocation2 + $0x31] ss:$2 sm:$0xff]  ;;  %v5048_v44 = vmax.f32 %v9179_v61, %v3762_v28  ;;  %v3772_v0 = vadd.f32 %v9011_v24, %v3771_v35  ;;  %7935 = vmatprep.mubr.msk.f32.mxu1 %vm744_vm0, %v614_v62  ;;  %v2427_v45 = vadd.f32 %v9000_v22, %v9011_v24  ;;  %5177 = vst.msk [vmem:[#allocation2 + $0x50] sm:$0xff] %vm5166_vm2, %v4920_v15 }
 0x151   : > { %v5937_v46 = vmax.f32 %v5429_v42, %v5685_v43  ;;  %v5557_v30 = vld [vmem:[#allocation2 + $0x430] ss:$2 sm:$0xff]  ;;  %v5813_v47 = vld [vmem:[#allocation2 + $0x431] ss:$2 sm:$0xff]  ;;  %v4923_v48 = vmax.f32 %v9196_v11, %v2497_v16  ;;  %v5051_v31 = vmax.f32 %v3697_v20, %v3777_v17  ;;  %v3707_v32 = vadd.f32 %v9002_v23, %v9011_v24  ;;  %v7394_v52 = vpop.f32.mrb[30].mxu0 }
 0x152   : > { %v6001_v51 = vmax.f32 %v5557_v30, %v5813_v47  ;;  %5305 = vst.msk [vmem:[#allocation2 + $0x450] sm:$0xff] %vm5166_vm2, %v5048_v44  ;;  %v4922_v6 = vmax.f32 %v2412_v21, %v2492_v63  ;;  %v5050_v22 = vmax.f32 %v3692_v27, %v3772_v0  ;;  %v7778_v53 = vpop.f32.mrb[30].mxu1  ;;  %v2422_v58 = vadd.f32 %v9011_v24, %v9013_v25  ;;  %v2501_v49 = vpop.f32.mrb[31].mxu0  ;;  %v361_v61 = vld [vmem:[%s8439_s30 + $0x458] sm:$0xff]  ;;  %v364_v62 = vld [vmem:[%s8439_s30 + $0x470] sm:$0xff]  ;;  %v366_v0 = vld [vmem:[%s8439_s30 + $0x480] sm:$0xff] }
 0x153   : > { %6065 = vst.msk [vmem:[%s9114_s25 + $0x18] sm:$0xff] %vm5166_vm2, %v5937_v46  ;;  %5180 = vst.msk [vmem:[#allocation2 + $0x68] sm:$0xff] %vm5166_vm2, %v4923_v48  ;;  %v2507_v23 = vadd.f32 %v7394_v52, %v9011_v24  ;;  %v3787_v59 = vadd.f32 %v7778_v53, %v9011_v24  ;;  %7552 = vmatmul.mubr.msk.f32.gmra.mrb[136].mxu0 %vm744_vm0, %v359_v36  ;;  %v3781_v60 = vpop.f32.mrb[31].mxu1  ;;  %7936 = vmatmul.mubr.msk.f32.gmra.mrb[136].mxu1 %vm744_vm0, %v615_v37  ;;  %v620_v28 = vld [vmem:[%s8439_s30 + $0xc70] sm:$0xff]  ;;  %v365_v43 = vld [vmem:[%s8439_s30 + $0x478] sm:$0xff] }
 0x154   : > { %5308 = vst.msk [vmem:[#allocation2 + $0x468] sm:$0xff] %vm5166_vm2, %v5051_v31  ;;  %v3702_v25 = vadd.f32 %v9011_v24, %v9016_v26  ;;  %6129 = vst.msk [vmem:[%s9114_s25 + $0x218] sm:$0xff] %vm5166_vm2, %v6001_v51  ;;  %v5431_v33 = vld [vmem:[#allocation2 + $0x40] ss:$2 sm:$0xff]  ;;  %v5687_v3 = vld [vmem:[#allocation2 + $0x41] ss:$2 sm:$0xff]  ;;  %v2502_v4 = vadd.f32 %v9011_v24, %v2501_v49  ;;  %v3782_v7 = vadd.f32 %v9011_v24, %v3781_v60  ;;  %7554 = vmatprep.mubr.msk.f32.mxu0 %vm744_vm0, %v360_v1 }
 0x155   : > { %5179 = vst.msk [vmem:[#allocation2 + $0x60] sm:$0xff] %vm5166_vm2, %v4922_v6  ;;  %5307 = vst.msk [vmem:[#allocation2 + $0x460] sm:$0xff] %vm5166_vm2, %v5050_v22  ;;  %7938 = vmatprep.mubr.msk.f32.mxu1 %vm744_vm0, %v616_v50  ;;  %v5938_v26 = vmax.f32 %v5431_v33, %v5687_v3  ;;  %v5559_v8 = vld [vmem:[#allocation2 + $0x440] ss:$2 sm:$0xff]  ;;  %v5815_v9 = vld [vmem:[#allocation2 + $0x441] ss:$2 sm:$0xff]  ;;  %v4925_v10 = vmax.f32 %v2427_v45, %v2507_v23  ;;  %v5053_v11 = vmax.f32 %v3707_v32, %v3787_v59 }
 0x156   : > { %v6002_v55 = vmax.f32 %v5559_v8, %v5815_v9  ;;  %v4924_v56 = vmax.f32 %v2422_v58, %v2502_v4  ;;  %v5052_v38 = vmax.f32 %v3702_v25, %v3782_v7  ;;  %v9267_v12 = vpop.f32.mrb[32].mxu0  ;;  %v9269_v39 = vpop.f32.mrb[32].mxu1  ;;  %v621_v44 = vld [vmem:[%s8439_s30 + $0xc78] sm:$0xff]  ;;  %v622_v1 = vld [vmem:[%s8439_s30 + $0xc80] sm:$0xff]  ;;  %v367_v6 = vld [vmem:[%s8439_s30 + $0x488] sm:$0xff] }
 0x157   : > { %6066 = vst.msk [vmem:[%s9114_s25 + $0x20] sm:$0xff] %vm5166_vm2, %v5938_v26  ;;  %5182 = vst.msk [vmem:[#allocation2 + $0x78] sm:$0xff] %vm5166_vm2, %v4925_v10  ;;  %v9275_v13 = vpop.f32.mrb[33].mxu0  ;;  %7555 = vmatmul.mubr.msk.f32.gmra.mrb[138].mxu0 %vm744_vm0, %v361_v61  ;;  %v9278_v40 = vpop.f32.mrb[33].mxu1  ;;  %7939 = vmatmul.mubr.msk.f32.gmra.mrb[138].mxu1 %vm744_vm0, %v617_v2  ;;  %v5433_v18 = vld [vmem:[#allocation2 + $0x50] ss:$2 sm:$0xff] }
 0x158   : > { %5310 = vst.msk [vmem:[#allocation2 + $0x478] sm:$0xff] %vm5166_vm2, %v5053_v11  ;;  %6130 = vst.msk [vmem:[%s9114_s25 + $0x220] sm:$0xff] %vm5166_vm2, %v6002_v55  ;;  %v5689_v19 = vld [vmem:[#allocation2 + $0x51] ss:$2 sm:$0xff]  ;;  %7557 = vmatprep.mubr.msk.f32.mxu0 %vm744_vm0, %v362_v5  ;;  %7941 = vmatprep.mubr.msk.f32.mxu1 %vm744_vm0, %v618_v54  ;;  %v623_v22 = vld [vmem:[%s8439_s30 + $0xc88] sm:$0xff] }
 0x159   : > { %5181 = vst.msk [vmem:[#allocation2 + $0x70] sm:$0xff] %vm5166_vm2, %v4924_v56  ;;  %5309 = vst.msk [vmem:[#allocation2 + $0x470] sm:$0xff] %vm5166_vm2, %v5052_v38  ;;  %v5939_v20 = vmax.f32 %v5433_v18, %v5689_v19  ;;  %v5561_v21 = vld [vmem:[#allocation2 + $0x450] ss:$2 sm:$0xff]  ;;  %v5817_v27 = vld [vmem:[#allocation2 + $0x451] ss:$2 sm:$0xff] }
 0x15a   : > { %v6003_v29 = vmax.f32 %v5561_v21, %v5817_v27  ;;  %v9291_v41 = vpop.f32.mrb[34].mxu0  ;;  %v9293_v15 = vpop.f32.mrb[34].mxu1  ;;  %v368_v53 = vld [vmem:[%s8439_s30 + $0x490] sm:$0xff]  ;;  %v369_v61 = vld [vmem:[%s8439_s30 + $0x498] sm:$0xff]  ;;  %v370_v25 = vld [vmem:[%s8439_s30 + $0x4a0] sm:$0xff] }
 0x15b   : > { %6067 = vst.msk [vmem:[%s9114_s25 + $0x28] sm:$0xff] %vm5166_vm2, %v5939_v20  ;;  %7558 = vmatmul.mubr.msk.f32.gmra.mrb[140].mxu0 %vm744_vm0, %v363_v14  ;;  %7942 = vmatmul.mubr.msk.f32.gmra.mrb[140].mxu1 %vm744_vm0, %v619_v57  ;;  %v9301_v37 = vpop.f32.mrb[35].mxu0  ;;  %v9303_v42 = vpop.f32.mrb[35].mxu1  ;;  %v624_v58 = vld [vmem:[%s8439_s30 + $0xc90] sm:$0xff]  ;;  %v625_v2 = vld [vmem:[%s8439_s30 + $0xc98] sm:$0xff]  ;;  %v626_v33 = vld [vmem:[%s8439_s30 + $0xca0] sm:$0xff] }
 0x15c   : > { %v5435_v16 = vld [vmem:[#allocation2 + $0x60] ss:$2 sm:$0xff]  ;;  %v5691_v17 = vld [vmem:[#allocation2 + $0x61] ss:$2 sm:$0xff]  ;;  %6131 = vst.msk [vmem:[%s9114_s25 + $0x228] sm:$0xff] %vm5166_vm2, %v6003_v29  ;;  %7560 = vmatprep.mubr.msk.f32.mxu0 %vm744_vm0, %v364_v62  ;;  %7944 = vmatprep.mubr.msk.f32.mxu1 %vm744_vm0, %v620_v28  ;;  %v372_v9 = vld [vmem:[%s8439_s30 + $0x4b0] sm:$0xff] }
 0x15d   : > { %v5563_v34 = vld [vmem:[#allocation2 + $0x460] ss:$2 sm:$0xff]  ;;  %v5940_v35 = vmax.f32 %v5435_v16, %v5691_v17  ;;  %v5819_v36 = vld [vmem:[#allocation2 + $0x461] ss:$2 sm:$0xff]  ;;  %v9313_v45 = vpop.f32.mrb[36].mxu0  ;;  %v628_v10 = vld [vmem:[%s8439_s30 + $0xcb0] sm:$0xff] }
 0x15e   : > { %v6004_v63 = vmax.f32 %v5563_v34, %v5819_v36  ;;  %v9315_v46 = vpop.f32.mrb[36].mxu1  ;;  %v9321_v32 = vpop.f32.mrb[37].mxu0  ;;  %v371_v26 = vld [vmem:[%s8439_s30 + $0x4a8] sm:$0xff]  ;;  %v373_v38 = vld [vmem:[%s8439_s30 + $0x4b8] sm:$0xff]  ;;  %v374_v57 = vld [vmem:[%s8439_s30 + $0x4c0] sm:$0xff] }
 0x15f   : > { %6068 = vst.msk [vmem:[%s9114_s25 + $0x30] sm:$0xff] %vm5166_vm2, %v5940_v35  ;;  %7561 = vmatmul.mubr.msk.f32.gmra.mrb[142].mxu0 %vm744_vm0, %v365_v43  ;;  %7945 = vmatmul.mubr.msk.f32.gmra.mrb[142].mxu1 %vm744_vm0, %v621_v44  ;;  %v9323_v51 = vpop.f32.mrb[37].mxu1  ;;  %v627_v8 = vld [vmem:[%s8439_s30 + $0xca8] sm:$0xff]  ;;  %v629_v14 = vld [vmem:[%s8439_s30 + $0xcb8] sm:$0xff]  ;;  %v630_v18 = vld [vmem:[%s8439_s30 + $0xcc0] sm:$0xff] }
 0x160   : > { %6132 = vst.msk [vmem:[%s9114_s25 + $0x230] sm:$0xff] %vm5166_vm2, %v6004_v63  ;;  %v5437_v30 = vld [vmem:[#allocation2 + $0x70] ss:$2 sm:$0xff]  ;;  %v5693_v47 = vld [vmem:[#allocation2 + $0x71] ss:$2 sm:$0xff]  ;;  %7563 = vmatprep.mubr.msk.f32.mxu0 %vm744_vm0, %v366_v0  ;;  %7947 = vmatprep.mubr.msk.f32.mxu1 %vm744_vm0, %v622_v1  ;;  %v375_v27 = vld [vmem:[%s8439_s30 + $0x4c8] sm:$0xff]  ;;  %v2517_v1 = vadd.f32 %v9267_v12, %v9011_v24 }
 0x161   : > { %v5565_v48 = vld [vmem:[#allocation2 + $0x470] ss:$2 sm:$0xff]  ;;  %v5941_v31 = vmax.f32 %v5437_v30, %v5693_v47  ;;  %v5821_v50 = vld [vmem:[#allocation2 + $0x471] ss:$2 sm:$0xff]  ;;  %v9333_v23 = vpop.f32.mrb[38].mxu0  ;;  %v631_v28 = vld [vmem:[%s8439_s30 + $0xcc8] sm:$0xff]  ;;  %v3797_v30 = vadd.f32 %v9269_v39, %v9011_v24  ;;  %v3792_v39 = vadd.f32 %v9011_v24, %v9278_v40  ;;  %v3807_v40 = vadd.f32 %v9293_v15, %v9011_v24 }
 0x162   : > { %v6005_v52 = vmax.f32 %v5565_v48, %v5821_v50  ;;  %v9335_v59 = vpop.f32.mrb[38].mxu1  ;;  %v9339_v49 = vpop.f32.mrb[39].mxu0  ;;  %v376_v29 = vld [vmem:[%s8439_s30 + $0x4d0] sm:$0xff]  ;;  %v377_v43 = vld [vmem:[%s8439_s30 + $0x4d8] sm:$0xff]  ;;  %v378_v63 = vld [vmem:[%s8439_s30 + $0x4e0] sm:$0xff] }
 0x163   : > { %6069 = vst.msk [vmem:[%s9114_s25 + $0x38] sm:$0xff] %vm5166_vm2, %v5941_v31  ;;  %7564 = vmatmul.mubr.msk.f32.gmra.mrb[144].mxu0 %vm744_vm0, %v367_v6  ;;  %v9342_v60 = vpop.f32.mrb[39].mxu1  ;;  %7948 = vmatmul.mubr.msk.f32.gmra.mrb[144].mxu1 %vm744_vm0, %v623_v22  ;;  %v632_v16 = vld [vmem:[%s8439_s30 + $0xcd0] sm:$0xff]  ;;  %v633_v44 = vld [vmem:[%s8439_s30 + $0xcd8] sm:$0xff]  ;;  %v634_v0 = vld [vmem:[%s8439_s30 + $0xce0] sm:$0xff]  ;;  %v2512_v31 = vadd.f32 %v9011_v24, %v9275_v13 }
 0x164   : > { %6133 = vst.msk [vmem:[%s9114_s25 + $0x238] sm:$0xff] %vm5166_vm2, %v6005_v52  ;;  %7566 = vmatprep.mubr.msk.f32.mxu0 %vm744_vm0, %v368_v53  ;;  %7950 = vmatprep.mubr.msk.f32.mxu1 %vm744_vm0, %v624_v58  ;;  %v379_v13 = vld [vmem:[%s8439_s30 + $0x4e8] sm:$0xff] }
 0x165   : > { %v9351_v3 = vpop.f32.mrb[40].mxu0  ;;  %v635_v58 = vld [vmem:[%s8439_s30 + $0xce8] sm:$0xff] }
 0x166   : > { %v9353_v4 = vpop.f32.mrb[40].mxu1  ;;  %v9355_v7 = vpop.f32.mrb[41].mxu0 }
 0x167   : > { %7567 = vmatmul.mubr.msk.f32.gmra.mrb[146].mxu0 %vm744_vm0, %v369_v61  ;;  %v9358_v5 = vpop.f32.mrb[41].mxu1  ;;  %7951 = vmatmul.mubr.msk.f32.gmra.mrb[146].mxu1 %vm744_vm0, %v625_v2 }
 0x168   : > { %7569 = vmatprep.mubr.msk.f32.mxu0 %vm744_vm0, %v370_v25  ;;  %7953 = vmatprep.mubr.msk.f32.mxu1 %vm744_vm0, %v626_v33  ;;  %v380_v25 = vld [vmem:[%s8439_s30 + $0x4f0] sm:$0xff] }
 0x169   : > { %v9367_v11 = vpop.f32.mrb[42].mxu0  ;;  %v636_v33 = vld [vmem:[%s8439_s30 + $0xcf0] sm:$0xff] }
 0x16a   : > { %v9369_v54 = vpop.f32.mrb[42].mxu1  ;;  %v9371_v55 = vpop.f32.mrb[43].mxu0 }
 0x16b   : > { %7570 = vmatmul.mubr.msk.f32.gmra.mrb[148].mxu0 %vm744_vm0, %v371_v26  ;;  %v9374_v56 = vpop.f32.mrb[43].mxu1  ;;  %7954 = vmatmul.mubr.msk.f32.gmra.mrb[148].mxu1 %vm744_vm0, %v627_v8  ;;  %v2527_v26 = vadd.f32 %v9291_v41, %v9011_v24 }
 0x16c   : > { %7572 = vmatprep.mubr.msk.f32.mxu0 %vm744_vm0, %v372_v9  ;;  %7956 = vmatprep.mubr.msk.f32.mxu1 %vm744_vm0, %v628_v10 }
 0x16d   : > { %v9383_v19 = vpop.f32.mrb[44].mxu0 }
 0x16e   : > { %v9385_v62 = vpop.f32.mrb[44].mxu1  ;;  %v9387_v20 = vpop.f32.mrb[45].mxu0 }
 0x16f   : > { %7573 = vmatmul.mubr.msk.f32.gmra.mrb[150].mxu0 %vm744_vm0, %v373_v38  ;;  %v9390_v21 = vpop.f32.mrb[45].mxu1  ;;  %7957 = vmatmul.mubr.msk.f32.gmra.mrb[150].mxu1 %vm744_vm0, %v629_v14  ;;  %v2522_v14 = vadd.f32 %v9011_v24, %v9301_v37  ;;  %v3802_v37 = vadd.f32 %v9011_v24, %v9303_v42  ;;  %v2537_v42 = vadd.f32 %v9313_v45, %v9011_v24 }
 0x170   : > { %7575 = vmatprep.mubr.msk.f32.mxu0 %vm744_vm0, %v374_v57  ;;  %7959 = vmatprep.mubr.msk.f32.mxu1 %vm744_vm0, %v630_v18 }
 0x171   : > { %v9399_v17 = vpop.f32.mrb[46].mxu0 }
 0x172   : > { %v9401_v34 = vpop.f32.mrb[46].mxu1  ;;  %v9403_v35 = vpop.f32.mrb[47].mxu0 }
 0x173   : > { %7576 = vmatmul.mubr.msk.f32.gmra.mrb[152].mxu0 %vm744_vm0, %v375_v27  ;;  %v9406_v36 = vpop.f32.mrb[47].mxu1  ;;  %7960 = vmatmul.mubr.msk.f32.gmra.mrb[152].mxu1 %vm744_vm0, %v631_v28 }
 0x174   : > { %7578 = vmatprep.mubr.msk.f32.mxu0 %vm744_vm0, %v376_v29  ;;  %7962 = vmatprep.mubr.msk.f32.mxu1 %vm744_vm0, %v632_v16  ;;  %v381_v29 = vld [vmem:[%s8439_s30 + $0x4f8] sm:$0xff] }
 0x175   : > { %v7421_v47 = vpop.f32.mrb[48].mxu0  ;;  %v637_v16 = vld [vmem:[%s8439_s30 + $0xcf8] sm:$0xff] }
 0x176   : > { %v7805_v48 = vpop.f32.mrb[48].mxu1  ;;  %v2597_v50 = vadd.f32 %v7421_v47, %v9011_v24  ;;  %v2591_v22 = vpop.f32.mrb[49].mxu0 }
 0x177   : > { %v3877_v6 = vadd.f32 %v7805_v48, %v9011_v24  ;;  %7579 = vmatmul.mubr.msk.f32.gmra.mrb[154].mxu0 %vm744_vm0, %v377_v43  ;;  %v3871_v12 = vpop.f32.mrb[49].mxu1  ;;  %7963 = vmatmul.mubr.msk.f32.gmra.mrb[154].mxu1 %vm744_vm0, %v633_v44  ;;  %v2592_v52 = vadd.f32 %v9011_v24, %v2591_v22 }
 0x178   : > { %v3872_v53 = vadd.f32 %v9011_v24, %v3871_v12  ;;  %7581 = vmatprep.mubr.msk.f32.mxu0 %vm744_vm0, %v378_v63  ;;  %7965 = vmatprep.mubr.msk.f32.mxu1 %vm744_vm0, %v634_v0  ;;  %v4927_v61 = vmax.f32 %v2517_v1, %v2597_v50  ;;  %v382_v63 = vld [vmem:[%s8439_s30 + $0x500] sm:$0xff]  ;;  %v3817_v1 = vadd.f32 %v9315_v46, %v9011_v24 }
 0x179   : > { %v5055_v2 = vmax.f32 %v3797_v30, %v3877_v6  ;;  %v4926_v8 = vmax.f32 %v2512_v31, %v2592_v52  ;;  %v7424_v10 = vpop.f32.mrb[50].mxu0  ;;  %v638_v0 = vld [vmem:[%s8439_s30 + $0xd00] sm:$0xff]  ;;  %v2532_v50 = vadd.f32 %v9011_v24, %v9321_v32  ;;  %v3812_v32 = vadd.f32 %v9011_v24, %v9323_v51  ;;  %v383_v52 = vld [vmem:[%s8439_s30 + $0x508] sm:$0xff] }
 0x17a   : > { %v5054_v9 = vmax.f32 %v3792_v39, %v3872_v53  ;;  %v7808_v38 = vpop.f32.mrb[50].mxu1  ;;  %5184 = vst.msk [vmem:[#allocation2 + $0x88] sm:$0xff] %vm5166_vm2, %v4927_v61  ;;  %v2607_v57 = vadd.f32 %v7424_v10, %v9011_v24  ;;  %v2601_v18 = vpop.f32.mrb[51].mxu0  ;;  %v639_v53 = vld [vmem:[%s8439_s30 + $0xd08] sm:$0xff]  ;;  %v384_v61 = vld [vmem:[%s8439_s30 + $0x510] sm:$0xff]  ;;  %v2547_v51 = vadd.f32 %v9333_v23, %v9011_v24 }
 0x17b   : > { %5312 = vst.msk [vmem:[#allocation2 + $0x488] sm:$0xff] %vm5166_vm2, %v5055_v2  ;;  %v3887_v41 = vadd.f32 %v7808_v38, %v9011_v24  ;;  %7582 = vmatmul.mubr.msk.f32.gmra.mrb[156].mxu0 %vm744_vm0, %v379_v13  ;;  %v3881_v15 = vpop.f32.mrb[51].mxu1  ;;  %7966 = vmatmul.mubr.msk.f32.gmra.mrb[156].mxu1 %vm744_vm0, %v635_v58  ;;  %5183 = vst.msk [vmem:[#allocation2 + $0x80] sm:$0xff] %vm5166_vm2, %v4926_v8  ;;  %v2602_v27 = vadd.f32 %v9011_v24, %v2601_v18  ;;  %v640_v2 = vld [vmem:[%s8439_s30 + $0xd10] sm:$0xff] }
 0x17c   : > { %5311 = vst.msk [vmem:[#allocation2 + $0x480] sm:$0xff] %vm5166_vm2, %v5054_v9  ;;  %v3882_v28 = vadd.f32 %v9011_v24, %v3881_v15  ;;  %7584 = vmatprep.mubr.msk.f32.mxu0 %vm744_vm0, %v380_v25  ;;  %7968 = vmatprep.mubr.msk.f32.mxu1 %vm744_vm0, %v636_v33  ;;  %v4929_v43 = vmax.f32 %v2527_v26, %v2607_v57 }
 0x17d   : > { %v5057_v44 = vmax.f32 %v3807_v40, %v3887_v41  ;;  %v4928_v30 = vmax.f32 %v2522_v14, %v2602_v27  ;;  %v7427_v48 = vpop.f32.mrb[52].mxu0  ;;  %v3827_v25 = vadd.f32 %v9335_v59, %v9011_v24  ;;  %v2542_v9 = vadd.f32 %v9011_v24, %v9339_v49  ;;  %v641_v27 = vld [vmem:[%s8439_s30 + $0xd18] sm:$0xff] }
 0x17e   : > { %v5056_v47 = vmax.f32 %v3802_v37, %v3882_v28  ;;  %v7811_v31 = vpop.f32.mrb[52].mxu1  ;;  %5186 = vst.msk [vmem:[#allocation2 + $0x98] sm:$0xff] %vm5166_vm2, %v4929_v43  ;;  %v2617_v6 = vadd.f32 %v7427_v48, %v9011_v24  ;;  %v2611_v22 = vpop.f32.mrb[53].mxu0  ;;  %v3822_v49 = vadd.f32 %v9011_v24, %v9342_v60  ;;  %v9499_v57 = vadd.f32 %v9351_v3, %v9011_v24  ;;  %v385_v60 = vld [vmem:[%s8439_s30 + $0x518] sm:$0xff]  ;;  %v386_v43 = vld [vmem:[%s8439_s30 + $0x520] sm:$0xff] }
 0x17f   : > { %5314 = vst.msk [vmem:[#allocation2 + $0x498] sm:$0xff] %vm5166_vm2, %v5057_v44  ;;  %v3897_v45 = vadd.f32 %v7811_v31, %v9011_v24  ;;  %7585 = vmatmul.mubr.msk.f32.gmra.mrb[158].mxu0 %vm744_vm0, %v381_v29  ;;  %v3891_v46 = vpop.f32.mrb[53].mxu1  ;;  %7969 = vmatmul.mubr.msk.f32.gmra.mrb[158].mxu1 %vm744_vm0, %v637_v16  ;;  %5185 = vst.msk [vmem:[#allocation2 + $0x90] sm:$0xff] %vm5166_vm2, %v4928_v30  ;;  %v2612_v12 = vadd.f32 %v9011_v24, %v2611_v22  ;;  %v9510_v29 = vld [vmem:[%s11428_s2] ss:$0 sm:$0xff]  ;;  %v642_v44 = vld [vmem:[%s8439_s30 + $0xd20] sm:$0xff] }
 0x180   : > { %5313 = vst.msk [vmem:[#allocation2 + $0x490] sm:$0xff] %vm5166_vm2, %v5056_v47  ;;  %v3892_v39 = vadd.f32 %v9011_v24, %v3891_v46  ;;  %7587 = vmatprep.mubr.msk.f32.mxu0 %vm744_vm0, %v382_v63  ;;  %7971 = vmatprep.mubr.msk.f32.mxu1 %vm744_vm0, %v638_v0  ;;  %v4931_v13 = vmax.f32 %v2537_v42, %v2617_v6 }
 0x181   : > { %v5059_v58 = vmax.f32 %v3817_v1, %v3897_v45  ;;  %v4930_v33 = vmax.f32 %v2532_v50, %v2612_v12  ;;  %v7430_v40 = vpop.f32.mrb[54].mxu0  ;;  %v3837_v63 = vadd.f32 %v9510_v29, %v9353_v4  ;;  %v9519_v0 = vadd.f32 %v9510_v29, %v9355_v7 }
 0x182   : > { %v5058_v26 = vmax.f32 %v3812_v32, %v3892_v39  ;;  %v7814_v8 = vpop.f32.mrb[54].mxu1  ;;  %v5439_v10 = vld [vmem:[#allocation2 + $0x80] ss:$2 sm:$0xff]  ;;  %v5695_v38 = vld [vmem:[#allocation2 + $0x81] ss:$2 sm:$0xff]  ;;  %5188 = vst.msk [vmem:[#allocation2 + $0xa8] sm:$0xff] %vm5166_vm2, %v4931_v13  ;;  %v2627_v23 = vadd.f32 %v7430_v40, %v9011_v24  ;;  %v9523_v42 = vadd.f32 %v9510_v29, %v9358_v5  ;;  %v9538_v6 = vadd.f32 %v9510_v29, %v9367_v11 }
 0x183   : > { %v5567_v14 = vld [vmem:[#allocation2 + $0x480] ss:$2 sm:$0xff]  ;;  %5316 = vst.msk [vmem:[#allocation2 + $0x4a8] sm:$0xff] %vm5166_vm2, %v5059_v58  ;;  %v3907_v59 = vadd.f32 %v7814_v8, %v9011_v24  ;;  %7588 = vmatmul.mubr.msk.f32.gmra.mrb[160].mxu0 %vm744_vm0, %v383_v52  ;;  %7972 = vmatmul.mubr.msk.f32.gmra.mrb[160].mxu1 %vm744_vm0, %v639_v53  ;;  %v5942_v41 = vmax.f32 %v5439_v10, %v5695_v38  ;;  %v5823_v18 = vld [vmem:[#allocation2 + $0x481] ss:$2 sm:$0xff]  ;;  %5187 = vst.msk [vmem:[#allocation2 + $0xa0] sm:$0xff] %vm5166_vm2, %v4930_v33 }
 0x184   : > { %5315 = vst.msk [vmem:[#allocation2 + $0x4a0] sm:$0xff] %vm5166_vm2, %v5058_v26  ;;  %v2621_v15 = vpop.f32.mrb[55].mxu0  ;;  %v3901_v37 = vpop.f32.mrb[55].mxu1  ;;  %7590 = vmatprep.mubr.msk.f32.mxu0 %vm744_vm0, %v384_v61  ;;  %7974 = vmatprep.mubr.msk.f32.mxu1 %vm744_vm0, %v640_v2  ;;  %v6006_v24 = vmax.f32 %v5567_v14, %v5823_v18  ;;  %v4933_v3 = vmax.f32 %v2547_v51, %v2627_v23  ;;  %v387_v39 = vld [vmem:[%s8439_s30 + $0x528] sm:$0xff]  ;;  %v388_v61 = vld [vmem:[%s8439_s30 + $0x530] sm:$0xff]  ;;  %v389_v18 = vld [vmem:[%s8439_s30 + $0x538] sm:$0xff] }
 0x185   : > { %v5061_v28 = vmax.f32 %v3827_v25, %v3907_v59  ;;  %v2622_v16 = vadd.f32 %v9510_v29, %v2621_v15  ;;  %6070 = vst.msk [vmem:[%s9114_s25 + $0x40] sm:$0xff] %vm5166_vm2, %v5942_v41  ;;  %v3902_v1 = vadd.f32 %v9510_v29, %v3901_v37  ;;  %v7433_v30 = vpop.f32.mrb[56].mxu0  ;;  %v643_v52 = vld [vmem:[%s8439_s30 + $0xd28] sm:$0xff]  ;;  %v644_v2 = vld [vmem:[%s8439_s30 + $0xd30] sm:$0xff]  ;;  %v3847_v51 = vadd.f32 %v9510_v29, %v9369_v54  ;;  %v645_v15 = vld [vmem:[%s8439_s30 + $0xd38] sm:$0xff] }
 0x186   : > { %v7817_v47 = vpop.f32.mrb[56].mxu1  ;;  %6134 = vst.msk [vmem:[%s9114_s25 + $0x240] sm:$0xff] %vm5166_vm2, %v6006_v24  ;;  %v5441_v48 = vld [vmem:[#allocation2 + $0x90] ss:$2 sm:$0xff]  ;;  %v5697_v31 = vld [vmem:[#allocation2 + $0x91] ss:$2 sm:$0xff]  ;;  %v2637_v7 = vadd.f32 %v9510_v29, %v7433_v30  ;;  %v9553_v25 = vadd.f32 %v9510_v29, %v9371_v55  ;;  %v9557_v33 = vadd.f32 %v9510_v29, %v9374_v56  ;;  %v9574_v14 = vadd.f32 %v9510_v29, %v9383_v19 }
 0x187   : > { %v5569_v50 = vld [vmem:[#allocation2 + $0x490] ss:$2 sm:$0xff]  ;;  %5190 = vst.msk [vmem:[#allocation2 + $0xb8] sm:$0xff] %vm5166_vm2, %v4933_v3  ;;  %5318 = vst.msk [vmem:[#allocation2 + $0x4b8] sm:$0xff] %vm5166_vm2, %v5061_v28  ;;  %v4932_v4 = vmax.f32 %v2542_v9, %v2622_v16  ;;  %v3917_v5 = vadd.f32 %v9510_v29, %v7817_v47  ;;  %7591 = vmatmul.mubr.msk.f32.gmra.mrb[162].mxu0 %vm744_vm0, %v385_v60  ;;  %7975 = vmatmul.mubr.msk.f32.gmra.mrb[162].mxu1 %vm744_vm0, %v641_v27  ;;  %v5825_v22 = vld [vmem:[#allocation2 + $0x491] ss:$2 sm:$0xff] }
 0x188   : > { %v5943_v45 = vmax.f32 %v5441_v48, %v5697_v31  ;;  %v5060_v46 = vmax.f32 %v3822_v49, %v3902_v1  ;;  %v2631_v32 = vpop.f32.mrb[57].mxu0  ;;  %v3911_v12 = vpop.f32.mrb[57].mxu1  ;;  %7593 = vmatprep.mubr.msk.f32.mxu0 %vm744_vm0, %v386_v43  ;;  %7977 = vmatprep.mubr.msk.f32.mxu1 %vm744_vm0, %v642_v44  ;;  %v6007_v53 = vmax.f32 %v5569_v50, %v5825_v22  ;;  %v390_v24 = vld [vmem:[%s8439_s30 + $0x540] sm:$0xff]  ;;  %v391_v30 = vld [vmem:[%s8439_s30 + $0x548] sm:$0xff] }
 0x189   : > { %5189 = vst.msk [vmem:[#allocation2 + $0xb0] sm:$0xff] %vm5166_vm2, %v4932_v4  ;;  %v4935_v11 = vmax.f32 %v9499_v57, %v2637_v7  ;;  %v5063_v13 = vmax.f32 %v3837_v63, %v3917_v5  ;;  %v2632_v58 = vadd.f32 %v9510_v29, %v2631_v32  ;;  %v3912_v26 = vadd.f32 %v9510_v29, %v3911_v12  ;;  %v7436_v40 = vpop.f32.mrb[58].mxu0  ;;  %v646_v3 = vld [vmem:[%s8439_s30 + $0xd40] sm:$0xff]  ;;  %v647_v47 = vld [vmem:[%s8439_s30 + $0xd48] sm:$0xff]  ;;  %v392_v5 = vld [vmem:[%s8439_s30 + $0x550] sm:$0xff] }
 0x18a   : > { %6071 = vst.msk [vmem:[%s9114_s25 + $0x48] sm:$0xff] %vm5166_vm2, %v5943_v45  ;;  %5317 = vst.msk [vmem:[#allocation2 + $0x4b0] sm:$0xff] %vm5166_vm2, %v5060_v46  ;;  %v7820_v8 = vpop.f32.mrb[58].mxu1  ;;  %v5443_v9 = vld [vmem:[#allocation2 + $0xa0] ss:$2 sm:$0xff]  ;;  %v2647_v56 = vadd.f32 %v9510_v29, %v7436_v40  ;;  %v2641_v57 = vpop.f32.mrb[59].mxu0  ;;  %v3857_v28 = vadd.f32 %v9510_v29, %v9385_v62  ;;  %v2572_v16 = vadd.f32 %v9510_v29, %v9387_v20 }
 0x18b   : > { %6135 = vst.msk [vmem:[%s9114_s25 + $0x248] sm:$0xff] %vm5166_vm2, %v6007_v53  ;;  %v5699_v54 = vld [vmem:[#allocation2 + $0xa1] ss:$2 sm:$0xff]  ;;  %v5571_v10 = vld [vmem:[#allocation2 + $0x4a0] ss:$2 sm:$0xff]  ;;  %5192 = vst.msk [vmem:[#allocation2 + $0xc8] sm:$0xff] %vm5166_vm2, %v4935_v11  ;;  %v4934_v55 = vmax.f32 %v9519_v0, %v2632_v58  ;;  %v3927_v38 = vadd.f32 %v9510_v29, %v7820_v8  ;;  %7594 = vmatmul.mubr.msk.f32.gmra.mrb[164].mxu0 %vm744_vm0, %v387_v39  ;;  %7978 = vmatmul.mubr.msk.f32.gmra.mrb[164].mxu1 %vm744_vm0, %v643_v52 }
 0x18c   : > { %5320 = vst.msk [vmem:[#allocation2 + $0x4c8] sm:$0xff] %vm5166_vm2, %v5063_v13  ;;  %v5944_v23 = vmax.f32 %v5443_v9, %v5699_v54  ;;  %v5827_v59 = vld [vmem:[#allocation2 + $0x4a1] ss:$2 sm:$0xff]  ;;  %v5062_v49 = vmax.f32 %v9523_v42, %v3912_v26  ;;  %v3921_v41 = vpop.f32.mrb[59].mxu1  ;;  %7596 = vmatprep.mubr.msk.f32.mxu0 %vm744_vm0, %v388_v61  ;;  %7980 = vmatprep.mubr.msk.f32.mxu1 %vm744_vm0, %v644_v2  ;;  %v648_v39 = vld [vmem:[%s8439_s30 + $0xd50] sm:$0xff]  ;;  %v649_v26 = vld [vmem:[%s8439_s30 + $0xd58] sm:$0xff] }
 0x18d   : > { %v6008_v37 = vmax.f32 %v5571_v10, %v5827_v59  ;;  %5191 = vst.msk [vmem:[#allocation2 + $0xc0] sm:$0xff] %vm5166_vm2, %v4934_v55  ;;  %v4937_v19 = vmax.f32 %v9538_v6, %v2647_v56  ;;  %v5065_v60 = vmax.f32 %v3847_v51, %v3927_v38  ;;  %v2642_v27 = vadd.f32 %v9510_v29, %v2641_v57  ;;  %v7439_v63 = vpop.f32.mrb[60].mxu0  ;;  %v394_v10 = vld [vmem:[%s8439_s30 + $0x560] sm:$0xff] }
 0x18e   : > { %v3852_v43 = vadd.f32 %v9510_v29, %v9390_v21  ;;  %6072 = vst.msk [vmem:[%s9114_s25 + $0x50] sm:$0xff] %vm5166_vm2, %v5944_v23  ;;  %5319 = vst.msk [vmem:[#allocation2 + $0x4c0] sm:$0xff] %vm5166_vm2, %v5062_v49  ;;  %v3922_v44 = vadd.f32 %v9510_v29, %v3921_v41  ;;  %v7823_v0 = vpop.f32.mrb[60].mxu1  ;;  %v2657_v20 = vadd.f32 %v9510_v29, %v7439_v63  ;;  %v2651_v42 = vpop.f32.mrb[61].mxu0  ;;  %v650_v23 = vld [vmem:[%s8439_s30 + $0xd60] sm:$0xff] }
 0x18f   : > { %6136 = vst.msk [vmem:[%s9114_s25 + $0x250] sm:$0xff] %vm5166_vm2, %v6008_v37  ;;  %5194 = vst.msk [vmem:[#allocation2 + $0xd8] sm:$0xff] %vm5166_vm2, %v4937_v19  ;;  %v4936_v62 = vmax.f32 %v9553_v25, %v2642_v27  ;;  %v3937_v21 = vadd.f32 %v9510_v29, %v7823_v0  ;;  %7597 = vmatmul.mubr.msk.f32.gmra.mrb[166].mxu0 %vm744_vm0, %v389_v18  ;;  %v3931_v1 = vpop.f32.mrb[61].mxu1  ;;  %7981 = vmatmul.mubr.msk.f32.gmra.mrb[166].mxu1 %vm744_vm0, %v645_v15  ;;  %v395_v19 = vld [vmem:[%s8439_s30 + $0x568] sm:$0xff] }
 0x190   : > { %5322 = vst.msk [vmem:[#allocation2 + $0x4d8] sm:$0xff] %vm5166_vm2, %v5065_v60  ;;  %v5445_v48 = vld [vmem:[#allocation2 + $0xb0] ss:$2 sm:$0xff]  ;;  %v5701_v31 = vld [vmem:[#allocation2 + $0xb1] ss:$2 sm:$0xff]  ;;  %v5064_v50 = vmax.f32 %v9557_v33, %v3922_v44  ;;  %v2652_v4 = vadd.f32 %v9510_v29, %v2651_v42  ;;  %v3932_v7 = vadd.f32 %v9510_v29, %v3931_v1  ;;  %7599 = vmatprep.mubr.msk.f32.mxu0 %vm744_vm0, %v390_v24  ;;  %v651_v60 = vld [vmem:[%s8439_s30 + $0xd68] sm:$0xff] }
 0x191   : > { %7983 = vmatprep.mubr.msk.f32.mxu1 %vm744_vm0, %v646_v3  ;;  %v2587_v6 = vadd.f32 %v9510_v29, %v9399_v17  ;;  %v5945_v45 = vmax.f32 %v5445_v48, %v5701_v31  ;;  %v5573_v22 = vld [vmem:[#allocation2 + $0x4b0] ss:$2 sm:$0xff]  ;;  %v5829_v46 = vld [vmem:[#allocation2 + $0x4b1] ss:$2 sm:$0xff]  ;;  %5193 = vst.msk [vmem:[#allocation2 + $0xd0] sm:$0xff] %vm5166_vm2, %v4936_v62  ;;  %v4939_v32 = vmax.f32 %v9574_v14, %v2657_v20  ;;  %v7442_v13 = vpop.f32.mrb[62].mxu0 }
 0x192   : > { %v5067_v12 = vmax.f32 %v3857_v28, %v3937_v21  ;;  %v3867_v52 = vadd.f32 %v9510_v29, %v9401_v34  ;;  %v6009_v53 = vmax.f32 %v5573_v22, %v5829_v46  ;;  %5321 = vst.msk [vmem:[#allocation2 + $0x4d0] sm:$0xff] %vm5166_vm2, %v5064_v50  ;;  %v4938_v11 = vmax.f32 %v2572_v16, %v2652_v4  ;;  %v7826_v58 = vpop.f32.mrb[62].mxu1  ;;  %v2661_v51 = vpop.f32.mrb[63].mxu0  ;;  %v393_v33 = vld [vmem:[%s8439_s30 + $0x558] sm:$0xff]  ;;  %v396_v3 = vld [vmem:[%s8439_s30 + $0x570] sm:$0xff] }
 0x193   : > { %v5066_v17 = vmax.f32 %v3852_v43, %v3932_v7  ;;  %v2582_v61 = vadd.f32 %v9510_v29, %v9403_v35  ;;  %6073 = vst.msk [vmem:[%s9114_s25 + $0x58] sm:$0xff] %vm5166_vm2, %v5945_v45  ;;  %5196 = vst.msk [vmem:[#allocation2 + $0xe8] sm:$0xff] %vm5166_vm2, %v4939_v32  ;;  %v2667_v34 = vadd.f32 %v9510_v29, %v7442_v13  ;;  %7600 = vmatmul.mubr.msk.f32.gmra.mrb[168].mxu0 %vm744_vm0, %v391_v30  ;;  %v3941_v25 = vpop.f32.mrb[63].mxu1  ;;  %v652_v44 = vld [vmem:[%s8439_s30 + $0xd70] sm:$0xff]  ;;  %v397_v31 = vld [vmem:[%s8439_s30 + $0x578] sm:$0xff] }
 0x194   : > { %5324 = vst.msk [vmem:[#allocation2 + $0x4e8] sm:$0xff] %vm5166_vm2, %v5067_v12  ;;  %v3947_v2 = vadd.f32 %v9510_v29, %v7826_v58  ;;  %7984 = vmatmul.mubr.msk.f32.gmra.mrb[168].mxu1 %vm744_vm0, %v647_v47  ;;  %v3862_v35 = vadd.f32 %v9510_v29, %v9406_v36  ;;  %6137 = vst.msk [vmem:[%s9114_s25 + $0x258] sm:$0xff] %vm5166_vm2, %v6009_v53  ;;  %v5447_v40 = vld [vmem:[#allocation2 + $0xc0] ss:$2 sm:$0xff]  ;;  %v5703_v8 = vld [vmem:[#allocation2 + $0xc1] ss:$2 sm:$0xff]  ;;  %v2662_v9 = vadd.f32 %v9510_v29, %v2661_v51 }
 0x195   : > { %5195 = vst.msk [vmem:[#allocation2 + $0xe0] sm:$0xff] %vm5166_vm2, %v4938_v11  ;;  %5323 = vst.msk [vmem:[#allocation2 + $0x4e0] sm:$0xff] %vm5166_vm2, %v5066_v17  ;;  %v3942_v54 = vadd.f32 %v9510_v29, %v3941_v25  ;;  %7602 = vmatprep.mubr.msk.f32.mxu0 %vm744_vm0, %v392_v5  ;;  %7986 = vmatprep.mubr.msk.f32.mxu1 %vm744_vm0, %v648_v39  ;;  %v5946_v36 = vmax.f32 %v5447_v40, %v5703_v8  ;;  %v5575_v55 = vld [vmem:[#allocation2 + $0x4c0] ss:$2 sm:$0xff]  ;;  %v5831_v56 = vld [vmem:[#allocation2 + $0x4c1] ss:$2 sm:$0xff] }
 0x196   : > { %v4941_v38 = vmax.f32 %v2587_v6, %v2667_v34  ;;  %v5069_v14 = vmax.f32 %v3867_v52, %v3947_v2  ;;  %v6010_v59 = vmax.f32 %v5575_v55, %v5831_v56  ;;  %v4940_v49 = vmax.f32 %v2582_v61, %v2662_v9  ;;  %v9645_v41 = vpop.f32.mrb[64].mxu0  ;;  %v9647_v18 = vpop.f32.mrb[64].mxu1  ;;  %v653_v50 = vld [vmem:[%s8439_s30 + $0xd78] sm:$0xff]  ;;  %v398_v7 = vld [vmem:[%s8439_s30 + $0x580] sm:$0xff]  ;;  %v399_v11 = vld [vmem:[%s8439_s30 + $0x588] sm:$0xff] }
 0x197   : > { %v5068_v57 = vmax.f32 %v3862_v35, %v3942_v54  ;;  %6074 = vst.msk [vmem:[%s9114_s25 + $0x60] sm:$0xff] %vm5166_vm2, %v5946_v36  ;;  %v9653_v15 = vpop.f32.mrb[65].mxu0  ;;  %7603 = vmatmul.mubr.msk.f32.gmra.mrb[170].mxu0 %vm744_vm0, %v393_v33  ;;  %v9656_v37 = vpop.f32.mrb[65].mxu1  ;;  %v654_v5 = vld [vmem:[%s8439_s30 + $0xd80] sm:$0xff]  ;;  %v655_v17 = vld [vmem:[%s8439_s30 + $0xd88] sm:$0xff]  ;;  %v400_v58 = vld [vmem:[%s8439_s30 + $0x590] sm:$0xff] }
 0x198   : > { %5198 = vst.msk [vmem:[#allocation2 + $0xf8] sm:$0xff] %vm5166_vm2, %v4941_v38  ;;  %5326 = vst.msk [vmem:[#allocation2 + $0x4f8] sm:$0xff] %vm5166_vm2, %v5069_v14  ;;  %7987 = vmatmul.mubr.msk.f32.gmra.mrb[170].mxu1 %vm744_vm0, %v649_v26  ;;  %v5449_v27 = vld [vmem:[#allocation2 + $0xd0] ss:$2 sm:$0xff]  ;;  %v5705_v24 = vld [vmem:[#allocation2 + $0xd1] ss:$2 sm:$0xff]  ;;  %7605 = vmatprep.mubr.msk.f32.mxu0 %vm744_vm0, %v394_v10 }
 0x199   : > { %6138 = vst.msk [vmem:[%s9114_s25 + $0x260] sm:$0xff] %vm5166_vm2, %v6010_v59  ;;  %5197 = vst.msk [vmem:[#allocation2 + $0xf0] sm:$0xff] %vm5166_vm2, %v4940_v49  ;;  %7989 = vmatprep.mubr.msk.f32.mxu1 %vm744_vm0, %v650_v23  ;;  %v5947_v28 = vmax.f32 %v5449_v27, %v5705_v24  ;;  %v5577_v16 = vld [vmem:[#allocation2 + $0x4d0] ss:$2 sm:$0xff]  ;;  %v5833_v43 = vld [vmem:[#allocation2 + $0x4d1] ss:$2 sm:$0xff] }
 0x19a   : > { %5325 = vst.msk [vmem:[#allocation2 + $0x4f0] sm:$0xff] %vm5166_vm2, %v5068_v57  ;;  %v6011_v63 = vmax.f32 %v5577_v16, %v5833_v43  ;;  %v9669_v0 = vpop.f32.mrb[66].mxu0  ;;  %v9671_v62 = vpop.f32.mrb[66].mxu1  ;;  %v656_v61 = vld [vmem:[%s8439_s30 + $0xd90] sm:$0xff]  ;;  %v401_v33 = vld [vmem:[%s8439_s30 + $0x598] sm:$0xff]  ;;  %v402_v35 = vld [vmem:[%s8439_s30 + $0x5a0] sm:$0xff] }
 0x19b   : > { %6075 = vst.msk [vmem:[%s9114_s25 + $0x68] sm:$0xff] %vm5166_vm2, %v5947_v28  ;;  %7606 = vmatmul.mubr.msk.f32.gmra.mrb[172].mxu0 %vm744_vm0, %v395_v19  ;;  %v9679_v47 = vpop.f32.mrb[67].mxu0  ;;  %v9681_v48 = vpop.f32.mrb[67].mxu1  ;;  %v657_v26 = vld [vmem:[%s8439_s30 + $0xd98] sm:$0xff]  ;;  %v658_v40 = vld [vmem:[%s8439_s30 + $0xda0] sm:$0xff]  ;;  %v403_v36 = vld [vmem:[%s8439_s30 + $0x5a8] sm:$0xff] }
 0x19c   : > { %v5451_v20 = vld [vmem:[#allocation2 + $0xe0] ss:$2 sm:$0xff]  ;;  %v5707_v21 = vld [vmem:[#allocation2 + $0xe1] ss:$2 sm:$0xff]  ;;  %7990 = vmatmul.mubr.msk.f32.gmra.mrb[172].mxu1 %vm744_vm0, %v651_v60  ;;  %6139 = vst.msk [vmem:[%s9114_s25 + $0x268] sm:$0xff] %vm5166_vm2, %v6011_v63  ;;  %7608 = vmatprep.mubr.msk.f32.mxu0 %vm744_vm0, %v396_v3  ;;  %v404_v56 = vld [vmem:[%s8439_s30 + $0x5b0] sm:$0xff] }
 0x19d   : > { %v5579_v42 = vld [vmem:[#allocation2 + $0x4e0] ss:$2 sm:$0xff]  ;;  %v5948_v1 = vmax.f32 %v5451_v20, %v5707_v21  ;;  %v5835_v30 = vld [vmem:[#allocation2 + $0x4e1] ss:$2 sm:$0xff]  ;;  %7992 = vmatprep.mubr.msk.f32.mxu1 %vm744_vm0, %v652_v44  ;;  %v9691_v6 = vpop.f32.mrb[68].mxu0  ;;  %v660_v38 = vld [vmem:[%s8439_s30 + $0xdb0] sm:$0xff] }
 0x19e   : > { %v6012_v4 = vmax.f32 %v5579_v42, %v5835_v30  ;;  %v9693_v45 = vpop.f32.mrb[68].mxu1  ;;  %v9699_v52 = vpop.f32.mrb[69].mxu0  ;;  %v659_v55 = vld [vmem:[%s8439_s30 + $0xda8] sm:$0xff]  ;;  %v405_v57 = vld [vmem:[%s8439_s30 + $0x5b8] sm:$0xff]  ;;  %v406_v60 = vld [vmem:[%s8439_s30 + $0x5c0] sm:$0xff] }
 0x19f   : > { %6076 = vst.msk [vmem:[%s9114_s25 + $0x70] sm:$0xff] %vm5166_vm2, %v5948_v1  ;;  %7609 = vmatmul.mubr.msk.f32.gmra.mrb[174].mxu0 %vm744_vm0, %v397_v31  ;;  %v9701_v53 = vpop.f32.mrb[69].mxu1  ;;  %v661_v19 = vld [vmem:[%s8439_s30 + $0xdb8] sm:$0xff]  ;;  %v662_v27 = vld [vmem:[%s8439_s30 + $0xdc0] sm:$0xff]  ;;  %v407_v43 = vld [vmem:[%s8439_s30 + $0x5c8] sm:$0xff] }
 0x1a0   : > { %6140 = vst.msk [vmem:[%s9114_s25 + $0x270] sm:$0xff] %vm5166_vm2, %v6012_v4  ;;  %v5453_v22 = vld [vmem:[#allocation2 + $0xf0] ss:$2 sm:$0xff]  ;;  %v5709_v46 = vld [vmem:[#allocation2 + $0xf1] ss:$2 sm:$0xff]  ;;  %7993 = vmatmul.mubr.msk.f32.gmra.mrb[174].mxu1 %vm744_vm0, %v653_v50  ;;  %7611 = vmatprep.mubr.msk.f32.mxu0 %vm744_vm0, %v398_v7  ;;  %v663_v44 = vld [vmem:[%s8439_s30 + $0xdc8] sm:$0xff] }
 0x1a1   : > { %v5581_v32 = vld [vmem:[#allocation2 + $0x4f0] ss:$2 sm:$0xff]  ;;  %v5949_v12 = vmax.f32 %v5453_v22, %v5709_v46  ;;  %v5837_v39 = vld [vmem:[#allocation2 + $0x4f1] ss:$2 sm:$0xff]  ;;  %7995 = vmatprep.mubr.msk.f32.mxu1 %vm744_vm0, %v654_v5  ;;  %v9711_v34 = vpop.f32.mrb[70].mxu0  ;;  %v410_v4 = vld [vmem:[%s8439_s30 + $0x5e0] sm:$0xff]  ;;  %v2677_v5 = vadd.f32 %v9510_v29, %v9645_v41  ;;  %v3957_v22 = vadd.f32 %v9510_v29, %v9647_v18  ;;  %v3952_v18 = vadd.f32 %v9510_v29, %v9656_v37 }
 0x1a2   : > { %v6013_v13 = vmax.f32 %v5581_v32, %v5837_v39  ;;  %v9713_v2 = vpop.f32.mrb[70].mxu1  ;;  %v9717_v51 = vpop.f32.mrb[71].mxu0  ;;  %v408_v63 = vld [vmem:[%s8439_s30 + $0x5d0] sm:$0xff]  ;;  %v409_v31 = vld [vmem:[%s8439_s30 + $0x5d8] sm:$0xff]  ;;  %v666_v7 = vld [vmem:[%s8439_s30 + $0xde0] sm:$0xff]  ;;  %v3967_v37 = vadd.f32 %v9510_v29, %v9671_v62 }
 0x1a3   : > { %6077 = vst.msk [vmem:[%s9114_s25 + $0x78] sm:$0xff] %vm5166_vm2, %v5949_v12  ;;  %7612 = vmatmul.mubr.msk.f32.gmra.mrb[176].mxu0 %vm744_vm0, %v399_v11  ;;  %v9720_v25 = vpop.f32.mrb[71].mxu1  ;;  %v664_v20 = vld [vmem:[%s8439_s30 + $0xdd0] sm:$0xff]  ;;  %v665_v50 = vld [vmem:[%s8439_s30 + $0xdd8] sm:$0xff]  ;;  %v2672_v12 = vadd.f32 %v9510_v29, %v9653_v15  ;;  %v411_v15 = vld [vmem:[%s8439_s30 + $0x5e8] sm:$0xff] }
 0x1a4   : > { %6141 = vst.msk [vmem:[%s9114_s25 + $0x278] sm:$0xff] %vm5166_vm2, %v6013_v13  ;;  %7996 = vmatmul.mubr.msk.f32.gmra.mrb[176].mxu1 %vm744_vm0, %v655_v17  ;;  %7614 = vmatprep.mubr.msk.f32.mxu0 %vm744_vm0, %v400_v58 }
 0x1a5   : > { %7998 = vmatprep.mubr.msk.f32.mxu1 %vm744_vm0, %v656_v61  ;;  %v9729_v8 = vpop.f32.mrb[72].mxu0  ;;  %v667_v61 = vld [vmem:[%s8439_s30 + $0xde8] sm:$0xff] }
 0x1a6   : > { %v9731_v9 = vpop.f32.mrb[72].mxu1  ;;  %v9733_v54 = vpop.f32.mrb[73].mxu0 }
 0x1a7   : > { %7615 = vmatmul.mubr.msk.f32.gmra.mrb[178].mxu0 %vm744_vm0, %v401_v33  ;;  %v9736_v10 = vpop.f32.mrb[73].mxu1 }
 0x1a8   : > { %7999 = vmatmul.mubr.msk.f32.gmra.mrb[178].mxu1 %vm744_vm0, %v657_v26  ;;  %7617 = vmatprep.mubr.msk.f32.mxu0 %vm744_vm0, %v402_v35  ;;  %v412_v35 = vld [vmem:[%s8439_s30 + $0x5f0] sm:$0xff] }
 0x1a9   : > { %8001 = vmatprep.mubr.msk.f32.mxu1 %vm744_vm0, %v658_v40  ;;  %v9745_v14 = vpop.f32.mrb[74].mxu0  ;;  %v668_v40 = vld [vmem:[%s8439_s30 + $0xdf0] sm:$0xff] }
 0x1aa   : > { %v9747_v23 = vpop.f32.mrb[74].mxu1  ;;  %v9749_v59 = vpop.f32.mrb[75].mxu0 }
 0x1ab   : > { %7618 = vmatmul.mubr.msk.f32.gmra.mrb[180].mxu0 %vm744_vm0, %v403_v36  ;;  %v9752_v49 = vpop.f32.mrb[75].mxu1  ;;  %v2687_v36 = vadd.f32 %v9510_v29, %v9669_v0 }
 0x1ac   : > { %8002 = vmatmul.mubr.msk.f32.gmra.mrb[180].mxu1 %vm744_vm0, %v659_v55  ;;  %7620 = vmatprep.mubr.msk.f32.mxu0 %vm744_vm0, %v404_v56 }
 0x1ad   : > { %8004 = vmatprep.mubr.msk.f32.mxu1 %vm744_vm0, %v660_v38  ;;  %v9761_v24 = vpop.f32.mrb[76].mxu0 }
 0x1ae   : > { %v9763_v3 = vpop.f32.mrb[76].mxu1  ;;  %v9765_v28 = vpop.f32.mrb[77].mxu0 }
 0x1af   : > { %7621 = vmatmul.mubr.msk.f32.gmra.mrb[182].mxu0 %vm744_vm0, %v405_v57  ;;  %v9768_v16 = vpop.f32.mrb[77].mxu1 }
 0x1b0   : > { %8005 = vmatmul.mubr.msk.f32.gmra.mrb[182].mxu1 %vm744_vm0, %v661_v19  ;;  %7623 = vmatprep.mubr.msk.f32.mxu0 %vm744_vm0, %v406_v60  ;;  %v2682_v19 = vadd.f32 %v9510_v29, %v9679_v47  ;;  %v3962_v47 = vadd.f32 %v9510_v29, %v9681_v48  ;;  %v2697_v48 = vadd.f32 %v9510_v29, %v9691_v6 }
 0x1b1   : > { %8007 = vmatprep.mubr.msk.f32.mxu1 %vm744_vm0, %v662_v27  ;;  %v9777_v21 = vpop.f32.mrb[78].mxu0 }
 0x1b2   : > { %v9779_v42 = vpop.f32.mrb[78].mxu1  ;;  %v9781_v1 = vpop.f32.mrb[79].mxu0 }
 0x1b3   : > { %7624 = vmatmul.mubr.msk.f32.gmra.mrb[184].mxu0 %vm744_vm0, %v407_v43  ;;  %v9784_v30 = vpop.f32.mrb[79].mxu1 }
 0x1b4   : > { %8008 = vmatmul.mubr.msk.f32.gmra.mrb[184].mxu1 %vm744_vm0, %v663_v44  ;;  %7626 = vmatprep.mubr.msk.f32.mxu0 %vm744_vm0, %v408_v63  ;;  %v413_v63 = vld [vmem:[%s8439_s30 + $0x5f8] sm:$0xff] }
 0x1b5   : > { %8010 = vmatprep.mubr.msk.f32.mxu1 %vm744_vm0, %v664_v20  ;;  %v7469_v46 = vpop.f32.mrb[80].mxu0  ;;  %v669_v20 = vld [vmem:[%s8439_s30 + $0xdf8] sm:$0xff] }
 0x1b6   : > { %v7853_v32 = vpop.f32.mrb[80].mxu1  ;;  %v2757_v39 = vadd.f32 %v9510_v29, %v7469_v46  ;;  %v2751_v17 = vpop.f32.mrb[81].mxu0 }
 0x1b7   : > { %v4037_v11 = vadd.f32 %v9510_v29, %v7853_v32  ;;  %7627 = vmatmul.mubr.msk.f32.gmra.mrb[186].mxu0 %vm744_vm0, %v409_v31  ;;  %v4031_v41 = vpop.f32.mrb[81].mxu1  ;;  %v2752_v13 = vadd.f32 %v9510_v29, %v2751_v17 }
 0x1b8   : > { %8011 = vmatmul.mubr.msk.f32.gmra.mrb[186].mxu1 %vm744_vm0, %v665_v50  ;;  %v4032_v58 = vadd.f32 %v9510_v29, %v4031_v41  ;;  %7629 = vmatprep.mubr.msk.f32.mxu0 %vm744_vm0, %v410_v4  ;;  %v4943_v33 = vmax.f32 %v2677_v5, %v2757_v39  ;;  %v414_v4 = vld [vmem:[%s8439_s30 + $0x600] sm:$0xff]  ;;  %v3977_v5 = vadd.f32 %v9510_v29, %v9693_v45 }
 0x1b9   : > { %8013 = vmatprep.mubr.msk.f32.mxu1 %vm744_vm0, %v666_v7  ;;  %v5071_v26 = vmax.f32 %v3957_v22, %v4037_v11  ;;  %v4942_v55 = vmax.f32 %v2672_v12, %v2752_v13  ;;  %v7472_v38 = vpop.f32.mrb[82].mxu0  ;;  %v670_v7 = vld [vmem:[%s8439_s30 + $0xe00] sm:$0xff]  ;;  %v2692_v39 = vadd.f32 %v9510_v29, %v9699_v52  ;;  %v3972_v52 = vadd.f32 %v9510_v29, %v9701_v53  ;;  %v415_v13 = vld [vmem:[%s8439_s30 + $0x608] sm:$0xff] }
 0x1ba   : > { %v5070_v56 = vmax.f32 %v3952_v18, %v4032_v58  ;;  %v7856_v57 = vpop.f32.mrb[82].mxu1  ;;  %5200 = vst.msk [vmem:[#allocation2 + $0x108] sm:$0xff] %vm5166_vm2, %v4943_v33  ;;  %v2767_v60 = vadd.f32 %v9510_v29, %v7472_v38  ;;  %v2761_v27 = vpop.f32.mrb[83].mxu0  ;;  %v671_v58 = vld [vmem:[%s8439_s30 + $0xe08] sm:$0xff]  ;;  %v416_v33 = vld [vmem:[%s8439_s30 + $0x610] sm:$0xff]  ;;  %v2707_v53 = vadd.f32 %v9510_v29, %v9711_v34 }
 0x1bb   : > { %5328 = vst.msk [vmem:[#allocation2 + $0x508] sm:$0xff] %vm5166_vm2, %v5071_v26  ;;  %v4047_v0 = vadd.f32 %v9510_v29, %v7856_v57  ;;  %7630 = vmatmul.mubr.msk.f32.gmra.mrb[188].mxu0 %vm744_vm0, %v411_v15  ;;  %v4041_v62 = vpop.f32.mrb[83].mxu1  ;;  %5199 = vst.msk [vmem:[#allocation2 + $0x100] sm:$0xff] %vm5166_vm2, %v4942_v55  ;;  %v2762_v43 = vadd.f32 %v9510_v29, %v2761_v27  ;;  %v672_v26 = vld [vmem:[%s8439_s30 + $0xe10] sm:$0xff] }
 0x1bc   : > { %8014 = vmatmul.mubr.msk.f32.gmra.mrb[188].mxu1 %vm744_vm0, %v667_v61  ;;  %5327 = vst.msk [vmem:[#allocation2 + $0x500] sm:$0xff] %vm5166_vm2, %v5070_v56  ;;  %v4042_v44 = vadd.f32 %v9510_v29, %v4041_v62  ;;  %7632 = vmatprep.mubr.msk.f32.mxu0 %vm744_vm0, %v412_v35  ;;  %v4945_v31 = vmax.f32 %v2687_v36, %v2767_v60 }
 0x1bd   : > { %8016 = vmatprep.mubr.msk.f32.mxu1 %vm744_vm0, %v668_v40  ;;  %v5073_v50 = vmax.f32 %v3967_v37, %v4047_v0  ;;  %v4944_v22 = vmax.f32 %v2682_v19, %v2762_v43  ;;  %v7475_v32 = vpop.f32.mrb[84].mxu0  ;;  %v3987_v35 = vadd.f32 %v9510_v29, %v9713_v2  ;;  %v2702_v56 = vadd.f32 %v9510_v29, %v9717_v51  ;;  %v673_v43 = vld [vmem:[%s8439_s30 + $0xe18] sm:$0xff] }
 0x1be   : > { %v5072_v46 = vmax.f32 %v3962_v47, %v4042_v44  ;;  %v7859_v12 = vpop.f32.mrb[84].mxu1  ;;  %5202 = vst.msk [vmem:[#allocation2 + $0x118] sm:$0xff] %vm5166_vm2, %v4945_v31  ;;  %v2777_v11 = vadd.f32 %v9510_v29, %v7475_v32  ;;  %v2771_v17 = vpop.f32.mrb[85].mxu0  ;;  %v3982_v51 = vadd.f32 %v9510_v29, %v9720_v25  ;;  %v9877_v60 = vadd.f32 %v9510_v29, %v9729_v8  ;;  %v417_v25 = vld [vmem:[%s8439_s30 + $0x618] sm:$0xff]  ;;  %v418_v31 = vld [vmem:[%s8439_s30 + $0x620] sm:$0xff] }
 0x1bf   : > { %5330 = vst.msk [vmem:[#allocation2 + $0x518] sm:$0xff] %vm5166_vm2, %v5073_v50  ;;  %v4057_v6 = vadd.f32 %v9510_v29, %v7859_v12  ;;  %7633 = vmatmul.mubr.msk.f32.gmra.mrb[190].mxu0 %vm744_vm0, %v413_v63  ;;  %v4051_v45 = vpop.f32.mrb[85].mxu1  ;;  %5201 = vst.msk [vmem:[#allocation2 + $0x110] sm:$0xff] %vm5166_vm2, %v4944_v22  ;;  %v2772_v41 = vadd.f32 %v9510_v29, %v2771_v17  ;;  %v674_v50 = vld [vmem:[%s8439_s30 + $0xe20] sm:$0xff] }
 0x1c0   : > { %8017 = vmatmul.mubr.msk.f32.gmra.mrb[190].mxu1 %vm744_vm0, %v669_v20  ;;  %5329 = vst.msk [vmem:[#allocation2 + $0x510] sm:$0xff] %vm5166_vm2, %v5072_v46  ;;  %v4052_v18 = vadd.f32 %v9510_v29, %v4051_v45  ;;  %7635 = vmatprep.mubr.msk.f32.mxu0 %vm744_vm0, %v414_v4  ;;  %v4947_v15 = vmax.f32 %v2697_v48, %v2777_v11 }
 0x1c1   : > { %8019 = vmatprep.mubr.msk.f32.mxu1 %vm744_vm0, %v670_v7  ;;  %v5075_v61 = vmax.f32 %v3977_v5, %v4057_v6  ;;  %v4946_v40 = vmax.f32 %v2692_v39, %v2772_v41  ;;  %v7478_v37 = vpop.f32.mrb[86].mxu0  ;;  %v3997_v4 = vadd.f32 %v9510_v29, %v9731_v9  ;;  %v9892_v7 = vadd.f32 %v9510_v29, %v9733_v54 }
 0x1c2   : > { %v5074_v36 = vmax.f32 %v3972_v52, %v4052_v18  ;;  %v7862_v55 = vpop.f32.mrb[86].mxu1  ;;  %v5455_v38 = vld [vmem:[#allocation2 + $0x100] ss:$2 sm:$0xff]  ;;  %v5711_v57 = vld [vmem:[#allocation2 + $0x101] ss:$2 sm:$0xff]  ;;  %5204 = vst.msk [vmem:[#allocation2 + $0x128] sm:$0xff] %vm5166_vm2, %v4947_v15  ;;  %v2787_v34 = vadd.f32 %v9510_v29, %v7478_v37  ;;  %v9896_v48 = vadd.f32 %v9510_v29, %v9736_v10  ;;  %v9911_v11 = vadd.f32 %v9510_v29, %v9745_v14 }
 0x1c3   : > { %v5583_v19 = vld [vmem:[#allocation2 + $0x500] ss:$2 sm:$0xff]  ;;  %5332 = vst.msk [vmem:[#allocation2 + $0x528] sm:$0xff] %vm5166_vm2, %v5075_v61  ;;  %v4067_v2 = vadd.f32 %v9510_v29, %v7862_v55  ;;  %7636 = vmatmul.mubr.msk.f32.gmra.mrb[192].mxu0 %vm744_vm0, %v415_v13  ;;  %v5950_v0 = vmax.f32 %v5455_v38, %v5711_v57  ;;  %v5839_v27 = vld [vmem:[#allocation2 + $0x501] ss:$2 sm:$0xff]  ;;  %5203 = vst.msk [vmem:[#allocation2 + $0x120] sm:$0xff] %vm5166_vm2, %v4946_v40  ;;  %v9930_v40 = vadd.f32 %v9510_v29, %v9752_v49 }
 0x1c4   : > { %8020 = vmatmul.mubr.msk.f32.gmra.mrb[192].mxu1 %vm744_vm0, %v671_v58  ;;  %5331 = vst.msk [vmem:[#allocation2 + $0x520] sm:$0xff] %vm5166_vm2, %v5074_v36  ;;  %v2781_v62 = vpop.f32.mrb[87].mxu0  ;;  %v4061_v47 = vpop.f32.mrb[87].mxu1  ;;  %7638 = vmatprep.mubr.msk.f32.mxu0 %vm744_vm0, %v416_v33  ;;  %v6014_v44 = vmax.f32 %v5583_v19, %v5839_v27  ;;  %v4949_v8 = vmax.f32 %v2707_v53, %v2787_v34  ;;  %v419_v18 = vld [vmem:[%s8439_s30 + $0x628] sm:$0xff]  ;;  %v420_v33 = vld [vmem:[%s8439_s30 + $0x630] sm:$0xff]  ;;  %v421_v27 = vld [vmem:[%s8439_s30 + $0x638] sm:$0xff] }
 0x1c5   : > { %8022 = vmatprep.mubr.msk.f32.mxu1 %vm744_vm0, %v672_v26  ;;  %v5077_v63 = vmax.f32 %v3987_v35, %v4067_v2  ;;  %v2782_v20 = vadd.f32 %v9510_v29, %v2781_v62  ;;  %6078 = vst.msk [vmem:[%s9114_s25 + $0x80] sm:$0xff] %vm5166_vm2, %v5950_v0  ;;  %v4062_v5 = vadd.f32 %v9510_v29, %v4061_v47  ;;  %v7481_v22 = vpop.f32.mrb[88].mxu0  ;;  %v675_v13 = vld [vmem:[%s8439_s30 + $0xe28] sm:$0xff]  ;;  %v676_v26 = vld [vmem:[%s8439_s30 + $0xe30] sm:$0xff]  ;;  %v677_v62 = vld [vmem:[%s8439_s30 + $0xe38] sm:$0xff] }
 0x1c6   : > { %v7865_v46 = vpop.f32.mrb[88].mxu1  ;;  %6142 = vst.msk [vmem:[%s9114_s25 + $0x280] sm:$0xff] %vm5166_vm2, %v6014_v44  ;;  %v5457_v32 = vld [vmem:[#allocation2 + $0x110] ss:$2 sm:$0xff]  ;;  %v5713_v12 = vld [vmem:[#allocation2 + $0x111] ss:$2 sm:$0xff]  ;;  %v2797_v54 = vadd.f32 %v9510_v29, %v7481_v22  ;;  %v4007_v53 = vadd.f32 %v9510_v29, %v9747_v23  ;;  %v9926_v35 = vadd.f32 %v9510_v29, %v9749_v59  ;;  %v9947_v19 = vadd.f32 %v9510_v29, %v9761_v24 }
 0x1c7   : > { %v5585_v39 = vld [vmem:[#allocation2 + $0x510] ss:$2 sm:$0xff]  ;;  %5206 = vst.msk [vmem:[#allocation2 + $0x138] sm:$0xff] %vm5166_vm2, %v4949_v8  ;;  %5334 = vst.msk [vmem:[#allocation2 + $0x538] sm:$0xff] %vm5166_vm2, %v5077_v63  ;;  %v4948_v9 = vmax.f32 %v2702_v56, %v2782_v20  ;;  %v4077_v10 = vadd.f32 %v9510_v29, %v7865_v46  ;;  %7639 = vmatmul.mubr.msk.f32.gmra.mrb[194].mxu0 %vm744_vm0, %v417_v25  ;;  %v5951_v6 = vmax.f32 %v5457_v32, %v5713_v12  ;;  %v5841_v17 = vld [vmem:[#allocation2 + $0x511] ss:$2 sm:$0xff] }
 0x1c8   : > { %8023 = vmatmul.mubr.msk.f32.gmra.mrb[194].mxu1 %vm744_vm0, %v673_v43  ;;  %v5076_v45 = vmax.f32 %v3982_v51, %v4062_v5  ;;  %v2791_v52 = vpop.f32.mrb[89].mxu0  ;;  %v4071_v41 = vpop.f32.mrb[89].mxu1  ;;  %7641 = vmatprep.mubr.msk.f32.mxu0 %vm744_vm0, %v418_v31  ;;  %v6015_v58 = vmax.f32 %v5585_v39, %v5841_v17  ;;  %v4951_v14 = vmax.f32 %v9877_v60, %v2797_v54  ;;  %v422_v44 = vld [vmem:[%s8439_s30 + $0x640] sm:$0xff]  ;;  %v423_v22 = vld [vmem:[%s8439_s30 + $0x648] sm:$0xff] }
 0x1c9   : > { %8025 = vmatprep.mubr.msk.f32.mxu1 %vm744_vm0, %v674_v50  ;;  %5205 = vst.msk [vmem:[#allocation2 + $0x130] sm:$0xff] %vm5166_vm2, %v4948_v9  ;;  %v5079_v15 = vmax.f32 %v3997_v4, %v4077_v10  ;;  %v2792_v61 = vadd.f32 %v9510_v29, %v2791_v52  ;;  %6079 = vst.msk [vmem:[%s9114_s25 + $0x88] sm:$0xff] %vm5166_vm2, %v5951_v6  ;;  %v4072_v36 = vadd.f32 %v9510_v29, %v4071_v41  ;;  %v7484_v37 = vpop.f32.mrb[90].mxu0  ;;  %v678_v8 = vld [vmem:[%s8439_s30 + $0xe40] sm:$0xff]  ;;  %v679_v46 = vld [vmem:[%s8439_s30 + $0xe48] sm:$0xff] }
 0x1ca   : > { %5333 = vst.msk [vmem:[#allocation2 + $0x530] sm:$0xff] %vm5166_vm2, %v5076_v45  ;;  %v7868_v55 = vpop.f32.mrb[90].mxu1  ;;  %6143 = vst.msk [vmem:[%s9114_s25 + $0x288] sm:$0xff] %vm5166_vm2, %v6015_v58  ;;  %v5459_v56 = vld [vmem:[#allocation2 + $0x120] ss:$2 sm:$0xff]  ;;  %v2807_v49 = vadd.f32 %v9510_v29, %v7484_v37  ;;  %v2801_v60 = vpop.f32.mrb[91].mxu0  ;;  %v4017_v63 = vadd.f32 %v9510_v29, %v9763_v3  ;;  %v2732_v20 = vadd.f32 %v9510_v29, %v9765_v28 }
 0x1cb   : > { %v5715_v23 = vld [vmem:[#allocation2 + $0x121] ss:$2 sm:$0xff]  ;;  %v5587_v38 = vld [vmem:[#allocation2 + $0x520] ss:$2 sm:$0xff]  ;;  %5208 = vst.msk [vmem:[#allocation2 + $0x148] sm:$0xff] %vm5166_vm2, %v4951_v14  ;;  %5336 = vst.msk [vmem:[#allocation2 + $0x548] sm:$0xff] %vm5166_vm2, %v5079_v15  ;;  %v4950_v59 = vmax.f32 %v9892_v7, %v2792_v61  ;;  %v4087_v57 = vadd.f32 %v9510_v29, %v7868_v55  ;;  %7642 = vmatmul.mubr.msk.f32.gmra.mrb[196].mxu0 %vm744_vm0, %v419_v18  ;;  %v5078_v51 = vmax.f32 %v9896_v48, %v4072_v36 }
 0x1cc   : > { %8026 = vmatmul.mubr.msk.f32.gmra.mrb[196].mxu1 %vm744_vm0, %v675_v13  ;;  %v5952_v34 = vmax.f32 %v5459_v56, %v5715_v23  ;;  %v5843_v2 = vld [vmem:[#allocation2 + $0x521] ss:$2 sm:$0xff]  ;;  %v4081_v0 = vpop.f32.mrb[91].mxu1  ;;  %7644 = vmatprep.mubr.msk.f32.mxu0 %vm744_vm0, %v420_v33  ;;  %v4953_v24 = vmax.f32 %v9911_v11, %v2807_v49  ;;  %v2802_v43 = vadd.f32 %v9510_v29, %v2801_v60  ;;  %v424_v10 = vld [vmem:[%s8439_s30 + $0x650] sm:$0xff]  ;;  %v681_v36 = vld [vmem:[%s8439_s30 + $0xe58] sm:$0xff] }
 0x1cd   : > { %8028 = vmatprep.mubr.msk.f32.mxu1 %vm744_vm0, %v676_v26  ;;  %v6016_v47 = vmax.f32 %v5587_v38, %v5843_v2  ;;  %5207 = vst.msk [vmem:[#allocation2 + $0x140] sm:$0xff] %vm5166_vm2, %v4950_v59  ;;  %v5081_v25 = vmax.f32 %v4007_v53, %v4087_v57  ;;  %v4012_v31 = vadd.f32 %v9510_v29, %v9768_v16  ;;  %5335 = vst.msk [vmem:[#allocation2 + $0x540] sm:$0xff] %vm5166_vm2, %v5078_v51  ;;  %v7487_v4 = vpop.f32.mrb[92].mxu0  ;;  %v680_v18 = vld [vmem:[%s8439_s30 + $0xe50] sm:$0xff]  ;;  %v426_v38 = vld [vmem:[%s8439_s30 + $0x660] sm:$0xff] }
 0x1ce   : > { %6080 = vst.msk [vmem:[%s9114_s25 + $0x90] sm:$0xff] %vm5166_vm2, %v5952_v34  ;;  %v4082_v50 = vadd.f32 %v9510_v29, %v4081_v0  ;;  %v7871_v7 = vpop.f32.mrb[92].mxu1  ;;  %5210 = vst.msk [vmem:[#allocation2 + $0x158] sm:$0xff] %vm5166_vm2, %v4953_v24  ;;  %v4952_v3 = vmax.f32 %v9926_v35, %v2802_v43  ;;  %v2817_v28 = vadd.f32 %v9510_v29, %v7487_v4  ;;  %v2811_v48 = vpop.f32.mrb[93].mxu0  ;;  %v682_v34 = vld [vmem:[%s8439_s30 + $0xe60] sm:$0xff]  ;;  %v427_v24 = vld [vmem:[%s8439_s30 + $0x668] sm:$0xff] }
 0x1cf   : > { %6144 = vst.msk [vmem:[%s9114_s25 + $0x290] sm:$0xff] %vm5166_vm2, %v6016_v47  ;;  %5338 = vst.msk [vmem:[#allocation2 + $0x558] sm:$0xff] %vm5166_vm2, %v5081_v25  ;;  %v4097_v16 = vadd.f32 %v9510_v29, %v7871_v7  ;;  %7645 = vmatmul.mubr.msk.f32.gmra.mrb[198].mxu0 %vm744_vm0, %v421_v27  ;;  %v4091_v5 = vpop.f32.mrb[93].mxu1  ;;  %v2812_v9 = vadd.f32 %v9510_v29, %v2811_v48  ;;  %v2747_v11 = vadd.f32 %v9510_v29, %v9777_v21  ;;  %v683_v25 = vld [vmem:[%s8439_s30 + $0xe68] sm:$0xff] }
 0x1d0   : > { %8029 = vmatmul.mubr.msk.f32.gmra.mrb[198].mxu1 %vm744_vm0, %v677_v62  ;;  %v5461_v32 = vld [vmem:[#allocation2 + $0x130] ss:$2 sm:$0xff]  ;;  %v5717_v12 = vld [vmem:[#allocation2 + $0x131] ss:$2 sm:$0xff]  ;;  %v5080_v39 = vmax.f32 %v9930_v40, %v4082_v50  ;;  %v4092_v54 = vadd.f32 %v9510_v29, %v4091_v5  ;;  %7647 = vmatprep.mubr.msk.f32.mxu0 %vm744_vm0, %v422_v44  ;;  %5209 = vst.msk [vmem:[#allocation2 + $0x150] sm:$0xff] %vm5166_vm2, %v4952_v3 }
 0x1d1   : > { %8031 = vmatprep.mubr.msk.f32.mxu1 %vm744_vm0, %v678_v8  ;;  %v5953_v6 = vmax.f32 %v5461_v32, %v5717_v12  ;;  %v5589_v17 = vld [vmem:[#allocation2 + $0x530] ss:$2 sm:$0xff]  ;;  %v5845_v45 = vld [vmem:[#allocation2 + $0x531] ss:$2 sm:$0xff]  ;;  %v4955_v52 = vmax.f32 %v9947_v19, %v2817_v28  ;;  %v5083_v41 = vmax.f32 %v4017_v63, %v4097_v16  ;;  %v4027_v13 = vadd.f32 %v9510_v29, %v9779_v42  ;;  %v7490_v15 = vpop.f32.mrb[94].mxu0 }
 0x1d2   : > { %v6017_v58 = vmax.f32 %v5589_v17, %v5845_v45  ;;  %5337 = vst.msk [vmem:[#allocation2 + $0x550] sm:$0xff] %vm5166_vm2, %v5080_v39  ;;  %v4954_v14 = vmax.f32 %v2732_v20, %v2812_v9  ;;  %v5082_v21 = vmax.f32 %v4012_v31, %v4092_v54  ;;  %v7874_v61 = vpop.f32.mrb[94].mxu1  ;;  %v2742_v33 = vadd.f32 %v9510_v29, %v9781_v1  ;;  %v2821_v53 = vpop.f32.mrb[95].mxu0  ;;  %v425_v40 = vld [vmem:[%s8439_s30 + $0x658] sm:$0xff]  ;;  %v428_v8 = vld [vmem:[%s8439_s30 + $0x670] sm:$0xff]  ;;  %v430_v54 = vld [vmem:[%s8439_s30 + $0x680] sm:$0xff] }
 0x1d3   : > { %6081 = vst.msk [vmem:[%s9114_s25 + $0x98] sm:$0xff] %vm5166_vm2, %v5953_v6  ;;  %5212 = vst.msk [vmem:[#allocation2 + $0x168] sm:$0xff] %vm5166_vm2, %v4955_v52  ;;  %v2827_v42 = vadd.f32 %v9510_v29, %v7490_v15  ;;  %v4107_v26 = vadd.f32 %v9510_v29, %v7874_v61  ;;  %7648 = vmatmul.mubr.msk.f32.gmra.mrb[200].mxu0 %vm744_vm0, %v423_v22  ;;  %v4101_v35 = vpop.f32.mrb[95].mxu1  ;;  %v10009_v1 = vld [vmem:[%s11428_s2] ss:$0 sm:$0xff]  ;;  %v684_v50 = vld [vmem:[%s8439_s30 + $0xe70] sm:$0xff] }
 0x1d4   : > { %5340 = vst.msk [vmem:[#allocation2 + $0x568] sm:$0xff] %vm5166_vm2, %v5083_v41  ;;  %8032 = vmatmul.mubr.msk.f32.gmra.mrb[200].mxu1 %vm744_vm0, %v679_v46  ;;  %v4022_v37 = vadd.f32 %v10009_v1, %v9784_v30  ;;  %6145 = vst.msk [vmem:[%s9114_s25 + $0x298] sm:$0xff] %vm5166_vm2, %v6017_v58  ;;  %v5463_v29 = vld [vmem:[#allocation2 + $0x140] ss:$2 sm:$0xff]  ;;  %v5719_v55 = vld [vmem:[#allocation2 + $0x141] ss:$2 sm:$0xff]  ;;  %v2822_v56 = vadd.f32 %v10009_v1, %v2821_v53  ;;  %v4102_v23 = vadd.f32 %v10009_v1, %v4101_v35 }
 0x1d5   : > { %5211 = vst.msk [vmem:[#allocation2 + $0x160] sm:$0xff] %vm5166_vm2, %v4954_v14  ;;  %5339 = vst.msk [vmem:[#allocation2 + $0x560] sm:$0xff] %vm5166_vm2, %v5082_v21  ;;  %7650 = vmatprep.mubr.msk.f32.mxu0 %vm744_vm0, %v424_v10  ;;  %8034 = vmatprep.mubr.msk.f32.mxu1 %vm744_vm0, %v680_v18  ;;  %v5954_v30 = vmax.f32 %v5463_v29, %v5719_v55  ;;  %v5591_v59 = vld [vmem:[#allocation2 + $0x540] ss:$2 sm:$0xff]  ;;  %v5847_v49 = vld [vmem:[#allocation2 + $0x541] ss:$2 sm:$0xff]  ;;  %v4957_v57 = vmax.f32 %v2747_v11, %v2827_v42 }
 0x1d6   : > { %v5085_v19 = vmax.f32 %v4027_v13, %v4107_v26  ;;  %v6018_v2 = vmax.f32 %v5591_v59, %v5847_v49  ;;  %v4956_v51 = vmax.f32 %v2742_v33, %v2822_v56  ;;  %v5084_v60 = vmax.f32 %v4022_v37, %v4102_v23  ;;  %v10023_v0 = vpop.f32.mrb[96].mxu0  ;;  %v10025_v27 = vpop.f32.mrb[96].mxu1  ;;  %v429_v12 = vld [vmem:[%s8439_s30 + $0x678] sm:$0xff]  ;;  %v686_v10 = vld [vmem:[%s8439_s30 + $0xe80] sm:$0xff]  ;;  %v431_v14 = vld [vmem:[%s8439_s30 + $0x688] sm:$0xff] }
 0x1d7   : > { %6082 = vst.msk [vmem:[%s9114_s25 + $0xa0] sm:$0xff] %vm5166_vm2, %v5954_v30  ;;  %5214 = vst.msk [vmem:[#allocation2 + $0x178] sm:$0xff] %vm5166_vm2, %v4957_v57  ;;  %v10031_v62 = vpop.f32.mrb[97].mxu0  ;;  %7651 = vmatmul.mubr.msk.f32.gmra.mrb[202].mxu0 %vm744_vm0, %v425_v40  ;;  %v10034_v47 = vpop.f32.mrb[97].mxu1  ;;  %v5465_v43 = vld [vmem:[#allocation2 + $0x150] ss:$2 sm:$0xff] }
 0x1d8   : > { %5342 = vst.msk [vmem:[#allocation2 + $0x578] sm:$0xff] %vm5166_vm2, %v5085_v19  ;;  %8035 = vmatmul.mubr.msk.f32.gmra.mrb[202].mxu1 %vm744_vm0, %v681_v36  ;;  %6146 = vst.msk [vmem:[%s9114_s25 + $0x2a0] sm:$0xff] %vm5166_vm2, %v6018_v2  ;;  %v5721_v44 = vld [vmem:[#allocation2 + $0x151] ss:$2 sm:$0xff]  ;;  %7653 = vmatprep.mubr.msk.f32.mxu0 %vm744_vm0, %v426_v38  ;;  %v687_v21 = vld [vmem:[%s8439_s30 + $0xe88] sm:$0xff] }
 0x1d9   : > { %5213 = vst.msk [vmem:[#allocation2 + $0x170] sm:$0xff] %vm5166_vm2, %v4956_v51  ;;  %5341 = vst.msk [vmem:[#allocation2 + $0x570] sm:$0xff] %vm5166_vm2, %v5084_v60  ;;  %8037 = vmatprep.mubr.msk.f32.mxu1 %vm744_vm0, %v682_v34  ;;  %v5955_v63 = vmax.f32 %v5465_v43, %v5721_v44  ;;  %v5593_v20 = vld [vmem:[#allocation2 + $0x550] ss:$2 sm:$0xff]  ;;  %v5849_v31 = vld [vmem:[#allocation2 + $0x551] ss:$2 sm:$0xff] }
 0x1da   : > { %v6019_v4 = vmax.f32 %v5593_v20, %v5849_v31  ;;  %v10047_v7 = vpop.f32.mrb[98].mxu0  ;;  %v10049_v3 = vpop.f32.mrb[98].mxu1  ;;  %v685_v39 = vld [vmem:[%s8439_s30 + $0xe78] sm:$0xff]  ;;  %v432_v61 = vld [vmem:[%s8439_s30 + $0x690] sm:$0xff]  ;;  %v434_v37 = vld [vmem:[%s8439_s30 + $0x6a0] sm:$0xff] }
 0x1db   : > { %6083 = vst.msk [vmem:[%s9114_s25 + $0xa8] sm:$0xff] %vm5166_vm2, %v5955_v63  ;;  %7654 = vmatmul.mubr.msk.f32.gmra.mrb[204].mxu0 %vm744_vm0, %v427_v24  ;;  %v10057_v46 = vpop.f32.mrb[99].mxu0  ;;  %v10059_v32 = vpop.f32.mrb[99].mxu1  ;;  %v688_v33 = vld [vmem:[%s8439_s30 + $0xe90] sm:$0xff]  ;;  %v433_v40 = vld [vmem:[%s8439_s30 + $0x698] sm:$0xff]  ;;  %v690_v29 = vld [vmem:[%s8439_s30 + $0xea0] sm:$0xff] }
 0x1dc   : > { %v5467_v28 = vld [vmem:[#allocation2 + $0x160] ss:$2 sm:$0xff]  ;;  %v5723_v16 = vld [vmem:[#allocation2 + $0x161] ss:$2 sm:$0xff]  ;;  %8038 = vmatmul.mubr.msk.f32.gmra.mrb[204].mxu1 %vm744_vm0, %v683_v25  ;;  %6147 = vst.msk [vmem:[%s9114_s25 + $0x2a8] sm:$0xff] %vm5166_vm2, %v6019_v4  ;;  %7656 = vmatprep.mubr.msk.f32.mxu0 %vm744_vm0, %v428_v8  ;;  %v689_v36 = vld [vmem:[%s8439_s30 + $0xe98] sm:$0xff] }
 0x1dd   : > { %v5595_v48 = vld [vmem:[#allocation2 + $0x560] ss:$2 sm:$0xff]  ;;  %v5956_v5 = vmax.f32 %v5467_v28, %v5723_v16  ;;  %v5851_v22 = vld [vmem:[#allocation2 + $0x561] ss:$2 sm:$0xff]  ;;  %8040 = vmatprep.mubr.msk.f32.mxu1 %vm744_vm0, %v684_v50  ;;  %v10069_v11 = vpop.f32.mrb[100].mxu0  ;;  %v436_v49 = vld [vmem:[%s8439_s30 + $0x6b0] sm:$0xff] }
 0x1de   : > { %v6020_v9 = vmax.f32 %v5595_v48, %v5851_v22  ;;  %v10071_v6 = vpop.f32.mrb[100].mxu1  ;;  %v10077_v13 = vpop.f32.mrb[101].mxu0  ;;  %v435_v30 = vld [vmem:[%s8439_s30 + $0x6a8] sm:$0xff]  ;;  %v692_v57 = vld [vmem:[%s8439_s30 + $0xeb0] sm:$0xff]  ;;  %v437_v60 = vld [vmem:[%s8439_s30 + $0x6b8] sm:$0xff] }
 0x1df   : > { %6084 = vst.msk [vmem:[%s9114_s25 + $0xb0] sm:$0xff] %vm5166_vm2, %v5956_v5  ;;  %7657 = vmatmul.mubr.msk.f32.gmra.mrb[206].mxu0 %vm744_vm0, %v429_v12  ;;  %v10079_v58 = vpop.f32.mrb[101].mxu1  ;;  %v691_v59 = vld [vmem:[%s8439_s30 + $0xea8] sm:$0xff]  ;;  %v693_v24 = vld [vmem:[%s8439_s30 + $0xeb8] sm:$0xff]  ;;  %v438_v25 = vld [vmem:[%s8439_s30 + $0x6c0] sm:$0xff] }
 0x1e0   : > { %6148 = vst.msk [vmem:[%s9114_s25 + $0x2b0] sm:$0xff] %vm5166_vm2, %v6020_v9  ;;  %v5469_v17 = vld [vmem:[#allocation2 + $0x170] ss:$2 sm:$0xff]  ;;  %v5725_v45 = vld [vmem:[#allocation2 + $0x171] ss:$2 sm:$0xff]  ;;  %8041 = vmatmul.mubr.msk.f32.gmra.mrb[206].mxu1 %vm744_vm0, %v685_v39  ;;  %7659 = vmatprep.mubr.msk.f32.mxu0 %vm744_vm0, %v430_v54  ;;  %v694_v43 = vld [vmem:[%s8439_s30 + $0xec0] sm:$0xff] }
 0x1e1   : > { %v5597_v52 = vld [vmem:[#allocation2 + $0x570] ss:$2 sm:$0xff]  ;;  %v5957_v41 = vmax.f32 %v5469_v17, %v5725_v45  ;;  %v5853_v18 = vld [vmem:[#allocation2 + $0x571] ss:$2 sm:$0xff]  ;;  %8043 = vmatprep.mubr.msk.f32.mxu1 %vm744_vm0, %v686_v10  ;;  %v10089_v42 = vpop.f32.mrb[102].mxu0  ;;  %v439_v31 = vld [vmem:[%s8439_s30 + $0x6c8] sm:$0xff]  ;;  %v2837_v10 = vadd.f32 %v10009_v1, %v10023_v0  ;;  %v4117_v17 = vadd.f32 %v10009_v1, %v10025_v27  ;;  %v4112_v27 = vadd.f32 %v10009_v1, %v10034_v47 }
 0x1e2   : > { %v6021_v15 = vmax.f32 %v5597_v52, %v5853_v18  ;;  %v10091_v26 = vpop.f32.mrb[102].mxu1  ;;  %v10095_v53 = vpop.f32.mrb[103].mxu0  ;;  %v695_v50 = vld [vmem:[%s8439_s30 + $0xec8] sm:$0xff]  ;;  %v440_v4 = vld [vmem:[%s8439_s30 + $0x6d0] sm:$0xff]  ;;  %v441_v12 = vld [vmem:[%s8439_s30 + $0x6d8] sm:$0xff]  ;;  %v4127_v47 = vadd.f32 %v10009_v1, %v10049_v3 }
 0x1e3   : > { %6085 = vst.msk [vmem:[%s9114_s25 + $0xb8] sm:$0xff] %vm5166_vm2, %v5957_v41  ;;  %7660 = vmatmul.mubr.msk.f32.gmra.mrb[208].mxu0 %vm744_vm0, %v431_v14  ;;  %v10098_v35 = vpop.f32.mrb[103].mxu1  ;;  %v696_v28 = vld [vmem:[%s8439_s30 + $0xed0] sm:$0xff]  ;;  %v697_v39 = vld [vmem:[%s8439_s30 + $0xed8] sm:$0xff]  ;;  %v442_v9 = vld [vmem:[%s8439_s30 + $0x6e0] sm:$0xff]  ;;  %v2832_v41 = vadd.f32 %v10009_v1, %v10031_v62 }
 0x1e4   : > { %6149 = vst.msk [vmem:[%s9114_s25 + $0x2b8] sm:$0xff] %vm5166_vm2, %v6021_v15  ;;  %8044 = vmatmul.mubr.msk.f32.gmra.mrb[208].mxu1 %vm744_vm0, %v687_v21  ;;  %7662 = vmatprep.mubr.msk.f32.mxu0 %vm744_vm0, %v432_v61  ;;  %v698_v54 = vld [vmem:[%s8439_s30 + $0xee0] sm:$0xff]  ;;  %v443_v62 = vld [vmem:[%s8439_s30 + $0x6e8] sm:$0xff] }
 0x1e5   : > { %8046 = vmatprep.mubr.msk.f32.mxu1 %vm744_vm0, %v688_v33  ;;  %v10107_v55 = vpop.f32.mrb[104].mxu0  ;;  %v699_v33 = vld [vmem:[%s8439_s30 + $0xee8] sm:$0xff] }
 0x1e6   : > { %v10109_v56 = vpop.f32.mrb[104].mxu1  ;;  %v10111_v23 = vpop.f32.mrb[105].mxu0 }
 0x1e7   : > { %7663 = vmatmul.mubr.msk.f32.gmra.mrb[210].mxu0 %vm744_vm0, %v433_v40  ;;  %v10114_v38 = vpop.f32.mrb[105].mxu1 }
 0x1e8   : > { %8047 = vmatmul.mubr.msk.f32.gmra.mrb[210].mxu1 %vm744_vm0, %v689_v36  ;;  %7665 = vmatprep.mubr.msk.f32.mxu0 %vm744_vm0, %v434_v37  ;;  %v444_v37 = vld [vmem:[%s8439_s30 + $0x6f0] sm:$0xff] }
 0x1e9   : > { %8049 = vmatprep.mubr.msk.f32.mxu1 %vm744_vm0, %v690_v29  ;;  %v10123_v19 = vpop.f32.mrb[106].mxu0  ;;  %v700_v29 = vld [vmem:[%s8439_s30 + $0xef0] sm:$0xff] }
 0x1ea   : > { %v10125_v34 = vpop.f32.mrb[106].mxu1  ;;  %v10127_v2 = vpop.f32.mrb[107].mxu0 }
 0x1eb   : > { %7666 = vmatmul.mubr.msk.f32.gmra.mrb[212].mxu0 %vm744_vm0, %v435_v30  ;;  %v10130_v51 = vpop.f32.mrb[107].mxu1  ;;  %v2847_v30 = vadd.f32 %v10009_v1, %v10047_v7 }
 0x1ec   : > { %8050 = vmatmul.mubr.msk.f32.gmra.mrb[212].mxu1 %vm744_vm0, %v691_v59  ;;  %7668 = vmatprep.mubr.msk.f32.mxu0 %vm744_vm0, %v436_v49 }
 0x1ed   : > { %8052 = vmatprep.mubr.msk.f32.mxu1 %vm744_vm0, %v692_v57  ;;  %v10139_v44 = vpop.f32.mrb[108].mxu0 }
 0x1ee   : > { %v10141_v8 = vpop.f32.mrb[108].mxu1  ;;  %v10143_v63 = vpop.f32.mrb[109].mxu0 }
 0x1ef   : > { %7669 = vmatmul.mubr.msk.f32.gmra.mrb[214].mxu0 %vm744_vm0, %v437_v60  ;;  %v10146_v20 = vpop.f32.mrb[109].mxu1 }
 0x1f0   : > { %8053 = vmatmul.mubr.msk.f32.gmra.mrb[214].mxu1 %vm744_vm0, %v693_v24  ;;  %7671 = vmatprep.mubr.msk.f32.mxu0 %vm744_vm0, %v438_v25  ;;  %v2842_v24 = vadd.f32 %v10009_v1, %v10057_v46  ;;  %v4122_v46 = vadd.f32 %v10009_v1, %v10059_v32  ;;  %v2857_v32 = vadd.f32 %v10009_v1, %v10069_v11 }
 0x1f1   : > { %8055 = vmatprep.mubr.msk.f32.mxu1 %vm744_vm0, %v694_v43  ;;  %v10155_v16 = vpop.f32.mrb[110].mxu0 }
 0x1f2   : > { %v10157_v48 = vpop.f32.mrb[110].mxu1  ;;  %v10159_v5 = vpop.f32.mrb[111].mxu0 }
 0x1f3   : > { %7672 = vmatmul.mubr.msk.f32.gmra.mrb[216].mxu0 %vm744_vm0, %v439_v31  ;;  %v10162_v22 = vpop.f32.mrb[111].mxu1 }
 0x1f4   : > { %8056 = vmatmul.mubr.msk.f32.gmra.mrb[216].mxu1 %vm744_vm0, %v695_v50  ;;  %7674 = vmatprep.mubr.msk.f32.mxu0 %vm744_vm0, %v440_v4  ;;  %v445_v4 = vld [vmem:[%s8439_s30 + $0x6f8] sm:$0xff] }
 0x1f5   : > { %8058 = vmatprep.mubr.msk.f32.mxu1 %vm744_vm0, %v696_v28  ;;  %v7517_v45 = vpop.f32.mrb[112].mxu0  ;;  %v701_v28 = vld [vmem:[%s8439_s30 + $0xef8] sm:$0xff] }
 0x1f6   : > { %v7901_v52 = vpop.f32.mrb[112].mxu1  ;;  %v2917_v18 = vadd.f32 %v10009_v1, %v7517_v45  ;;  %v2911_v21 = vpop.f32.mrb[113].mxu0 }
 0x1f7   : > { %v4197_v14 = vadd.f32 %v10009_v1, %v7901_v52  ;;  %7675 = vmatmul.mubr.msk.f32.gmra.mrb[218].mxu0 %vm744_vm0, %v441_v12  ;;  %v4191_v0 = vpop.f32.mrb[113].mxu1  ;;  %v2912_v15 = vadd.f32 %v10009_v1, %v2911_v21 }
 0x1f8   : > { %8059 = vmatmul.mubr.msk.f32.gmra.mrb[218].mxu1 %vm744_vm0, %v697_v39  ;;  %v4192_v61 = vadd.f32 %v10009_v1, %v4191_v0  ;;  %7677 = vmatprep.mubr.msk.f32.mxu0 %vm744_vm0, %v442_v9  ;;  %v4959_v40 = vmax.f32 %v2837_v10, %v2917_v18  ;;  %v446_v9 = vld [vmem:[%s8439_s30 + $0x700] sm:$0xff]  ;;  %v4137_v10 = vadd.f32 %v10009_v1, %v10071_v6 }
 0x1f9   : > { %8061 = vmatprep.mubr.msk.f32.mxu1 %vm744_vm0, %v698_v54  ;;  %v5087_v36 = vmax.f32 %v4117_v17, %v4197_v14  ;;  %v4958_v59 = vmax.f32 %v2832_v41, %v2912_v15  ;;  %v7520_v57 = vpop.f32.mrb[114].mxu0  ;;  %v702_v54 = vld [vmem:[%s8439_s30 + $0xf00] sm:$0xff]  ;;  %v2852_v18 = vadd.f32 %v10009_v1, %v10077_v13  ;;  %v4132_v13 = vadd.f32 %v10009_v1, %v10079_v58  ;;  %v447_v15 = vld [vmem:[%s8439_s30 + $0x708] sm:$0xff] }
 0x1fa   : > { %v5086_v49 = vmax.f32 %v4112_v27, %v4192_v61  ;;  %v7904_v60 = vpop.f32.mrb[114].mxu1  ;;  %5216 = vst.msk [vmem:[#allocation2 + $0x188] sm:$0xff] %vm5166_vm2, %v4959_v40  ;;  %v2927_v25 = vadd.f32 %v10009_v1, %v7520_v57  ;;  %v2921_v43 = vpop.f32.mrb[115].mxu0  ;;  %v703_v61 = vld [vmem:[%s8439_s30 + $0xf08] sm:$0xff]  ;;  %v448_v40 = vld [vmem:[%s8439_s30 + $0x710] sm:$0xff]  ;;  %v2867_v58 = vadd.f32 %v10009_v1, %v10089_v42 }
 0x1fb   : > { %5344 = vst.msk [vmem:[#allocation2 + $0x588] sm:$0xff] %vm5166_vm2, %v5087_v36  ;;  %v4207_v7 = vadd.f32 %v10009_v1, %v7904_v60  ;;  %7678 = vmatmul.mubr.msk.f32.gmra.mrb[220].mxu0 %vm744_vm0, %v443_v62  ;;  %v4201_v3 = vpop.f32.mrb[115].mxu1  ;;  %5215 = vst.msk [vmem:[#allocation2 + $0x180] sm:$0xff] %vm5166_vm2, %v4958_v59  ;;  %v2922_v31 = vadd.f32 %v10009_v1, %v2921_v43  ;;  %v704_v36 = vld [vmem:[%s8439_s30 + $0xf10] sm:$0xff] }
 0x1fc   : > { %8062 = vmatmul.mubr.msk.f32.gmra.mrb[220].mxu1 %vm744_vm0, %v699_v33  ;;  %5343 = vst.msk [vmem:[#allocation2 + $0x580] sm:$0xff] %vm5166_vm2, %v5086_v49  ;;  %v4202_v50 = vadd.f32 %v10009_v1, %v4201_v3  ;;  %7680 = vmatprep.mubr.msk.f32.mxu0 %vm744_vm0, %v444_v37  ;;  %v4961_v12 = vmax.f32 %v2847_v30, %v2927_v25 }
 0x1fd   : > { %8064 = vmatprep.mubr.msk.f32.mxu1 %vm744_vm0, %v700_v29  ;;  %v5089_v39 = vmax.f32 %v4127_v47, %v4207_v7  ;;  %v4960_v17 = vmax.f32 %v2842_v24, %v2922_v31  ;;  %v7523_v52 = vpop.f32.mrb[116].mxu0  ;;  %v4147_v37 = vadd.f32 %v10009_v1, %v10091_v26  ;;  %v2862_v49 = vadd.f32 %v10009_v1, %v10095_v53  ;;  %v705_v31 = vld [vmem:[%s8439_s30 + $0xf18] sm:$0xff] }
 0x1fe   : > { %v5088_v45 = vmax.f32 %v4122_v46, %v4202_v50  ;;  %v7907_v41 = vpop.f32.mrb[116].mxu1  ;;  %5218 = vst.msk [vmem:[#allocation2 + $0x198] sm:$0xff] %vm5166_vm2, %v4961_v12  ;;  %v2937_v14 = vadd.f32 %v10009_v1, %v7523_v52  ;;  %v2931_v21 = vpop.f32.mrb[117].mxu0  ;;  %v4142_v53 = vadd.f32 %v10009_v1, %v10098_v35  ;;  %v10255_v25 = vadd.f32 %v10009_v1, %v10107_v55  ;;  %v449_v35 = vld [vmem:[%s8439_s30 + $0x718] sm:$0xff]  ;;  %v450_v12 = vld [vmem:[%s8439_s30 + $0x720] sm:$0xff] }
 0x1ff   : > { %5346 = vst.msk [vmem:[#allocation2 + $0x598] sm:$0xff] %vm5166_vm2, %v5089_v39  ;;  %v4217_v11 = vadd.f32 %v10009_v1, %v7907_v41  ;;  %7681 = vmatmul.mubr.msk.f32.gmra.mrb[222].mxu0 %vm744_vm0, %v445_v4  ;;  %v4211_v6 = vpop.f32.mrb[117].mxu1  ;;  %5217 = vst.msk [vmem:[#allocation2 + $0x190] sm:$0xff] %vm5166_vm2, %v4960_v17  ;;  %v2932_v0 = vadd.f32 %v10009_v1, %v2931_v21  ;;  %v706_v39 = vld [vmem:[%s8439_s30 + $0xf20] sm:$0xff] }
 0x200   : > { %8065 = vmatmul.mubr.msk.f32.gmra.mrb[222].mxu1 %vm744_vm0, %v701_v28  ;;  %5345 = vst.msk [vmem:[#allocation2 + $0x590] sm:$0xff] %vm5166_vm2, %v5088_v45  ;;  %v4212_v27 = vadd.f32 %v10009_v1, %v4211_v6  ;;  %7683 = vmatprep.mubr.msk.f32.mxu0 %vm744_vm0, %v446_v9  ;;  %v4963_v62 = vmax.f32 %v2857_v32, %v2937_v14 }
 0x201   : > { %8067 = vmatprep.mubr.msk.f32.mxu1 %vm744_vm0, %v702_v54  ;;  %v5091_v33 = vmax.f32 %v4137_v10, %v4217_v11  ;;  %v4962_v29 = vmax.f32 %v2852_v18, %v2932_v0  ;;  %v7526_v47 = vpop.f32.mrb[118].mxu0  ;;  %v4157_v9 = vadd.f32 %v10009_v1, %v10109_v56  ;;  %v10270_v54 = vadd.f32 %v10009_v1, %v10111_v23 }
 0x202   : > { %v5090_v30 = vmax.f32 %v4132_v13, %v4212_v27  ;;  %v7910_v59 = vpop.f32.mrb[118].mxu1  ;;  %v5471_v57 = vld [vmem:[#allocation2 + $0x180] ss:$2 sm:$0xff]  ;;  %v5727_v60 = vld [vmem:[#allocation2 + $0x181] ss:$2 sm:$0xff]  ;;  %5220 = vst.msk [vmem:[#allocation2 + $0x1a8] sm:$0xff] %vm5166_vm2, %v4963_v62  ;;  %v2947_v42 = vadd.f32 %v10009_v1, %v7526_v47  ;;  %v10274_v32 = vadd.f32 %v10009_v1, %v10114_v38  ;;  %v10289_v14 = vadd.f32 %v10009_v1, %v10123_v19 }
 0x203   : > { %v5599_v24 = vld [vmem:[#allocation2 + $0x580] ss:$2 sm:$0xff]  ;;  %5348 = vst.msk [vmem:[#allocation2 + $0x5a8] sm:$0xff] %vm5166_vm2, %v5091_v33  ;;  %v4227_v26 = vadd.f32 %v10009_v1, %v7910_v59  ;;  %7684 = vmatmul.mubr.msk.f32.gmra.mrb[224].mxu0 %vm744_vm0, %v447_v15  ;;  %v5958_v7 = vmax.f32 %v5471_v57, %v5727_v60  ;;  %v5855_v43 = vld [vmem:[#allocation2 + $0x581] ss:$2 sm:$0xff]  ;;  %5219 = vst.msk [vmem:[#allocation2 + $0x1a0] sm:$0xff] %vm5166_vm2, %v4962_v29  ;;  %v10308_v29 = vadd.f32 %v10009_v1, %v10130_v51 }
 0x204   : > { %8068 = vmatmul.mubr.msk.f32.gmra.mrb[224].mxu1 %vm744_vm0, %v703_v61  ;;  %5347 = vst.msk [vmem:[#allocation2 + $0x5a0] sm:$0xff] %vm5166_vm2, %v5090_v30  ;;  %v2941_v3 = vpop.f32.mrb[119].mxu0  ;;  %v4221_v46 = vpop.f32.mrb[119].mxu1  ;;  %7686 = vmatprep.mubr.msk.f32.mxu0 %vm744_vm0, %v448_v40  ;;  %v6022_v50 = vmax.f32 %v5599_v24, %v5855_v43  ;;  %v4965_v55 = vmax.f32 %v2867_v58, %v2947_v42  ;;  %v451_v27 = vld [vmem:[%s8439_s30 + $0x728] sm:$0xff]  ;;  %v452_v40 = vld [vmem:[%s8439_s30 + $0x730] sm:$0xff]  ;;  %v453_v43 = vld [vmem:[%s8439_s30 + $0x738] sm:$0xff] }
 0x205   : > { %8070 = vmatprep.mubr.msk.f32.mxu1 %vm744_vm0, %v704_v36  ;;  %v5093_v4 = vmax.f32 %v4147_v37, %v4227_v26  ;;  %v2942_v28 = vadd.f32 %v10009_v1, %v2941_v3  ;;  %6086 = vst.msk [vmem:[%s9114_s25 + $0xc0] sm:$0xff] %vm5166_vm2, %v5958_v7  ;;  %v4222_v10 = vadd.f32 %v10009_v1, %v4221_v46  ;;  %v7529_v17 = vpop.f32.mrb[120].mxu0  ;;  %v707_v15 = vld [vmem:[%s8439_s30 + $0xf28] sm:$0xff]  ;;  %v708_v36 = vld [vmem:[%s8439_s30 + $0xf30] sm:$0xff]  ;;  %v709_v3 = vld [vmem:[%s8439_s30 + $0xf38] sm:$0xff] }
 0x206   : > { %v7913_v45 = vpop.f32.mrb[120].mxu1  ;;  %6150 = vst.msk [vmem:[%s9114_s25 + $0x2c0] sm:$0xff] %vm5166_vm2, %v6022_v50  ;;  %v5473_v52 = vld [vmem:[#allocation2 + $0x190] ss:$2 sm:$0xff]  ;;  %v5729_v41 = vld [vmem:[#allocation2 + $0x191] ss:$2 sm:$0xff]  ;;  %v2957_v23 = vadd.f32 %v10009_v1, %v7529_v17  ;;  %v4167_v58 = vadd.f32 %v10009_v1, %v10125_v34  ;;  %v10304_v37 = vadd.f32 %v10009_v1, %v10127_v2  ;;  %v10325_v24 = vadd.f32 %v10009_v1, %v10139_v44 }
 0x207   : > { %v5601_v18 = vld [vmem:[#allocation2 + $0x590] ss:$2 sm:$0xff]  ;;  %5222 = vst.msk [vmem:[#allocation2 + $0x1b8] sm:$0xff] %vm5166_vm2, %v4965_v55  ;;  %5350 = vst.msk [vmem:[#allocation2 + $0x5b8] sm:$0xff] %vm5166_vm2, %v5093_v4  ;;  %v4964_v56 = vmax.f32 %v2862_v49, %v2942_v28  ;;  %v4237_v38 = vadd.f32 %v10009_v1, %v7913_v45  ;;  %7687 = vmatmul.mubr.msk.f32.gmra.mrb[226].mxu0 %vm744_vm0, %v449_v35  ;;  %v5959_v11 = vmax.f32 %v5473_v52, %v5729_v41  ;;  %v5857_v21 = vld [vmem:[#allocation2 + $0x591] ss:$2 sm:$0xff] }
 0x208   : > { %8071 = vmatmul.mubr.msk.f32.gmra.mrb[226].mxu1 %vm744_vm0, %v705_v31  ;;  %v5092_v6 = vmax.f32 %v4142_v53, %v4222_v10  ;;  %v2951_v13 = vpop.f32.mrb[121].mxu0  ;;  %v4231_v0 = vpop.f32.mrb[121].mxu1  ;;  %7689 = vmatprep.mubr.msk.f32.mxu0 %vm744_vm0, %v450_v12  ;;  %v6023_v61 = vmax.f32 %v5601_v18, %v5857_v21  ;;  %v4967_v19 = vmax.f32 %v10255_v25, %v2957_v23  ;;  %v454_v50 = vld [vmem:[%s8439_s30 + $0x740] sm:$0xff]  ;;  %v455_v17 = vld [vmem:[%s8439_s30 + $0x748] sm:$0xff] }
 0x209   : > { %8073 = vmatprep.mubr.msk.f32.mxu1 %vm744_vm0, %v706_v39  ;;  %5221 = vst.msk [vmem:[#allocation2 + $0x1b0] sm:$0xff] %vm5166_vm2, %v4964_v56  ;;  %v5095_v62 = vmax.f32 %v4157_v9, %v4237_v38  ;;  %v2952_v33 = vadd.f32 %v10009_v1, %v2951_v13  ;;  %6087 = vst.msk [vmem:[%s9114_s25 + $0xc8] sm:$0xff] %vm5166_vm2, %v5959_v11  ;;  %v4232_v30 = vadd.f32 %v10009_v1, %v4231_v0  ;;  %v7532_v47 = vpop.f32.mrb[122].mxu0  ;;  %v710_v55 = vld [vmem:[%s8439_s30 + $0xf40] sm:$0xff]  ;;  %v711_v45 = vld [vmem:[%s8439_s30 + $0xf48] sm:$0xff] }
 0x20a   : > { %5349 = vst.msk [vmem:[#allocation2 + $0x5b0] sm:$0xff] %vm5166_vm2, %v5092_v6  ;;  %v7916_v59 = vpop.f32.mrb[122].mxu1  ;;  %6151 = vst.msk [vmem:[%s9114_s25 + $0x2c8] sm:$0xff] %vm5166_vm2, %v6023_v61  ;;  %v5475_v49 = vld [vmem:[#allocation2 + $0x1a0] ss:$2 sm:$0xff]  ;;  %v2967_v51 = vadd.f32 %v10009_v1, %v7532_v47  ;;  %v2961_v25 = vpop.f32.mrb[123].mxu0  ;;  %v4177_v4 = vadd.f32 %v10009_v1, %v10141_v8  ;;  %v2892_v28 = vadd.f32 %v10009_v1, %v10143_v63 }
 0x20b   : > { %v5731_v34 = vld [vmem:[#allocation2 + $0x1a1] ss:$2 sm:$0xff]  ;;  %v5603_v57 = vld [vmem:[#allocation2 + $0x5a0] ss:$2 sm:$0xff]  ;;  %5224 = vst.msk [vmem:[#allocation2 + $0x1c8] sm:$0xff] %vm5166_vm2, %v4967_v19  ;;  %5352 = vst.msk [vmem:[#allocation2 + $0x5c8] sm:$0xff] %vm5166_vm2, %v5095_v62  ;;  %v4966_v2 = vmax.f32 %v10270_v54, %v2952_v33  ;;  %v4247_v60 = vadd.f32 %v10009_v1, %v7916_v59  ;;  %7690 = vmatmul.mubr.msk.f32.gmra.mrb[228].mxu0 %vm744_vm0, %v451_v27  ;;  %v5094_v53 = vmax.f32 %v10274_v32, %v4232_v30 }
 0x20c   : > { %8074 = vmatmul.mubr.msk.f32.gmra.mrb[228].mxu1 %vm744_vm0, %v707_v15  ;;  %v5960_v42 = vmax.f32 %v5475_v49, %v5731_v34  ;;  %v5859_v26 = vld [vmem:[#allocation2 + $0x5a1] ss:$2 sm:$0xff]  ;;  %v4241_v7 = vpop.f32.mrb[123].mxu1  ;;  %7692 = vmatprep.mubr.msk.f32.mxu0 %vm744_vm0, %v452_v40  ;;  %v4969_v44 = vmax.f32 %v10289_v14, %v2967_v51  ;;  %v2962_v31 = vadd.f32 %v10009_v1, %v2961_v25  ;;  %v456_v38 = vld [vmem:[%s8439_s30 + $0x750] sm:$0xff]  ;;  %v713_v30 = vld [vmem:[%s8439_s30 + $0xf58] sm:$0xff] }
 0x20d   : > { %8076 = vmatprep.mubr.msk.f32.mxu1 %vm744_vm0, %v708_v36  ;;  %v6024_v46 = vmax.f32 %v5603_v57, %v5859_v26  ;;  %5223 = vst.msk [vmem:[#allocation2 + $0x1c0] sm:$0xff] %vm5166_vm2, %v4966_v2  ;;  %v5097_v35 = vmax.f32 %v4167_v58, %v4247_v60  ;;  %v4172_v12 = vadd.f32 %v10009_v1, %v10146_v20  ;;  %5351 = vst.msk [vmem:[#allocation2 + $0x5c0] sm:$0xff] %vm5166_vm2, %v5094_v53  ;;  %v7535_v9 = vpop.f32.mrb[124].mxu0  ;;  %v712_v27 = vld [vmem:[%s8439_s30 + $0xf50] sm:$0xff]  ;;  %v458_v57 = vld [vmem:[%s8439_s30 + $0x760] sm:$0xff] }
 0x20e   : > { %6088 = vst.msk [vmem:[%s9114_s25 + $0xd0] sm:$0xff] %vm5166_vm2, %v5960_v42  ;;  %v4242_v39 = vadd.f32 %v10009_v1, %v4241_v7  ;;  %v7919_v54 = vpop.f32.mrb[124].mxu1  ;;  %5226 = vst.msk [vmem:[#allocation2 + $0x1d8] sm:$0xff] %vm5166_vm2, %v4969_v44  ;;  %v4968_v8 = vmax.f32 %v10304_v37, %v2962_v31  ;;  %v2977_v63 = vadd.f32 %v10009_v1, %v7535_v9  ;;  %v2971_v32 = vpop.f32.mrb[125].mxu0  ;;  %v714_v42 = vld [vmem:[%s8439_s30 + $0xf60] sm:$0xff]  ;;  %v715_v44 = vld [vmem:[%s8439_s30 + $0xf68] sm:$0xff] }
 0x20f   : > { %6152 = vst.msk [vmem:[%s9114_s25 + $0x2d0] sm:$0xff] %vm5166_vm2, %v6024_v46  ;;  %5354 = vst.msk [vmem:[#allocation2 + $0x5d8] sm:$0xff] %vm5166_vm2, %v5097_v35  ;;  %v4257_v20 = vadd.f32 %v10009_v1, %v7919_v54  ;;  %7693 = vmatmul.mubr.msk.f32.gmra.mrb[230].mxu0 %vm744_vm0, %v453_v43  ;;  %v4251_v10 = vpop.f32.mrb[125].mxu1  ;;  %v2972_v56 = vadd.f32 %v10009_v1, %v2971_v32  ;;  %v2907_v14 = vadd.f32 %v10009_v1, %v10155_v16  ;;  %v459_v46 = vld [vmem:[%s8439_s30 + $0x768] sm:$0xff] }
 0x210   : > { %8077 = vmatmul.mubr.msk.f32.gmra.mrb[230].mxu1 %vm744_vm0, %v709_v3  ;;  %v5477_v52 = vld [vmem:[#allocation2 + $0x1b0] ss:$2 sm:$0xff]  ;;  %v5733_v41 = vld [vmem:[#allocation2 + $0x1b1] ss:$2 sm:$0xff]  ;;  %v5096_v18 = vmax.f32 %v10308_v29, %v4242_v39  ;;  %v4252_v23 = vadd.f32 %v10009_v1, %v4251_v10  ;;  %7695 = vmatprep.mubr.msk.f32.mxu0 %vm744_vm0, %v454_v50  ;;  %5225 = vst.msk [vmem:[#allocation2 + $0x1d0] sm:$0xff] %vm5166_vm2, %v4968_v8 }
 0x211   : > { %8079 = vmatprep.mubr.msk.f32.mxu1 %vm744_vm0, %v710_v55  ;;  %v5961_v11 = vmax.f32 %v5477_v52, %v5733_v41  ;;  %v5605_v21 = vld [vmem:[#allocation2 + $0x5b0] ss:$2 sm:$0xff]  ;;  %v5861_v6 = vld [vmem:[#allocation2 + $0x5b1] ss:$2 sm:$0xff]  ;;  %v4971_v13 = vmax.f32 %v10325_v24, %v2977_v63  ;;  %v5099_v0 = vmax.f32 %v4177_v4, %v4257_v20  ;;  %v4187_v15 = vadd.f32 %v10009_v1, %v10157_v48  ;;  %v7538_v62 = vpop.f32.mrb[126].mxu0 }
 0x212   : > { %v6025_v61 = vmax.f32 %v5605_v21, %v5861_v6  ;;  %5353 = vst.msk [vmem:[#allocation2 + $0x5d0] sm:$0xff] %vm5166_vm2, %v5096_v18  ;;  %v4970_v19 = vmax.f32 %v2892_v28, %v2972_v56  ;;  %v5098_v16 = vmax.f32 %v4172_v12, %v4252_v23  ;;  %v7922_v33 = vpop.f32.mrb[126].mxu1  ;;  %v2902_v40 = vadd.f32 %v10009_v1, %v10159_v5  ;;  %v2981_v58 = vpop.f32.mrb[127].mxu0  ;;  %v457_v29 = vld [vmem:[%s8439_s30 + $0x758] sm:$0xff]  ;;  %v460_v50 = vld [vmem:[%s8439_s30 + $0x770] sm:$0xff]  ;;  %v462_v56 = vld [vmem:[%s8439_s30 + $0x780] sm:$0xff] }
 0x213   : > { %6089 = vst.msk [vmem:[%s9114_s25 + $0xd8] sm:$0xff] %vm5166_vm2, %v5961_v11  ;;  %5228 = vst.msk [vmem:[#allocation2 + $0x1e8] sm:$0xff] %vm5166_vm2, %v4971_v13  ;;  %v2987_v48 = vadd.f32 %v10009_v1, %v7538_v62  ;;  %v4267_v36 = vadd.f32 %v10009_v1, %v7922_v33  ;;  %7696 = vmatmul.mubr.msk.f32.gmra.mrb[232].mxu0 %vm744_vm0, %v455_v17  ;;  %v4261_v37 = vpop.f32.mrb[127].mxu1  ;;  %v4182_v5 = vadd.f32 %v10009_v1, %v10162_v22  ;;  %v716_v12 = vld [vmem:[%s8439_s30 + $0xf70] sm:$0xff]  ;;  %v461_v52 = vld [vmem:[%s8439_s30 + $0x778] sm:$0xff] }
 0x214   : > { %5356 = vst.msk [vmem:[#allocation2 + $0x5e8] sm:$0xff] %vm5166_vm2, %v5099_v0  ;;  %8080 = vmatmul.mubr.msk.f32.gmra.mrb[232].mxu1 %vm744_vm0, %v711_v45  ;;  %6153 = vst.msk [vmem:[%s9114_s25 + $0x2d8] sm:$0xff] %vm5166_vm2, %v6025_v61  ;;  %v5479_v47 = vld [vmem:[#allocation2 + $0x1c0] ss:$2 sm:$0xff]  ;;  %v5735_v59 = vld [vmem:[#allocation2 + $0x1c1] ss:$2 sm:$0xff]  ;;  %v2982_v49 = vadd.f32 %v10009_v1, %v2981_v58  ;;  %v4262_v34 = vadd.f32 %v10009_v1, %v4261_v37  ;;  %7698 = vmatprep.mubr.msk.f32.mxu0 %vm744_vm0, %v456_v38 }
 0x215   : > { %5227 = vst.msk [vmem:[#allocation2 + $0x1e0] sm:$0xff] %vm5166_vm2, %v4970_v19  ;;  %5355 = vst.msk [vmem:[#allocation2 + $0x5e0] sm:$0xff] %vm5166_vm2, %v5098_v16  ;;  %8082 = vmatprep.mubr.msk.f32.mxu1 %vm744_vm0, %v712_v27  ;;  %v5962_v22 = vmax.f32 %v5479_v47, %v5735_v59  ;;  %v5607_v2 = vld [vmem:[#allocation2 + $0x5c0] ss:$2 sm:$0xff]  ;;  %v5863_v51 = vld [vmem:[#allocation2 + $0x5c1] ss:$2 sm:$0xff]  ;;  %v4973_v60 = vmax.f32 %v2907_v14, %v2987_v48  ;;  %v5101_v24 = vmax.f32 %v4187_v15, %v4267_v36 }
 0x216   : > { %v6026_v26 = vmax.f32 %v5607_v2, %v5863_v51  ;;  %v4972_v53 = vmax.f32 %v2902_v40, %v2982_v49  ;;  %v5100_v25 = vmax.f32 %v4182_v5, %v4262_v34  ;;  %v10396_v7 = vpop.f32.mrb[128].mxu0  ;;  %v10398_v1 = vpop.f32.mrb[128].mxu1  ;;  %v717_v41 = vld [vmem:[%s8439_s30 + $0xf78] sm:$0xff]  ;;  %v718_v23 = vld [vmem:[%s8439_s30 + $0xf80] sm:$0xff]  ;;  %v463_v61 = vld [vmem:[%s8439_s30 + $0x788] sm:$0xff] }
 0x217   : > { %6090 = vst.msk [vmem:[%s9114_s25 + $0xe0] sm:$0xff] %vm5166_vm2, %v5962_v22  ;;  %5230 = vst.msk [vmem:[#allocation2 + $0x1f8] sm:$0xff] %vm5166_vm2, %v4973_v60  ;;  %v10404_v43 = vpop.f32.mrb[129].mxu0  ;;  %7699 = vmatmul.mubr.msk.f32.gmra.mrb[234].mxu0 %vm744_vm0, %v457_v29  ;;  %v10407_v3 = vpop.f32.mrb[129].mxu1  ;;  %v5481_v35 = vld [vmem:[#allocation2 + $0x1d0] ss:$2 sm:$0xff] }
 0x218   : > { %5358 = vst.msk [vmem:[#allocation2 + $0x5f8] sm:$0xff] %vm5166_vm2, %v5101_v24  ;;  %8083 = vmatmul.mubr.msk.f32.gmra.mrb[234].mxu1 %vm744_vm0, %v713_v30  ;;  %6154 = vst.msk [vmem:[%s9114_s25 + $0x2e0] sm:$0xff] %vm5166_vm2, %v6026_v26  ;;  %v5737_v31 = vld [vmem:[#allocation2 + $0x1d1] ss:$2 sm:$0xff]  ;;  %7701 = vmatprep.mubr.msk.f32.mxu0 %vm744_vm0, %v458_v57  ;;  %v719_v19 = vld [vmem:[%s8439_s30 + $0xf88] sm:$0xff] }
 0x219   : > { %5229 = vst.msk [vmem:[#allocation2 + $0x1f0] sm:$0xff] %vm5166_vm2, %v4972_v53  ;;  %5357 = vst.msk [vmem:[#allocation2 + $0x5f0] sm:$0xff] %vm5166_vm2, %v5100_v25  ;;  %8085 = vmatprep.mubr.msk.f32.mxu1 %vm744_vm0, %v714_v42  ;;  %v5963_v55 = vmax.f32 %v5481_v35, %v5737_v31  ;;  %v5609_v4 = vld [vmem:[#allocation2 + $0x5d0] ss:$2 sm:$0xff]  ;;  %v5865_v28 = vld [vmem:[#allocation2 + $0x5d1] ss:$2 sm:$0xff] }
 0x21a   : > { %v6027_v39 = vmax.f32 %v5609_v4, %v5865_v28  ;;  %v10420_v9 = vpop.f32.mrb[130].mxu0  ;;  %v10422_v54 = vpop.f32.mrb[130].mxu1  ;;  %v464_v62 = vld [vmem:[%s8439_s30 + $0x790] sm:$0xff]  ;;  %v465_v37 = vld [vmem:[%s8439_s30 + $0x798] sm:$0xff]  ;;  %v466_v30 = vld [vmem:[%s8439_s30 + $0x7a0] sm:$0xff] }
 0x21b   : > { %6091 = vst.msk [vmem:[%s9114_s25 + $0xe8] sm:$0xff] %vm5166_vm2, %v5963_v55  ;;  %7702 = vmatmul.mubr.msk.f32.gmra.mrb[236].mxu0 %vm744_vm0, %v459_v46  ;;  %v10430_v17 = vpop.f32.mrb[131].mxu0  ;;  %v10432_v45 = vpop.f32.mrb[131].mxu1  ;;  %v720_v33 = vld [vmem:[%s8439_s30 + $0xf90] sm:$0xff]  ;;  %v721_v29 = vld [vmem:[%s8439_s30 + $0xf98] sm:$0xff]  ;;  %v722_v5 = vld [vmem:[%s8439_s30 + $0xfa0] sm:$0xff] }
 0x21c   : > { %v5483_v8 = vld [vmem:[#allocation2 + $0x1e0] ss:$2 sm:$0xff]  ;;  %v5739_v63 = vld [vmem:[#allocation2 + $0x1e1] ss:$2 sm:$0xff]  ;;  %8086 = vmatmul.mubr.msk.f32.gmra.mrb[236].mxu1 %vm744_vm0, %v715_v44  ;;  %6155 = vst.msk [vmem:[%s9114_s25 + $0x2e8] sm:$0xff] %vm5166_vm2, %v6027_v39  ;;  %7704 = vmatprep.mubr.msk.f32.mxu0 %vm744_vm0, %v460_v50  ;;  %v468_v2 = vld [vmem:[%s8439_s30 + $0x7b0] sm:$0xff] }
 0x21d   : > { %v5611_v20 = vld [vmem:[#allocation2 + $0x5e0] ss:$2 sm:$0xff]  ;;  %v5964_v32 = vmax.f32 %v5483_v8, %v5739_v63  ;;  %v5867_v10 = vld [vmem:[#allocation2 + $0x5e1] ss:$2 sm:$0xff]  ;;  %8088 = vmatprep.mubr.msk.f32.mxu1 %vm744_vm0, %v716_v12  ;;  %v10442_v38 = vpop.f32.mrb[132].mxu0  ;;  %v724_v51 = vld [vmem:[%s8439_s30 + $0xfb0] sm:$0xff] }
 0x21e   : > { %v6028_v18 = vmax.f32 %v5611_v20, %v5867_v10  ;;  %v10444_v14 = vpop.f32.mrb[132].mxu1  ;;  %v10450_v27 = vpop.f32.mrb[133].mxu0  ;;  %v467_v57 = vld [vmem:[%s8439_s30 + $0x7a8] sm:$0xff]  ;;  %v469_v53 = vld [vmem:[%s8439_s30 + $0x7b8] sm:$0xff]  ;;  %v470_v46 = vld [vmem:[%s8439_s30 + $0x7c0] sm:$0xff] }
 0x21f   : > { %6092 = vst.msk [vmem:[%s9114_s25 + $0xf0] sm:$0xff] %vm5166_vm2, %v5964_v32  ;;  %7705 = vmatmul.mubr.msk.f32.gmra.mrb[238].mxu0 %vm744_vm0, %v461_v52  ;;  %v10452_v15 = vpop.f32.mrb[133].mxu1  ;;  %v723_v22 = vld [vmem:[%s8439_s30 + $0xfa8] sm:$0xff]  ;;  %v725_v25 = vld [vmem:[%s8439_s30 + $0xfb8] sm:$0xff]  ;;  %v726_v44 = vld [vmem:[%s8439_s30 + $0xfc0] sm:$0xff] }
 0x220   : > { %6156 = vst.msk [vmem:[%s9114_s25 + $0x2f0] sm:$0xff] %vm5166_vm2, %v6028_v18  ;;  %v5485_v11 = vld [vmem:[#allocation2 + $0x1f0] ss:$2 sm:$0xff]  ;;  %v5741_v21 = vld [vmem:[#allocation2 + $0x1f1] ss:$2 sm:$0xff]  ;;  %8089 = vmatmul.mubr.msk.f32.gmra.mrb[238].mxu1 %vm744_vm0, %v717_v41  ;;  %7707 = vmatprep.mubr.msk.f32.mxu0 %vm744_vm0, %v462_v56  ;;  %v471_v4 = vld [vmem:[%s8439_s30 + $0x7c8] sm:$0xff] }
 0x221   : > { %v5613_v6 = vld [vmem:[#allocation2 + $0x5f0] ss:$2 sm:$0xff]  ;;  %v5965_v13 = vmax.f32 %v5485_v11, %v5741_v21  ;;  %v5869_v0 = vld [vmem:[#allocation2 + $0x5f1] ss:$2 sm:$0xff]  ;;  %8091 = vmatprep.mubr.msk.f32.mxu1 %vm744_vm0, %v718_v23  ;;  %v10462_v40 = vpop.f32.mrb[134].mxu0  ;;  %v727_v28 = vld [vmem:[%s8439_s30 + $0xfc8] sm:$0xff] }
 0x222   : > { %v6029_v16 = vmax.f32 %v5613_v6, %v5869_v0  ;;  %v10464_v48 = vpop.f32.mrb[134].mxu1  ;;  %v10468_v36 = vpop.f32.mrb[135].mxu0  ;;  %v472_v12 = vld [vmem:[%s8439_s30 + $0x7d0] sm:$0xff]  ;;  %v473_v10 = vld [vmem:[%s8439_s30 + $0x7d8] sm:$0xff]  ;;  %v474_v41 = vld [vmem:[%s8439_s30 + $0x7e0] sm:$0xff] }
 0x223   : > { %6093 = vst.msk [vmem:[%s9114_s25 + $0xf8] sm:$0xff] %vm5166_vm2, %v5965_v13  ;;  %7708 = vmatmul.mubr.msk.f32.gmra.mrb[240].mxu0 %vm744_vm0, %v463_v61  ;;  %v10471_v58 = vpop.f32.mrb[135].mxu1  ;;  %v728_v39 = vld [vmem:[%s8439_s30 + $0xfd0] sm:$0xff]  ;;  %v729_v52 = vld [vmem:[%s8439_s30 + $0xfd8] sm:$0xff]  ;;  %v730_v18 = vld [vmem:[%s8439_s30 + $0xfe0] sm:$0xff] }
 0x224   : > { %6157 = vst.msk [vmem:[%s9114_s25 + $0x2f8] sm:$0xff] %vm5166_vm2, %v6029_v16  ;;  %8092 = vmatmul.mubr.msk.f32.gmra.mrb[240].mxu1 %vm744_vm0, %v719_v19  ;;  %7710 = vmatprep.mubr.msk.f32.mxu0 %vm744_vm0, %v464_v62  ;;  %v10547_v56 = vld [vmem:[%s11428_s2] ss:$0 sm:$0xff] }
 0x225   : > { %8094 = vmatprep.mubr.msk.f32.mxu1 %vm744_vm0, %v720_v33  ;;  %v2997_v23 = vadd.f32 %v10547_v56, %v10396_v7  ;;  %v4277_v11 = vadd.f32 %v10547_v56, %v10398_v1  ;;  %v2992_v13 = vadd.f32 %v10547_v56, %v10404_v43  ;;  %v4272_v1 = vadd.f32 %v10547_v56, %v10407_v3  ;;  %v475_v43 = vld [vmem:[%s8439_s30 + $0x7e8] sm:$0xff] }
 0x226   : > { %v10480_v47 = vpop.f32.mrb[136].mxu0  ;;  %v10482_v59 = vpop.f32.mrb[136].mxu1  ;;  %v731_v33 = vld [vmem:[%s8439_s30 + $0xfe8] sm:$0xff]  ;;  %v4287_v3 = vadd.f32 %v10547_v56, %v10422_v54 }
 0x227   : > { %v10484_v49 = vpop.f32.mrb[137].mxu0  ;;  %7711 = vmatmul.mubr.msk.f32.gmra.mrb[242].mxu0 %vm744_vm0, %v465_v37  ;;  %v10487_v34 = vpop.f32.mrb[137].mxu1 }
 0x228   : > { %8095 = vmatmul.mubr.msk.f32.gmra.mrb[242].mxu1 %vm744_vm0, %v721_v29  ;;  %7713 = vmatprep.mubr.msk.f32.mxu0 %vm744_vm0, %v466_v30  ;;  %v476_v30 = vld [vmem:[%s8439_s30 + $0x7f0] sm:$0xff] }
 0x229   : > { %8097 = vmatprep.mubr.msk.f32.mxu1 %vm744_vm0, %v722_v5  ;;  %v732_v5 = vld [vmem:[%s8439_s30 + $0xff0] sm:$0xff] }
 0x22a   : > { %v10496_v60 = vpop.f32.mrb[138].mxu0  ;;  %v10498_v24 = vpop.f32.mrb[138].mxu1 }
 0x22b   : > { %v10500_v42 = vpop.f32.mrb[139].mxu0  ;;  %7714 = vmatmul.mubr.msk.f32.gmra.mrb[244].mxu0 %vm744_vm0, %v467_v57  ;;  %v10503_v26 = vpop.f32.mrb[139].mxu1  ;;  %v3007_v57 = vadd.f32 %v10547_v56, %v10420_v9 }
 0x22c   : > { %8098 = vmatmul.mubr.msk.f32.gmra.mrb[244].mxu1 %vm744_vm0, %v723_v22  ;;  %7716 = vmatprep.mubr.msk.f32.mxu0 %vm744_vm0, %v468_v2 }
 0x22d   : > { %8100 = vmatprep.mubr.msk.f32.mxu1 %vm744_vm0, %v724_v51 }
 0x22e   : > { %v10512_v35 = vpop.f32.mrb[140].mxu0  ;;  %v10514_v31 = vpop.f32.mrb[140].mxu1 }
 0x22f   : > { %v10516_v50 = vpop.f32.mrb[141].mxu0  ;;  %7717 = vmatmul.mubr.msk.f32.gmra.mrb[246].mxu0 %vm744_vm0, %v469_v53  ;;  %v10519_v55 = vpop.f32.mrb[141].mxu1 }
 0x230   : > { %8101 = vmatmul.mubr.msk.f32.gmra.mrb[246].mxu1 %vm744_vm0, %v725_v25  ;;  %7719 = vmatprep.mubr.msk.f32.mxu0 %vm744_vm0, %v470_v46  ;;  %v3002_v25 = vadd.f32 %v10547_v56, %v10430_v17 }
 0x231   : > { %8103 = vmatprep.mubr.msk.f32.mxu1 %vm744_vm0, %v726_v44 }
 0x232   : > { %v10528_v8 = vpop.f32.mrb[142].mxu0  ;;  %v10530_v63 = vpop.f32.mrb[142].mxu1 }
 0x233   : > { %v10532_v20 = vpop.f32.mrb[143].mxu0  ;;  %7720 = vmatmul.mubr.msk.f32.gmra.mrb[248].mxu0 %vm744_vm0, %v471_v4  ;;  %v10535_v32 = vpop.f32.mrb[143].mxu1  ;;  %v4282_v4 = vadd.f32 %v10547_v56, %v10432_v45 }
 0x234   : > { %8104 = vmatmul.mubr.msk.f32.gmra.mrb[248].mxu1 %vm744_vm0, %v727_v28  ;;  %7722 = vmatprep.mubr.msk.f32.mxu0 %vm744_vm0, %v472_v12  ;;  %v477_v12 = vld [vmem:[%s8439_s30 + $0x7f8] sm:$0xff] }
 0x235   : > { %8106 = vmatprep.mubr.msk.f32.mxu1 %vm744_vm0, %v728_v39  ;;  %v733_v39 = vld [vmem:[%s8439_s30 + $0xff8] sm:$0xff] }
 0x236   : > { %v7565_v21 = vpop.f32.mrb[144].mxu0  ;;  %v7949_v6 = vpop.f32.mrb[144].mxu1 }
 0x237   : > { %v3077_v0 = vadd.f32 %v10547_v56, %v7565_v21  ;;  %v4357_v61 = vadd.f32 %v10547_v56, %v7949_v6  ;;  %v3071_v19 = vpop.f32.mrb[145].mxu0  ;;  %7723 = vmatmul.mubr.msk.f32.gmra.mrb[250].mxu0 %vm744_vm0, %v473_v10  ;;  %v4351_v7 = vpop.f32.mrb[145].mxu1  ;;  %v4297_v21 = vadd.f32 %v10547_v56, %v10444_v14  ;;  %v4292_v14 = vadd.f32 %v10547_v56, %v10452_v15 }
 0x238   : > { %8107 = vmatmul.mubr.msk.f32.gmra.mrb[250].mxu1 %vm744_vm0, %v729_v52  ;;  %v3072_v16 = vadd.f32 %v10547_v56, %v3071_v19  ;;  %v4352_v62 = vadd.f32 %v10547_v56, %v4351_v7  ;;  %7725 = vmatprep.mubr.msk.f32.mxu0 %vm744_vm0, %v474_v41  ;;  %v3017_v41 = vadd.f32 %v10547_v56, %v10442_v38 }
 0x239   : > { %8109 = vmatprep.mubr.msk.f32.mxu1 %vm744_vm0, %v730_v18  ;;  %v4975_v37 = vmax.f32 %v2997_v23, %v3077_v0  ;;  %v5103_v29 = vmax.f32 %v4277_v11, %v4357_v61  ;;  %v3012_v38 = vadd.f32 %v10547_v56, %v10450_v27  ;;  %v3027_v27 = vadd.f32 %v10547_v56, %v10462_v40 }
 0x23a   : > { %v4974_v22 = vmax.f32 %v2992_v13, %v3072_v16  ;;  %v5102_v2 = vmax.f32 %v4272_v1, %v4352_v62  ;;  %v7568_v51 = vpop.f32.mrb[146].mxu0  ;;  %v7952_v53 = vpop.f32.mrb[146].mxu1  ;;  %v4307_v15 = vadd.f32 %v10547_v56, %v10464_v48 }
 0x23b   : > { %5232 = vst.msk [vmem:[#allocation2 + $0x208] sm:$0xff] %vm5166_vm2, %v4975_v37  ;;  %5360 = vst.msk [vmem:[#allocation2 + $0x608] sm:$0xff] %vm5166_vm2, %v5103_v29  ;;  %v3087_v46 = vadd.f32 %v10547_v56, %v7568_v51  ;;  %v4367_v9 = vadd.f32 %v10547_v56, %v7952_v53  ;;  %v3081_v44 = vpop.f32.mrb[147].mxu0  ;;  %7726 = vmatmul.mubr.msk.f32.gmra.mrb[252].mxu0 %vm744_vm0, %v475_v43  ;;  %v4361_v54 = vpop.f32.mrb[147].mxu1 }
 0x23c   : > { %8110 = vmatmul.mubr.msk.f32.gmra.mrb[252].mxu1 %vm744_vm0, %v731_v33  ;;  %5231 = vst.msk [vmem:[#allocation2 + $0x200] sm:$0xff] %vm5166_vm2, %v4974_v22  ;;  %5359 = vst.msk [vmem:[#allocation2 + $0x600] sm:$0xff] %vm5166_vm2, %v5102_v2  ;;  %v3082_v17 = vadd.f32 %v10547_v56, %v3081_v44  ;;  %v4362_v28 = vadd.f32 %v10547_v56, %v4361_v54  ;;  %7728 = vmatprep.mubr.msk.f32.mxu0 %vm744_vm0, %v476_v30 }
 0x23d   : > { %8112 = vmatprep.mubr.msk.f32.mxu1 %vm744_vm0, %v732_v5  ;;  %v4977_v10 = vmax.f32 %v3007_v57, %v3087_v46  ;;  %v5105_v52 = vmax.f32 %v4287_v3, %v4367_v9  ;;  %v3022_v22 = vadd.f32 %v10547_v56, %v10468_v36  ;;  %v4302_v44 = vadd.f32 %v10547_v56, %v10471_v58 }
 0x23e   : > { %v4976_v45 = vmax.f32 %v3002_v25, %v3082_v17  ;;  %v5104_v18 = vmax.f32 %v4282_v4, %v4362_v28  ;;  %v7571_v23 = vpop.f32.mrb[148].mxu0  ;;  %v7955_v11 = vpop.f32.mrb[148].mxu1  ;;  %v3037_v36 = vadd.f32 %v10547_v56, %v10480_v47  ;;  %v4317_v28 = vadd.f32 %v10547_v56, %v10482_v59 }
 0x23f   : > { %5234 = vst.msk [vmem:[#allocation2 + $0x218] sm:$0xff] %vm5166_vm2, %v4977_v10  ;;  %5362 = vst.msk [vmem:[#allocation2 + $0x618] sm:$0xff] %vm5166_vm2, %v5105_v52  ;;  %v3097_v6 = vadd.f32 %v10547_v56, %v7571_v23  ;;  %v4377_v13 = vadd.f32 %v10547_v56, %v7955_v11  ;;  %v3091_v0 = vpop.f32.mrb[149].mxu0  ;;  %7729 = vmatmul.mubr.msk.f32.gmra.mrb[254].mxu0 %vm744_vm0, %v477_v12  ;;  %v4371_v61 = vpop.f32.mrb[149].mxu1 }
 0x240   : > { %8113 = vmatmul.mubr.msk.f32.gmra.mrb[254].mxu1 %vm744_vm0, %v733_v39  ;;  %5233 = vst.msk [vmem:[#allocation2 + $0x210] sm:$0xff] %vm5166_vm2, %v4976_v45  ;;  %5361 = vst.msk [vmem:[#allocation2 + $0x610] sm:$0xff] %vm5166_vm2, %v5104_v18  ;;  %v3092_v19 = vadd.f32 %v10547_v56, %v3091_v0  ;;  %v4372_v7 = vadd.f32 %v10547_v56, %v4371_v61  ;;  %v4312_v61 = vadd.f32 %v10547_v56, %v10487_v34 }
 0x241   : > { %v4979_v1 = vmax.f32 %v3017_v41, %v3097_v6  ;;  %v5107_v16 = vmax.f32 %v4297_v21, %v4377_v13  ;;  %v3032_v41 = vadd.f32 %v10547_v56, %v10484_v49 }
 0x242   : > { %v4978_v62 = vmax.f32 %v3012_v38, %v3092_v19  ;;  %v5106_v43 = vmax.f32 %v4292_v14, %v4372_v7  ;;  %v7574_v33 = vpop.f32.mrb[150].mxu0  ;;  %v7958_v37 = vpop.f32.mrb[150].mxu1  ;;  %v3047_v38 = vadd.f32 %v10547_v56, %v10496_v60  ;;  %v4327_v7 = vadd.f32 %v10547_v56, %v10498_v24 }
 0x243   : > { %v5487_v29 = vld [vmem:[#allocation2 + $0x200] ss:$2 sm:$0xff]  ;;  %v5743_v30 = vld [vmem:[#allocation2 + $0x201] ss:$2 sm:$0xff]  ;;  %5236 = vst.msk [vmem:[#allocation2 + $0x228] sm:$0xff] %vm5166_vm2, %v4979_v1  ;;  %5364 = vst.msk [vmem:[#allocation2 + $0x628] sm:$0xff] %vm5166_vm2, %v5107_v16  ;;  %v3107_v57 = vadd.f32 %v10547_v56, %v7574_v33  ;;  %v4387_v3 = vadd.f32 %v10547_v56, %v7958_v37  ;;  %v3042_v33 = vadd.f32 %v10547_v56, %v10500_v42 }
 0x244   : > { %v5615_v5 = vld [vmem:[#allocation2 + $0x600] ss:$2 sm:$0xff]  ;;  %v5966_v2 = vmax.f32 %v5487_v29, %v5743_v30  ;;  %v5871_v40 = vld [vmem:[#allocation2 + $0x601] ss:$2 sm:$0xff]  ;;  %5235 = vst.msk [vmem:[#allocation2 + $0x220] sm:$0xff] %vm5166_vm2, %v4978_v62  ;;  %5363 = vst.msk [vmem:[#allocation2 + $0x620] sm:$0xff] %vm5166_vm2, %v5106_v43  ;;  %v4337_v42 = vadd.f32 %v10547_v56, %v10514_v31 }
 0x245   : > { %v3101_v48 = vpop.f32.mrb[151].mxu0  ;;  %v4381_v51 = vpop.f32.mrb[151].mxu1  ;;  %v6030_v53 = vmax.f32 %v5615_v5, %v5871_v40  ;;  %v4981_v25 = vmax.f32 %v3027_v27, %v3107_v57  ;;  %v5109_v46 = vmax.f32 %v4307_v15, %v4387_v3 }
 0x246   : > { %v3102_v9 = vadd.f32 %v10547_v56, %v3101_v48  ;;  %6094 = vst.msk [vmem:[%s9114_s25 + $0x100] sm:$0xff] %vm5166_vm2, %v5966_v2  ;;  %v4382_v54 = vadd.f32 %v10547_v56, %v4381_v51  ;;  %v7577_v4 = vpop.f32.mrb[152].mxu0  ;;  %v7961_v17 = vpop.f32.mrb[152].mxu1  ;;  %v3057_v2 = vadd.f32 %v10547_v56, %v10512_v35 }
 0x247   : > { %6158 = vst.msk [vmem:[%s9114_s25 + $0x300] sm:$0xff] %vm5166_vm2, %v6030_v53  ;;  %v5489_v12 = vld [vmem:[#allocation2 + $0x210] ss:$2 sm:$0xff]  ;;  %v5745_v39 = vld [vmem:[#allocation2 + $0x211] ss:$2 sm:$0xff]  ;;  %5238 = vst.msk [vmem:[#allocation2 + $0x238] sm:$0xff] %vm5166_vm2, %v4981_v25  ;;  %v3117_v47 = vadd.f32 %v10547_v56, %v7577_v4  ;;  %v4397_v52 = vadd.f32 %v10547_v56, %v7961_v17  ;;  %v3052_v53 = vadd.f32 %v10547_v56, %v10516_v50 }
 0x248   : > { %v5617_v10 = vld [vmem:[#allocation2 + $0x610] ss:$2 sm:$0xff]  ;;  %5366 = vst.msk [vmem:[#allocation2 + $0x638] sm:$0xff] %vm5166_vm2, %v5109_v46  ;;  %v4980_v58 = vmax.f32 %v3022_v22, %v3102_v9  ;;  %v5967_v45 = vmax.f32 %v5489_v12, %v5745_v39  ;;  %v5873_v59 = vld [vmem:[#allocation2 + $0x611] ss:$2 sm:$0xff]  ;;  %v5108_v18 = vmax.f32 %v4302_v44, %v4382_v54  ;;  %v3111_v23 = vpop.f32.mrb[153].mxu0  ;;  %v4322_v22 = vadd.f32 %v10547_v56, %v10503_v26 }
 0x249   : > { %v4391_v11 = vpop.f32.mrb[153].mxu1  ;;  %v6031_v21 = vmax.f32 %v5617_v10, %v5873_v59  ;;  %v4983_v6 = vmax.f32 %v3037_v36, %v3117_v47  ;;  %v5111_v13 = vmax.f32 %v4317_v28, %v4397_v52  ;;  %v3112_v0 = vadd.f32 %v10547_v56, %v3111_v23 }
 0x24a   : > { %5237 = vst.msk [vmem:[#allocation2 + $0x230] sm:$0xff] %vm5166_vm2, %v4980_v58  ;;  %6095 = vst.msk [vmem:[%s9114_s25 + $0x108] sm:$0xff] %vm5166_vm2, %v5967_v45  ;;  %v4392_v49 = vadd.f32 %v10547_v56, %v4391_v11  ;;  %v7580_v14 = vpop.f32.mrb[154].mxu0  ;;  %v7964_v19 = vpop.f32.mrb[154].mxu1  ;;  %v4332_v9 = vadd.f32 %v10547_v56, %v10519_v55  ;;  %v3067_v45 = vadd.f32 %v10547_v56, %v10528_v8 }
 0x24b   : > { %5365 = vst.msk [vmem:[#allocation2 + $0x630] sm:$0xff] %vm5166_vm2, %v5108_v18  ;;  %6159 = vst.msk [vmem:[%s9114_s25 + $0x308] sm:$0xff] %vm5166_vm2, %v6031_v21  ;;  %v5491_v1 = vld [vmem:[#allocation2 + $0x220] ss:$2 sm:$0xff]  ;;  %v5747_v16 = vld [vmem:[#allocation2 + $0x221] ss:$2 sm:$0xff]  ;;  %v4982_v34 = vmax.f32 %v3032_v41, %v3112_v0  ;;  %v3127_v60 = vadd.f32 %v10547_v56, %v7580_v14  ;;  %v4407_v43 = vadd.f32 %v10547_v56, %v7964_v19 }
 0x24c   : > { %v5619_v62 = vld [vmem:[#allocation2 + $0x620] ss:$2 sm:$0xff]  ;;  %5240 = vst.msk [vmem:[#allocation2 + $0x248] sm:$0xff] %vm5166_vm2, %v4983_v6  ;;  %5368 = vst.msk [vmem:[#allocation2 + $0x648] sm:$0xff] %vm5166_vm2, %v5111_v13  ;;  %v5968_v37 = vmax.f32 %v5491_v1, %v5747_v16  ;;  %v5875_v24 = vld [vmem:[#allocation2 + $0x621] ss:$2 sm:$0xff]  ;;  %v5110_v27 = vmax.f32 %v4312_v61, %v4392_v49  ;;  %v4347_v59 = vadd.f32 %v10547_v56, %v10530_v63 }
 0x24d   : > { %v3121_v15 = vpop.f32.mrb[155].mxu0  ;;  %v4401_v29 = vpop.f32.mrb[155].mxu1  ;;  %v6032_v30 = vmax.f32 %v5619_v62, %v5875_v24  ;;  %5239 = vst.msk [vmem:[#allocation2 + $0x240] sm:$0xff] %vm5166_vm2, %v4982_v34  ;;  %v4985_v5 = vmax.f32 %v3047_v38, %v3127_v60  ;;  %v5113_v57 = vmax.f32 %v4327_v7, %v4407_v43  ;;  %v3062_v6 = vadd.f32 %v10547_v56, %v10532_v20 }
 0x24e   : > { %v3122_v3 = vadd.f32 %v10547_v56, %v3121_v15  ;;  %6096 = vst.msk [vmem:[%s9114_s25 + $0x110] sm:$0xff] %vm5166_vm2, %v5968_v37  ;;  %5367 = vst.msk [vmem:[#allocation2 + $0x640] sm:$0xff] %vm5166_vm2, %v5110_v27  ;;  %v4402_v40 = vadd.f32 %v10547_v56, %v4401_v29  ;;  %v7583_v48 = vpop.f32.mrb[156].mxu0  ;;  %v7967_v51 = vpop.f32.mrb[156].mxu1  ;;  %v4342_v8 = vadd.f32 %v10547_v56, %v10535_v32 }
 0x24f   : > { %6160 = vst.msk [vmem:[%s9114_s25 + $0x310] sm:$0xff] %vm5166_vm2, %v6032_v30  ;;  %5242 = vst.msk [vmem:[#allocation2 + $0x258] sm:$0xff] %vm5166_vm2, %v4985_v5  ;;  %v3137_v35 = vadd.f32 %v10547_v56, %v7583_v48  ;;  %v4417_v31 = vadd.f32 %v10547_v56, %v7967_v51  ;;  %v3131_v25 = vpop.f32.mrb[157].mxu0  ;;  %v4411_v46 = vpop.f32.mrb[157].mxu1 }
 0x250   : > { %5370 = vst.msk [vmem:[#allocation2 + $0x658] sm:$0xff] %vm5166_vm2, %v5113_v57  ;;  %v4984_v26 = vmax.f32 %v3042_v33, %v3122_v3  ;;  %v5112_v54 = vmax.f32 %v4322_v22, %v4402_v40  ;;  %v3132_v50 = vadd.f32 %v10547_v56, %v3131_v25  ;;  %v4412_v4 = vadd.f32 %v10547_v56, %v4411_v46 }
 0x251   : > { %v5493_v44 = vld [vmem:[#allocation2 + $0x230] ss:$2 sm:$0xff]  ;;  %v5749_v36 = vld [vmem:[#allocation2 + $0x231] ss:$2 sm:$0xff]  ;;  %v4987_v39 = vmax.f32 %v3057_v2, %v3137_v35  ;;  %v5115_v10 = vmax.f32 %v4337_v42, %v4417_v31 }
 0x252   : > { %v5969_v17 = vmax.f32 %v5493_v44, %v5749_v36  ;;  %v5621_v28 = vld [vmem:[#allocation2 + $0x630] ss:$2 sm:$0xff]  ;;  %v5877_v12 = vld [vmem:[#allocation2 + $0x631] ss:$2 sm:$0xff]  ;;  %5241 = vst.msk [vmem:[#allocation2 + $0x250] sm:$0xff] %vm5166_vm2, %v4984_v26  ;;  %5369 = vst.msk [vmem:[#allocation2 + $0x650] sm:$0xff] %vm5166_vm2, %v5112_v54  ;;  %v4986_v55 = vmax.f32 %v3052_v53, %v3132_v50  ;;  %v5114_v47 = vmax.f32 %v4332_v9, %v4412_v4 }
 0x253   : > { %v6033_v58 = vmax.f32 %v5621_v28, %v5877_v12  ;;  %v7586_v52 = vpop.f32.mrb[158].mxu0  ;;  %v7970_v41 = vpop.f32.mrb[158].mxu1  ;;  %5244 = vst.msk [vmem:[#allocation2 + $0x268] sm:$0xff] %vm5166_vm2, %v4987_v39  ;;  %5372 = vst.msk [vmem:[#allocation2 + $0x668] sm:$0xff] %vm5166_vm2, %v5115_v10 }
 0x254   : > { %6097 = vst.msk [vmem:[%s9114_s25 + $0x118] sm:$0xff] %vm5166_vm2, %v5969_v17  ;;  %v3147_v18 = vadd.f32 %v10547_v56, %v7586_v52  ;;  %v4427_v23 = vadd.f32 %v10547_v56, %v7970_v41  ;;  %v3141_v11 = vpop.f32.mrb[159].mxu0  ;;  %v4421_v21 = vpop.f32.mrb[159].mxu1  ;;  %v5495_v63 = vld [vmem:[#allocation2 + $0x240] ss:$2 sm:$0xff]  ;;  %5243 = vst.msk [vmem:[#allocation2 + $0x260] sm:$0xff] %vm5166_vm2, %v4986_v55 }
 0x255   : > { %6161 = vst.msk [vmem:[%s9114_s25 + $0x318] sm:$0xff] %vm5166_vm2, %v6033_v58  ;;  %v5751_v13 = vld [vmem:[#allocation2 + $0x241] ss:$2 sm:$0xff]  ;;  %5371 = vst.msk [vmem:[#allocation2 + $0x660] sm:$0xff] %vm5166_vm2, %v5114_v47  ;;  %v3142_v0 = vadd.f32 %v10547_v56, %v3141_v11  ;;  %v4422_v61 = vadd.f32 %v10547_v56, %v4421_v21  ;;  %v5623_v49 = vld [vmem:[#allocation2 + $0x640] ss:$2 sm:$0xff] }
 0x256   : > { %v5970_v38 = vmax.f32 %v5495_v63, %v5751_v13  ;;  %v5879_v20 = vld [vmem:[#allocation2 + $0x641] ss:$2 sm:$0xff]  ;;  %v4989_v14 = vmax.f32 %v3067_v45, %v3147_v18  ;;  %v5117_v19 = vmax.f32 %v4347_v59, %v4427_v23  ;;  %v10705_v16 = vpop.f32.mrb[160].mxu0  ;;  %v10707_v62 = vpop.f32.mrb[160].mxu1 }
 0x257   : > { %v6034_v32 = vmax.f32 %v5623_v49, %v5879_v20  ;;  %v4988_v7 = vmax.f32 %v3062_v6, %v3142_v0  ;;  %v5116_v1 = vmax.f32 %v4342_v8, %v4422_v61  ;;  %v10713_v34 = vpop.f32.mrb[161].mxu0  ;;  %v10715_v60 = vpop.f32.mrb[161].mxu1  ;;  %v3157_v13 = vadd.f32 %v10547_v56, %v10705_v16 }
 0x258   : > { %6098 = vst.msk [vmem:[%s9114_s25 + $0x120] sm:$0xff] %vm5166_vm2, %v5970_v38  ;;  %5246 = vst.msk [vmem:[#allocation2 + $0x278] sm:$0xff] %vm5166_vm2, %v4989_v14  ;;  %v4437_v0 = vadd.f32 %v10547_v56, %v10707_v62  ;;  %v3152_v14 = vadd.f32 %v10547_v56, %v10713_v34 }
 0x259   : > { %5374 = vst.msk [vmem:[#allocation2 + $0x678] sm:$0xff] %vm5166_vm2, %v5117_v19  ;;  %6162 = vst.msk [vmem:[%s9114_s25 + $0x320] sm:$0xff] %vm5166_vm2, %v6034_v32  ;;  %v5497_v43 = vld [vmem:[#allocation2 + $0x250] ss:$2 sm:$0xff]  ;;  %v5753_v33 = vld [vmem:[#allocation2 + $0x251] ss:$2 sm:$0xff]  ;;  %v4432_v19 = vadd.f32 %v10547_v56, %v10715_v60 }
 0x25a   : > { %5245 = vst.msk [vmem:[#allocation2 + $0x270] sm:$0xff] %vm5166_vm2, %v4988_v7  ;;  %5373 = vst.msk [vmem:[#allocation2 + $0x670] sm:$0xff] %vm5166_vm2, %v5116_v1  ;;  %v5971_v37 = vmax.f32 %v5497_v43, %v5753_v33  ;;  %v5625_v24 = vld [vmem:[#allocation2 + $0x650] ss:$2 sm:$0xff]  ;;  %v5881_v27 = vld [vmem:[#allocation2 + $0x651] ss:$2 sm:$0xff] }
 0x25b   : > { %v6035_v15 = vmax.f32 %v5625_v24, %v5881_v27  ;;  %v10721_v29 = vpop.f32.mrb[162].mxu0  ;;  %v10723_v30 = vpop.f32.mrb[162].mxu1  ;;  %v5499_v5 = vld [vmem:[#allocation2 + $0x260] ss:$2 sm:$0xff]  ;;  %v5755_v57 = vld [vmem:[#allocation2 + $0x261] ss:$2 sm:$0xff] }
 0x25c   : > { %6099 = vst.msk [vmem:[%s9114_s25 + $0x128] sm:$0xff] %vm5166_vm2, %v5971_v37  ;;  %v5627_v3 = vld [vmem:[#allocation2 + $0x660] ss:$2 sm:$0xff]  ;;  %v5972_v22 = vmax.f32 %v5499_v5, %v5755_v57  ;;  %v5883_v2 = vld [vmem:[#allocation2 + $0x661] ss:$2 sm:$0xff]  ;;  %v10729_v42 = vpop.f32.mrb[163].mxu0  ;;  %v3167_v24 = vadd.f32 %v10547_v56, %v10721_v29  ;;  %v4447_v27 = vadd.f32 %v10547_v56, %v10723_v30 }
 0x25d   : > { %6163 = vst.msk [vmem:[%s9114_s25 + $0x328] sm:$0xff] %vm5166_vm2, %v6035_v15  ;;  %v10731_v40 = vpop.f32.mrb[163].mxu1  ;;  %v6036_v48 = vmax.f32 %v5627_v3, %v5883_v2  ;;  %v3162_v57 = vadd.f32 %v10547_v56, %v10729_v42 }
 0x25e   : > { %6100 = vst.msk [vmem:[%s9114_s25 + $0x130] sm:$0xff] %vm5166_vm2, %v5972_v22  ;;  %v10735_v51 = vpop.f32.mrb[164].mxu0  ;;  %v10737_v53 = vpop.f32.mrb[164].mxu1  ;;  %v4442_v3 = vadd.f32 %v10547_v56, %v10731_v40 }
 0x25f   : > { %6164 = vst.msk [vmem:[%s9114_s25 + $0x330] sm:$0xff] %vm5166_vm2, %v6036_v48  ;;  %v10741_v9 = vpop.f32.mrb[165].mxu0  ;;  %v10743_v44 = vpop.f32.mrb[165].mxu1  ;;  %v3177_v42 = vadd.f32 %v10547_v56, %v10735_v51  ;;  %v4457_v40 = vadd.f32 %v10547_v56, %v10737_v53 }
 0x261   : > { %v5501_v26 = vld [vmem:[#allocation2 + $0x270] ss:$2 sm:$0xff]  ;;  %v5757_v35 = vld [vmem:[#allocation2 + $0x271] ss:$2 sm:$0xff] }
 0x262   : > { %v5629_v31 = vld [vmem:[#allocation2 + $0x670] ss:$2 sm:$0xff]  ;;  %v5973_v25 = vmax.f32 %v5501_v26, %v5757_v35  ;;  %v5885_v46 = vld [vmem:[#allocation2 + $0x671] ss:$2 sm:$0xff]  ;;  %v10747_v54 = vpop.f32.mrb[166].mxu0  ;;  %v10749_v50 = vpop.f32.mrb[166].mxu1 }
 0x263   : > { %v6037_v36 = vmax.f32 %v5629_v31, %v5885_v46  ;;  %v10753_v4 = vpop.f32.mrb[167].mxu0  ;;  %v10755_v17 = vpop.f32.mrb[167].mxu1 }
 0x264   : > { %6101 = vst.msk [vmem:[%s9114_s25 + $0x138] sm:$0xff] %vm5166_vm2, %v5973_v25 }
 0x265   : > { %6165 = vst.msk [vmem:[%s9114_s25 + $0x338] sm:$0xff] %vm5166_vm2, %v6037_v36 }
 0x266   : > { %v10757_v28 = vpop.f32.mrb[168].mxu0 }
 0x267   : > { %v10759_v12 = vpop.f32.mrb[168].mxu1  ;;  %v10761_v39 = vpop.f32.mrb[169].mxu0 }
 0x268   : > { %v10763_v10 = vpop.f32.mrb[169].mxu1 }
 0x26a   : > { %v10765_v58 = vpop.f32.mrb[170].mxu0 }
 0x26b   : > { %v10767_v55 = vpop.f32.mrb[170].mxu1  ;;  %v10769_v47 = vpop.f32.mrb[171].mxu0 }
 0x26c   : > { %v10771_v52 = vpop.f32.mrb[171].mxu1 }
 0x26e   : > { %v10773_v41 = vpop.f32.mrb[172].mxu0 }
 0x26f   : > { %v10775_v45 = vpop.f32.mrb[172].mxu1  ;;  %v10777_v59 = vpop.f32.mrb[173].mxu0 }
 0x270   : > { %v10779_v18 = vpop.f32.mrb[173].mxu1 }
 0x272   : > { %v10781_v23 = vpop.f32.mrb[174].mxu0 }
 0x273   : > { %v10783_v11 = vpop.f32.mrb[174].mxu1  ;;  %v10785_v21 = vpop.f32.mrb[175].mxu0 }
 0x274   : > { %v10787_v6 = vpop.f32.mrb[175].mxu1 }
 0x276   : > { %v7613_v8 = vpop.f32.mrb[176].mxu0 }
 0x277   : > { %v7997_v63 = vpop.f32.mrb[176].mxu1  ;;  %v3237_v61 = vadd.f32 %v10547_v56, %v7613_v8  ;;  %v3231_v49 = vpop.f32.mrb[177].mxu0 }
 0x278   : > { %v4517_v38 = vadd.f32 %v10547_v56, %v7997_v63  ;;  %v4511_v20 = vpop.f32.mrb[177].mxu1  ;;  %v3232_v32 = vadd.f32 %v10547_v56, %v3231_v49  ;;  %v3172_v63 = vadd.f32 %v10547_v56, %v10741_v9  ;;  %v3187_v9 = vadd.f32 %v10547_v56, %v10747_v54 }
 0x279   : > { %v4512_v7 = vadd.f32 %v10547_v56, %v4511_v20  ;;  %v4991_v1 = vmax.f32 %v3157_v13, %v3237_v61  ;;  %v4452_v13 = vadd.f32 %v10547_v56, %v10743_v44  ;;  %v4467_v44 = vadd.f32 %v10547_v56, %v10749_v50 }
 0x27a   : > { %v5119_v16 = vmax.f32 %v4437_v0, %v4517_v38  ;;  %v4990_v43 = vmax.f32 %v3152_v14, %v3232_v32  ;;  %v7616_v33 = vpop.f32.mrb[178].mxu0 }
 0x27b   : > { %v5118_v62 = vmax.f32 %v4432_v19, %v4512_v7  ;;  %v8000_v37 = vpop.f32.mrb[178].mxu1  ;;  %5248 = vst.msk [vmem:[#allocation2 + $0x288] sm:$0xff] %vm5166_vm2, %v4991_v1  ;;  %v3247_v34 = vadd.f32 %v10547_v56, %v7616_v33  ;;  %v3241_v15 = vpop.f32.mrb[179].mxu0 }
 0x27c   : > { %5376 = vst.msk [vmem:[#allocation2 + $0x688] sm:$0xff] %vm5166_vm2, %v5119_v16  ;;  %v4527_v60 = vadd.f32 %v10547_v56, %v8000_v37  ;;  %v4521_v5 = vpop.f32.mrb[179].mxu1  ;;  %5247 = vst.msk [vmem:[#allocation2 + $0x280] sm:$0xff] %vm5166_vm2, %v4990_v43  ;;  %v3242_v29 = vadd.f32 %v10547_v56, %v3241_v15  ;;  %v3182_v43 = vadd.f32 %v10547_v56, %v10753_v4 }
 0x27d   : > { %5375 = vst.msk [vmem:[#allocation2 + $0x680] sm:$0xff] %vm5166_vm2, %v5118_v62  ;;  %v4522_v30 = vadd.f32 %v10547_v56, %v4521_v5  ;;  %v4993_v22 = vmax.f32 %v3167_v24, %v3247_v34  ;;  %v3197_v4 = vadd.f32 %v10547_v56, %v10757_v28 }
 0x27e   : > { %v5121_v2 = vmax.f32 %v4447_v27, %v4527_v60  ;;  %v4992_v48 = vmax.f32 %v3162_v57, %v3242_v29  ;;  %v7619_v35 = vpop.f32.mrb[180].mxu0  ;;  %v4462_v60 = vadd.f32 %v10547_v56, %v10755_v17 }
 0x27f   : > { %v5120_v26 = vmax.f32 %v4442_v3, %v4522_v30  ;;  %v8003_v31 = vpop.f32.mrb[180].mxu1  ;;  %5250 = vst.msk [vmem:[#allocation2 + $0x298] sm:$0xff] %vm5166_vm2, %v4993_v22  ;;  %v3257_v25 = vadd.f32 %v10547_v56, %v7619_v35  ;;  %v3251_v36 = vpop.f32.mrb[181].mxu0  ;;  %v4477_v3 = vadd.f32 %v10547_v56, %v10759_v12 }
 0x280   : > { %5378 = vst.msk [vmem:[#allocation2 + $0x698] sm:$0xff] %vm5166_vm2, %v5121_v2  ;;  %v4537_v46 = vadd.f32 %v10547_v56, %v8003_v31  ;;  %v4531_v8 = vpop.f32.mrb[181].mxu1  ;;  %5249 = vst.msk [vmem:[#allocation2 + $0x290] sm:$0xff] %vm5166_vm2, %v4992_v48  ;;  %v3252_v51 = vadd.f32 %v10547_v56, %v3251_v36  ;;  %v3192_v48 = vadd.f32 %v10547_v56, %v10761_v39 }
 0x281   : > { %5377 = vst.msk [vmem:[#allocation2 + $0x690] sm:$0xff] %vm5166_vm2, %v5120_v26  ;;  %v4532_v53 = vadd.f32 %v10547_v56, %v4531_v8  ;;  %v4995_v0 = vmax.f32 %v3177_v42, %v3257_v25  ;;  %v4472_v8 = vadd.f32 %v10547_v56, %v10763_v10 }
 0x282   : > { %v5123_v61 = vmax.f32 %v4457_v40, %v4537_v46  ;;  %v4994_v38 = vmax.f32 %v3172_v63, %v3252_v51  ;;  %v7622_v20 = vpop.f32.mrb[182].mxu0  ;;  %v3207_v63 = vadd.f32 %v10547_v56, %v10765_v58 }
 0x283   : > { %v5122_v49 = vmax.f32 %v4452_v13, %v4532_v53  ;;  %v8006_v14 = vpop.f32.mrb[182].mxu1  ;;  %v5503_v19 = vld [vmem:[#allocation2 + $0x280] ss:$2 sm:$0xff]  ;;  %v5759_v32 = vld [vmem:[#allocation2 + $0x281] ss:$2 sm:$0xff]  ;;  %5252 = vst.msk [vmem:[#allocation2 + $0x2a8] sm:$0xff] %vm5166_vm2, %v4995_v0  ;;  %v3267_v1 = vadd.f32 %v10547_v56, %v7622_v20  ;;  %v4487_v53 = vadd.f32 %v10547_v56, %v10767_v55  ;;  %v3202_v20 = vadd.f32 %v10547_v56, %v10769_v47 }
 0x284   : > { %v5631_v7 = vld [vmem:[#allocation2 + $0x680] ss:$2 sm:$0xff]  ;;  %5380 = vst.msk [vmem:[#allocation2 + $0x6a8] sm:$0xff] %vm5166_vm2, %v5123_v61  ;;  %v4547_v16 = vadd.f32 %v10547_v56, %v8006_v14  ;;  %v5974_v62 = vmax.f32 %v5503_v19, %v5759_v32  ;;  %v5887_v54 = vld [vmem:[#allocation2 + $0x681] ss:$2 sm:$0xff]  ;;  %5251 = vst.msk [vmem:[#allocation2 + $0x2a0] sm:$0xff] %vm5166_vm2, %v4994_v38  ;;  %v4497_v47 = vadd.f32 %v10547_v56, %v10775_v45 }
 0x285   : > { %5379 = vst.msk [vmem:[#allocation2 + $0x6a0] sm:$0xff] %vm5166_vm2, %v5122_v49  ;;  %v3261_v50 = vpop.f32.mrb[183].mxu0  ;;  %v4541_v33 = vpop.f32.mrb[183].mxu1  ;;  %v6038_v37 = vmax.f32 %v5631_v7, %v5887_v54  ;;  %v4997_v24 = vmax.f32 %v3187_v9, %v3267_v1 }
 0x286   : > { %v5125_v27 = vmax.f32 %v4467_v44, %v4547_v16  ;;  %v3262_v34 = vadd.f32 %v10547_v56, %v3261_v50  ;;  %6102 = vst.msk [vmem:[%s9114_s25 + $0x140] sm:$0xff] %vm5166_vm2, %v5974_v62  ;;  %v4542_v15 = vadd.f32 %v10547_v56, %v4541_v33  ;;  %v7625_v5 = vpop.f32.mrb[184].mxu0  ;;  %v3217_v62 = vadd.f32 %v10547_v56, %v10773_v41 }
 0x287   : > { %v8009_v57 = vpop.f32.mrb[184].mxu1  ;;  %6166 = vst.msk [vmem:[%s9114_s25 + $0x340] sm:$0xff] %vm5166_vm2, %v6038_v37  ;;  %v5505_v29 = vld [vmem:[#allocation2 + $0x290] ss:$2 sm:$0xff]  ;;  %v5761_v30 = vld [vmem:[#allocation2 + $0x291] ss:$2 sm:$0xff]  ;;  %v3277_v28 = vadd.f32 %v10547_v56, %v7625_v5  ;;  %v3212_v37 = vadd.f32 %v10547_v56, %v10777_v59 }
 0x288   : > { %v5633_v22 = vld [vmem:[#allocation2 + $0x690] ss:$2 sm:$0xff]  ;;  %5254 = vst.msk [vmem:[#allocation2 + $0x2b8] sm:$0xff] %vm5166_vm2, %v4997_v24  ;;  %5382 = vst.msk [vmem:[#allocation2 + $0x6b8] sm:$0xff] %vm5166_vm2, %v5125_v27  ;;  %v4996_v17 = vmax.f32 %v3182_v43, %v3262_v34  ;;  %v4557_v2 = vadd.f32 %v10547_v56, %v8009_v57  ;;  %v5975_v26 = vmax.f32 %v5505_v29, %v5761_v30  ;;  %v5889_v12 = vld [vmem:[#allocation2 + $0x691] ss:$2 sm:$0xff] }
 0x289   : > { %v5124_v35 = vmax.f32 %v4462_v60, %v4542_v15  ;;  %v3271_v31 = vpop.f32.mrb[185].mxu0  ;;  %v4551_v42 = vpop.f32.mrb[185].mxu1  ;;  %v6039_v40 = vmax.f32 %v5633_v22, %v5889_v12  ;;  %v4999_v25 = vmax.f32 %v3197_v4, %v3277_v28  ;;  %v4482_v43 = vadd.f32 %v10547_v56, %v10771_v52 }
 0x28a   : > { %5253 = vst.msk [vmem:[#allocation2 + $0x2b0] sm:$0xff] %vm5166_vm2, %v4996_v17  ;;  %v5127_v46 = vmax.f32 %v4477_v3, %v4557_v2  ;;  %v3272_v36 = vadd.f32 %v10547_v56, %v3271_v31  ;;  %6103 = vst.msk [vmem:[%s9114_s25 + $0x148] sm:$0xff] %vm5166_vm2, %v5975_v26  ;;  %v4552_v39 = vadd.f32 %v10547_v56, %v4551_v42  ;;  %v7628_v13 = vpop.f32.mrb[186].mxu0 }
 0x28b   : > { %5381 = vst.msk [vmem:[#allocation2 + $0x6b0] sm:$0xff] %vm5166_vm2, %v5124_v35  ;;  %v8012_v51 = vpop.f32.mrb[186].mxu1  ;;  %6167 = vst.msk [vmem:[%s9114_s25 + $0x348] sm:$0xff] %vm5166_vm2, %v6039_v40  ;;  %v5507_v0 = vld [vmem:[#allocation2 + $0x2a0] ss:$2 sm:$0xff]  ;;  %v3287_v58 = vadd.f32 %v10547_v56, %v7628_v13  ;;  %v3281_v44 = vpop.f32.mrb[187].mxu0  ;;  %v4492_v34 = vadd.f32 %v10547_v56, %v10779_v18  ;;  %v3227_v26 = vadd.f32 %v10547_v56, %v10781_v23 }
 0x28c   : > { %v5763_v61 = vld [vmem:[#allocation2 + $0x2a1] ss:$2 sm:$0xff]  ;;  %v5635_v38 = vld [vmem:[#allocation2 + $0x6a0] ss:$2 sm:$0xff]  ;;  %5256 = vst.msk [vmem:[#allocation2 + $0x2c8] sm:$0xff] %vm5166_vm2, %v4999_v25  ;;  %5384 = vst.msk [vmem:[#allocation2 + $0x6c8] sm:$0xff] %vm5166_vm2, %v5127_v46  ;;  %v4998_v10 = vmax.f32 %v3192_v48, %v3272_v36  ;;  %v4567_v49 = vadd.f32 %v10547_v56, %v8012_v51  ;;  %v5126_v9 = vmax.f32 %v4472_v8, %v4552_v39 }
 0x28d   : > { %v5976_v14 = vmax.f32 %v5507_v0, %v5763_v61  ;;  %v5891_v55 = vld [vmem:[#allocation2 + $0x6a1] ss:$2 sm:$0xff]  ;;  %v4561_v19 = vpop.f32.mrb[187].mxu1  ;;  %v5001_v7 = vmax.f32 %v3207_v63, %v3287_v58  ;;  %v3282_v16 = vadd.f32 %v10547_v56, %v3281_v44  ;;  %v4507_v12 = vadd.f32 %v10547_v56, %v10783_v11 }
 0x28e   : > { %v6040_v32 = vmax.f32 %v5635_v38, %v5891_v55  ;;  %5255 = vst.msk [vmem:[#allocation2 + $0x2c0] sm:$0xff] %vm5166_vm2, %v4998_v10  ;;  %v5129_v1 = vmax.f32 %v4487_v53, %v4567_v49  ;;  %5383 = vst.msk [vmem:[#allocation2 + $0x6c0] sm:$0xff] %vm5166_vm2, %v5126_v9  ;;  %v4562_v54 = vadd.f32 %v10547_v56, %v4561_v19  ;;  %v7631_v50 = vpop.f32.mrb[188].mxu0 }
 0x28f   : > { %6104 = vst.msk [vmem:[%s9114_s25 + $0x150] sm:$0xff] %vm5166_vm2, %v5976_v14  ;;  %v8015_v33 = vpop.f32.mrb[188].mxu1  ;;  %5258 = vst.msk [vmem:[#allocation2 + $0x2d8] sm:$0xff] %vm5166_vm2, %v5001_v7  ;;  %v5000_v52 = vmax.f32 %v3202_v20, %v3282_v16  ;;  %v3297_v41 = vadd.f32 %v10547_v56, %v7631_v50  ;;  %v3291_v24 = vpop.f32.mrb[189].mxu0  ;;  %v3222_v25 = vadd.f32 %v10547_v56, %v10785_v21 }
 0x290   : > { %6168 = vst.msk [vmem:[%s9114_s25 + $0x350] sm:$0xff] %vm5166_vm2, %v6040_v32  ;;  %5386 = vst.msk [vmem:[#allocation2 + $0x6d8] sm:$0xff] %vm5166_vm2, %v5129_v1  ;;  %v4577_v45 = vadd.f32 %v10547_v56, %v8015_v33  ;;  %v4571_v27 = vpop.f32.mrb[189].mxu1  ;;  %v5128_v15 = vmax.f32 %v4482_v43, %v4562_v54  ;;  %v3292_v59 = vadd.f32 %v10547_v56, %v3291_v24 }
 0x291   : > { %v5509_v60 = vld [vmem:[#allocation2 + $0x2b0] ss:$2 sm:$0xff]  ;;  %v5765_v4 = vld [vmem:[#allocation2 + $0x2b1] ss:$2 sm:$0xff]  ;;  %v4572_v5 = vadd.f32 %v10547_v56, %v4571_v27  ;;  %5257 = vst.msk [vmem:[#allocation2 + $0x2d0] sm:$0xff] %vm5166_vm2, %v5000_v52  ;;  %v5003_v30 = vmax.f32 %v3217_v62, %v3297_v41  ;;  %v4502_v23 = vadd.f32 %v10547_v56, %v10787_v6 }
 0x292   : > { %v5977_v57 = vmax.f32 %v5509_v60, %v5765_v4  ;;  %v5637_v3 = vld [vmem:[#allocation2 + $0x6b0] ss:$2 sm:$0xff]  ;;  %v5893_v29 = vld [vmem:[#allocation2 + $0x6b1] ss:$2 sm:$0xff]  ;;  %v5131_v22 = vmax.f32 %v4497_v47, %v4577_v45  ;;  %5385 = vst.msk [vmem:[#allocation2 + $0x6d0] sm:$0xff] %vm5166_vm2, %v5128_v15  ;;  %v5002_v18 = vmax.f32 %v3212_v37, %v3292_v59  ;;  %v7634_v2 = vpop.f32.mrb[190].mxu0 }
 0x293   : > { %v6041_v17 = vmax.f32 %v5637_v3, %v5893_v29  ;;  %v5130_v28 = vmax.f32 %v4492_v34, %v4572_v5  ;;  %v8018_v48 = vpop.f32.mrb[190].mxu1  ;;  %5260 = vst.msk [vmem:[#allocation2 + $0x2e8] sm:$0xff] %vm5166_vm2, %v5003_v30  ;;  %v3307_v35 = vadd.f32 %v10547_v56, %v7634_v2  ;;  %v3301_v42 = vpop.f32.mrb[191].mxu0 }
 0x294   : > { %6105 = vst.msk [vmem:[%s9114_s25 + $0x158] sm:$0xff] %vm5166_vm2, %v5977_v57  ;;  %5388 = vst.msk [vmem:[#allocation2 + $0x6e8] sm:$0xff] %vm5166_vm2, %v5131_v22  ;;  %v4587_v31 = vadd.f32 %v10547_v56, %v8018_v48  ;;  %v4581_v40 = vpop.f32.mrb[191].mxu1  ;;  %v3302_v36 = vadd.f32 %v10547_v56, %v3301_v42 }
 0x295   : > { %6169 = vst.msk [vmem:[%s9114_s25 + $0x358] sm:$0xff] %vm5166_vm2, %v6041_v17  ;;  %v5511_v11 = vld [vmem:[#allocation2 + $0x2c0] ss:$2 sm:$0xff]  ;;  %v5767_v46 = vld [vmem:[#allocation2 + $0x2c1] ss:$2 sm:$0xff]  ;;  %5259 = vst.msk [vmem:[#allocation2 + $0x2e0] sm:$0xff] %vm5166_vm2, %v5002_v18  ;;  %v4582_v8 = vadd.f32 %v10547_v56, %v4581_v40  ;;  %v5005_v13 = vmax.f32 %v3227_v26, %v3307_v35 }
 0x296   : > { %5387 = vst.msk [vmem:[#allocation2 + $0x6e0] sm:$0xff] %vm5166_vm2, %v5130_v28  ;;  %v5978_v63 = vmax.f32 %v5511_v11, %v5767_v46  ;;  %v5639_v39 = vld [vmem:[#allocation2 + $0x6c0] ss:$2 sm:$0xff]  ;;  %v5895_v21 = vld [vmem:[#allocation2 + $0x6c1] ss:$2 sm:$0xff]  ;;  %v5133_v51 = vmax.f32 %v4507_v12, %v4587_v31  ;;  %v5004_v53 = vmax.f32 %v3222_v25, %v3302_v36  ;;  %v10929_v61 = vpop.f32.mrb[192].mxu0 }
 0x297   : > { %v6042_v6 = vmax.f32 %v5639_v39, %v5895_v21  ;;  %v5132_v0 = vmax.f32 %v4502_v23, %v4582_v8  ;;  %v10931_v38 = vpop.f32.mrb[192].mxu1  ;;  %5262 = vst.msk [vmem:[#allocation2 + $0x2f8] sm:$0xff] %vm5166_vm2, %v5005_v13  ;;  %v10937_v56 = vpop.f32.mrb[193].mxu0  ;;  %v11016_v11 = vld [vmem:[%s11428_s2] ss:$0 sm:$0xff] }
 0x298   : > { %6106 = vst.msk [vmem:[%s9114_s25 + $0x160] sm:$0xff] %vm5166_vm2, %v5978_v63  ;;  %5390 = vst.msk [vmem:[#allocation2 + $0x6f8] sm:$0xff] %vm5166_vm2, %v5133_v51  ;;  %v10939_v10 = vpop.f32.mrb[193].mxu1  ;;  %v5513_v58 = vld [vmem:[#allocation2 + $0x2d0] ss:$2 sm:$0xff]  ;;  %v3317_v46 = vadd.f32 %v11016_v11, %v10929_v61  ;;  %v4597_v36 = vadd.f32 %v11016_v11, %v10931_v38  ;;  %v3312_v13 = vadd.f32 %v11016_v11, %v10937_v56 }
 0x299   : > { %6170 = vst.msk [vmem:[%s9114_s25 + $0x360] sm:$0xff] %vm5166_vm2, %v6042_v6  ;;  %v5769_v49 = vld [vmem:[#allocation2 + $0x2d1] ss:$2 sm:$0xff]  ;;  %5261 = vst.msk [vmem:[#allocation2 + $0x2f0] sm:$0xff] %vm5166_vm2, %v5004_v53  ;;  %v5641_v14 = vld [vmem:[#allocation2 + $0x6d0] ss:$2 sm:$0xff]  ;;  %v4592_v51 = vadd.f32 %v11016_v11, %v10939_v10 }
 0x29a   : > { %5389 = vst.msk [vmem:[#allocation2 + $0x6f0] sm:$0xff] %vm5166_vm2, %v5132_v0  ;;  %v5979_v20 = vmax.f32 %v5513_v58, %v5769_v49  ;;  %v5897_v55 = vld [vmem:[#allocation2 + $0x6d1] ss:$2 sm:$0xff]  ;;  %v10945_v44 = vpop.f32.mrb[194].mxu0 }
 0x29b   : > { %v6043_v9 = vmax.f32 %v5641_v14, %v5897_v55  ;;  %v10947_v19 = vpop.f32.mrb[194].mxu1  ;;  %v10953_v62 = vpop.f32.mrb[195].mxu0  ;;  %v3327_v14 = vadd.f32 %v11016_v11, %v10945_v44 }
 0x29c   : > { %6107 = vst.msk [vmem:[%s9114_s25 + $0x168] sm:$0xff] %vm5166_vm2, %v5979_v20  ;;  %v5515_v32 = vld [vmem:[#allocation2 + $0x2e0] ss:$2 sm:$0xff]  ;;  %v5771_v7 = vld [vmem:[#allocation2 + $0x2e1] ss:$2 sm:$0xff]  ;;  %v10955_v47 = vpop.f32.mrb[195].mxu1  ;;  %v4607_v55 = vadd.f32 %v11016_v11, %v10947_v19 }
 0x29d   : > { %v5643_v1 = vld [vmem:[#allocation2 + $0x6e0] ss:$2 sm:$0xff]  ;;  %6171 = vst.msk [vmem:[%s9114_s25 + $0x368] sm:$0xff] %vm5166_vm2, %v6043_v9  ;;  %v5980_v16 = vmax.f32 %v5515_v32, %v5771_v7  ;;  %v5899_v43 = vld [vmem:[#allocation2 + $0x6e1] ss:$2 sm:$0xff]  ;;  %v3322_v7 = vadd.f32 %v11016_v11, %v10953_v62 }
 0x29e   : > { %v6044_v54 = vmax.f32 %v5643_v1, %v5899_v43  ;;  %v10959_v50 = vpop.f32.mrb[196].mxu0  ;;  %v4602_v1 = vadd.f32 %v11016_v11, %v10955_v47 }
 0x29f   : > { %6108 = vst.msk [vmem:[%s9114_s25 + $0x170] sm:$0xff] %vm5166_vm2, %v5980_v16  ;;  %v10961_v33 = vpop.f32.mrb[196].mxu1  ;;  %v10965_v27 = vpop.f32.mrb[197].mxu0  ;;  %v3337_v62 = vadd.f32 %v11016_v11, %v10959_v50 }
 0x2a0   : > { %6172 = vst.msk [vmem:[%s9114_s25 + $0x370] sm:$0xff] %vm5166_vm2, %v6044_v54  ;;  %v5517_v37 = vld [vmem:[#allocation2 + $0x2f0] ss:$2 sm:$0xff]  ;;  %v5773_v52 = vld [vmem:[#allocation2 + $0x2f1] ss:$2 sm:$0xff]  ;;  %v10967_v34 = vpop.f32.mrb[197].mxu1  ;;  %v4617_v47 = vadd.f32 %v11016_v11, %v10961_v33 }
 0x2a1   : > { %v5645_v41 = vld [vmem:[#allocation2 + $0x6f0] ss:$2 sm:$0xff]  ;;  %v5981_v45 = vmax.f32 %v5517_v37, %v5773_v52  ;;  %v5901_v24 = vld [vmem:[#allocation2 + $0x6f1] ss:$2 sm:$0xff] }
 0x2a2   : > { %v6045_v60 = vmax.f32 %v5645_v41, %v5901_v24  ;;  %v10971_v4 = vpop.f32.mrb[198].mxu0 }
 0x2a3   : > { %6109 = vst.msk [vmem:[%s9114_s25 + $0x178] sm:$0xff] %vm5166_vm2, %v5981_v45  ;;  %v10973_v15 = vpop.f32.mrb[198].mxu1  ;;  %v10977_v59 = vpop.f32.mrb[199].mxu0 }
 0x2a4   : > { %6173 = vst.msk [vmem:[%s9114_s25 + $0x378] sm:$0xff] %vm5166_vm2, %v6045_v60  ;;  %v10979_v5 = vpop.f32.mrb[199].mxu1 }
 0x2a6   : > { %v10981_v57 = vpop.f32.mrb[200].mxu0 }
 0x2a7   : > { %v10983_v3 = vpop.f32.mrb[200].mxu1  ;;  %v10985_v29 = vpop.f32.mrb[201].mxu0 }
 0x2a8   : > { %v10987_v30 = vpop.f32.mrb[201].mxu1 }
 0x2aa   : > { %v10989_v22 = vpop.f32.mrb[202].mxu0 }
 0x2ab   : > { %v10991_v17 = vpop.f32.mrb[202].mxu1  ;;  %v10993_v18 = vpop.f32.mrb[203].mxu0 }
 0x2ac   : > { %v10995_v28 = vpop.f32.mrb[203].mxu1 }
 0x2ae   : > { %v10997_v2 = vpop.f32.mrb[204].mxu0 }
 0x2af   : > { %v10999_v48 = vpop.f32.mrb[204].mxu1  ;;  %v11001_v26 = vpop.f32.mrb[205].mxu0 }
 0x2b0   : > { %v11003_v12 = vpop.f32.mrb[205].mxu1 }
 0x2b2   : > { %v11005_v35 = vpop.f32.mrb[206].mxu0 }
 0x2b3   : > { %v11007_v31 = vpop.f32.mrb[206].mxu1  ;;  %v11009_v42 = vpop.f32.mrb[207].mxu0 }
 0x2b4   : > { %v11011_v40 = vpop.f32.mrb[207].mxu1 }
 0x2b6   : > { %v7661_v25 = vpop.f32.mrb[208].mxu0 }
 0x2b7   : > { %v8045_v23 = vpop.f32.mrb[208].mxu1  ;;  %v3397_v8 = vadd.f32 %v11016_v11, %v7661_v25  ;;  %v3391_v39 = vpop.f32.mrb[209].mxu0 }
 0x2b8   : > { %v4677_v63 = vadd.f32 %v11016_v11, %v8045_v23  ;;  %v4671_v21 = vpop.f32.mrb[209].mxu1  ;;  %v3392_v6 = vadd.f32 %v11016_v11, %v3391_v39  ;;  %v3332_v23 = vadd.f32 %v11016_v11, %v10965_v27  ;;  %v3347_v27 = vadd.f32 %v11016_v11, %v10971_v4 }
 0x2b9   : > { %v4672_v53 = vadd.f32 %v11016_v11, %v4671_v21  ;;  %v5007_v0 = vmax.f32 %v3317_v46, %v3397_v8  ;;  %v4612_v46 = vadd.f32 %v11016_v11, %v10967_v34  ;;  %v4627_v34 = vadd.f32 %v11016_v11, %v10973_v15 }
 0x2ba   : > { %v5135_v61 = vmax.f32 %v4597_v36, %v4677_v63  ;;  %v5006_v58 = vmax.f32 %v3312_v13, %v3392_v6  ;;  %v7664_v49 = vpop.f32.mrb[210].mxu0 }
 0x2bb   : > { %v5134_v38 = vmax.f32 %v4592_v51, %v4672_v53  ;;  %v8048_v20 = vpop.f32.mrb[210].mxu1  ;;  %5264 = vst.msk [vmem:[#allocation2 + $0x308] sm:$0xff] %vm5166_vm2, %v5007_v0  ;;  %v3407_v56 = vadd.f32 %v11016_v11, %v7664_v49  ;;  %v3401_v9 = vpop.f32.mrb[211].mxu0 }
 0x2bc   : > { %5392 = vst.msk [vmem:[#allocation2 + $0x708] sm:$0xff] %vm5166_vm2, %v5135_v61  ;;  %v4687_v10 = vadd.f32 %v11016_v11, %v8048_v20  ;;  %v4681_v32 = vpop.f32.mrb[211].mxu1  ;;  %5263 = vst.msk [vmem:[#allocation2 + $0x300] sm:$0xff] %vm5166_vm2, %v5006_v58  ;;  %v3402_v44 = vadd.f32 %v11016_v11, %v3401_v9  ;;  %v3342_v58 = vadd.f32 %v11016_v11, %v10977_v59 }
 0x2bd   : > { %5391 = vst.msk [vmem:[#allocation2 + $0x700] sm:$0xff] %vm5166_vm2, %v5134_v38  ;;  %v4682_v19 = vadd.f32 %v11016_v11, %v4681_v32  ;;  %v5009_v16 = vmax.f32 %v3327_v14, %v3407_v56  ;;  %v3357_v59 = vadd.f32 %v11016_v11, %v10981_v57 }
 0x2be   : > { %v5137_v43 = vmax.f32 %v4607_v55, %v4687_v10  ;;  %v5008_v54 = vmax.f32 %v3322_v7, %v3402_v44  ;;  %v7667_v52 = vpop.f32.mrb[212].mxu0  ;;  %v4622_v10 = vadd.f32 %v11016_v11, %v10979_v5 }
 0x2bf   : > { %v5136_v37 = vmax.f32 %v4602_v1, %v4682_v19  ;;  %v8051_v41 = vpop.f32.mrb[212].mxu1  ;;  %5266 = vst.msk [vmem:[#allocation2 + $0x318] sm:$0xff] %vm5166_vm2, %v5009_v16  ;;  %v3417_v45 = vadd.f32 %v11016_v11, %v7667_v52  ;;  %v3411_v60 = vpop.f32.mrb[213].mxu0  ;;  %v4637_v1 = vadd.f32 %v11016_v11, %v10983_v3 }
 0x2c0   : > { %5394 = vst.msk [vmem:[#allocation2 + $0x718] sm:$0xff] %vm5166_vm2, %v5137_v43  ;;  %v4697_v24 = vadd.f32 %v11016_v11, %v8051_v41  ;;  %v4691_v25 = vpop.f32.mrb[213].mxu1  ;;  %5265 = vst.msk [vmem:[#allocation2 + $0x310] sm:$0xff] %vm5166_vm2, %v5008_v54  ;;  %v3412_v50 = vadd.f32 %v11016_v11, %v3411_v60  ;;  %v3352_v54 = vadd.f32 %v11016_v11, %v10985_v29 }
 0x2c1   : > { %5393 = vst.msk [vmem:[#allocation2 + $0x710] sm:$0xff] %vm5166_vm2, %v5136_v37  ;;  %v4692_v33 = vadd.f32 %v11016_v11, %v4691_v25  ;;  %v5011_v36 = vmax.f32 %v3337_v62, %v3417_v45  ;;  %v4632_v25 = vadd.f32 %v11016_v11, %v10987_v30 }
 0x2c2   : > { %v5139_v8 = vmax.f32 %v4617_v47, %v4697_v24  ;;  %v5010_v63 = vmax.f32 %v3332_v23, %v3412_v50  ;;  %v7670_v21 = vpop.f32.mrb[214].mxu0  ;;  %v3367_v23 = vadd.f32 %v11016_v11, %v10989_v22 }
 0x2c3   : > { %v5138_v39 = vmax.f32 %v4612_v46, %v4692_v33  ;;  %v8054_v13 = vpop.f32.mrb[214].mxu1  ;;  %v5519_v51 = vld [vmem:[#allocation2 + $0x300] ss:$2 sm:$0xff]  ;;  %v5775_v6 = vld [vmem:[#allocation2 + $0x301] ss:$2 sm:$0xff]  ;;  %5268 = vst.msk [vmem:[#allocation2 + $0x328] sm:$0xff] %vm5166_vm2, %v5011_v36  ;;  %v3427_v0 = vadd.f32 %v11016_v11, %v7670_v21  ;;  %v4647_v33 = vadd.f32 %v11016_v11, %v10991_v17  ;;  %v3362_v21 = vadd.f32 %v11016_v11, %v10993_v18 }
 0x2c4   : > { %v5647_v53 = vld [vmem:[#allocation2 + $0x700] ss:$2 sm:$0xff]  ;;  %5396 = vst.msk [vmem:[#allocation2 + $0x728] sm:$0xff] %vm5166_vm2, %v5139_v8  ;;  %v4707_v61 = vadd.f32 %v11016_v11, %v8054_v13  ;;  %v5982_v38 = vmax.f32 %v5519_v51, %v5775_v6  ;;  %v5903_v4 = vld [vmem:[#allocation2 + $0x701] ss:$2 sm:$0xff]  ;;  %5267 = vst.msk [vmem:[#allocation2 + $0x320] sm:$0xff] %vm5166_vm2, %v5010_v63  ;;  %v4657_v18 = vadd.f32 %v11016_v11, %v10999_v48 }
 0x2c5   : > { %5395 = vst.msk [vmem:[#allocation2 + $0x720] sm:$0xff] %vm5166_vm2, %v5138_v39  ;;  %v3421_v15 = vpop.f32.mrb[215].mxu0  ;;  %v4701_v49 = vpop.f32.mrb[215].mxu1  ;;  %v6046_v20 = vmax.f32 %v5647_v53, %v5903_v4  ;;  %v5013_v14 = vmax.f32 %v3347_v27, %v3427_v0 }
 0x2c6   : > { %v5141_v55 = vmax.f32 %v4627_v34, %v4707_v61  ;;  %v3422_v56 = vadd.f32 %v11016_v11, %v3421_v15  ;;  %6110 = vst.msk [vmem:[%s9114_s25 + $0x180] sm:$0xff] %vm5166_vm2, %v5982_v38  ;;  %v4702_v9 = vadd.f32 %v11016_v11, %v4701_v49  ;;  %v7673_v32 = vpop.f32.mrb[216].mxu0  ;;  %v3377_v38 = vadd.f32 %v11016_v11, %v10997_v2 }
 0x2c7   : > { %v8057_v7 = vpop.f32.mrb[216].mxu1  ;;  %6174 = vst.msk [vmem:[%s9114_s25 + $0x380] sm:$0xff] %vm5166_vm2, %v6046_v20  ;;  %v5521_v44 = vld [vmem:[#allocation2 + $0x310] ss:$2 sm:$0xff]  ;;  %v5777_v19 = vld [vmem:[#allocation2 + $0x311] ss:$2 sm:$0xff]  ;;  %v3437_v57 = vadd.f32 %v11016_v11, %v7673_v32  ;;  %v3372_v20 = vadd.f32 %v11016_v11, %v11001_v26 }
 0x2c8   : > { %v5649_v16 = vld [vmem:[#allocation2 + $0x710] ss:$2 sm:$0xff]  ;;  %5270 = vst.msk [vmem:[#allocation2 + $0x338] sm:$0xff] %vm5166_vm2, %v5013_v14  ;;  %5398 = vst.msk [vmem:[#allocation2 + $0x738] sm:$0xff] %vm5166_vm2, %v5141_v55  ;;  %v5012_v5 = vmax.f32 %v3342_v58, %v3422_v56  ;;  %v4717_v43 = vadd.f32 %v11016_v11, %v8057_v7  ;;  %v5983_v37 = vmax.f32 %v5521_v44, %v5777_v19  ;;  %v5905_v3 = vld [vmem:[#allocation2 + $0x711] ss:$2 sm:$0xff] }
 0x2c9   : > { %v5140_v52 = vmax.f32 %v4622_v10, %v4702_v9  ;;  %v3431_v41 = vpop.f32.mrb[217].mxu0  ;;  %v4711_v62 = vpop.f32.mrb[217].mxu1  ;;  %v6047_v47 = vmax.f32 %v5649_v16, %v5905_v3  ;;  %v5015_v45 = vmax.f32 %v3357_v59, %v3437_v57  ;;  %v4642_v58 = vadd.f32 %v11016_v11, %v10995_v28 }
 0x2ca   : > { %5269 = vst.msk [vmem:[#allocation2 + $0x330] sm:$0xff] %vm5166_vm2, %v5012_v5  ;;  %v5143_v24 = vmax.f32 %v4637_v1, %v4717_v43  ;;  %v3432_v60 = vadd.f32 %v11016_v11, %v3431_v41  ;;  %6111 = vst.msk [vmem:[%s9114_s25 + $0x188] sm:$0xff] %vm5166_vm2, %v5983_v37  ;;  %v4712_v29 = vadd.f32 %v11016_v11, %v4711_v62  ;;  %v7676_v46 = vpop.f32.mrb[218].mxu0 }
 0x2cb   : > { %5397 = vst.msk [vmem:[#allocation2 + $0x730] sm:$0xff] %vm5166_vm2, %v5140_v52  ;;  %v8060_v50 = vpop.f32.mrb[218].mxu1  ;;  %6175 = vst.msk [vmem:[%s9114_s25 + $0x388] sm:$0xff] %vm5166_vm2, %v6047_v47  ;;  %v5523_v36 = vld [vmem:[#allocation2 + $0x320] ss:$2 sm:$0xff]  ;;  %v3447_v22 = vadd.f32 %v11016_v11, %v7676_v46  ;;  %v3441_v34 = vpop.f32.mrb[219].mxu0  ;;  %v4652_v56 = vadd.f32 %v11016_v11, %v11003_v12  ;;  %v3387_v37 = vadd.f32 %v11016_v11, %v11005_v35 }
 0x2cc   : > { %v5779_v8 = vld [vmem:[#allocation2 + $0x321] ss:$2 sm:$0xff]  ;;  %v5651_v63 = vld [vmem:[#allocation2 + $0x720] ss:$2 sm:$0xff]  ;;  %5272 = vst.msk [vmem:[#allocation2 + $0x348] sm:$0xff] %vm5166_vm2, %v5015_v45  ;;  %5400 = vst.msk [vmem:[#allocation2 + $0x748] sm:$0xff] %vm5166_vm2, %v5143_v24  ;;  %v5014_v30 = vmax.f32 %v3352_v54, %v3432_v60  ;;  %v4727_v39 = vadd.f32 %v11016_v11, %v8060_v50  ;;  %v5142_v27 = vmax.f32 %v4632_v25, %v4712_v29 }
 0x2cd   : > { %v5984_v13 = vmax.f32 %v5523_v36, %v5779_v8  ;;  %v5907_v17 = vld [vmem:[#allocation2 + $0x721] ss:$2 sm:$0xff]  ;;  %v4721_v51 = vpop.f32.mrb[219].mxu1  ;;  %v5017_v53 = vmax.f32 %v3367_v23, %v3447_v22  ;;  %v3442_v61 = vadd.f32 %v11016_v11, %v3441_v34  ;;  %v4667_v3 = vadd.f32 %v11016_v11, %v11007_v31 }
 0x2ce   : > { %v6048_v6 = vmax.f32 %v5651_v63, %v5907_v17  ;;  %5271 = vst.msk [vmem:[#allocation2 + $0x340] sm:$0xff] %vm5166_vm2, %v5014_v30  ;;  %v5145_v0 = vmax.f32 %v4647_v33, %v4727_v39  ;;  %5399 = vst.msk [vmem:[#allocation2 + $0x740] sm:$0xff] %vm5166_vm2, %v5142_v27  ;;  %v4722_v4 = vadd.f32 %v11016_v11, %v4721_v51  ;;  %v7679_v15 = vpop.f32.mrb[220].mxu0 }
 0x2cf   : > { %6112 = vst.msk [vmem:[%s9114_s25 + $0x190] sm:$0xff] %vm5166_vm2, %v5984_v13  ;;  %v8063_v49 = vpop.f32.mrb[220].mxu1  ;;  %5274 = vst.msk [vmem:[#allocation2 + $0x358] sm:$0xff] %vm5166_vm2, %v5017_v53  ;;  %v5016_v28 = vmax.f32 %v3362_v21, %v3442_v61  ;;  %v3457_v2 = vadd.f32 %v11016_v11, %v7679_v15  ;;  %v3451_v14 = vpop.f32.mrb[221].mxu0  ;;  %v3382_v45 = vadd.f32 %v11016_v11, %v11009_v42 }
 0x2d0   : > { %6176 = vst.msk [vmem:[%s9114_s25 + $0x390] sm:$0xff] %vm5166_vm2, %v6048_v6  ;;  %5402 = vst.msk [vmem:[#allocation2 + $0x758] sm:$0xff] %vm5166_vm2, %v5145_v0  ;;  %v4737_v48 = vadd.f32 %v11016_v11, %v8063_v49  ;;  %v4731_v55 = vpop.f32.mrb[221].mxu1  ;;  %v5144_v9 = vmax.f32 %v4642_v58, %v4722_v4  ;;  %v3452_v26 = vadd.f32 %v11016_v11, %v3451_v14 }
 0x2d1   : > { %v5525_v10 = vld [vmem:[#allocation2 + $0x330] ss:$2 sm:$0xff]  ;;  %v5781_v59 = vld [vmem:[#allocation2 + $0x331] ss:$2 sm:$0xff]  ;;  %v4732_v32 = vadd.f32 %v11016_v11, %v4731_v55  ;;  %5273 = vst.msk [vmem:[#allocation2 + $0x350] sm:$0xff] %vm5166_vm2, %v5016_v28  ;;  %v5019_v19 = vmax.f32 %v3377_v38, %v3457_v2  ;;  %v4662_v35 = vadd.f32 %v11016_v11, %v11011_v40 }
 0x2d2   : > { %v5985_v7 = vmax.f32 %v5525_v10, %v5781_v59  ;;  %v5653_v1 = vld [vmem:[#allocation2 + $0x730] ss:$2 sm:$0xff]  ;;  %v5909_v44 = vld [vmem:[#allocation2 + $0x731] ss:$2 sm:$0xff]  ;;  %v5147_v16 = vmax.f32 %v4657_v18, %v4737_v48  ;;  %5401 = vst.msk [vmem:[#allocation2 + $0x750] sm:$0xff] %vm5166_vm2, %v5144_v9  ;;  %v5018_v12 = vmax.f32 %v3372_v20, %v3452_v26  ;;  %v7682_v43 = vpop.f32.mrb[222].mxu0 }
 0x2d3   : > { %v6049_v5 = vmax.f32 %v5653_v1, %v5909_v44  ;;  %v5146_v57 = vmax.f32 %v4652_v56, %v4732_v32  ;;  %v8066_v54 = vpop.f32.mrb[222].mxu1  ;;  %5276 = vst.msk [vmem:[#allocation2 + $0x368] sm:$0xff] %vm5166_vm2, %v5019_v19  ;;  %v3467_v52 = vadd.f32 %v11016_v11, %v7682_v43  ;;  %v3461_v62 = vpop.f32.mrb[223].mxu0 }
 0x2d4   : > { %6113 = vst.msk [vmem:[%s9114_s25 + $0x198] sm:$0xff] %vm5166_vm2, %v5985_v7  ;;  %5404 = vst.msk [vmem:[#allocation2 + $0x768] sm:$0xff] %vm5166_vm2, %v5147_v16  ;;  %v4747_v41 = vadd.f32 %v11016_v11, %v8066_v54  ;;  %v4741_v47 = vpop.f32.mrb[223].mxu1  ;;  %v3462_v60 = vadd.f32 %v11016_v11, %v3461_v62 }
 0x2d5   : > { %6177 = vst.msk [vmem:[%s9114_s25 + $0x398] sm:$0xff] %vm5166_vm2, %v6049_v5  ;;  %v5527_v31 = vld [vmem:[#allocation2 + $0x340] ss:$2 sm:$0xff]  ;;  %v5783_v24 = vld [vmem:[#allocation2 + $0x341] ss:$2 sm:$0xff]  ;;  %5275 = vst.msk [vmem:[#allocation2 + $0x360] sm:$0xff] %vm5166_vm2, %v5018_v12  ;;  %v4742_v25 = vadd.f32 %v11016_v11, %v4741_v47  ;;  %v5021_v46 = vmax.f32 %v3387_v37, %v3467_v52 }
 0x2d6   : > { %5403 = vst.msk [vmem:[#allocation2 + $0x760] sm:$0xff] %vm5166_vm2, %v5146_v57  ;;  %v5986_v23 = vmax.f32 %v5527_v31, %v5783_v24  ;;  %v5655_v29 = vld [vmem:[#allocation2 + $0x740] ss:$2 sm:$0xff]  ;;  %v5911_v42 = vld [vmem:[#allocation2 + $0x741] ss:$2 sm:$0xff]  ;;  %v5149_v50 = vmax.f32 %v4667_v3, %v4747_v41  ;;  %v5020_v33 = vmax.f32 %v3382_v45, %v3462_v60  ;;  %v11158_v8 = vpop.f32.mrb[224].mxu0 }
 0x2d7   : > { %v6050_v40 = vmax.f32 %v5655_v29, %v5911_v42  ;;  %v5148_v36 = vmax.f32 %v4662_v35, %v4742_v25  ;;  %v11160_v63 = vpop.f32.mrb[224].mxu1  ;;  %5278 = vst.msk [vmem:[#allocation2 + $0x378] sm:$0xff] %vm5166_vm2, %v5021_v46  ;;  %v11166_v30 = vpop.f32.mrb[225].mxu0  ;;  %v3477_v24 = vadd.f32 %v11016_v11, %v11158_v8 }
 0x2d8   : > { %6114 = vst.msk [vmem:[%s9114_s25 + $0x1a0] sm:$0xff] %vm5166_vm2, %v5986_v23  ;;  %5406 = vst.msk [vmem:[#allocation2 + $0x778] sm:$0xff] %vm5166_vm2, %v5149_v50  ;;  %v11168_v22 = vpop.f32.mrb[225].mxu1  ;;  %v5529_v39 = vld [vmem:[#allocation2 + $0x350] ss:$2 sm:$0xff]  ;;  %v4757_v60 = vadd.f32 %v11016_v11, %v11160_v63  ;;  %v3472_v46 = vadd.f32 %v11016_v11, %v11166_v30 }
 0x2d9   : > { %6178 = vst.msk [vmem:[%s9114_s25 + $0x3a0] sm:$0xff] %vm5166_vm2, %v6050_v40  ;;  %v5785_v21 = vld [vmem:[#allocation2 + $0x351] ss:$2 sm:$0xff]  ;;  %5277 = vst.msk [vmem:[#allocation2 + $0x370] sm:$0xff] %vm5166_vm2, %v5020_v33  ;;  %v5657_v17 = vld [vmem:[#allocation2 + $0x750] ss:$2 sm:$0xff]  ;;  %v4752_v50 = vadd.f32 %v11016_v11, %v11168_v22 }
 0x2da   : > { %5405 = vst.msk [vmem:[#allocation2 + $0x770] sm:$0xff] %vm5166_vm2, %v5148_v36  ;;  %v5987_v13 = vmax.f32 %v5529_v39, %v5785_v21  ;;  %v5913_v27 = vld [vmem:[#allocation2 + $0x751] ss:$2 sm:$0xff]  ;;  %v11174_v51 = vpop.f32.mrb[226].mxu0 }
 0x2db   : > { %v6051_v34 = vmax.f32 %v5657_v17, %v5913_v27  ;;  %v11176_v6 = vpop.f32.mrb[226].mxu1  ;;  %v11182_v18 = vpop.f32.mrb[227].mxu0  ;;  %v3487_v17 = vadd.f32 %v11016_v11, %v11174_v51 }
 0x2dc   : > { %6115 = vst.msk [vmem:[%s9114_s25 + $0x1a8] sm:$0xff] %vm5166_vm2, %v5987_v13  ;;  %v5531_v53 = vld [vmem:[#allocation2 + $0x360] ss:$2 sm:$0xff]  ;;  %v5787_v0 = vld [vmem:[#allocation2 + $0x361] ss:$2 sm:$0xff]  ;;  %v11184_v4 = vpop.f32.mrb[227].mxu1  ;;  %v4767_v27 = vadd.f32 %v11016_v11, %v11176_v6 }
 0x2dd   : > { %v5659_v61 = vld [vmem:[#allocation2 + $0x760] ss:$2 sm:$0xff]  ;;  %6179 = vst.msk [vmem:[%s9114_s25 + $0x3a8] sm:$0xff] %vm5166_vm2, %v6051_v34  ;;  %v5988_v58 = vmax.f32 %v5531_v53, %v5787_v0  ;;  %v5915_v38 = vld [vmem:[#allocation2 + $0x761] ss:$2 sm:$0xff]  ;;  %v3482_v0 = vadd.f32 %v11016_v11, %v11182_v18 }
 0x2de   : > { %v6052_v15 = vmax.f32 %v5659_v61, %v5915_v38  ;;  %v11188_v49 = vpop.f32.mrb[228].mxu0  ;;  %v4762_v61 = vadd.f32 %v11016_v11, %v11184_v4 }
 0x2df   : > { %6116 = vst.msk [vmem:[%s9114_s25 + $0x1b0] sm:$0xff] %vm5166_vm2, %v5988_v58  ;;  %v11190_v20 = vpop.f32.mrb[228].mxu1  ;;  %v11194_v56 = vpop.f32.mrb[229].mxu0  ;;  %v3497_v18 = vadd.f32 %v11016_v11, %v11188_v49 }
 0x2e0   : > { %6180 = vst.msk [vmem:[%s9114_s25 + $0x3b0] sm:$0xff] %vm5166_vm2, %v6052_v15  ;;  %v5533_v28 = vld [vmem:[#allocation2 + $0x370] ss:$2 sm:$0xff]  ;;  %v5789_v2 = vld [vmem:[#allocation2 + $0x371] ss:$2 sm:$0xff]  ;;  %v11196_v10 = vpop.f32.mrb[229].mxu1  ;;  %v4777_v4 = vadd.f32 %v11016_v11, %v11190_v20 }
 0x2e1   : > { %v5661_v48 = vld [vmem:[#allocation2 + $0x770] ss:$2 sm:$0xff]  ;;  %v5989_v14 = vmax.f32 %v5533_v28, %v5789_v2  ;;  %v5917_v55 = vld [vmem:[#allocation2 + $0x771] ss:$2 sm:$0xff] }
 0x2e2   : > { %v6053_v59 = vmax.f32 %v5661_v48, %v5917_v55  ;;  %v11200_v9 = vpop.f32.mrb[230].mxu0 }
 0x2e3   : > { %6117 = vst.msk [vmem:[%s9114_s25 + $0x1b8] sm:$0xff] %vm5166_vm2, %v5989_v14  ;;  %v11202_v26 = vpop.f32.mrb[230].mxu1  ;;  %v11206_v32 = vpop.f32.mrb[231].mxu0 }
 0x2e4   : > { %6181 = vst.msk [vmem:[%s9114_s25 + $0x3b8] sm:$0xff] %vm5166_vm2, %v6053_v59  ;;  %v11208_v7 = vpop.f32.mrb[231].mxu1 }
 0x2e6   : > { %v11210_v1 = vpop.f32.mrb[232].mxu0 }
 0x2e7   : > { %v11212_v44 = vpop.f32.mrb[232].mxu1  ;;  %v11214_v19 = vpop.f32.mrb[233].mxu0 }
 0x2e8   : > { %v11216_v16 = vpop.f32.mrb[233].mxu1 }
 0x2ea   : > { %v11218_v5 = vpop.f32.mrb[234].mxu0 }
 0x2eb   : > { %v11220_v12 = vpop.f32.mrb[234].mxu1  ;;  %v11222_v57 = vpop.f32.mrb[235].mxu0 }
 0x2ec   : > { %v11224_v43 = vpop.f32.mrb[235].mxu1 }
 0x2ee   : > { %v11226_v54 = vpop.f32.mrb[236].mxu0 }
 0x2ef   : > { %v11228_v37 = vpop.f32.mrb[236].mxu1  ;;  %v11230_v3 = vpop.f32.mrb[237].mxu0 }
 0x2f0   : > { %v11232_v52 = vpop.f32.mrb[237].mxu1 }
 0x2f2   : > { %v11234_v41 = vpop.f32.mrb[238].mxu0 }
 0x2f3   : > { %v11236_v62 = vpop.f32.mrb[238].mxu1  ;;  %v11238_v47 = vpop.f32.mrb[239].mxu0 }
 0x2f4   : > { %v11240_v45 = vpop.f32.mrb[239].mxu1 }
 0x2f6   : > { %v7709_v35 = vpop.f32.mrb[240].mxu0 }
 0x2f7   : > { %v8093_v31 = vpop.f32.mrb[240].mxu1  ;;  %v3557_v25 = vadd.f32 %v11016_v11, %v7709_v35  ;;  %v3551_v29 = vpop.f32.mrb[241].mxu0 }
 0x2f8   : > { %v4837_v23 = vadd.f32 %v11016_v11, %v8093_v31  ;;  %v4831_v42 = vpop.f32.mrb[241].mxu1  ;;  %v3552_v40 = vadd.f32 %v11016_v11, %v3551_v29  ;;  %v3492_v31 = vadd.f32 %v11016_v11, %v11194_v56  ;;  %v3507_v56 = vadd.f32 %v11016_v11, %v11200_v9 }
 0x2f9   : > { %v4832_v33 = vadd.f32 %v11016_v11, %v4831_v42  ;;  %v5023_v36 = vmax.f32 %v3477_v24, %v3557_v25  ;;  %v4772_v24 = vadd.f32 %v11016_v11, %v11196_v10  ;;  %v4787_v10 = vadd.f32 %v11016_v11, %v11202_v26 }
 0x2fa   : > { %v5151_v8 = vmax.f32 %v4757_v60, %v4837_v23  ;;  %v5022_v39 = vmax.f32 %v3472_v46, %v3552_v40  ;;  %v7712_v21 = vpop.f32.mrb[242].mxu0 }
 0x2fb   : > { %v5150_v63 = vmax.f32 %v4752_v50, %v4832_v33  ;;  %v8096_v13 = vpop.f32.mrb[242].mxu1  ;;  %5280 = vst.msk [vmem:[#allocation2 + $0x388] sm:$0xff] %vm5166_vm2, %v5023_v36  ;;  %v3567_v30 = vadd.f32 %v11016_v11, %v7712_v21  ;;  %v3561_v34 = vpop.f32.mrb[243].mxu0 }
 0x2fc   : > { %5408 = vst.msk [vmem:[#allocation2 + $0x788] sm:$0xff] %vm5166_vm2, %v5151_v8  ;;  %v4847_v22 = vadd.f32 %v11016_v11, %v8096_v13  ;;  %v4841_v53 = vpop.f32.mrb[243].mxu1  ;;  %5279 = vst.msk [vmem:[#allocation2 + $0x380] sm:$0xff] %vm5166_vm2, %v5022_v39  ;;  %v3562_v51 = vadd.f32 %v11016_v11, %v3561_v34  ;;  %v3502_v39 = vadd.f32 %v11016_v11, %v11206_v32 }
 0x2fd   : > { %5407 = vst.msk [vmem:[#allocation2 + $0x780] sm:$0xff] %vm5166_vm2, %v5150_v63  ;;  %v4842_v6 = vadd.f32 %v11016_v11, %v4841_v53  ;;  %v5025_v58 = vmax.f32 %v3487_v17, %v3567_v30  ;;  %v3517_v32 = vadd.f32 %v11016_v11, %v11210_v1 }
 0x2fe   : > { %v5153_v38 = vmax.f32 %v4767_v27, %v4847_v22  ;;  %v5024_v15 = vmax.f32 %v3482_v0, %v3562_v51  ;;  %v7715_v2 = vpop.f32.mrb[244].mxu0  ;;  %v4782_v22 = vadd.f32 %v11016_v11, %v11208_v7 }
 0x2ff   : > { %v5152_v28 = vmax.f32 %v4762_v61, %v4842_v6  ;;  %v8099_v48 = vpop.f32.mrb[244].mxu1  ;;  %5282 = vst.msk [vmem:[#allocation2 + $0x398] sm:$0xff] %vm5166_vm2, %v5025_v58  ;;  %v3577_v14 = vadd.f32 %v11016_v11, %v7715_v2  ;;  %v3571_v59 = vpop.f32.mrb[245].mxu0  ;;  %v4797_v61 = vadd.f32 %v11016_v11, %v11212_v44 }
 0x300   : > { %5410 = vst.msk [vmem:[#allocation2 + $0x798] sm:$0xff] %vm5166_vm2, %v5153_v38  ;;  %v4857_v55 = vadd.f32 %v11016_v11, %v8099_v48  ;;  %v4851_v35 = vpop.f32.mrb[245].mxu1  ;;  %5281 = vst.msk [vmem:[#allocation2 + $0x390] sm:$0xff] %vm5166_vm2, %v5024_v15  ;;  %v3572_v49 = vadd.f32 %v11016_v11, %v3571_v59  ;;  %v3512_v15 = vadd.f32 %v11016_v11, %v11214_v19 }
 0x301   : > { %5409 = vst.msk [vmem:[#allocation2 + $0x790] sm:$0xff] %vm5166_vm2, %v5152_v28  ;;  %v4852_v20 = vadd.f32 %v11016_v11, %v4851_v35  ;;  %v5027_v60 = vmax.f32 %v3497_v18, %v3577_v14  ;;  %v4792_v35 = vadd.f32 %v11016_v11, %v11216_v16 }
 0x302   : > { %v5155_v25 = vmax.f32 %v4777_v4, %v4857_v55  ;;  %v5026_v23 = vmax.f32 %v3492_v31, %v3572_v49  ;;  %v7718_v42 = vpop.f32.mrb[246].mxu0  ;;  %v3527_v31 = vadd.f32 %v11016_v11, %v11218_v5 }
 0x303   : > { %v5154_v29 = vmax.f32 %v4772_v24, %v4852_v20  ;;  %v8102_v46 = vpop.f32.mrb[246].mxu1  ;;  %v5535_v50 = vld [vmem:[#allocation2 + $0x380] ss:$2 sm:$0xff]  ;;  %v5791_v40 = vld [vmem:[#allocation2 + $0x381] ss:$2 sm:$0xff]  ;;  %5284 = vst.msk [vmem:[#allocation2 + $0x3a8] sm:$0xff] %vm5166_vm2, %v5027_v60  ;;  %v3587_v36 = vadd.f32 %v11016_v11, %v7718_v42  ;;  %v4807_v20 = vadd.f32 %v11016_v11, %v11220_v12  ;;  %v3522_v42 = vadd.f32 %v11016_v11, %v11222_v57 }
 0x304   : > { %v5663_v33 = vld [vmem:[#allocation2 + $0x780] ss:$2 sm:$0xff]  ;;  %5412 = vst.msk [vmem:[#allocation2 + $0x7a8] sm:$0xff] %vm5166_vm2, %v5155_v25  ;;  %v4867_v8 = vadd.f32 %v11016_v11, %v8102_v46  ;;  %v5990_v63 = vmax.f32 %v5535_v50, %v5791_v40  ;;  %v5919_v9 = vld [vmem:[#allocation2 + $0x781] ss:$2 sm:$0xff]  ;;  %5283 = vst.msk [vmem:[#allocation2 + $0x3a0] sm:$0xff] %vm5166_vm2, %v5026_v23  ;;  %v4817_v57 = vadd.f32 %v11016_v11, %v11228_v37 }
 0x305   : > { %5411 = vst.msk [vmem:[#allocation2 + $0x7a0] sm:$0xff] %vm5166_vm2, %v5154_v29  ;;  %v3581_v26 = vpop.f32.mrb[247].mxu0  ;;  %v4861_v21 = vpop.f32.mrb[247].mxu1  ;;  %v6054_v13 = vmax.f32 %v5663_v33, %v5919_v9  ;;  %v5029_v17 = vmax.f32 %v3507_v56, %v3587_v36 }
 0x306   : > { %v5157_v27 = vmax.f32 %v4787_v10, %v4867_v8  ;;  %v3582_v30 = vadd.f32 %v11016_v11, %v3581_v26  ;;  %6118 = vst.msk [vmem:[%s9114_s25 + $0x1c0] sm:$0xff] %vm5166_vm2, %v5990_v63  ;;  %v4862_v34 = vadd.f32 %v11016_v11, %v4861_v21  ;;  %v7721_v53 = vpop.f32.mrb[248].mxu0  ;;  %v3537_v63 = vadd.f32 %v11016_v11, %v11226_v54 }
 0x307   : > { %v8105_v0 = vpop.f32.mrb[248].mxu1  ;;  %6182 = vst.msk [vmem:[%s9114_s25 + $0x3c0] sm:$0xff] %vm5166_vm2, %v6054_v13  ;;  %v5537_v51 = vld [vmem:[#allocation2 + $0x390] ss:$2 sm:$0xff]  ;;  %v5793_v6 = vld [vmem:[#allocation2 + $0x391] ss:$2 sm:$0xff]  ;;  %v3597_v1 = vadd.f32 %v11016_v11, %v7721_v53  ;;  %v3532_v13 = vadd.f32 %v11016_v11, %v11230_v3 }
 0x308   : > { %v5665_v58 = vld [vmem:[#allocation2 + $0x790] ss:$2 sm:$0xff]  ;;  %5286 = vst.msk [vmem:[#allocation2 + $0x3b8] sm:$0xff] %vm5166_vm2, %v5029_v17  ;;  %5414 = vst.msk [vmem:[#allocation2 + $0x7b8] sm:$0xff] %vm5166_vm2, %v5157_v27  ;;  %v5028_v7 = vmax.f32 %v3502_v39, %v3582_v30  ;;  %v4877_v38 = vadd.f32 %v11016_v11, %v8105_v0  ;;  %v5991_v28 = vmax.f32 %v5537_v51, %v5793_v6  ;;  %v5921_v44 = vld [vmem:[#allocation2 + $0x791] ss:$2 sm:$0xff] }
 0x309   : > { %v5156_v2 = vmax.f32 %v4782_v22, %v4862_v34  ;;  %v3591_v48 = vpop.f32.mrb[249].mxu0  ;;  %v4871_v18 = vpop.f32.mrb[249].mxu1  ;;  %v6055_v4 = vmax.f32 %v5665_v58, %v5921_v44  ;;  %v5031_v14 = vmax.f32 %v3517_v32, %v3597_v1  ;;  %v4802_v39 = vadd.f32 %v11016_v11, %v11224_v43 }
 0x30a   : > { %5285 = vst.msk [vmem:[#allocation2 + $0x3b0] sm:$0xff] %vm5166_vm2, %v5028_v7  ;;  %v5159_v55 = vmax.f32 %v4797_v61, %v4877_v38  ;;  %v3592_v59 = vadd.f32 %v11016_v11, %v3591_v48  ;;  %6119 = vst.msk [vmem:[%s9114_s25 + $0x1c8] sm:$0xff] %vm5166_vm2, %v5991_v28  ;;  %v4872_v19 = vadd.f32 %v11016_v11, %v4871_v18  ;;  %v7724_v24 = vpop.f32.mrb[250].mxu0 }
 0x30b   : > { %5413 = vst.msk [vmem:[#allocation2 + $0x7b0] sm:$0xff] %vm5166_vm2, %v5156_v2  ;;  %v8108_v49 = vpop.f32.mrb[250].mxu1  ;;  %6183 = vst.msk [vmem:[%s9114_s25 + $0x3c8] sm:$0xff] %vm5166_vm2, %v6055_v4  ;;  %v5539_v60 = vld [vmem:[#allocation2 + $0x3a0] ss:$2 sm:$0xff]  ;;  %v3607_v5 = vadd.f32 %v11016_v11, %v7724_v24  ;;  %v3601_v10 = vpop.f32.mrb[251].mxu0  ;;  %v4812_v30 = vadd.f32 %v11016_v11, %v11232_v52  ;;  %v3547_v28 = vadd.f32 %v11016_v11, %v11234_v41 }
 0x30c   : > { %v5795_v25 = vld [vmem:[#allocation2 + $0x3a1] ss:$2 sm:$0xff]  ;;  %v5667_v23 = vld [vmem:[#allocation2 + $0x7a0] ss:$2 sm:$0xff]  ;;  %5288 = vst.msk [vmem:[#allocation2 + $0x3c8] sm:$0xff] %vm5166_vm2, %v5031_v14  ;;  %5416 = vst.msk [vmem:[#allocation2 + $0x7c8] sm:$0xff] %vm5166_vm2, %v5159_v55  ;;  %v5030_v16 = vmax.f32 %v3512_v15, %v3592_v59  ;;  %v4887_v29 = vadd.f32 %v11016_v11, %v8108_v49  ;;  %v5158_v56 = vmax.f32 %v4792_v35, %v4872_v19 }
 0x30d   : > { %v5992_v46 = vmax.f32 %v5539_v60, %v5795_v25  ;;  %v5923_v12 = vld [vmem:[#allocation2 + $0x7a1] ss:$2 sm:$0xff]  ;;  %v4881_v50 = vpop.f32.mrb[251].mxu1  ;;  %v5033_v33 = vmax.f32 %v3527_v31, %v3607_v5  ;;  %v3602_v8 = vadd.f32 %v11016_v11, %v3601_v10  ;;  %v4827_v44 = vadd.f32 %v11016_v11, %v11236_v62 }
 0x30e   : > { %v6056_v40 = vmax.f32 %v5667_v23, %v5923_v12  ;;  %5287 = vst.msk [vmem:[#allocation2 + $0x3c0] sm:$0xff] %vm5166_vm2, %v5030_v16  ;;  %v5161_v36 = vmax.f32 %v4807_v20, %v4887_v29  ;;  %5415 = vst.msk [vmem:[#allocation2 + $0x7c0] sm:$0xff] %vm5166_vm2, %v5158_v56  ;;  %v4882_v9 = vadd.f32 %v11016_v11, %v4881_v50  ;;  %v7727_v26 = vpop.f32.mrb[252].mxu0 }
 0x30f   : > { %6120 = vst.msk [vmem:[%s9114_s25 + $0x1d0] sm:$0xff] %vm5166_vm2, %v5992_v46  ;;  %v8111_v21 = vpop.f32.mrb[252].mxu1  ;;  %5290 = vst.msk [vmem:[#allocation2 + $0x3d8] sm:$0xff] %vm5166_vm2, %v5033_v33  ;;  %v5032_v43 = vmax.f32 %v3522_v42, %v3602_v8  ;;  %v3617_v54 = vadd.f32 %v11016_v11, %v7727_v26  ;;  %v3611_v17 = vpop.f32.mrb[253].mxu0  ;;  %v3542_v14 = vadd.f32 %v11016_v11, %v11238_v47 }
 0x310   : > { %6184 = vst.msk [vmem:[%s9114_s25 + $0x3d0] sm:$0xff] %vm5166_vm2, %v6056_v40  ;;  %5418 = vst.msk [vmem:[#allocation2 + $0x7d8] sm:$0xff] %vm5166_vm2, %v5161_v36  ;;  %v4897_v37 = vadd.f32 %v11016_v11, %v8111_v21  ;;  %v4891_v27 = vpop.f32.mrb[253].mxu1  ;;  %v5160_v34 = vmax.f32 %v4802_v39, %v4882_v9  ;;  %v3612_v3 = vadd.f32 %v11016_v11, %v3611_v17 }
 0x311   : > { %v5541_v22 = vld [vmem:[#allocation2 + $0x3b0] ss:$2 sm:$0xff]  ;;  %v5797_v32 = vld [vmem:[#allocation2 + $0x3b1] ss:$2 sm:$0xff]  ;;  %v4892_v53 = vadd.f32 %v11016_v11, %v4891_v27  ;;  %5289 = vst.msk [vmem:[#allocation2 + $0x3d0] sm:$0xff] %vm5166_vm2, %v5032_v43  ;;  %v5035_v6 = vmax.f32 %v3537_v63, %v3617_v54  ;;  %v4822_v41 = vadd.f32 %v11016_v11, %v11240_v45 }
 0x312   : > { %v5993_v0 = vmax.f32 %v5541_v22, %v5797_v32  ;;  %v5669_v61 = vld [vmem:[#allocation2 + $0x7b0] ss:$2 sm:$0xff]  ;;  %v5925_v51 = vld [vmem:[#allocation2 + $0x7b1] ss:$2 sm:$0xff]  ;;  %v5163_v58 = vmax.f32 %v4817_v57, %v4897_v37  ;;  %5417 = vst.msk [vmem:[#allocation2 + $0x7d0] sm:$0xff] %vm5166_vm2, %v5160_v34  ;;  %v5034_v52 = vmax.f32 %v3532_v13, %v3612_v3  ;;  %v7730_v38 = vpop.f32.mrb[254].mxu0 }
 0x313   : > { %v6057_v7 = vmax.f32 %v5669_v61, %v5925_v51  ;;  %v5162_v1 = vmax.f32 %v4812_v30, %v4892_v53  ;;  %v8114_v15 = vpop.f32.mrb[254].mxu1  ;;  %5292 = vst.msk [vmem:[#allocation2 + $0x3e8] sm:$0xff] %vm5166_vm2, %v5035_v6  ;;  %v3627_v2 = vadd.f32 %v11016_v11, %v7730_v38  ;;  %v3621_v18 = vpop.f32.mrb[255].mxu0 }
 0x314   : > { %6121 = vst.msk [vmem:[%s9114_s25 + $0x1d8] sm:$0xff] %vm5166_vm2, %v5993_v0  ;;  %5420 = vst.msk [vmem:[#allocation2 + $0x7e8] sm:$0xff] %vm5166_vm2, %v5163_v58  ;;  %v4907_v48 = vadd.f32 %v11016_v11, %v8114_v15  ;;  %v4901_v4 = vpop.f32.mrb[255].mxu1  ;;  %v3622_v59 = vadd.f32 %v11016_v11, %v3621_v18 }
 0x315   : > { %6185 = vst.msk [vmem:[%s9114_s25 + $0x3d8] sm:$0xff] %vm5166_vm2, %v6057_v7  ;;  %v5543_v62 = vld [vmem:[#allocation2 + $0x3c0] ss:$2 sm:$0xff]  ;;  %v5799_v55 = vld [vmem:[#allocation2 + $0x3c1] ss:$2 sm:$0xff]  ;;  %5291 = vst.msk [vmem:[#allocation2 + $0x3e0] sm:$0xff] %vm5166_vm2, %v5034_v52  ;;  %v4902_v35 = vadd.f32 %v11016_v11, %v4901_v4  ;;  %v5037_v24 = vmax.f32 %v3547_v28, %v3627_v2 }
 0x316   : > { %5419 = vst.msk [vmem:[#allocation2 + $0x7e0] sm:$0xff] %vm5166_vm2, %v5162_v1  ;;  %v5994_v31 = vmax.f32 %v5543_v62, %v5799_v55  ;;  %v5671_v19 = vld [vmem:[#allocation2 + $0x7c0] ss:$2 sm:$0xff]  ;;  %v5927_v47 = vld [vmem:[#allocation2 + $0x7c1] ss:$2 sm:$0xff]  ;;  %v5165_v49 = vmax.f32 %v4827_v44, %v4907_v48  ;;  %v5036_v20 = vmax.f32 %v3542_v14, %v3622_v59 }
 0x317   : > { %v6058_v45 = vmax.f32 %v5671_v19, %v5927_v47  ;;  %v5164_v60 = vmax.f32 %v4822_v41, %v4902_v35  ;;  %5294 = vst.msk [vmem:[#allocation2 + $0x3f8] sm:$0xff] %vm5166_vm2, %v5037_v24 }
 0x318   : > { %6122 = vst.msk [vmem:[%s9114_s25 + $0x1e0] sm:$0xff] %vm5166_vm2, %v5994_v31  ;;  %5422 = vst.msk [vmem:[#allocation2 + $0x7f8] sm:$0xff] %vm5166_vm2, %v5165_v49  ;;  %v5545_v25 = vld [vmem:[#allocation2 + $0x3d0] ss:$2 sm:$0xff]  ;;  %v5801_v11 = vld [vmem:[#allocation2 + $0x3d1] ss:$2 sm:$0xff] }
 0x319   : > { %6186 = vst.msk [vmem:[%s9114_s25 + $0x3e0] sm:$0xff] %vm5166_vm2, %v6058_v45  ;;  %5293 = vst.msk [vmem:[#allocation2 + $0x3f0] sm:$0xff] %vm5166_vm2, %v5036_v20  ;;  %v5995_v23 = vmax.f32 %v5545_v25, %v5801_v11  ;;  %v5673_v16 = vld [vmem:[#allocation2 + $0x7d0] ss:$2 sm:$0xff]  ;;  %v5929_v5 = vld [vmem:[#allocation2 + $0x7d1] ss:$2 sm:$0xff] }
 0x31a   : > { %5421 = vst.msk [vmem:[#allocation2 + $0x7f0] sm:$0xff] %vm5166_vm2, %v5164_v60  ;;  %v6059_v29 = vmax.f32 %v5673_v16, %v5929_v5 }
 0x31b   : > { %6123 = vst.msk [vmem:[%s9114_s25 + $0x1e8] sm:$0xff] %vm5166_vm2, %v5995_v23 }
 0x31c   : > { %v5547_v42 = vld [vmem:[#allocation2 + $0x3e0] ss:$2 sm:$0xff]  ;;  %v5803_v46 = vld [vmem:[#allocation2 + $0x3e1] ss:$2 sm:$0xff]  ;;  %6187 = vst.msk [vmem:[%s9114_s25 + $0x3e8] sm:$0xff] %vm5166_vm2, %v6059_v29 }
 0x31d   : > { %v5675_v12 = vld [vmem:[#allocation2 + $0x7e0] ss:$2 sm:$0xff]  ;;  %v5996_v56 = vmax.f32 %v5547_v42, %v5803_v46  ;;  %v5931_v10 = vld [vmem:[#allocation2 + $0x7e1] ss:$2 sm:$0xff] }
 0x31e   : > { %v6060_v50 = vmax.f32 %v5675_v12, %v5931_v10 }
 0x31f   : > { %6124 = vst.msk [vmem:[%s9114_s25 + $0x1f0] sm:$0xff] %vm5166_vm2, %v5996_v56 }
 0x320   : > { %6188 = vst.msk [vmem:[%s9114_s25 + $0x3f0] sm:$0xff] %vm5166_vm2, %v6060_v50  ;;  %v5549_v40 = vld [vmem:[#allocation2 + $0x3f0] ss:$2 sm:$0xff]  ;;  %v5805_v33 = vld [vmem:[#allocation2 + $0x3f1] ss:$2 sm:$0xff] }
 0x321   : > { %v5677_v36 = vld [vmem:[#allocation2 + $0x7f0] ss:$2 sm:$0xff]  ;;  %v5997_v8 = vmax.f32 %v5549_v40, %v5805_v33  ;;  %v5933_v39 = vld [vmem:[#allocation2 + $0x7f1] ss:$2 sm:$0xff] }
 0x322   : > { %v6061_v63 = vmax.f32 %v5677_v36, %v5933_v39 }
 0x323   : > { %6125 = vst.msk [vmem:[%s9114_s25 + $0x1f8] sm:$0xff] %vm5166_vm2, %v5997_v8 }
 0x324   : > { %6189 = vst.msk [vmem:[%s9114_s25 + $0x3f8] sm:$0xff] %vm5166_vm2, %v6061_v63 }
 0x325 PF: > { %s16_s19 = sadd.s32 1, %s8296_s19   ;;  %s11435_s12 = smov %s8272_s13 }
 0x326   : > { %p13_p11 = scmp.ge.s32.totalorder %s16_s19, 10   ;;  %s11436_s13 = smov %s8276_s14 }
 0x327   : > { %s11437_s14 = smov %s8388_s5  ;;  %s11438_s15 = smov %s8288_s17 }
 0x328   : > { %s11439_s16 = smov %s8292_s18  ;;  %s11440_s17 = smov %s11443_s21 }
 0x329   : > { %s11441_s18 = smov %s11447_s22  ;;  %15 = sbr.rel (!%p13_p11) target bundleno = 5 (0x5), region = 327 }
 0x330   :  { %6222 = vsyncpa [#allocation4], 1 }
 0x331   :  { %6224 = vsyncpa [#allocation4 + $0x1], 1 }

// kernel: full_wav_model_forward.4
= control target key start
LH: loop header
LB: loop body
LE: loop exit
PB: predicated region body
PF: predicated region fallthrough
CT: control target
= control target key end

     0   :  { %s4027_s12 = smov 0   ;;  %s4029_s13 = smov 0   ;;  %s5790_s0 = inlined_call_operand.vmem [shape: f32[2,64,64,144], index: 0, kind: input, shape index: {}]   ;;  %s5791_s1 = inlined_call_operand.vmem [shape: f32[144,32], index: 1, kind: input, shape index: {}]   ;;  %s5792_s2 = inlined_call_operand.vmem [shape: f32[1,32], index: 2, kind: input, shape index: {}]   ;;  %s5793_s3 = inlined_call_operand.vmem [shape: f32[2,32,32,32], index: 3, kind: output, shape index: {}]  }
   0x1   :  { %s4031_s14 = smov 0   ;;  %s4033_s15 = smov 0  }
   0x2   :  { %s4035_s16 = smov 0  }
   0x3 LB: > { %s22_s17 = sadd.s32 1, %s3996_s14  ;;  %s25_s18 = sadd.s32 1, %s4000_s15  ;;  %s4004_s16 = sphi %s4035_s16, %s13_s16   ;;  %s4000_s15 = sphi %s4033_s15, %s5798_s15   ;;  %s3996_s14 = sphi %s4031_s14, %s5797_s14   ;;  %s3992_s13 = sphi %s4029_s13, %s5796_s13   ;;  %s3988_s12 = sphi %s4027_s12, %s5795_s12  }
   0x4   : > { %p23_p0 = scmp.ge.s32.totalorder %s22_s17, 2  ;;  %p3609_p1 = scmp.ge.s32.totalorder %s4004_s16, 1 }
   0x5   : > { %p159_p2 = scmp.lt.s32.totalorder %s4004_s16, 5 }
   0x6   : > { %s5800_s17 = smov (%p23_p0, %s22_s17), 0  ;;  %s5802_s18 = smov (!%p23_p0, %s25_s18), %s4000_s15 }
   0x7   : > { %p160_p3 = pnand %p3609_p1, %p159_p2  ;;  %p27_p4 = scmp.ge.s32.totalorder %s5802_s18, 2 }
   0x8   : > { %v727_v0 = vld [vmem:[%s5791_s1] sm:$0xff] (!%p160_p3)  ;;  %v728_v1 = vld [vmem:[%s5791_s1 + $0x8] sm:$0xff] (!%p160_p3)  ;;  %v729_v2 = vld [vmem:[%s5791_s1 + $0x10] sm:$0xff] (!%p160_p3)  ;;  %s3610_s25 = sshll.u32 (!%p160_p3), %s3988_s12, 5  ;;  %p194_p5 = scmp.lt.s32.totalorder (!%p160_p3), %s3992_s13, 1  ;;  %v4006_v3 = vmov (!%p160_p3), 0.0|0.0  }
   0x9   : > { %s5804_s18 = smov (%p27_p4, %s5802_s18), 0  ;;  %163 = sbr.rel (%p160_p3) target bundleno = 783 (0x30f), region = 32 }
   0xa   : > { %3877 = vmatprep.subr.bf16.mxu0 (!%p160_p3), %v4006_v3  ;;  %3904 = vmatprep.subr.bf16.mxu1 (!%p160_p3), %v4006_v3  ;;  %v3878_v4 = vpack.c.bf16 (!%p160_p3), %v728_v1, %v727_v0  ;;  %v730_v5 = vld [vmem:[%s5791_s1 + $0x18] sm:$0xff] (!%p160_p3)  ;;  %p196_p6 = scmp.lt.s32.totalorder (!%p160_p3), %s3610_s25, 63  ;;  %v731_v7 = vld [vmem:[%s5791_s1 + $0x20] sm:$0xff] (!%p160_p3)  ;;  %v732_v8 = vld [vmem:[%s5791_s1 + $0x28] sm:$0xff] (!%p160_p3)  ;;  %vm752_vm0 = vcmask (!%p160_p3), 130048   ;;  %s3614_s24 = sshll.u32 (!%p160_p3), %s3988_s12, 4 }
   0xb   : > { %v3881_v6 = vpack.c.bf16 (!%p160_p3), %v730_v5, %v729_v2  ;;  %v3884_v9 = vpack.c.bf16 (!%p160_p3), %v732_v8, %v731_v7  ;;  %v733_v10 = vld [vmem:[%s5791_s1 + $0x30] sm:$0xff] (!%p160_p3)  ;;  %v734_v11 = vld [vmem:[%s5791_s1 + $0x38] sm:$0xff] (!%p160_p3)  ;;  %v735_v15 = vld [vmem:[%s5791_s1 + $0x40] sm:$0xff] (!%p160_p3)  ;;  %p4552_p7 = scmp.lt.s32.totalorder (!%p160_p3), %s3614_s24, 31  ;;  %vm2994_vm1 = vcmask (!%p160_p3), 261120  }
   0xc   : > { %3879 = vmatpush1.bf16.msra.mxu0 (!%p160_p3), %v3878_v4  ;;  %3913 = vmatpush1.bf16.msra.mxu1 (!%p160_p3), %v3878_v4  ;;  %v3887_v14 = vpack.c.bf16 (!%p160_p3), %v734_v11, %v733_v10  ;;  %v736_v16 = vld [vmem:[%s5791_s1 + $0x48] sm:$0xff] (!%p160_p3)  ;;  %v737_v18 = vld [vmem:[%s5791_s1 + $0x50] sm:$0xff] (!%p160_p3)  ;;  %v738_v19 = vld [vmem:[%s5791_s1 + $0x58] sm:$0xff] (!%p160_p3) }
   0xd   : > { %3880 = vmatprep.subr.bf16.mxu0 (!%p160_p3), %v4006_v3  ;;  %3905 = vmatprep.subr.bf16.mxu1 (!%p160_p3), %v4006_v3  ;;  %v3890_v17 = vpack.c.bf16 (!%p160_p3), %v736_v16, %v735_v15  ;;  %v3893_v20 = vpack.c.bf16 (!%p160_p3), %v738_v19, %v737_v18  ;;  %v739_v21 = vld [vmem:[%s5791_s1 + $0x60] sm:$0xff] (!%p160_p3)  ;;  %v740_v22 = vld [vmem:[%s5791_s1 + $0x68] sm:$0xff] (!%p160_p3)  ;;  %v741_v24 = vld [vmem:[%s5791_s1 + $0x70] sm:$0xff] (!%p160_p3) }
   0xe   : > { %v3896_v23 = vpack.c.bf16 (!%p160_p3), %v740_v22, %v739_v21  ;;  %v742_v25 = vld [vmem:[%s5791_s1 + $0x78] sm:$0xff] (!%p160_p3)  ;;  %v743_v27 = vld [vmem:[%s5791_s1 + $0x80] sm:$0xff] (!%p160_p3)  ;;  %v744_v28 = vld [vmem:[%s5791_s1 + $0x88] sm:$0xff] (!%p160_p3) }
   0xf   : > { %v3899_v26 = vpack.c.bf16 (!%p160_p3), %v742_v25, %v741_v24  ;;  %v3902_v29 = vpack.c.bf16 (!%p160_p3), %v744_v28, %v743_v27 }
  0x10   : > { %s5806_s13 = smov (!%p194_p5, %s3992_s13), 1  ;;  %s5808_s25 = smov (!%p196_p6, %s3610_s25), 63  ;;  %3882 = vmatpush1.bf16.msra.mxu0 %v3881_v6  ;;  %3914 = vmatpush1.bf16.msra.mxu1 %v3881_v6 }
  0x11   : > { %s3612_s5 = sshll.u32 %s5806_s13, 10  ;;  %s3611_s6 = sshll.u32 %s5808_s25, 4  ;;  %3883 = vmatprep.subr.bf16.mxu0 %v4006_v3  ;;  %3906 = vmatprep.subr.bf16.mxu1 %v4006_v3 }
  0x12   : > { %s200_s7 = sadd.s32 %s3612_s5, %s3611_s6  ;;  %s5810_s24 = smov (!%p4552_p7, %s3614_s24), 31 }
  0x13   : > { %s3613_s8 = sshll.u32 %s200_s7, 3  ;;  %s3615_s12 = sshll.u32 %s5810_s24, 2 }
  0x14   : > { %s4096_s22 = scalar_lea.vmem %s5790_s0, %s3613_s8  ;;  %3885 = vmatpush1.bf16.msra.mxu0 %v3884_v9  ;;  %3915 = vmatpush1.bf16.msra.mxu1 %v3884_v9  ;;  %s3616_s28 = sshll.u32 %s5806_s13, 7 }
  0x15   : > { %v216_v12 = vld [vmem:[%s4096_s22 + $0x8] sm:$0xff]  ;;  %3886 = vmatprep.subr.bf16.mxu0 %v4006_v3  ;;  %3907 = vmatprep.subr.bf16.mxu1 %v4006_v3  ;;  %v215_v30 = vld [vmem:[%s4096_s22] sm:$0xff]  ;;  %v218_v32 = vld [vmem:[%s4096_s22 + $0x18] sm:$0xff]  ;;  %s4600_s13 = sadd.s32 %s3616_s28, %s3615_s12 }
  0x16   : > { %v472_v13 = vld [vmem:[%s4096_s22 + $0x808] sm:$0xff]  ;;  %3619 = vmatprep.mubr.msk.f32.mxu0 %vm752_vm0, %v216_v12  ;;  %v471_v31 = vld [vmem:[%s4096_s22 + $0x800] sm:$0xff]  ;;  %v474_v33 = vld [vmem:[%s4096_s22 + $0x818] sm:$0xff]  ;;  %s3617_s29 = sshll.u32 %s4600_s13, 3 }
  0x17   : > { %3747 = vmatprep.mubr.msk.f32.mxu1 %vm752_vm0, %v472_v13  ;;  %v217_v34 = vld [vmem:[%s4096_s22 + $0x10] sm:$0xff]  ;;  %v220_v36 = vld [vmem:[%s4096_s22 + $0x28] sm:$0xff]  ;;  %v219_v38 = vld [vmem:[%s4096_s22 + $0x20] sm:$0xff]  ;;  %s4626_s5 = scalar_lea.vmem %s5793_s3, %s3617_s29 }
  0x18   : > { %3888 = vmatpush1.bf16.msra.mxu0 %v3887_v14  ;;  %3916 = vmatpush1.bf16.msra.mxu1 %v3887_v14  ;;  %v473_v35 = vld [vmem:[%s4096_s22 + $0x810] sm:$0xff]  ;;  %v476_v37 = vld [vmem:[%s4096_s22 + $0x828] sm:$0xff]  ;;  %v475_v39 = vld [vmem:[%s4096_s22 + $0x820] sm:$0xff] }
  0x19   : > { %3889 = vmatprep.subr.bf16.mxu0 %v4006_v3  ;;  %3908 = vmatprep.subr.bf16.mxu1 %v4006_v3  ;;  %v222_v40 = vld [vmem:[%s4096_s22 + $0x38] sm:$0xff]  ;;  %v221_v42 = vld [vmem:[%s4096_s22 + $0x30] sm:$0xff]  ;;  %v224_v44 = vld [vmem:[%s4096_s22 + $0x48] sm:$0xff] }
  0x1a   : > { %v478_v41 = vld [vmem:[%s4096_s22 + $0x838] sm:$0xff]  ;;  %v477_v43 = vld [vmem:[%s4096_s22 + $0x830] sm:$0xff]  ;;  %v480_v45 = vld [vmem:[%s4096_s22 + $0x848] sm:$0xff] }
  0x1b   : > { %v223_v46 = vld [vmem:[%s4096_s22 + $0x40] sm:$0xff]  ;;  %v226_v48 = vld [vmem:[%s4096_s22 + $0x58] sm:$0xff]  ;;  %v225_v50 = vld [vmem:[%s4096_s22 + $0x50] sm:$0xff] }
  0x1c   : > { %3891 = vmatpush1.bf16.msra.mxu0 %v3890_v17  ;;  %3917 = vmatpush1.bf16.msra.mxu1 %v3890_v17  ;;  %v479_v47 = vld [vmem:[%s4096_s22 + $0x840] sm:$0xff]  ;;  %v482_v49 = vld [vmem:[%s4096_s22 + $0x858] sm:$0xff]  ;;  %v481_v51 = vld [vmem:[%s4096_s22 + $0x850] sm:$0xff] }
  0x1d   : > { %3892 = vmatprep.subr.bf16.mxu0 %v4006_v3  ;;  %3909 = vmatprep.subr.bf16.mxu1 %v4006_v3  ;;  %v228_v52 = vld [vmem:[%s4096_s22 + $0x68] sm:$0xff]  ;;  %v227_v54 = vld [vmem:[%s4096_s22 + $0x60] sm:$0xff]  ;;  %v230_v56 = vld [vmem:[%s4096_s22 + $0x78] sm:$0xff] }
  0x1e   : > { %v484_v53 = vld [vmem:[%s4096_s22 + $0x868] sm:$0xff]  ;;  %v483_v55 = vld [vmem:[%s4096_s22 + $0x860] sm:$0xff]  ;;  %v486_v57 = vld [vmem:[%s4096_s22 + $0x878] sm:$0xff] }
  0x1f   : > { %v229_v58 = vld [vmem:[%s4096_s22 + $0x70] sm:$0xff]  ;;  %v232_v60 = vld [vmem:[%s4096_s22 + $0x88] sm:$0xff]  ;;  %v231_v62 = vld [vmem:[%s4096_s22 + $0x80] sm:$0xff] }
  0x20   : > { %3894 = vmatpush1.bf16.msra.mxu0 %v3893_v20  ;;  %3918 = vmatpush1.bf16.msra.mxu1 %v3893_v20  ;;  %v485_v59 = vld [vmem:[%s4096_s22 + $0x870] sm:$0xff]  ;;  %v488_v61 = vld [vmem:[%s4096_s22 + $0x888] sm:$0xff]  ;;  %v487_v63 = vld [vmem:[%s4096_s22 + $0x880] sm:$0xff] }
  0x21   : > { %3895 = vmatprep.subr.bf16.mxu0 %v4006_v3  ;;  %3910 = vmatprep.subr.bf16.mxu1 %v4006_v3  ;;  %v234_v0 = vld [vmem:[%s4096_s22 + $0x98] sm:$0xff]  ;;  %v233_v2 = vld [vmem:[%s4096_s22 + $0x90] sm:$0xff]  ;;  %v236_v4 = vld [vmem:[%s4096_s22 + $0xa8] sm:$0xff] }
  0x22   : > { %v490_v1 = vld [vmem:[%s4096_s22 + $0x898] sm:$0xff]  ;;  %v492_v5 = vld [vmem:[%s4096_s22 + $0x8a8] sm:$0xff]  ;;  %v235_v6 = vld [vmem:[%s4096_s22 + $0xa0] sm:$0xff] }
  0x23   : > { %v491_v7 = vld [vmem:[%s4096_s22 + $0x8a0] sm:$0xff]  ;;  %v238_v8 = vld [vmem:[%s4096_s22 + $0xb8] sm:$0xff]  ;;  %v237_v10 = vld [vmem:[%s4096_s22 + $0xb0] sm:$0xff] }
  0x24   : > { %3897 = vmatpush1.bf16.msra.mxu0 %v3896_v23  ;;  %3919 = vmatpush1.bf16.msra.mxu1 %v3896_v23  ;;  %v494_v9 = vld [vmem:[%s4096_s22 + $0x8b8] sm:$0xff]  ;;  %v493_v11 = vld [vmem:[%s4096_s22 + $0x8b0] sm:$0xff]  ;;  %v240_v12 = vld [vmem:[%s4096_s22 + $0xc8] sm:$0xff] }
  0x25   : > { %3898 = vmatprep.subr.bf16.mxu0 %v4006_v3  ;;  %3911 = vmatprep.subr.bf16.mxu1 %v4006_v3  ;;  %v496_v13 = vld [vmem:[%s4096_s22 + $0x8c8] sm:$0xff]  ;;  %v239_v14 = vld [vmem:[%s4096_s22 + $0xc0] sm:$0xff]  ;;  %v242_v16 = vld [vmem:[%s4096_s22 + $0xd8] sm:$0xff] }
  0x26   : > { %v495_v15 = vld [vmem:[%s4096_s22 + $0x8c0] sm:$0xff]  ;;  %v498_v17 = vld [vmem:[%s4096_s22 + $0x8d8] sm:$0xff]  ;;  %v241_v18 = vld [vmem:[%s4096_s22 + $0xd0] sm:$0xff] }
  0x27   : > { %v497_v19 = vld [vmem:[%s4096_s22 + $0x8d0] sm:$0xff]  ;;  %v244_v20 = vld [vmem:[%s4096_s22 + $0xe8] sm:$0xff]  ;;  %v243_v22 = vld [vmem:[%s4096_s22 + $0xe0] sm:$0xff] }
  0x28   : > { %3900 = vmatpush1.bf16.msra.mxu0 %v3899_v26  ;;  %3920 = vmatpush1.bf16.msra.mxu1 %v3899_v26  ;;  %v500_v21 = vld [vmem:[%s4096_s22 + $0x8e8] sm:$0xff]  ;;  %v499_v23 = vld [vmem:[%s4096_s22 + $0x8e0] sm:$0xff]  ;;  %v246_v24 = vld [vmem:[%s4096_s22 + $0xf8] sm:$0xff] }
  0x29   : > { %3901 = vmatprep.subr.bf16.mxu0 %v4006_v3  ;;  %3912 = vmatprep.subr.bf16.mxu1 %v4006_v3  ;;  %v489_v3 = vld [vmem:[%s4096_s22 + $0x890] sm:$0xff]  ;;  %v502_v25 = vld [vmem:[%s4096_s22 + $0x8f8] sm:$0xff]  ;;  %v248_v28 = vld [vmem:[%s4096_s22 + $0x108] sm:$0xff] }
  0x2a   : > { %v245_v26 = vld [vmem:[%s4096_s22 + $0xf0] sm:$0xff] }
  0x2b   : > { %v501_v27 = vld [vmem:[%s4096_s22 + $0x8f0] sm:$0xff] }
  0x2c   : > { %3903 = vmatpush1.bf16.msra.mxu0 %v3902_v29  ;;  %3921 = vmatpush1.bf16.msra.mxu1 %v3902_v29  ;;  %v504_v29 = vld [vmem:[%s4096_s22 + $0x908] sm:$0xff] }
  0x2f   : > { %1586 = vmatmul.mubr.f32.vlgmr.msra.gmra.mrb[0].mxu0 %v215_v30  ;;  %2226 = vmatmul.mubr.f32.vlgmr.msra.gmra.mrb[0].mxu1 %v471_v31  ;;  %v247_v30 = vld [vmem:[%s4096_s22 + $0x100] sm:$0xff] }
  0x30   : > { %3620 = vmatprep.mubr.msk.f32.mxu0 %vm752_vm0, %v218_v32  ;;  %3748 = vmatprep.mubr.msk.f32.mxu1 %vm752_vm0, %v474_v33  ;;  %v503_v31 = vld [vmem:[%s4096_s22 + $0x900] sm:$0xff]  ;;  %v250_v32 = vld [vmem:[%s4096_s22 + $0x118] sm:$0xff] }
  0x31   : > { %v506_v33 = vld [vmem:[%s4096_s22 + $0x918] sm:$0xff] }
  0x33   : > { %1591 = vmatmul.mubr.f32.gmra.mrb[2].mxu0 %v217_v34  ;;  %2231 = vmatmul.mubr.f32.gmra.mrb[2].mxu1 %v473_v35  ;;  %v249_v34 = vld [vmem:[%s4096_s22 + $0x110] sm:$0xff] }
  0x34   : > { %3621 = vmatprep.mubr.msk.f32.mxu0 %vm752_vm0, %v220_v36  ;;  %3749 = vmatprep.mubr.msk.f32.mxu1 %vm752_vm0, %v476_v37  ;;  %v505_v35 = vld [vmem:[%s4096_s22 + $0x910] sm:$0xff]  ;;  %v252_v36 = vld [vmem:[%s4096_s22 + $0x128] sm:$0xff] }
  0x35   : > { %v508_v37 = vld [vmem:[%s4096_s22 + $0x928] sm:$0xff] }
  0x37   : > { %1596 = vmatmul.mubr.f32.gmra.mrb[4].mxu0 %v219_v38  ;;  %2236 = vmatmul.mubr.f32.gmra.mrb[4].mxu1 %v475_v39  ;;  %v251_v38 = vld [vmem:[%s4096_s22 + $0x120] sm:$0xff] }
  0x38   : > { %3622 = vmatprep.mubr.msk.f32.mxu0 %vm752_vm0, %v222_v40  ;;  %3750 = vmatprep.mubr.msk.f32.mxu1 %vm752_vm0, %v478_v41  ;;  %v507_v39 = vld [vmem:[%s4096_s22 + $0x920] sm:$0xff]  ;;  %v254_v40 = vld [vmem:[%s4096_s22 + $0x138] sm:$0xff] }
  0x39   : > { %v510_v41 = vld [vmem:[%s4096_s22 + $0x938] sm:$0xff] }
  0x3b   : > { %1601 = vmatmul.mubr.f32.gmra.mrb[6].mxu0 %v221_v42  ;;  %2241 = vmatmul.mubr.f32.gmra.mrb[6].mxu1 %v477_v43  ;;  %v253_v42 = vld [vmem:[%s4096_s22 + $0x130] sm:$0xff] }
  0x3c   : > { %3623 = vmatprep.mubr.msk.f32.mxu0 %vm752_vm0, %v224_v44  ;;  %3751 = vmatprep.mubr.msk.f32.mxu1 %vm752_vm0, %v480_v45  ;;  %v509_v43 = vld [vmem:[%s4096_s22 + $0x930] sm:$0xff]  ;;  %v256_v44 = vld [vmem:[%s4096_s22 + $0x148] sm:$0xff] }
  0x3d   : > { %v512_v45 = vld [vmem:[%s4096_s22 + $0x948] sm:$0xff] }
  0x3f   : > { %1606 = vmatmul.mubr.f32.gmra.mrb[8].mxu0 %v223_v46  ;;  %2246 = vmatmul.mubr.f32.gmra.mrb[8].mxu1 %v479_v47  ;;  %v255_v46 = vld [vmem:[%s4096_s22 + $0x140] sm:$0xff] }
  0x40   : > { %3624 = vmatprep.mubr.msk.f32.mxu0 %vm752_vm0, %v226_v48  ;;  %3752 = vmatprep.mubr.msk.f32.mxu1 %vm752_vm0, %v482_v49  ;;  %v511_v47 = vld [vmem:[%s4096_s22 + $0x940] sm:$0xff]  ;;  %v258_v48 = vld [vmem:[%s4096_s22 + $0x158] sm:$0xff] }
  0x41   : > { %v514_v49 = vld [vmem:[%s4096_s22 + $0x958] sm:$0xff] }
  0x43   : > { %1611 = vmatmul.mubr.f32.gmra.mrb[10].mxu0 %v225_v50  ;;  %2251 = vmatmul.mubr.f32.gmra.mrb[10].mxu1 %v481_v51  ;;  %v257_v50 = vld [vmem:[%s4096_s22 + $0x150] sm:$0xff] }
  0x44   : > { %3625 = vmatprep.mubr.msk.f32.mxu0 %vm752_vm0, %v228_v52  ;;  %3753 = vmatprep.mubr.msk.f32.mxu1 %vm752_vm0, %v484_v53  ;;  %v513_v51 = vld [vmem:[%s4096_s22 + $0x950] sm:$0xff]  ;;  %v260_v52 = vld [vmem:[%s4096_s22 + $0x168] sm:$0xff] }
  0x45   : > { %v516_v53 = vld [vmem:[%s4096_s22 + $0x968] sm:$0xff] }
  0x47   : > { %1616 = vmatmul.mubr.f32.gmra.mrb[12].mxu0 %v227_v54  ;;  %2256 = vmatmul.mubr.f32.gmra.mrb[12].mxu1 %v483_v55  ;;  %v259_v54 = vld [vmem:[%s4096_s22 + $0x160] sm:$0xff] }
  0x48   : > { %3626 = vmatprep.mubr.msk.f32.mxu0 %vm752_vm0, %v230_v56  ;;  %3754 = vmatprep.mubr.msk.f32.mxu1 %vm752_vm0, %v486_v57  ;;  %v515_v55 = vld [vmem:[%s4096_s22 + $0x960] sm:$0xff]  ;;  %v262_v56 = vld [vmem:[%s4096_s22 + $0x178] sm:$0xff] }
  0x49   : > { %v518_v57 = vld [vmem:[%s4096_s22 + $0x978] sm:$0xff] }
  0x4b   : > { %1621 = vmatmul.mubr.f32.gmra.mrb[14].mxu0 %v229_v58  ;;  %2261 = vmatmul.mubr.f32.gmra.mrb[14].mxu1 %v485_v59  ;;  %v261_v58 = vld [vmem:[%s4096_s22 + $0x170] sm:$0xff] }
  0x4c   : > { %3627 = vmatprep.mubr.msk.f32.mxu0 %vm752_vm0, %v232_v60  ;;  %3755 = vmatprep.mubr.msk.f32.mxu1 %vm752_vm0, %v488_v61  ;;  %v517_v59 = vld [vmem:[%s4096_s22 + $0x970] sm:$0xff]  ;;  %v264_v60 = vld [vmem:[%s4096_s22 + $0x188] sm:$0xff] }
  0x4d   : > { %v520_v61 = vld [vmem:[%s4096_s22 + $0x988] sm:$0xff] }
  0x4f   : > { %1626 = vmatmul.mubr.f32.gmra.mrb[16].mxu0 %v231_v62  ;;  %2266 = vmatmul.mubr.f32.gmra.mrb[16].mxu1 %v487_v63  ;;  %v263_v62 = vld [vmem:[%s4096_s22 + $0x180] sm:$0xff] }
  0x50   : > { %3628 = vmatprep.mubr.msk.f32.mxu0 %vm752_vm0, %v234_v0  ;;  %3756 = vmatprep.mubr.msk.f32.mxu1 %vm752_vm0, %v490_v1  ;;  %v519_v63 = vld [vmem:[%s4096_s22 + $0x980] sm:$0xff]  ;;  %v266_v0 = vld [vmem:[%s4096_s22 + $0x198] sm:$0xff] }
  0x51   : > { %v522_v1 = vld [vmem:[%s4096_s22 + $0x998] sm:$0xff] }
  0x53   : > { %1631 = vmatmul.mubr.f32.gmra.mrb[18].mxu0 %v233_v2  ;;  %2271 = vmatmul.mubr.f32.gmra.mrb[18].mxu1 %v489_v3  ;;  %v265_v2 = vld [vmem:[%s4096_s22 + $0x190] sm:$0xff] }
  0x54   : > { %3629 = vmatprep.mubr.msk.f32.mxu0 %vm752_vm0, %v236_v4  ;;  %3757 = vmatprep.mubr.msk.f32.mxu1 %vm752_vm0, %v492_v5  ;;  %v521_v3 = vld [vmem:[%s4096_s22 + $0x990] sm:$0xff]  ;;  %v268_v4 = vld [vmem:[%s4096_s22 + $0x1a8] sm:$0xff] }
  0x55   : > { %v524_v5 = vld [vmem:[%s4096_s22 + $0x9a8] sm:$0xff] }
  0x57   : > { %1636 = vmatmul.mubr.f32.gmra.mrb[20].mxu0 %v235_v6  ;;  %2276 = vmatmul.mubr.f32.gmra.mrb[20].mxu1 %v491_v7  ;;  %v267_v6 = vld [vmem:[%s4096_s22 + $0x1a0] sm:$0xff] }
  0x58   : > { %3630 = vmatprep.mubr.msk.f32.mxu0 %vm752_vm0, %v238_v8  ;;  %3758 = vmatprep.mubr.msk.f32.mxu1 %vm752_vm0, %v494_v9  ;;  %v523_v7 = vld [vmem:[%s4096_s22 + $0x9a0] sm:$0xff]  ;;  %v270_v8 = vld [vmem:[%s4096_s22 + $0x1b8] sm:$0xff] }
  0x59   : > { %v526_v9 = vld [vmem:[%s4096_s22 + $0x9b8] sm:$0xff] }
  0x5b   : > { %1641 = vmatmul.mubr.f32.gmra.mrb[22].mxu0 %v237_v10  ;;  %2281 = vmatmul.mubr.f32.gmra.mrb[22].mxu1 %v493_v11  ;;  %v269_v10 = vld [vmem:[%s4096_s22 + $0x1b0] sm:$0xff] }
  0x5c   : > { %3631 = vmatprep.mubr.msk.f32.mxu0 %vm752_vm0, %v240_v12  ;;  %3759 = vmatprep.mubr.msk.f32.mxu1 %vm752_vm0, %v496_v13  ;;  %v525_v11 = vld [vmem:[%s4096_s22 + $0x9b0] sm:$0xff]  ;;  %v272_v12 = vld [vmem:[%s4096_s22 + $0x1c8] sm:$0xff] }
  0x5d   : > { %v528_v13 = vld [vmem:[%s4096_s22 + $0x9c8] sm:$0xff] }
  0x5f   : > { %1646 = vmatmul.mubr.f32.gmra.mrb[24].mxu0 %v239_v14  ;;  %2286 = vmatmul.mubr.f32.gmra.mrb[24].mxu1 %v495_v15  ;;  %v271_v14 = vld [vmem:[%s4096_s22 + $0x1c0] sm:$0xff] }
  0x60   : > { %3632 = vmatprep.mubr.msk.f32.mxu0 %vm752_vm0, %v242_v16  ;;  %3760 = vmatprep.mubr.msk.f32.mxu1 %vm752_vm0, %v498_v17  ;;  %v527_v15 = vld [vmem:[%s4096_s22 + $0x9c0] sm:$0xff]  ;;  %v274_v16 = vld [vmem:[%s4096_s22 + $0x1d8] sm:$0xff] }
  0x61   : > { %v530_v17 = vld [vmem:[%s4096_s22 + $0x9d8] sm:$0xff] }
  0x63   : > { %1651 = vmatmul.mubr.f32.gmra.mrb[26].mxu0 %v241_v18  ;;  %2291 = vmatmul.mubr.f32.gmra.mrb[26].mxu1 %v497_v19  ;;  %v273_v18 = vld [vmem:[%s4096_s22 + $0x1d0] sm:$0xff] }
  0x64   : > { %3633 = vmatprep.mubr.msk.f32.mxu0 %vm752_vm0, %v244_v20  ;;  %3761 = vmatprep.mubr.msk.f32.mxu1 %vm752_vm0, %v500_v21  ;;  %v529_v19 = vld [vmem:[%s4096_s22 + $0x9d0] sm:$0xff]  ;;  %v276_v20 = vld [vmem:[%s4096_s22 + $0x1e8] sm:$0xff] }
  0x65   : > { %v532_v21 = vld [vmem:[%s4096_s22 + $0x9e8] sm:$0xff] }
  0x67   : > { %1656 = vmatmul.mubr.f32.gmra.mrb[28].mxu0 %v243_v22  ;;  %2296 = vmatmul.mubr.f32.gmra.mrb[28].mxu1 %v499_v23  ;;  %v275_v22 = vld [vmem:[%s4096_s22 + $0x1e0] sm:$0xff] }
  0x68   : > { %3634 = vmatprep.mubr.msk.f32.mxu0 %vm752_vm0, %v246_v24  ;;  %3762 = vmatprep.mubr.msk.f32.mxu1 %vm752_vm0, %v502_v25  ;;  %v531_v23 = vld [vmem:[%s4096_s22 + $0x9e0] sm:$0xff]  ;;  %v278_v24 = vld [vmem:[%s4096_s22 + $0x1f8] sm:$0xff] }
  0x69   : > { %v534_v25 = vld [vmem:[%s4096_s22 + $0x9f8] sm:$0xff] }
  0x6b   : > { %1661 = vmatmul.mubr.f32.gmra.mrb[30].mxu0 %v245_v26  ;;  %2301 = vmatmul.mubr.f32.gmra.mrb[30].mxu1 %v501_v27  ;;  %v277_v26 = vld [vmem:[%s4096_s22 + $0x1f0] sm:$0xff] }
  0x6c   : > { %3635 = vmatprep.mubr.msk.f32.mxu0 %vm752_vm0, %v248_v28  ;;  %3763 = vmatprep.mubr.msk.f32.mxu1 %vm752_vm0, %v504_v29  ;;  %v533_v27 = vld [vmem:[%s4096_s22 + $0x9f0] sm:$0xff]  ;;  %v280_v28 = vld [vmem:[%s4096_s22 + $0x208] sm:$0xff] }
  0x6d   : > { %v536_v29 = vld [vmem:[%s4096_s22 + $0xa08] sm:$0xff] }
  0x6f   : > { %1666 = vmatmul.mubr.f32.gmra.mrb[32].mxu0 %v247_v30  ;;  %2306 = vmatmul.mubr.f32.gmra.mrb[32].mxu1 %v503_v31  ;;  %v279_v30 = vld [vmem:[%s4096_s22 + $0x200] sm:$0xff] }
  0x70   : > { %3636 = vmatprep.mubr.msk.f32.mxu0 %vm752_vm0, %v250_v32  ;;  %3764 = vmatprep.mubr.msk.f32.mxu1 %vm752_vm0, %v506_v33  ;;  %v535_v31 = vld [vmem:[%s4096_s22 + $0xa00] sm:$0xff]  ;;  %v282_v32 = vld [vmem:[%s4096_s22 + $0x218] sm:$0xff] }
  0x71   : > { %v538_v33 = vld [vmem:[%s4096_s22 + $0xa18] sm:$0xff] }
  0x73   : > { %1671 = vmatmul.mubr.f32.gmra.mrb[34].mxu0 %v249_v34  ;;  %2311 = vmatmul.mubr.f32.gmra.mrb[34].mxu1 %v505_v35  ;;  %v281_v34 = vld [vmem:[%s4096_s22 + $0x210] sm:$0xff] }
  0x74   : > { %3637 = vmatprep.mubr.msk.f32.mxu0 %vm752_vm0, %v252_v36  ;;  %3765 = vmatprep.mubr.msk.f32.mxu1 %vm752_vm0, %v508_v37  ;;  %v537_v35 = vld [vmem:[%s4096_s22 + $0xa10] sm:$0xff]  ;;  %v284_v36 = vld [vmem:[%s4096_s22 + $0x228] sm:$0xff] }
  0x75   : > { %v540_v37 = vld [vmem:[%s4096_s22 + $0xa28] sm:$0xff] }
  0x77   : > { %1676 = vmatmul.mubr.f32.gmra.mrb[36].mxu0 %v251_v38  ;;  %2316 = vmatmul.mubr.f32.gmra.mrb[36].mxu1 %v507_v39  ;;  %v283_v38 = vld [vmem:[%s4096_s22 + $0x220] sm:$0xff] }
  0x78   : > { %3638 = vmatprep.mubr.msk.f32.mxu0 %vm752_vm0, %v254_v40  ;;  %3766 = vmatprep.mubr.msk.f32.mxu1 %vm752_vm0, %v510_v41  ;;  %v539_v39 = vld [vmem:[%s4096_s22 + $0xa20] sm:$0xff]  ;;  %v286_v40 = vld [vmem:[%s4096_s22 + $0x238] sm:$0xff] }
  0x79   : > { %v542_v41 = vld [vmem:[%s4096_s22 + $0xa38] sm:$0xff] }
  0x7b   : > { %1681 = vmatmul.mubr.f32.gmra.mrb[38].mxu0 %v253_v42  ;;  %2321 = vmatmul.mubr.f32.gmra.mrb[38].mxu1 %v509_v43  ;;  %v285_v42 = vld [vmem:[%s4096_s22 + $0x230] sm:$0xff] }
  0x7c   : > { %3639 = vmatprep.mubr.msk.f32.mxu0 %vm752_vm0, %v256_v44  ;;  %3767 = vmatprep.mubr.msk.f32.mxu1 %vm752_vm0, %v512_v45  ;;  %v541_v43 = vld [vmem:[%s4096_s22 + $0xa30] sm:$0xff]  ;;  %v288_v44 = vld [vmem:[%s4096_s22 + $0x248] sm:$0xff] }
  0x7d   : > { %v544_v45 = vld [vmem:[%s4096_s22 + $0xa48] sm:$0xff] }
  0x7f   : > { %1686 = vmatmul.mubr.f32.gmra.mrb[40].mxu0 %v255_v46  ;;  %2326 = vmatmul.mubr.f32.gmra.mrb[40].mxu1 %v511_v47  ;;  %v287_v46 = vld [vmem:[%s4096_s22 + $0x240] sm:$0xff] }
  0x80   : > { %3640 = vmatprep.mubr.msk.f32.mxu0 %vm752_vm0, %v258_v48  ;;  %3768 = vmatprep.mubr.msk.f32.mxu1 %vm752_vm0, %v514_v49  ;;  %v543_v47 = vld [vmem:[%s4096_s22 + $0xa40] sm:$0xff]  ;;  %v290_v48 = vld [vmem:[%s4096_s22 + $0x258] sm:$0xff] }
  0x81   : > { %v546_v49 = vld [vmem:[%s4096_s22 + $0xa58] sm:$0xff] }
  0x83   : > { %1691 = vmatmul.mubr.f32.gmra.mrb[42].mxu0 %v257_v50  ;;  %2331 = vmatmul.mubr.f32.gmra.mrb[42].mxu1 %v513_v51  ;;  %v289_v50 = vld [vmem:[%s4096_s22 + $0x250] sm:$0xff] }
  0x84   : > { %3641 = vmatprep.mubr.msk.f32.mxu0 %vm752_vm0, %v260_v52  ;;  %3769 = vmatprep.mubr.msk.f32.mxu1 %vm752_vm0, %v516_v53  ;;  %v545_v51 = vld [vmem:[%s4096_s22 + $0xa50] sm:$0xff]  ;;  %v292_v52 = vld [vmem:[%s4096_s22 + $0x268] sm:$0xff] }
  0x85   : > { %v548_v53 = vld [vmem:[%s4096_s22 + $0xa68] sm:$0xff] }
  0x87   : > { %1696 = vmatmul.mubr.f32.gmra.mrb[44].mxu0 %v259_v54  ;;  %2336 = vmatmul.mubr.f32.gmra.mrb[44].mxu1 %v515_v55  ;;  %v291_v54 = vld [vmem:[%s4096_s22 + $0x260] sm:$0xff] }
  0x88   : > { %3642 = vmatprep.mubr.msk.f32.mxu0 %vm752_vm0, %v262_v56  ;;  %3770 = vmatprep.mubr.msk.f32.mxu1 %vm752_vm0, %v518_v57  ;;  %v547_v55 = vld [vmem:[%s4096_s22 + $0xa60] sm:$0xff]  ;;  %v294_v56 = vld [vmem:[%s4096_s22 + $0x278] sm:$0xff] }
  0x89   : > { %v550_v57 = vld [vmem:[%s4096_s22 + $0xa78] sm:$0xff] }
  0x8b   : > { %1701 = vmatmul.mubr.f32.gmra.mrb[46].mxu0 %v261_v58  ;;  %2341 = vmatmul.mubr.f32.gmra.mrb[46].mxu1 %v517_v59  ;;  %v293_v58 = vld [vmem:[%s4096_s22 + $0x270] sm:$0xff] }
  0x8c   : > { %3643 = vmatprep.mubr.msk.f32.mxu0 %vm752_vm0, %v264_v60  ;;  %3771 = vmatprep.mubr.msk.f32.mxu1 %vm752_vm0, %v520_v61  ;;  %v549_v59 = vld [vmem:[%s4096_s22 + $0xa70] sm:$0xff]  ;;  %v296_v60 = vld [vmem:[%s4096_s22 + $0x288] sm:$0xff] }
  0x8d   : > { %v552_v61 = vld [vmem:[%s4096_s22 + $0xa88] sm:$0xff] }
  0x8f   : > { %1706 = vmatmul.mubr.f32.gmra.mrb[48].mxu0 %v263_v62  ;;  %2346 = vmatmul.mubr.f32.gmra.mrb[48].mxu1 %v519_v63  ;;  %v295_v62 = vld [vmem:[%s4096_s22 + $0x280] sm:$0xff] }
  0x90   : > { %3644 = vmatprep.mubr.msk.f32.mxu0 %vm752_vm0, %v266_v0  ;;  %3772 = vmatprep.mubr.msk.f32.mxu1 %vm752_vm0, %v522_v1  ;;  %v551_v63 = vld [vmem:[%s4096_s22 + $0xa80] sm:$0xff]  ;;  %v298_v0 = vld [vmem:[%s4096_s22 + $0x298] sm:$0xff] }
  0x91   : > { %v554_v1 = vld [vmem:[%s4096_s22 + $0xa98] sm:$0xff] }
  0x93   : > { %1711 = vmatmul.mubr.f32.gmra.mrb[50].mxu0 %v265_v2  ;;  %2351 = vmatmul.mubr.f32.gmra.mrb[50].mxu1 %v521_v3  ;;  %v297_v2 = vld [vmem:[%s4096_s22 + $0x290] sm:$0xff] }
  0x94   : > { %3645 = vmatprep.mubr.msk.f32.mxu0 %vm752_vm0, %v268_v4  ;;  %3773 = vmatprep.mubr.msk.f32.mxu1 %vm752_vm0, %v524_v5  ;;  %v553_v3 = vld [vmem:[%s4096_s22 + $0xa90] sm:$0xff]  ;;  %v300_v4 = vld [vmem:[%s4096_s22 + $0x2a8] sm:$0xff] }
  0x95   : > { %v556_v5 = vld [vmem:[%s4096_s22 + $0xaa8] sm:$0xff] }
  0x97   : > { %1716 = vmatmul.mubr.f32.gmra.mrb[52].mxu0 %v267_v6  ;;  %2356 = vmatmul.mubr.f32.gmra.mrb[52].mxu1 %v523_v7  ;;  %v299_v6 = vld [vmem:[%s4096_s22 + $0x2a0] sm:$0xff] }
  0x98   : > { %3646 = vmatprep.mubr.msk.f32.mxu0 %vm752_vm0, %v270_v8  ;;  %3774 = vmatprep.mubr.msk.f32.mxu1 %vm752_vm0, %v526_v9  ;;  %v555_v7 = vld [vmem:[%s4096_s22 + $0xaa0] sm:$0xff]  ;;  %v302_v8 = vld [vmem:[%s4096_s22 + $0x2b8] sm:$0xff] }
  0x99   : > { %v558_v9 = vld [vmem:[%s4096_s22 + $0xab8] sm:$0xff] }
  0x9b   : > { %1721 = vmatmul.mubr.f32.gmra.mrb[54].mxu0 %v269_v10  ;;  %2361 = vmatmul.mubr.f32.gmra.mrb[54].mxu1 %v525_v11  ;;  %v301_v10 = vld [vmem:[%s4096_s22 + $0x2b0] sm:$0xff] }
  0x9c   : > { %3647 = vmatprep.mubr.msk.f32.mxu0 %vm752_vm0, %v272_v12  ;;  %3775 = vmatprep.mubr.msk.f32.mxu1 %vm752_vm0, %v528_v13  ;;  %v557_v11 = vld [vmem:[%s4096_s22 + $0xab0] sm:$0xff]  ;;  %v304_v12 = vld [vmem:[%s4096_s22 + $0x2c8] sm:$0xff] }
  0x9d   : > { %v560_v13 = vld [vmem:[%s4096_s22 + $0xac8] sm:$0xff] }
  0x9f   : > { %1726 = vmatmul.mubr.f32.gmra.mrb[56].mxu0 %v271_v14  ;;  %2366 = vmatmul.mubr.f32.gmra.mrb[56].mxu1 %v527_v15  ;;  %v303_v14 = vld [vmem:[%s4096_s22 + $0x2c0] sm:$0xff] }
  0xa0   : > { %3648 = vmatprep.mubr.msk.f32.mxu0 %vm752_vm0, %v274_v16  ;;  %3776 = vmatprep.mubr.msk.f32.mxu1 %vm752_vm0, %v530_v17  ;;  %v559_v15 = vld [vmem:[%s4096_s22 + $0xac0] sm:$0xff]  ;;  %v306_v16 = vld [vmem:[%s4096_s22 + $0x2d8] sm:$0xff] }
  0xa1   : > { %v562_v17 = vld [vmem:[%s4096_s22 + $0xad8] sm:$0xff] }
  0xa3   : > { %1731 = vmatmul.mubr.f32.gmra.mrb[58].mxu0 %v273_v18  ;;  %2371 = vmatmul.mubr.f32.gmra.mrb[58].mxu1 %v529_v19  ;;  %v305_v18 = vld [vmem:[%s4096_s22 + $0x2d0] sm:$0xff] }
  0xa4   : > { %3649 = vmatprep.mubr.msk.f32.mxu0 %vm752_vm0, %v276_v20  ;;  %3777 = vmatprep.mubr.msk.f32.mxu1 %vm752_vm0, %v532_v21  ;;  %v561_v19 = vld [vmem:[%s4096_s22 + $0xad0] sm:$0xff]  ;;  %v308_v20 = vld [vmem:[%s4096_s22 + $0x2e8] sm:$0xff] }
  0xa5   : > { %v564_v21 = vld [vmem:[%s4096_s22 + $0xae8] sm:$0xff] }
  0xa7   : > { %1736 = vmatmul.mubr.f32.gmra.mrb[60].mxu0 %v275_v22  ;;  %2376 = vmatmul.mubr.f32.gmra.mrb[60].mxu1 %v531_v23  ;;  %v307_v22 = vld [vmem:[%s4096_s22 + $0x2e0] sm:$0xff] }
  0xa8   : > { %3650 = vmatprep.mubr.msk.f32.mxu0 %vm752_vm0, %v278_v24  ;;  %3778 = vmatprep.mubr.msk.f32.mxu1 %vm752_vm0, %v534_v25  ;;  %v563_v23 = vld [vmem:[%s4096_s22 + $0xae0] sm:$0xff]  ;;  %v310_v24 = vld [vmem:[%s4096_s22 + $0x2f8] sm:$0xff] }
  0xa9   : > { %v566_v25 = vld [vmem:[%s4096_s22 + $0xaf8] sm:$0xff] }
  0xab   : > { %1741 = vmatmul.mubr.f32.gmra.mrb[62].mxu0 %v277_v26  ;;  %2381 = vmatmul.mubr.f32.gmra.mrb[62].mxu1 %v533_v27  ;;  %v309_v26 = vld [vmem:[%s4096_s22 + $0x2f0] sm:$0xff] }
  0xac   : > { %3651 = vmatprep.mubr.msk.f32.mxu0 %vm752_vm0, %v280_v28  ;;  %3779 = vmatprep.mubr.msk.f32.mxu1 %vm752_vm0, %v536_v29  ;;  %v565_v27 = vld [vmem:[%s4096_s22 + $0xaf0] sm:$0xff]  ;;  %v312_v28 = vld [vmem:[%s4096_s22 + $0x308] sm:$0xff] }
  0xad   : > { %v568_v29 = vld [vmem:[%s4096_s22 + $0xb08] sm:$0xff] }
  0xaf   : > { %1746 = vmatmul.mubr.f32.gmra.mrb[64].mxu0 %v279_v30  ;;  %2386 = vmatmul.mubr.f32.gmra.mrb[64].mxu1 %v535_v31  ;;  %v311_v30 = vld [vmem:[%s4096_s22 + $0x300] sm:$0xff] }
  0xb0   : > { %3652 = vmatprep.mubr.msk.f32.mxu0 %vm752_vm0, %v282_v32  ;;  %3780 = vmatprep.mubr.msk.f32.mxu1 %vm752_vm0, %v538_v33  ;;  %v567_v31 = vld [vmem:[%s4096_s22 + $0xb00] sm:$0xff]  ;;  %v314_v32 = vld [vmem:[%s4096_s22 + $0x318] sm:$0xff] }
  0xb1   : > { %v570_v33 = vld [vmem:[%s4096_s22 + $0xb18] sm:$0xff] }
  0xb3   : > { %1751 = vmatmul.mubr.f32.gmra.mrb[66].mxu0 %v281_v34  ;;  %2391 = vmatmul.mubr.f32.gmra.mrb[66].mxu1 %v537_v35  ;;  %v313_v34 = vld [vmem:[%s4096_s22 + $0x310] sm:$0xff] }
  0xb4   : > { %3653 = vmatprep.mubr.msk.f32.mxu0 %vm752_vm0, %v284_v36  ;;  %3781 = vmatprep.mubr.msk.f32.mxu1 %vm752_vm0, %v540_v37  ;;  %v569_v35 = vld [vmem:[%s4096_s22 + $0xb10] sm:$0xff]  ;;  %v316_v36 = vld [vmem:[%s4096_s22 + $0x328] sm:$0xff] }
  0xb5   : > { %v572_v37 = vld [vmem:[%s4096_s22 + $0xb28] sm:$0xff] }
  0xb7   : > { %1756 = vmatmul.mubr.f32.gmra.mrb[68].mxu0 %v283_v38  ;;  %2396 = vmatmul.mubr.f32.gmra.mrb[68].mxu1 %v539_v39  ;;  %v315_v38 = vld [vmem:[%s4096_s22 + $0x320] sm:$0xff] }
  0xb8   : > { %3654 = vmatprep.mubr.msk.f32.mxu0 %vm752_vm0, %v286_v40  ;;  %3782 = vmatprep.mubr.msk.f32.mxu1 %vm752_vm0, %v542_v41  ;;  %v571_v39 = vld [vmem:[%s4096_s22 + $0xb20] sm:$0xff]  ;;  %v318_v40 = vld [vmem:[%s4096_s22 + $0x338] sm:$0xff] }
  0xb9   : > { %v574_v41 = vld [vmem:[%s4096_s22 + $0xb38] sm:$0xff] }
  0xbb   : > { %1761 = vmatmul.mubr.f32.gmra.mrb[70].mxu0 %v285_v42  ;;  %2401 = vmatmul.mubr.f32.gmra.mrb[70].mxu1 %v541_v43  ;;  %v317_v42 = vld [vmem:[%s4096_s22 + $0x330] sm:$0xff] }
  0xbc   : > { %3655 = vmatprep.mubr.msk.f32.mxu0 %vm752_vm0, %v288_v44  ;;  %3783 = vmatprep.mubr.msk.f32.mxu1 %vm752_vm0, %v544_v45  ;;  %v573_v43 = vld [vmem:[%s4096_s22 + $0xb30] sm:$0xff]  ;;  %v320_v44 = vld [vmem:[%s4096_s22 + $0x348] sm:$0xff] }
  0xbd   : > { %v576_v45 = vld [vmem:[%s4096_s22 + $0xb48] sm:$0xff] }
  0xbf   : > { %1766 = vmatmul.mubr.f32.gmra.mrb[72].mxu0 %v287_v46  ;;  %2406 = vmatmul.mubr.f32.gmra.mrb[72].mxu1 %v543_v47  ;;  %v319_v46 = vld [vmem:[%s4096_s22 + $0x340] sm:$0xff] }
  0xc0   : > { %3656 = vmatprep.mubr.msk.f32.mxu0 %vm752_vm0, %v290_v48  ;;  %3784 = vmatprep.mubr.msk.f32.mxu1 %vm752_vm0, %v546_v49  ;;  %v575_v47 = vld [vmem:[%s4096_s22 + $0xb40] sm:$0xff]  ;;  %v322_v48 = vld [vmem:[%s4096_s22 + $0x358] sm:$0xff] }
  0xc1   : > { %v578_v49 = vld [vmem:[%s4096_s22 + $0xb58] sm:$0xff] }
  0xc3   : > { %1771 = vmatmul.mubr.f32.gmra.mrb[74].mxu0 %v289_v50  ;;  %2411 = vmatmul.mubr.f32.gmra.mrb[74].mxu1 %v545_v51  ;;  %v321_v50 = vld [vmem:[%s4096_s22 + $0x350] sm:$0xff] }
  0xc4   : > { %3657 = vmatprep.mubr.msk.f32.mxu0 %vm752_vm0, %v292_v52  ;;  %3785 = vmatprep.mubr.msk.f32.mxu1 %vm752_vm0, %v548_v53  ;;  %v577_v51 = vld [vmem:[%s4096_s22 + $0xb50] sm:$0xff]  ;;  %v324_v52 = vld [vmem:[%s4096_s22 + $0x368] sm:$0xff] }
  0xc5   : > { %v580_v53 = vld [vmem:[%s4096_s22 + $0xb68] sm:$0xff] }
  0xc7   : > { %1776 = vmatmul.mubr.f32.gmra.mrb[76].mxu0 %v291_v54  ;;  %2416 = vmatmul.mubr.f32.gmra.mrb[76].mxu1 %v547_v55 }
  0xc8   : > { %3658 = vmatprep.mubr.msk.f32.mxu0 %vm752_vm0, %v294_v56  ;;  %3786 = vmatprep.mubr.msk.f32.mxu1 %vm752_vm0, %v550_v57 }
  0xcb   : > { %1781 = vmatmul.mubr.f32.gmra.mrb[78].mxu0 %v293_v58  ;;  %2421 = vmatmul.mubr.f32.gmra.mrb[78].mxu1 %v549_v59  ;;  %v323_v58 = vld [vmem:[%s4096_s22 + $0x360] sm:$0xff] }
  0xcc   : > { %3659 = vmatprep.mubr.msk.f32.mxu0 %vm752_vm0, %v296_v60  ;;  %3787 = vmatprep.mubr.msk.f32.mxu1 %vm752_vm0, %v552_v61  ;;  %v579_v59 = vld [vmem:[%s4096_s22 + $0xb60] sm:$0xff]  ;;  %v326_v60 = vld [vmem:[%s4096_s22 + $0x378] sm:$0xff] }
  0xcd   : > { %v582_v61 = vld [vmem:[%s4096_s22 + $0xb78] sm:$0xff] }
  0xcf   : > { %1786 = vmatmul.mubr.f32.gmra.mrb[80].mxu0 %v295_v62  ;;  %2426 = vmatmul.mubr.f32.gmra.mrb[80].mxu1 %v551_v63 }
  0xd0   : > { %3660 = vmatprep.mubr.msk.f32.mxu0 %vm752_vm0, %v298_v0  ;;  %3788 = vmatprep.mubr.msk.f32.mxu1 %vm752_vm0, %v554_v1 }
  0xd3   : > { %1791 = vmatmul.mubr.f32.gmra.mrb[82].mxu0 %v297_v2  ;;  %2431 = vmatmul.mubr.f32.gmra.mrb[82].mxu1 %v553_v3  ;;  %v325_v2 = vld [vmem:[%s4096_s22 + $0x370] sm:$0xff] }
  0xd4   : > { %3661 = vmatprep.mubr.msk.f32.mxu0 %vm752_vm0, %v300_v4  ;;  %3789 = vmatprep.mubr.msk.f32.mxu1 %vm752_vm0, %v556_v5  ;;  %v581_v3 = vld [vmem:[%s4096_s22 + $0xb70] sm:$0xff]  ;;  %v328_v4 = vld [vmem:[%s4096_s22 + $0x388] sm:$0xff] }
  0xd5   : > { %v584_v5 = vld [vmem:[%s4096_s22 + $0xb88] sm:$0xff] }
  0xd7   : > { %1796 = vmatmul.mubr.f32.gmra.mrb[84].mxu0 %v299_v6  ;;  %2436 = vmatmul.mubr.f32.gmra.mrb[84].mxu1 %v555_v7 }
  0xd8   : > { %3662 = vmatprep.mubr.msk.f32.mxu0 %vm752_vm0, %v302_v8  ;;  %3790 = vmatprep.mubr.msk.f32.mxu1 %vm752_vm0, %v558_v9 }
  0xdb   : > { %1801 = vmatmul.mubr.f32.gmra.mrb[86].mxu0 %v301_v10  ;;  %2441 = vmatmul.mubr.f32.gmra.mrb[86].mxu1 %v557_v11  ;;  %v327_v10 = vld [vmem:[%s4096_s22 + $0x380] sm:$0xff] }
  0xdc   : > { %3663 = vmatprep.mubr.msk.f32.mxu0 %vm752_vm0, %v304_v12  ;;  %3791 = vmatprep.mubr.msk.f32.mxu1 %vm752_vm0, %v560_v13  ;;  %v583_v11 = vld [vmem:[%s4096_s22 + $0xb80] sm:$0xff]  ;;  %v330_v12 = vld [vmem:[%s4096_s22 + $0x398] sm:$0xff] }
  0xdd   : > { %v586_v13 = vld [vmem:[%s4096_s22 + $0xb98] sm:$0xff] }
  0xdf   : > { %1806 = vmatmul.mubr.f32.gmra.mrb[88].mxu0 %v303_v14  ;;  %2446 = vmatmul.mubr.f32.gmra.mrb[88].mxu1 %v559_v15 }
  0xe0   : > { %3664 = vmatprep.mubr.msk.f32.mxu0 %vm752_vm0, %v306_v16  ;;  %3792 = vmatprep.mubr.msk.f32.mxu1 %vm752_vm0, %v562_v17 }
  0xe3   : > { %1811 = vmatmul.mubr.f32.gmra.mrb[90].mxu0 %v305_v18  ;;  %2451 = vmatmul.mubr.f32.gmra.mrb[90].mxu1 %v561_v19  ;;  %v329_v18 = vld [vmem:[%s4096_s22 + $0x390] sm:$0xff] }
  0xe4   : > { %3665 = vmatprep.mubr.msk.f32.mxu0 %vm752_vm0, %v308_v20  ;;  %3793 = vmatprep.mubr.msk.f32.mxu1 %vm752_vm0, %v564_v21  ;;  %v585_v19 = vld [vmem:[%s4096_s22 + $0xb90] sm:$0xff]  ;;  %v332_v20 = vld [vmem:[%s4096_s22 + $0x3a8] sm:$0xff] }
  0xe5   : > { %v588_v21 = vld [vmem:[%s4096_s22 + $0xba8] sm:$0xff] }
  0xe7   : > { %1816 = vmatmul.mubr.f32.gmra.mrb[92].mxu0 %v307_v22  ;;  %2456 = vmatmul.mubr.f32.gmra.mrb[92].mxu1 %v563_v23 }
  0xe8   : > { %3666 = vmatprep.mubr.msk.f32.mxu0 %vm752_vm0, %v310_v24  ;;  %3794 = vmatprep.mubr.msk.f32.mxu1 %vm752_vm0, %v566_v25 }
  0xeb   : > { %1821 = vmatmul.mubr.f32.gmra.mrb[94].mxu0 %v309_v26  ;;  %2461 = vmatmul.mubr.f32.gmra.mrb[94].mxu1 %v565_v27  ;;  %v331_v26 = vld [vmem:[%s4096_s22 + $0x3a0] sm:$0xff] }
  0xec   : > { %3667 = vmatprep.mubr.msk.f32.mxu0 %vm752_vm0, %v312_v28  ;;  %3795 = vmatprep.mubr.msk.f32.mxu1 %vm752_vm0, %v568_v29  ;;  %v587_v27 = vld [vmem:[%s4096_s22 + $0xba0] sm:$0xff]  ;;  %v334_v28 = vld [vmem:[%s4096_s22 + $0x3b8] sm:$0xff] }
  0xed   : > { %v590_v29 = vld [vmem:[%s4096_s22 + $0xbb8] sm:$0xff] }
  0xef   : > { %1826 = vmatmul.mubr.f32.gmra.mrb[96].mxu0 %v311_v30  ;;  %2466 = vmatmul.mubr.f32.gmra.mrb[96].mxu1 %v567_v31 }
  0xf0   : > { %3668 = vmatprep.mubr.msk.f32.mxu0 %vm752_vm0, %v314_v32  ;;  %3796 = vmatprep.mubr.msk.f32.mxu1 %vm752_vm0, %v570_v33 }
  0xf3   : > { %1831 = vmatmul.mubr.f32.gmra.mrb[98].mxu0 %v313_v34  ;;  %2471 = vmatmul.mubr.f32.gmra.mrb[98].mxu1 %v569_v35  ;;  %v333_v34 = vld [vmem:[%s4096_s22 + $0x3b0] sm:$0xff] }
  0xf4   : > { %3669 = vmatprep.mubr.msk.f32.mxu0 %vm752_vm0, %v316_v36  ;;  %3797 = vmatprep.mubr.msk.f32.mxu1 %vm752_vm0, %v572_v37  ;;  %v589_v35 = vld [vmem:[%s4096_s22 + $0xbb0] sm:$0xff]  ;;  %v336_v36 = vld [vmem:[%s4096_s22 + $0x3c8] sm:$0xff] }
  0xf5   : > { %v592_v37 = vld [vmem:[%s4096_s22 + $0xbc8] sm:$0xff] }
  0xf7   : > { %1836 = vmatmul.mubr.f32.gmra.mrb[100].mxu0 %v315_v38  ;;  %2476 = vmatmul.mubr.f32.gmra.mrb[100].mxu1 %v571_v39 }
  0xf8   : > { %3670 = vmatprep.mubr.msk.f32.mxu0 %vm752_vm0, %v318_v40  ;;  %3798 = vmatprep.mubr.msk.f32.mxu1 %vm752_vm0, %v574_v41 }
  0xfb   : > { %1841 = vmatmul.mubr.f32.gmra.mrb[102].mxu0 %v317_v42  ;;  %2481 = vmatmul.mubr.f32.gmra.mrb[102].mxu1 %v573_v43  ;;  %v335_v42 = vld [vmem:[%s4096_s22 + $0x3c0] sm:$0xff] }
  0xfc   : > { %3671 = vmatprep.mubr.msk.f32.mxu0 %vm752_vm0, %v320_v44  ;;  %3799 = vmatprep.mubr.msk.f32.mxu1 %vm752_vm0, %v576_v45  ;;  %v591_v43 = vld [vmem:[%s4096_s22 + $0xbc0] sm:$0xff]  ;;  %v338_v44 = vld [vmem:[%s4096_s22 + $0x3d8] sm:$0xff] }
  0xfd   : > { %v594_v45 = vld [vmem:[%s4096_s22 + $0xbd8] sm:$0xff] }
  0xff   : > { %1846 = vmatmul.mubr.f32.gmra.mrb[104].mxu0 %v319_v46  ;;  %2486 = vmatmul.mubr.f32.gmra.mrb[104].mxu1 %v575_v47 }
 0x100   : > { %3672 = vmatprep.mubr.msk.f32.mxu0 %vm752_vm0, %v322_v48  ;;  %3800 = vmatprep.mubr.msk.f32.mxu1 %vm752_vm0, %v578_v49  ;;  %v4544_v48 = vld [vmem:[%s5792_s2] ss:$0 sm:$0xff] }
 0x102   : > { %v4466_v54 = vpop.f32.mrb[0].mxu0  ;;  %v4468_v55 = vpop.f32.mrb[0].mxu1 }
 0x103   : > { %v1589_v56 = vpop.f32.mrb[1].mxu0  ;;  %1851 = vmatmul.mubr.f32.gmra.mrb[106].mxu0 %v321_v50  ;;  %v2229_v57 = vpop.f32.mrb[1].mxu1  ;;  %2491 = vmatmul.mubr.f32.gmra.mrb[106].mxu1 %v577_v51  ;;  %v337_v51 = vld [vmem:[%s4096_s22 + $0x3d0] sm:$0xff] }
 0x104   : > { %3673 = vmatprep.mubr.msk.f32.mxu0 %vm752_vm0, %v324_v52  ;;  %3801 = vmatprep.mubr.msk.f32.mxu1 %vm752_vm0, %v580_v53  ;;  %v593_v52 = vld [vmem:[%s4096_s22 + $0xbd0] sm:$0xff]  ;;  %v340_v53 = vld [vmem:[%s4096_s22 + $0x3e8] sm:$0xff]  ;;  %v1588_v57 = vadd.f32 %v4544_v48, %v4466_v54  ;;  %v339_v54 = vld [vmem:[%s4096_s22 + $0x3e0] sm:$0xff] }
 0x105   : > { %v596_v56 = vld [vmem:[%s4096_s22 + $0xbe8] sm:$0xff] }
 0x106   : > { %v4476_v62 = vpop.f32.mrb[2].mxu0  ;;  %v4478_v63 = vpop.f32.mrb[2].mxu1 }
 0x107   : > { %v1594_v0 = vpop.f32.mrb[3].mxu0  ;;  %1856 = vmatmul.mubr.f32.gmra.mrb[108].mxu0 %v323_v58  ;;  %v2234_v1 = vpop.f32.mrb[3].mxu1  ;;  %2496 = vmatmul.mubr.f32.gmra.mrb[108].mxu1 %v579_v59 }
 0x108   : > { %3674 = vmatprep.mubr.msk.f32.mxu0 %vm752_vm0, %v326_v60  ;;  %3802 = vmatprep.mubr.msk.f32.mxu1 %vm752_vm0, %v582_v61  ;;  %v2228_v60 = vadd.f32 %v4544_v48, %v4468_v55  ;;  %v342_v55 = vld [vmem:[%s4096_s22 + $0x3f8] sm:$0xff] }
 0x10a   : > { %v4486_v6 = vpop.f32.mrb[4].mxu0  ;;  %v4488_v7 = vpop.f32.mrb[4].mxu1 }
 0x10b   : > { %v1599_v8 = vpop.f32.mrb[5].mxu0  ;;  %1861 = vmatmul.mubr.f32.gmra.mrb[110].mxu0 %v325_v2  ;;  %v2239_v9 = vpop.f32.mrb[5].mxu1  ;;  %2501 = vmatmul.mubr.f32.gmra.mrb[110].mxu1 %v581_v3  ;;  %v595_v3 = vld [vmem:[%s4096_s22 + $0xbe0] sm:$0xff] }
 0x10c   : > { %3675 = vmatprep.mubr.msk.f32.mxu0 %vm752_vm0, %v328_v4  ;;  %3803 = vmatprep.mubr.msk.f32.mxu1 %vm752_vm0, %v584_v5  ;;  %v598_v8 = vld [vmem:[%s4096_s22 + $0xbf8] sm:$0xff]  ;;  %v1593_v9 = vadd.f32 %v4544_v48, %v4476_v62 }
 0x10e   : > { %v4496_v14 = vpop.f32.mrb[6].mxu0  ;;  %v4498_v15 = vpop.f32.mrb[6].mxu1 }
 0x10f   : > { %v1604_v16 = vpop.f32.mrb[7].mxu0  ;;  %1866 = vmatmul.mubr.f32.gmra.mrb[112].mxu0 %v327_v10  ;;  %v2244_v17 = vpop.f32.mrb[7].mxu1  ;;  %2506 = vmatmul.mubr.f32.gmra.mrb[112].mxu1 %v583_v11 }
 0x110   : > { %3676 = vmatprep.mubr.msk.f32.mxu0 %vm752_vm0, %v330_v12  ;;  %3804 = vmatprep.mubr.msk.f32.mxu1 %vm752_vm0, %v586_v13  ;;  %v2233_v12 = vadd.f32 %v4544_v48, %v4478_v63  ;;  %v597_v63 = vld [vmem:[%s4096_s22 + $0xbf0] sm:$0xff] }
 0x112   : > { %v4506_v22 = vpop.f32.mrb[8].mxu0  ;;  %v4508_v23 = vpop.f32.mrb[8].mxu1 }
 0x113   : > { %v1609_v24 = vpop.f32.mrb[9].mxu0  ;;  %1871 = vmatmul.mubr.f32.gmra.mrb[114].mxu0 %v329_v18  ;;  %v2249_v25 = vpop.f32.mrb[9].mxu1  ;;  %2511 = vmatmul.mubr.f32.gmra.mrb[114].mxu1 %v585_v19  ;;  %v341_v18 = vld [vmem:[%s4096_s22 + $0x3f0] sm:$0xff] }
 0x114   : > { %3677 = vmatprep.mubr.msk.f32.mxu0 %vm752_vm0, %v332_v20  ;;  %3805 = vmatprep.mubr.msk.f32.mxu1 %vm752_vm0, %v588_v21  ;;  %v344_v21 = vld [vmem:[%s4096_s22 + $0x408] sm:$0xff]  ;;  %v1598_v25 = vadd.f32 %v4544_v48, %v4486_v6  ;;  %v343_v6 = vld [vmem:[%s4096_s22 + $0x400] sm:$0xff] }
 0x115   : > { %v600_v24 = vld [vmem:[%s4096_s22 + $0xc08] sm:$0xff] }
 0x116   : > { %v4516_v30 = vpop.f32.mrb[10].mxu0  ;;  %v4518_v31 = vpop.f32.mrb[10].mxu1 }
 0x117   : > { %v1614_v32 = vpop.f32.mrb[11].mxu0  ;;  %1876 = vmatmul.mubr.f32.gmra.mrb[116].mxu0 %v331_v26  ;;  %v2254_v33 = vpop.f32.mrb[11].mxu1  ;;  %2516 = vmatmul.mubr.f32.gmra.mrb[116].mxu1 %v587_v27 }
 0x118   : > { %3678 = vmatprep.mubr.msk.f32.mxu0 %vm752_vm0, %v334_v28  ;;  %3806 = vmatprep.mubr.msk.f32.mxu1 %vm752_vm0, %v590_v29  ;;  %v2238_v28 = vadd.f32 %v4544_v48, %v4488_v7  ;;  %v599_v7 = vld [vmem:[%s4096_s22 + $0xc00] sm:$0xff] }
 0x11a   : > { %v4526_v38 = vpop.f32.mrb[12].mxu0  ;;  %v4528_v39 = vpop.f32.mrb[12].mxu1 }
 0x11b   : > { %v1619_v40 = vpop.f32.mrb[13].mxu0  ;;  %1881 = vmatmul.mubr.f32.gmra.mrb[118].mxu0 %v333_v34  ;;  %v2259_v41 = vpop.f32.mrb[13].mxu1  ;;  %2521 = vmatmul.mubr.f32.gmra.mrb[118].mxu1 %v589_v35 }
 0x11c   : > { %3679 = vmatprep.mubr.msk.f32.mxu0 %vm752_vm0, %v336_v36  ;;  %3807 = vmatprep.mubr.msk.f32.mxu1 %vm752_vm0, %v592_v37  ;;  %v346_v37 = vld [vmem:[%s4096_s22 + $0x418] sm:$0xff]  ;;  %v1603_v41 = vadd.f32 %v4544_v48, %v4496_v14 }
 0x11d   : > { %v602_v40 = vld [vmem:[%s4096_s22 + $0xc18] sm:$0xff] }
 0x11e   : > { %v4536_v46 = vpop.f32.mrb[14].mxu0  ;;  %v4538_v47 = vpop.f32.mrb[14].mxu1 }
 0x11f   : > { %v1624_v49 = vpop.f32.mrb[15].mxu0  ;;  %1886 = vmatmul.mubr.f32.gmra.mrb[120].mxu0 %v335_v42  ;;  %v2264_v50 = vpop.f32.mrb[15].mxu1  ;;  %2526 = vmatmul.mubr.f32.gmra.mrb[120].mxu1 %v591_v43 }
 0x120   : > { %3680 = vmatprep.mubr.msk.f32.mxu0 %vm752_vm0, %v338_v44  ;;  %3808 = vmatprep.mubr.msk.f32.mxu1 %vm752_vm0, %v594_v45  ;;  %v2243_v44 = vadd.f32 %v4544_v48, %v4498_v15  ;;  %v345_v15 = vld [vmem:[%s4096_s22 + $0x410] sm:$0xff] }
 0x122   : > { %v1627_v58 = vpop.f32.mrb[16].mxu0  ;;  %v2267_v59 = vpop.f32.mrb[16].mxu1 }
 0x123   : > { %v1628_v61 = vadd.f32 %v4544_v48, %v1627_v58  ;;  %v2268_v0 = vadd.f32 %v4544_v48, %v2267_v59  ;;  %v1629_v1 = vpop.f32.mrb[17].mxu0  ;;  %1891 = vmatmul.mubr.f32.gmra.mrb[122].mxu0 %v337_v51  ;;  %v2269_v2 = vpop.f32.mrb[17].mxu1  ;;  %2531 = vmatmul.mubr.f32.gmra.mrb[122].mxu1 %v593_v52  ;;  %v601_v51 = vld [vmem:[%s4096_s22 + $0xc10] sm:$0xff] }
 0x124   : > { %3681 = vmatprep.mubr.msk.f32.mxu0 %vm752_vm0, %v340_v53  ;;  %3809 = vmatprep.mubr.msk.f32.mxu1 %vm752_vm0, %v596_v56  ;;  %v348_v56 = vld [vmem:[%s4096_s22 + $0x428] sm:$0xff] }
 0x125   : > { %v2866_v4 = vmax.f32 %v1588_v57, %v1628_v61  ;;  %v2930_v5 = vmax.f32 %v2228_v60, %v2268_v0  ;;  %v604_v57 = vld [vmem:[%s4096_s22 + $0xc28] sm:$0xff]  ;;  %v1608_v61 = vadd.f32 %v4544_v48, %v4506_v22  ;;  %v2248_v0 = vadd.f32 %v4544_v48, %v4508_v23 }
 0x126   : > { %v1632_v10 = vpop.f32.mrb[18].mxu0  ;;  %v2272_v11 = vpop.f32.mrb[18].mxu1 }
 0x127   : > { %2995 = vst.msk [vmem:[#allocation2] sm:$0xff] %vm2994_vm1, %v2866_v4  ;;  %3059 = vst.msk [vmem:[#allocation2 + $0x200] sm:$0xff] %vm2994_vm1, %v2930_v5  ;;  %v1633_v13 = vadd.f32 %v4544_v48, %v1632_v10  ;;  %v2273_v16 = vadd.f32 %v4544_v48, %v2272_v11  ;;  %v1634_v17 = vpop.f32.mrb[19].mxu0  ;;  %1896 = vmatmul.mubr.f32.gmra.mrb[124].mxu0 %v339_v54  ;;  %v2274_v62 = vpop.f32.mrb[19].mxu1  ;;  %2536 = vmatmul.mubr.f32.gmra.mrb[124].mxu1 %v595_v3  ;;  %v350_v10 = vld [vmem:[%s4096_s22 + $0x438] sm:$0xff] }
 0x128   : > { %3682 = vmatprep.mubr.msk.f32.mxu0 %vm752_vm0, %v342_v55  ;;  %3810 = vmatprep.mubr.msk.f32.mxu1 %vm752_vm0, %v598_v8  ;;  %v347_v8 = vld [vmem:[%s4096_s22 + $0x420] sm:$0xff]  ;;  %v606_v11 = vld [vmem:[%s4096_s22 + $0xc38] sm:$0xff] }
 0x129   : > { %v2867_v19 = vmax.f32 %v1593_v9, %v1633_v13  ;;  %v2931_v20 = vmax.f32 %v2233_v12, %v2273_v16  ;;  %v603_v9 = vld [vmem:[%s4096_s22 + $0xc20] sm:$0xff]  ;;  %v1613_v12 = vadd.f32 %v4544_v48, %v4516_v30 }
 0x12a   : > { %v1637_v26 = vpop.f32.mrb[20].mxu0  ;;  %v2277_v27 = vpop.f32.mrb[20].mxu1 }
 0x12b   : > { %2996 = vst.msk [vmem:[#allocation2 + $0x8] sm:$0xff] %vm2994_vm1, %v2867_v19  ;;  %3060 = vst.msk [vmem:[#allocation2 + $0x208] sm:$0xff] %vm2994_vm1, %v2931_v20  ;;  %v1638_v29 = vadd.f32 %v4544_v48, %v1637_v26  ;;  %v2278_v32 = vadd.f32 %v4544_v48, %v2277_v27  ;;  %v1639_v33 = vpop.f32.mrb[21].mxu0  ;;  %1901 = vmatmul.mubr.f32.gmra.mrb[126].mxu0 %v341_v18  ;;  %v2279_v34 = vpop.f32.mrb[21].mxu1  ;;  %2541 = vmatmul.mubr.f32.gmra.mrb[126].mxu1 %v597_v63  ;;  %v352_v26 = vld [vmem:[%s4096_s22 + $0x448] sm:$0xff] }
 0x12c   : > { %3683 = vmatprep.mubr.msk.f32.mxu0 %vm752_vm0, %v344_v21  ;;  %3811 = vmatprep.mubr.msk.f32.mxu1 %vm752_vm0, %v600_v24  ;;  %v2253_v18 = vadd.f32 %v4544_v48, %v4518_v31  ;;  %v349_v21 = vld [vmem:[%s4096_s22 + $0x430] sm:$0xff]  ;;  %v608_v27 = vld [vmem:[%s4096_s22 + $0xc48] sm:$0xff]  ;;  %v1618_v33 = vadd.f32 %v4544_v48, %v4526_v38  ;;  %v2258_v34 = vadd.f32 %v4544_v48, %v4528_v39 }
 0x12d   : > { %v2868_v35 = vmax.f32 %v1598_v25, %v1638_v29  ;;  %v2932_v36 = vmax.f32 %v2238_v28, %v2278_v32  ;;  %v605_v24 = vld [vmem:[%s4096_s22 + $0xc30] sm:$0xff] }
 0x12e   : > { %v1642_v42 = vpop.f32.mrb[22].mxu0  ;;  %v2282_v43 = vpop.f32.mrb[22].mxu1 }
 0x12f   : > { %2997 = vst.msk [vmem:[#allocation2 + $0x10] sm:$0xff] %vm2994_vm1, %v2868_v35  ;;  %3061 = vst.msk [vmem:[#allocation2 + $0x210] sm:$0xff] %vm2994_vm1, %v2932_v36  ;;  %v1643_v45 = vadd.f32 %v4544_v48, %v1642_v42  ;;  %v2283_v49 = vadd.f32 %v4544_v48, %v2282_v43  ;;  %v1644_v50 = vpop.f32.mrb[23].mxu0  ;;  %1906 = vmatmul.mubr.f32.gmra.mrb[128].mxu0 %v343_v6  ;;  %v2284_v14 = vpop.f32.mrb[23].mxu1  ;;  %2546 = vmatmul.mubr.f32.gmra.mrb[128].mxu1 %v599_v7  ;;  %v351_v42 = vld [vmem:[%s4096_s22 + $0x440] sm:$0xff] }
 0x130   : > { %3684 = vmatprep.mubr.msk.f32.mxu0 %vm752_vm0, %v346_v37  ;;  %3812 = vmatprep.mubr.msk.f32.mxu1 %vm752_vm0, %v602_v40  ;;  %v607_v43 = vld [vmem:[%s4096_s22 + $0xc40] sm:$0xff] }
 0x131   : > { %v2869_v52 = vmax.f32 %v1603_v41, %v1643_v45  ;;  %v2933_v53 = vmax.f32 %v2243_v44, %v2283_v49  ;;  %v354_v44 = vld [vmem:[%s4096_s22 + $0x458] sm:$0xff]  ;;  %v1623_v49 = vadd.f32 %v4544_v48, %v4536_v46 }
 0x132   : > { %v3123_v58 = vld [vmem:[#allocation2] ss:$2 sm:$0xff]  ;;  %v3251_v59 = vld [vmem:[#allocation2 + $0x1] ss:$2 sm:$0xff]  ;;  %v1647_v54 = vpop.f32.mrb[24].mxu0  ;;  %v2287_v3 = vpop.f32.mrb[24].mxu1 }
 0x133   : > { %v3187_v60 = vld [vmem:[#allocation2 + $0x200] ss:$2 sm:$0xff]  ;;  %v3378_v1 = vmax.f32 %v3123_v58, %v3251_v59  ;;  %v3315_v2 = vld [vmem:[#allocation2 + $0x201] ss:$2 sm:$0xff]  ;;  %2998 = vst.msk [vmem:[#allocation2 + $0x18] sm:$0xff] %vm2994_vm1, %v2869_v52  ;;  %3062 = vst.msk [vmem:[#allocation2 + $0x218] sm:$0xff] %vm2994_vm1, %v2933_v53  ;;  %1911 = vmatmul.mubr.f32.gmra.mrb[130].mxu0 %v345_v15  ;;  %2551 = vmatmul.mubr.f32.gmra.mrb[130].mxu1 %v601_v51  ;;  %v1648_v4 = vadd.f32 %v4544_v48, %v1647_v54 }
 0x134   : > { %v3410_v22 = vmax.f32 %v3187_v60, %v3315_v2  ;;  %v2288_v23 = vadd.f32 %v4544_v48, %v2287_v3  ;;  %v1649_v5 = vpop.f32.mrb[25].mxu0  ;;  %v2289_v55 = vpop.f32.mrb[25].mxu1  ;;  %3685 = vmatprep.mubr.msk.f32.mxu0 %vm752_vm0, %v348_v56  ;;  %3813 = vmatprep.mubr.msk.f32.mxu1 %vm752_vm0, %v604_v57  ;;  %v610_v45 = vld [vmem:[%s4096_s22 + $0xc58] sm:$0xff]  ;;  %v2263_v52 = vadd.f32 %v4544_v48, %v4538_v47  ;;  %v353_v58 = vld [vmem:[%s4096_s22 + $0x450] sm:$0xff] }
 0x135   : > { %3442 = vst.msk [vmem:[%s4626_s5] sm:$0xff] %vm2994_vm1, %v3378_v1  ;;  %v2870_v13 = vmax.f32 %v1608_v61, %v1648_v4  ;;  %v609_v59 = vld [vmem:[%s4096_s22 + $0xc50] sm:$0xff]  ;;  %v356_v61 = vld [vmem:[%s4096_s22 + $0x468] sm:$0xff] }
 0x136   : > { %3474 = vst.msk [vmem:[%s4626_s5 + $0x100] sm:$0xff] %vm2994_vm1, %v3410_v22  ;;  %v2934_v16 = vmax.f32 %v2248_v0, %v2288_v23  ;;  %v1652_v17 = vpop.f32.mrb[26].mxu0  ;;  %v2292_v62 = vpop.f32.mrb[26].mxu1  ;;  %v612_v0 = vld [vmem:[%s4096_s22 + $0xc68] sm:$0xff] }
 0x137   : > { %v1653_v63 = vadd.f32 %v4544_v48, %v1652_v17  ;;  %v2293_v19 = vadd.f32 %v4544_v48, %v2292_v62  ;;  %v1654_v20 = vpop.f32.mrb[27].mxu0  ;;  %1916 = vmatmul.mubr.f32.gmra.mrb[132].mxu0 %v347_v8  ;;  %v2294_v30 = vpop.f32.mrb[27].mxu1  ;;  %2556 = vmatmul.mubr.f32.gmra.mrb[132].mxu1 %v603_v9  ;;  %2999 = vst.msk [vmem:[#allocation2 + $0x20] sm:$0xff] %vm2994_vm1, %v2870_v13  ;;  %v355_v9 = vld [vmem:[%s4096_s22 + $0x460] sm:$0xff] }
 0x138   : > { %3063 = vst.msk [vmem:[#allocation2 + $0x220] sm:$0xff] %vm2994_vm1, %v2934_v16  ;;  %3686 = vmatprep.mubr.msk.f32.mxu0 %vm752_vm0, %v350_v10  ;;  %3814 = vmatprep.mubr.msk.f32.mxu1 %vm752_vm0, %v606_v11  ;;  %v611_v10 = vld [vmem:[%s4096_s22 + $0xc60] sm:$0xff]  ;;  %v358_v11 = vld [vmem:[%s4096_s22 + $0x478] sm:$0xff]  ;;  %v616_v20 = vld [vmem:[%s4096_s22 + $0xc88] sm:$0xff] }
 0x139   : > { %v2871_v31 = vmax.f32 %v1613_v12, %v1653_v63  ;;  %v2935_v25 = vmax.f32 %v2253_v18, %v2293_v19  ;;  %v614_v12 = vld [vmem:[%s4096_s22 + $0xc78] sm:$0xff]  ;;  %v357_v18 = vld [vmem:[%s4096_s22 + $0x470] sm:$0xff]  ;;  %v360_v19 = vld [vmem:[%s4096_s22 + $0x488] sm:$0xff] }
 0x13a   : > { %v3125_v28 = vld [vmem:[#allocation2 + $0x10] ss:$2 sm:$0xff]  ;;  %v3253_v29 = vld [vmem:[#allocation2 + $0x11] ss:$2 sm:$0xff]  ;;  %v1657_v35 = vpop.f32.mrb[28].mxu0  ;;  %v2297_v36 = vpop.f32.mrb[28].mxu1 }
 0x13b   : > { %v3189_v32 = vld [vmem:[#allocation2 + $0x210] ss:$2 sm:$0xff]  ;;  %v3379_v6 = vmax.f32 %v3125_v28, %v3253_v29  ;;  %v3317_v7 = vld [vmem:[#allocation2 + $0x211] ss:$2 sm:$0xff]  ;;  %3000 = vst.msk [vmem:[#allocation2 + $0x28] sm:$0xff] %vm2994_vm1, %v2871_v31  ;;  %3064 = vst.msk [vmem:[#allocation2 + $0x228] sm:$0xff] %vm2994_vm1, %v2935_v25  ;;  %1921 = vmatmul.mubr.f32.gmra.mrb[134].mxu0 %v349_v21  ;;  %2561 = vmatmul.mubr.f32.gmra.mrb[134].mxu1 %v605_v24  ;;  %v1658_v37 = vadd.f32 %v4544_v48, %v1657_v35 }
 0x13c   : > { %v3411_v38 = vmax.f32 %v3189_v32, %v3317_v7  ;;  %v2298_v39 = vadd.f32 %v4544_v48, %v2297_v36  ;;  %v1659_v40 = vpop.f32.mrb[29].mxu0  ;;  %v2299_v41 = vpop.f32.mrb[29].mxu1  ;;  %3687 = vmatprep.mubr.msk.f32.mxu0 %vm752_vm0, %v352_v26  ;;  %3815 = vmatprep.mubr.msk.f32.mxu1 %vm752_vm0, %v608_v27  ;;  %v613_v63 = vld [vmem:[%s4096_s22 + $0xc70] sm:$0xff]  ;;  %v618_v7 = vld [vmem:[%s4096_s22 + $0xc98] sm:$0xff] }
 0x13d   : > { %3443 = vst.msk [vmem:[%s4626_s5 + $0x8] sm:$0xff] %vm2994_vm1, %v3379_v6  ;;  %v2872_v50 = vmax.f32 %v1618_v33, %v1658_v37  ;;  %v359_v33 = vld [vmem:[%s4096_s22 + $0x480] sm:$0xff]  ;;  %v362_v6 = vld [vmem:[%s4096_s22 + $0x498] sm:$0xff]  ;;  %v617_v40 = vld [vmem:[%s4096_s22 + $0xc90] sm:$0xff] }
 0x13e   : > { %3475 = vst.msk [vmem:[%s4626_s5 + $0x108] sm:$0xff] %vm2994_vm1, %v3411_v38  ;;  %v2936_v14 = vmax.f32 %v2258_v34, %v2298_v39  ;;  %v1662_v15 = vpop.f32.mrb[30].mxu0  ;;  %v2302_v51 = vpop.f32.mrb[30].mxu1  ;;  %v615_v34 = vld [vmem:[%s4096_s22 + $0xc80] sm:$0xff]  ;;  %v361_v39 = vld [vmem:[%s4096_s22 + $0x490] sm:$0xff]  ;;  %v364_v41 = vld [vmem:[%s4096_s22 + $0x4a8] sm:$0xff] }
 0x13f   : > { %v1663_v53 = vadd.f32 %v4544_v48, %v1662_v15  ;;  %v2303_v56 = vadd.f32 %v4544_v48, %v2302_v51  ;;  %v1664_v57 = vpop.f32.mrb[31].mxu0  ;;  %1926 = vmatmul.mubr.f32.gmra.mrb[136].mxu0 %v351_v42  ;;  %v2304_v46 = vpop.f32.mrb[31].mxu1  ;;  %2566 = vmatmul.mubr.f32.gmra.mrb[136].mxu1 %v607_v43  ;;  %3001 = vst.msk [vmem:[#allocation2 + $0x30] sm:$0xff] %vm2994_vm1, %v2872_v50  ;;  %v620_v42 = vld [vmem:[%s4096_s22 + $0xca8] sm:$0xff]  ;;  %v363_v50 = vld [vmem:[%s4096_s22 + $0x4a0] sm:$0xff]  ;;  %v366_v15 = vld [vmem:[%s4096_s22 + $0x4b8] sm:$0xff] }
 0x140   : > { %3065 = vst.msk [vmem:[#allocation2 + $0x230] sm:$0xff] %vm2994_vm1, %v2936_v14  ;;  %3688 = vmatprep.mubr.msk.f32.mxu0 %vm752_vm0, %v354_v44  ;;  %3816 = vmatprep.mubr.msk.f32.mxu1 %vm752_vm0, %v610_v45  ;;  %v619_v14 = vld [vmem:[%s4096_s22 + $0xca0] sm:$0xff]  ;;  %v622_v51 = vld [vmem:[%s4096_s22 + $0xcb8] sm:$0xff]  ;;  %v365_v46 = vld [vmem:[%s4096_s22 + $0x4b0] sm:$0xff] }
 0x141   : > { %v2873_v47 = vmax.f32 %v1623_v49, %v1663_v53  ;;  %v2937_v60 = vmax.f32 %v2263_v52, %v2303_v56 }
 0x142   : > { %v3127_v1 = vld [vmem:[#allocation2 + $0x20] ss:$2 sm:$0xff]  ;;  %v3255_v2 = vld [vmem:[#allocation2 + $0x21] ss:$2 sm:$0xff]  ;;  %v4694_v4 = vpop.f32.mrb[32].mxu0  ;;  %v4696_v23 = vpop.f32.mrb[32].mxu1 }
 0x143   : > { %v3191_v54 = vld [vmem:[#allocation2 + $0x220] ss:$2 sm:$0xff]  ;;  %v3380_v3 = vmax.f32 %v3127_v1, %v3255_v2  ;;  %v3319_v22 = vld [vmem:[#allocation2 + $0x221] ss:$2 sm:$0xff]  ;;  %3002 = vst.msk [vmem:[#allocation2 + $0x38] sm:$0xff] %vm2994_vm1, %v2873_v47  ;;  %3066 = vst.msk [vmem:[#allocation2 + $0x238] sm:$0xff] %vm2994_vm1, %v2937_v60  ;;  %1931 = vmatmul.mubr.f32.gmra.mrb[138].mxu0 %v353_v58  ;;  %2571 = vmatmul.mubr.f32.gmra.mrb[138].mxu1 %v609_v59 }
 0x144   : > { %v3412_v5 = vmax.f32 %v3191_v54, %v3319_v22  ;;  %v1669_v55 = vpop.f32.mrb[33].mxu0  ;;  %v2309_v8 = vpop.f32.mrb[33].mxu1  ;;  %3689 = vmatprep.mubr.msk.f32.mxu0 %vm752_vm0, %v356_v61  ;;  %3817 = vmatprep.mubr.msk.f32.mxu1 %vm752_vm0, %v612_v0  ;;  %v621_v58 = vld [vmem:[%s4096_s22 + $0xcb0] sm:$0xff]  ;;  %v368_v59 = vld [vmem:[%s4096_s22 + $0x4c8] sm:$0xff]  ;;  %v367_v2 = vld [vmem:[%s4096_s22 + $0x4c0] sm:$0xff] }
 0x145   : > { %3444 = vst.msk [vmem:[%s4626_s5 + $0x10] sm:$0xff] %vm2994_vm1, %v3380_v3  ;;  %v624_v47 = vld [vmem:[%s4096_s22 + $0xcc8] sm:$0xff]  ;;  %v623_v54 = vld [vmem:[%s4096_s22 + $0xcc0] sm:$0xff]  ;;  %v370_v3 = vld [vmem:[%s4096_s22 + $0x4d8] sm:$0xff] }
 0x146   : > { %3476 = vst.msk [vmem:[%s4626_s5 + $0x110] sm:$0xff] %vm2994_vm1, %v3412_v5  ;;  %v4708_v13 = vpop.f32.mrb[34].mxu0  ;;  %v4710_v16 = vpop.f32.mrb[34].mxu1  ;;  %v626_v22 = vld [vmem:[%s4096_s22 + $0xcd8] sm:$0xff] }
 0x147   : > { %v1674_v17 = vpop.f32.mrb[35].mxu0  ;;  %1936 = vmatmul.mubr.f32.gmra.mrb[140].mxu0 %v355_v9  ;;  %v2314_v62 = vpop.f32.mrb[35].mxu1  ;;  %2576 = vmatmul.mubr.f32.gmra.mrb[140].mxu1 %v611_v10  ;;  %v369_v10 = vld [vmem:[%s4096_s22 + $0x4d0] sm:$0xff] }
 0x148   : > { %3690 = vmatprep.mubr.msk.f32.mxu0 %vm752_vm0, %v358_v11  ;;  %3818 = vmatprep.mubr.msk.f32.mxu1 %vm752_vm0, %v614_v12  ;;  %v625_v11 = vld [vmem:[%s4096_s22 + $0xcd0] sm:$0xff]  ;;  %v372_v12 = vld [vmem:[%s4096_s22 + $0x4e8] sm:$0xff]  ;;  %v1668_v62 = vadd.f32 %v4544_v48, %v4694_v4  ;;  %v371_v4 = vld [vmem:[%s4096_s22 + $0x4e0] sm:$0xff] }
 0x149   : > { %v628_v17 = vld [vmem:[%s4096_s22 + $0xce8] sm:$0xff] }
 0x14a   : > { %v3129_v30 = vld [vmem:[#allocation2 + $0x30] ss:$2 sm:$0xff]  ;;  %v3257_v21 = vld [vmem:[#allocation2 + $0x31] ss:$2 sm:$0xff]  ;;  %v4718_v26 = vpop.f32.mrb[36].mxu0  ;;  %v4720_v27 = vpop.f32.mrb[36].mxu1 }
 0x14b   : > { %v3193_v24 = vld [vmem:[#allocation2 + $0x230] ss:$2 sm:$0xff]  ;;  %v3381_v31 = vmax.f32 %v3129_v30, %v3257_v21  ;;  %v3321_v25 = vld [vmem:[#allocation2 + $0x231] ss:$2 sm:$0xff]  ;;  %1941 = vmatmul.mubr.f32.gmra.mrb[142].mxu0 %v357_v18  ;;  %2581 = vmatmul.mubr.f32.gmra.mrb[142].mxu1 %v613_v63  ;;  %v1679_v29 = vpop.f32.mrb[37].mxu0  ;;  %v2319_v32 = vpop.f32.mrb[37].mxu1 }
 0x14c   : > { %v3413_v28 = vmax.f32 %v3193_v24, %v3321_v25  ;;  %3691 = vmatprep.mubr.msk.f32.mxu0 %vm752_vm0, %v360_v19  ;;  %3819 = vmatprep.mubr.msk.f32.mxu1 %vm752_vm0, %v616_v20  ;;  %v2308_v19 = vadd.f32 %v4544_v48, %v4696_v23  ;;  %v374_v29 = vld [vmem:[%s4096_s22 + $0x4f8] sm:$0xff]  ;;  %v1673_v23 = vadd.f32 %v4544_v48, %v4708_v13  ;;  %v373_v13 = vld [vmem:[%s4096_s22 + $0x4f0] sm:$0xff] }
 0x14d   : > { %3445 = vst.msk [vmem:[%s4626_s5 + $0x18] sm:$0xff] %vm2994_vm1, %v3381_v31  ;;  %v627_v31 = vld [vmem:[%s4096_s22 + $0xce0] sm:$0xff]  ;;  %v630_v32 = vld [vmem:[%s4096_s22 + $0xcf8] sm:$0xff] }
 0x14e   : > { %3477 = vst.msk [vmem:[%s4626_s5 + $0x118] sm:$0xff] %vm2994_vm1, %v3413_v28  ;;  %v4732_v35 = vpop.f32.mrb[38].mxu0  ;;  %v4734_v36 = vpop.f32.mrb[38].mxu1 }
 0x14f   : > { %v1684_v38 = vpop.f32.mrb[39].mxu0  ;;  %1946 = vmatmul.mubr.f32.gmra.mrb[144].mxu0 %v359_v33  ;;  %v2324_v37 = vpop.f32.mrb[39].mxu1  ;;  %2586 = vmatmul.mubr.f32.gmra.mrb[144].mxu1 %v615_v34 }
 0x150   : > { %3692 = vmatprep.mubr.msk.f32.mxu0 %vm752_vm0, %v362_v6  ;;  %3820 = vmatprep.mubr.msk.f32.mxu1 %vm752_vm0, %v618_v7  ;;  %v2313_v6 = vadd.f32 %v4544_v48, %v4710_v16 }
 0x152   : > { %v4742_v43 = vpop.f32.mrb[40].mxu0  ;;  %v4744_v44 = vpop.f32.mrb[40].mxu1 }
 0x153   : > { %v1689_v45 = vpop.f32.mrb[41].mxu0  ;;  %1951 = vmatmul.mubr.f32.gmra.mrb[146].mxu0 %v361_v39  ;;  %v2329_v49 = vpop.f32.mrb[41].mxu1  ;;  %2591 = vmatmul.mubr.f32.gmra.mrb[146].mxu1 %v617_v40  ;;  %v629_v40 = vld [vmem:[%s4096_s22 + $0xcf0] sm:$0xff] }
 0x154   : > { %3693 = vmatprep.mubr.msk.f32.mxu0 %vm752_vm0, %v364_v41  ;;  %3821 = vmatprep.mubr.msk.f32.mxu1 %vm752_vm0, %v620_v42  ;;  %v376_v42 = vld [vmem:[%s4096_s22 + $0x508] sm:$0xff]  ;;  %v1678_v49 = vadd.f32 %v4544_v48, %v4718_v26  ;;  %v375_v26 = vld [vmem:[%s4096_s22 + $0x500] sm:$0xff] }
 0x155   : > { %v632_v45 = vld [vmem:[%s4096_s22 + $0xd08] sm:$0xff] }
 0x156   : > { %v4752_v52 = vpop.f32.mrb[42].mxu0  ;;  %v4754_v53 = vpop.f32.mrb[42].mxu1 }
 0x157   : > { %v1694_v56 = vpop.f32.mrb[43].mxu0  ;;  %1956 = vmatmul.mubr.f32.gmra.mrb[148].mxu0 %v363_v50  ;;  %v2334_v57 = vpop.f32.mrb[43].mxu1  ;;  %2596 = vmatmul.mubr.f32.gmra.mrb[148].mxu1 %v619_v14 }
 0x158   : > { %3694 = vmatprep.mubr.msk.f32.mxu0 %vm752_vm0, %v366_v15  ;;  %3822 = vmatprep.mubr.msk.f32.mxu1 %vm752_vm0, %v622_v51  ;;  %v2318_v15 = vadd.f32 %v4544_v48, %v4720_v27 }
 0x15a   : > { %v4762_v60 = vpop.f32.mrb[44].mxu0  ;;  %v4764_v61 = vpop.f32.mrb[44].mxu1 }
 0x15b   : > { %v1699_v0 = vpop.f32.mrb[45].mxu0  ;;  %1961 = vmatmul.mubr.f32.gmra.mrb[150].mxu0 %v365_v46  ;;  %v2339_v1 = vpop.f32.mrb[45].mxu1  ;;  %2601 = vmatmul.mubr.f32.gmra.mrb[150].mxu1 %v621_v58  ;;  %v631_v58 = vld [vmem:[%s4096_s22 + $0xd00] sm:$0xff] }
 0x15c   : > { %3695 = vmatprep.mubr.msk.f32.mxu0 %vm752_vm0, %v368_v59  ;;  %3823 = vmatprep.mubr.msk.f32.mxu1 %vm752_vm0, %v624_v47  ;;  %v378_v47 = vld [vmem:[%s4096_s22 + $0x518] sm:$0xff]  ;;  %v1683_v1 = vadd.f32 %v4544_v48, %v4732_v35  ;;  %v377_v35 = vld [vmem:[%s4096_s22 + $0x510] sm:$0xff] }
 0x15d   : > { %v634_v0 = vld [vmem:[%s4096_s22 + $0xd18] sm:$0xff] }
 0x15e   : > { %v4772_v5 = vpop.f32.mrb[46].mxu0  ;;  %v4774_v55 = vpop.f32.mrb[46].mxu1 }
 0x15f   : > { %v1704_v8 = vpop.f32.mrb[47].mxu0  ;;  %1966 = vmatmul.mubr.f32.gmra.mrb[152].mxu0 %v367_v2  ;;  %v2344_v9 = vpop.f32.mrb[47].mxu1  ;;  %2606 = vmatmul.mubr.f32.gmra.mrb[152].mxu1 %v623_v54 }
 0x160   : > { %3696 = vmatprep.mubr.msk.f32.mxu0 %vm752_vm0, %v370_v3  ;;  %3824 = vmatprep.mubr.msk.f32.mxu1 %vm752_vm0, %v626_v22  ;;  %v2323_v3 = vadd.f32 %v4544_v48, %v4734_v36 }
 0x162   : > { %v1707_v18 = vpop.f32.mrb[48].mxu0  ;;  %v2347_v63 = vpop.f32.mrb[48].mxu1 }
 0x163   : > { %v1708_v20 = vadd.f32 %v4544_v48, %v1707_v18  ;;  %v2348_v30 = vadd.f32 %v4544_v48, %v2347_v63  ;;  %v1709_v21 = vpop.f32.mrb[49].mxu0  ;;  %1971 = vmatmul.mubr.f32.gmra.mrb[154].mxu0 %v369_v10  ;;  %v2349_v24 = vpop.f32.mrb[49].mxu1  ;;  %2611 = vmatmul.mubr.f32.gmra.mrb[154].mxu1 %v625_v11  ;;  %v633_v11 = vld [vmem:[%s4096_s22 + $0xd10] sm:$0xff] }
 0x164   : > { %3697 = vmatprep.mubr.msk.f32.mxu0 %vm752_vm0, %v372_v12  ;;  %3825 = vmatprep.mubr.msk.f32.mxu1 %vm752_vm0, %v628_v17  ;;  %v380_v17 = vld [vmem:[%s4096_s22 + $0x528] sm:$0xff] }
 0x165   : > { %v2874_v25 = vmax.f32 %v1668_v62, %v1708_v20  ;;  %v2938_v28 = vmax.f32 %v2308_v19, %v2348_v30  ;;  %v636_v62 = vld [vmem:[%s4096_s22 + $0xd28] sm:$0xff]  ;;  %v1688_v20 = vadd.f32 %v4544_v48, %v4742_v43  ;;  %v2328_v30 = vadd.f32 %v4544_v48, %v4744_v44 }
 0x166   : > { %v1712_v33 = vpop.f32.mrb[50].mxu0  ;;  %v2352_v34 = vpop.f32.mrb[50].mxu1 }
 0x167   : > { %3003 = vst.msk [vmem:[#allocation2 + $0x40] sm:$0xff] %vm2994_vm1, %v2874_v25  ;;  %3067 = vst.msk [vmem:[#allocation2 + $0x240] sm:$0xff] %vm2994_vm1, %v2938_v28  ;;  %v1713_v7 = vadd.f32 %v4544_v48, %v1712_v33  ;;  %v2353_v38 = vadd.f32 %v4544_v48, %v2352_v34  ;;  %v1714_v37 = vpop.f32.mrb[51].mxu0  ;;  %1976 = vmatmul.mubr.f32.gmra.mrb[156].mxu0 %v371_v4  ;;  %v2354_v39 = vpop.f32.mrb[51].mxu1  ;;  %2616 = vmatmul.mubr.f32.gmra.mrb[156].mxu1 %v627_v31  ;;  %v382_v33 = vld [vmem:[%s4096_s22 + $0x538] sm:$0xff] }
 0x168   : > { %3698 = vmatprep.mubr.msk.f32.mxu0 %vm752_vm0, %v374_v29  ;;  %3826 = vmatprep.mubr.msk.f32.mxu1 %vm752_vm0, %v630_v32  ;;  %v379_v32 = vld [vmem:[%s4096_s22 + $0x520] sm:$0xff]  ;;  %v638_v34 = vld [vmem:[%s4096_s22 + $0xd38] sm:$0xff] }
 0x169   : > { %v2875_v16 = vmax.f32 %v1673_v23, %v1713_v7  ;;  %v2939_v41 = vmax.f32 %v2313_v6, %v2353_v38  ;;  %v635_v23 = vld [vmem:[%s4096_s22 + $0xd20] sm:$0xff]  ;;  %v1693_v6 = vadd.f32 %v4544_v48, %v4752_v52 }
 0x16a   : > { %v1717_v50 = vpop.f32.mrb[52].mxu0  ;;  %v2357_v14 = vpop.f32.mrb[52].mxu1 }
 0x16b   : > { %3004 = vst.msk [vmem:[#allocation2 + $0x48] sm:$0xff] %vm2994_vm1, %v2875_v16  ;;  %3068 = vst.msk [vmem:[#allocation2 + $0x248] sm:$0xff] %vm2994_vm1, %v2939_v41  ;;  %v1718_v51 = vadd.f32 %v4544_v48, %v1717_v50  ;;  %v2358_v56 = vadd.f32 %v4544_v48, %v2357_v14  ;;  %v1719_v57 = vpop.f32.mrb[53].mxu0  ;;  %1981 = vmatmul.mubr.f32.gmra.mrb[158].mxu0 %v373_v13  ;;  %v2359_v46 = vpop.f32.mrb[53].mxu1  ;;  %2621 = vmatmul.mubr.f32.gmra.mrb[158].mxu1 %v629_v40  ;;  %v384_v50 = vld [vmem:[%s4096_s22 + $0x548] sm:$0xff] }
 0x16c   : > { %3699 = vmatprep.mubr.msk.f32.mxu0 %vm752_vm0, %v376_v42  ;;  %3827 = vmatprep.mubr.msk.f32.mxu1 %vm752_vm0, %v632_v45  ;;  %v2333_v13 = vadd.f32 %v4544_v48, %v4754_v53  ;;  %v381_v42 = vld [vmem:[%s4096_s22 + $0x530] sm:$0xff]  ;;  %v640_v14 = vld [vmem:[%s4096_s22 + $0xd48] sm:$0xff]  ;;  %v1698_v57 = vadd.f32 %v4544_v48, %v4762_v60  ;;  %v2338_v46 = vadd.f32 %v4544_v48, %v4764_v61 }
 0x16d   : > { %v2876_v27 = vmax.f32 %v1678_v49, %v1718_v51  ;;  %v2940_v59 = vmax.f32 %v2318_v15, %v2358_v56  ;;  %v637_v45 = vld [vmem:[%s4096_s22 + $0xd30] sm:$0xff] }
 0x16e   : > { %v1722_v2 = vpop.f32.mrb[54].mxu0  ;;  %v2362_v54 = vpop.f32.mrb[54].mxu1 }
 0x16f   : > { %3005 = vst.msk [vmem:[#allocation2 + $0x50] sm:$0xff] %vm2994_vm1, %v2876_v27  ;;  %3069 = vst.msk [vmem:[#allocation2 + $0x250] sm:$0xff] %vm2994_vm1, %v2940_v59  ;;  %v1723_v22 = vadd.f32 %v4544_v48, %v1722_v2  ;;  %v2363_v8 = vadd.f32 %v4544_v48, %v2362_v54  ;;  %v1724_v9 = vpop.f32.mrb[55].mxu0  ;;  %1986 = vmatmul.mubr.f32.gmra.mrb[160].mxu0 %v375_v26  ;;  %v2364_v10 = vpop.f32.mrb[55].mxu1  ;;  %2626 = vmatmul.mubr.f32.gmra.mrb[160].mxu1 %v631_v58  ;;  %v383_v2 = vld [vmem:[%s4096_s22 + $0x540] sm:$0xff] }
 0x170   : > { %3700 = vmatprep.mubr.msk.f32.mxu0 %vm752_vm0, %v378_v47  ;;  %3828 = vmatprep.mubr.msk.f32.mxu1 %vm752_vm0, %v634_v0  ;;  %v639_v54 = vld [vmem:[%s4096_s22 + $0xd40] sm:$0xff] }
 0x171   : > { %v2877_v36 = vmax.f32 %v1683_v1, %v1723_v22  ;;  %v2941_v12 = vmax.f32 %v2323_v3, %v2363_v8  ;;  %v386_v3 = vld [vmem:[%s4096_s22 + $0x558] sm:$0xff]  ;;  %v1703_v8 = vadd.f32 %v4544_v48, %v4772_v5 }
 0x172   : > { %v3131_v18 = vld [vmem:[#allocation2 + $0x40] ss:$2 sm:$0xff]  ;;  %v3259_v63 = vld [vmem:[#allocation2 + $0x41] ss:$2 sm:$0xff]  ;;  %v1727_v4 = vpop.f32.mrb[56].mxu0  ;;  %v2367_v31 = vpop.f32.mrb[56].mxu1 }
 0x173   : > { %v3195_v19 = vld [vmem:[#allocation2 + $0x240] ss:$2 sm:$0xff]  ;;  %v3382_v21 = vmax.f32 %v3131_v18, %v3259_v63  ;;  %v3323_v24 = vld [vmem:[#allocation2 + $0x241] ss:$2 sm:$0xff]  ;;  %3006 = vst.msk [vmem:[#allocation2 + $0x58] sm:$0xff] %vm2994_vm1, %v2877_v36  ;;  %3070 = vst.msk [vmem:[#allocation2 + $0x258] sm:$0xff] %vm2994_vm1, %v2941_v12  ;;  %1991 = vmatmul.mubr.f32.gmra.mrb[162].mxu0 %v377_v35  ;;  %2631 = vmatmul.mubr.f32.gmra.mrb[162].mxu1 %v633_v11  ;;  %v1728_v25 = vadd.f32 %v4544_v48, %v1727_v4 }
 0x174   : > { %v3414_v43 = vmax.f32 %v3195_v19, %v3323_v24  ;;  %v2368_v44 = vadd.f32 %v4544_v48, %v2367_v31  ;;  %v1729_v28 = vpop.f32.mrb[57].mxu0  ;;  %v2369_v29 = vpop.f32.mrb[57].mxu1  ;;  %3701 = vmatprep.mubr.msk.f32.mxu0 %vm752_vm0, %v380_v17  ;;  %3829 = vmatprep.mubr.msk.f32.mxu1 %vm752_vm0, %v636_v62  ;;  %v642_v22 = vld [vmem:[%s4096_s22 + $0xd58] sm:$0xff]  ;;  %v2343_v36 = vadd.f32 %v4544_v48, %v4774_v55  ;;  %v385_v18 = vld [vmem:[%s4096_s22 + $0x550] sm:$0xff] }
 0x175   : > { %3446 = vst.msk [vmem:[%s4626_s5 + $0x20] sm:$0xff] %vm2994_vm1, %v3382_v21  ;;  %v2878_v7 = vmax.f32 %v1688_v20, %v1728_v25  ;;  %v641_v63 = vld [vmem:[%s4096_s22 + $0xd50] sm:$0xff]  ;;  %v388_v20 = vld [vmem:[%s4096_s22 + $0x568] sm:$0xff] }
 0x176   : > { %3478 = vst.msk [vmem:[%s4626_s5 + $0x120] sm:$0xff] %vm2994_vm1, %v3414_v43  ;;  %v2942_v38 = vmax.f32 %v2328_v30, %v2368_v44  ;;  %v1732_v37 = vpop.f32.mrb[58].mxu0  ;;  %v2372_v39 = vpop.f32.mrb[58].mxu1  ;;  %v644_v30 = vld [vmem:[%s4096_s22 + $0xd68] sm:$0xff] }
 0x177   : > { %v1733_v40 = vadd.f32 %v4544_v48, %v1732_v37  ;;  %v2373_v16 = vadd.f32 %v4544_v48, %v2372_v39  ;;  %v1734_v41 = vpop.f32.mrb[59].mxu0  ;;  %1996 = vmatmul.mubr.f32.gmra.mrb[164].mxu0 %v379_v32  ;;  %v2374_v52 = vpop.f32.mrb[59].mxu1  ;;  %2636 = vmatmul.mubr.f32.gmra.mrb[164].mxu1 %v635_v23  ;;  %3007 = vst.msk [vmem:[#allocation2 + $0x60] sm:$0xff] %vm2994_vm1, %v2878_v7  ;;  %v387_v32 = vld [vmem:[%s4096_s22 + $0x560] sm:$0xff]  ;;  %v389_v39 = vld [vmem:[%s4096_s22 + $0x570] sm:$0xff] }
 0x178   : > { %3071 = vst.msk [vmem:[#allocation2 + $0x260] sm:$0xff] %vm2994_vm1, %v2942_v38  ;;  %3702 = vmatprep.mubr.msk.f32.mxu0 %vm752_vm0, %v382_v33  ;;  %3830 = vmatprep.mubr.msk.f32.mxu1 %vm752_vm0, %v638_v34  ;;  %v643_v23 = vld [vmem:[%s4096_s22 + $0xd60] sm:$0xff]  ;;  %v390_v33 = vld [vmem:[%s4096_s22 + $0x578] sm:$0xff] }
 0x179   : > { %v2879_v53 = vmax.f32 %v1693_v6, %v1733_v40  ;;  %v2943_v49 = vmax.f32 %v2333_v13, %v2373_v16  ;;  %v646_v34 = vld [vmem:[%s4096_s22 + $0xd78] sm:$0xff]  ;;  %v645_v13 = vld [vmem:[%s4096_s22 + $0xd70] sm:$0xff]  ;;  %v392_v40 = vld [vmem:[%s4096_s22 + $0x588] sm:$0xff] }
 0x17a   : > { %v3133_v15 = vld [vmem:[#allocation2 + $0x50] ss:$2 sm:$0xff]  ;;  %v3261_v51 = vld [vmem:[#allocation2 + $0x51] ss:$2 sm:$0xff]  ;;  %v1737_v27 = vpop.f32.mrb[60].mxu0  ;;  %v2377_v59 = vpop.f32.mrb[60].mxu1 }
 0x17b   : > { %v3197_v56 = vld [vmem:[#allocation2 + $0x250] ss:$2 sm:$0xff]  ;;  %v3383_v26 = vmax.f32 %v3133_v15, %v3261_v51  ;;  %v3325_v58 = vld [vmem:[#allocation2 + $0x251] ss:$2 sm:$0xff]  ;;  %3008 = vst.msk [vmem:[#allocation2 + $0x68] sm:$0xff] %vm2994_vm1, %v2879_v53  ;;  %3072 = vst.msk [vmem:[#allocation2 + $0x268] sm:$0xff] %vm2994_vm1, %v2943_v49  ;;  %2001 = vmatmul.mubr.f32.gmra.mrb[166].mxu0 %v381_v42  ;;  %2641 = vmatmul.mubr.f32.gmra.mrb[166].mxu1 %v637_v45  ;;  %v1738_v47 = vadd.f32 %v4544_v48, %v1737_v27 }
 0x17c   : > { %v3415_v60 = vmax.f32 %v3197_v56, %v3325_v58  ;;  %v2378_v61 = vadd.f32 %v4544_v48, %v2377_v59  ;;  %v1739_v0 = vpop.f32.mrb[61].mxu0  ;;  %v2379_v1 = vpop.f32.mrb[61].mxu1  ;;  %3703 = vmatprep.mubr.msk.f32.mxu0 %vm752_vm0, %v384_v50  ;;  %3831 = vmatprep.mubr.msk.f32.mxu1 %vm752_vm0, %v640_v14  ;;  %v648_v16 = vld [vmem:[%s4096_s22 + $0xd88] sm:$0xff]  ;;  %v391_v56 = vld [vmem:[%s4096_s22 + $0x580] sm:$0xff] }
 0x17d   : > { %3447 = vst.msk [vmem:[%s4626_s5 + $0x28] sm:$0xff] %vm2994_vm1, %v3383_v26  ;;  %v2880_v9 = vmax.f32 %v1698_v57, %v1738_v47  ;;  %v647_v57 = vld [vmem:[%s4096_s22 + $0xd80] sm:$0xff]  ;;  %v650_v26 = vld [vmem:[%s4096_s22 + $0xd98] sm:$0xff]  ;;  %v393_v47 = vld [vmem:[%s4096_s22 + $0x590] sm:$0xff] }
 0x17e   : > { %3479 = vst.msk [vmem:[%s4626_s5 + $0x128] sm:$0xff] %vm2994_vm1, %v3415_v60  ;;  %v2944_v10 = vmax.f32 %v2338_v46, %v2378_v61  ;;  %v1742_v35 = vpop.f32.mrb[62].mxu0  ;;  %v2382_v11 = vpop.f32.mrb[62].mxu1  ;;  %v394_v46 = vld [vmem:[%s4096_s22 + $0x598] sm:$0xff]  ;;  %v649_v61 = vld [vmem:[%s4096_s22 + $0xd90] sm:$0xff]  ;;  %v396_v0 = vld [vmem:[%s4096_s22 + $0x5a8] sm:$0xff] }
 0x17f   : > { %v1743_v12 = vadd.f32 %v4544_v48, %v1742_v35  ;;  %v2383_v17 = vadd.f32 %v4544_v48, %v2382_v11  ;;  %v1744_v62 = vpop.f32.mrb[63].mxu0  ;;  %2006 = vmatmul.mubr.f32.gmra.mrb[168].mxu0 %v383_v2  ;;  %v2384_v5 = vpop.f32.mrb[63].mxu1  ;;  %2646 = vmatmul.mubr.f32.gmra.mrb[168].mxu1 %v639_v54  ;;  %3009 = vst.msk [vmem:[#allocation2 + $0x70] sm:$0xff] %vm2994_vm1, %v2880_v9  ;;  %v652_v1 = vld [vmem:[%s4096_s22 + $0xda8] sm:$0xff]  ;;  %v651_v9 = vld [vmem:[%s4096_s22 + $0xda0] sm:$0xff]  ;;  %v654_v35 = vld [vmem:[%s4096_s22 + $0xdb8] sm:$0xff] }
 0x180   : > { %3073 = vst.msk [vmem:[#allocation2 + $0x270] sm:$0xff] %vm2994_vm1, %v2944_v10  ;;  %3704 = vmatprep.mubr.msk.f32.mxu0 %vm752_vm0, %v386_v3  ;;  %3832 = vmatprep.mubr.msk.f32.mxu1 %vm752_vm0, %v642_v22  ;;  %v398_v10 = vld [vmem:[%s4096_s22 + $0x5b8] sm:$0xff]  ;;  %v397_v62 = vld [vmem:[%s4096_s22 + $0x5b0] sm:$0xff] }
 0x181   : > { %v2881_v55 = vmax.f32 %v1703_v8, %v1743_v12  ;;  %v2945_v19 = vmax.f32 %v2343_v36, %v2383_v17  ;;  %v395_v8 = vld [vmem:[%s4096_s22 + $0x5a0] sm:$0xff]  ;;  %v653_v5 = vld [vmem:[%s4096_s22 + $0xdb0] sm:$0xff] }
 0x182   : > { %v3135_v21 = vld [vmem:[#allocation2 + $0x60] ss:$2 sm:$0xff]  ;;  %v3263_v48 = vld [vmem:[#allocation2 + $0x61] ss:$2 sm:$0xff]  ;;  %v4902_v43 = vpop.f32.mrb[64].mxu0  ;;  %v4904_v25 = vpop.f32.mrb[64].mxu1 }
 0x183   : > { %v3199_v24 = vld [vmem:[#allocation2 + $0x260] ss:$2 sm:$0xff]  ;;  %v3384_v4 = vmax.f32 %v3135_v21, %v3263_v48  ;;  %v3327_v31 = vld [vmem:[#allocation2 + $0x261] ss:$2 sm:$0xff]  ;;  %3010 = vst.msk [vmem:[#allocation2 + $0x78] sm:$0xff] %vm2994_vm1, %v2881_v55  ;;  %3074 = vst.msk [vmem:[#allocation2 + $0x278] sm:$0xff] %vm2994_vm1, %v2945_v19  ;;  %2011 = vmatmul.mubr.f32.gmra.mrb[170].mxu0 %v385_v18  ;;  %2651 = vmatmul.mubr.f32.gmra.mrb[170].mxu1 %v641_v63 }
 0x184   : > { %v3416_v44 = vmax.f32 %v3199_v24, %v3327_v31  ;;  %v1749_v28 = vpop.f32.mrb[65].mxu0  ;;  %v2389_v29 = vpop.f32.mrb[65].mxu1  ;;  %3705 = vmatprep.mubr.msk.f32.mxu0 %vm752_vm0, %v388_v20  ;;  %3833 = vmatprep.mubr.msk.f32.mxu1 %vm752_vm0, %v644_v30  ;;  %v400_v18 = vld [vmem:[%s4096_s22 + $0x5c8] sm:$0xff]  ;;  %v399_v21 = vld [vmem:[%s4096_s22 + $0x5c0] sm:$0xff]  ;;  %v402_v24 = vld [vmem:[%s4096_s22 + $0x5d8] sm:$0xff] }
 0x185   : > { %3448 = vst.msk [vmem:[%s4626_s5 + $0x30] sm:$0xff] %vm2994_vm1, %v3384_v4  ;;  %v656_v63 = vld [vmem:[%s4096_s22 + $0xdc8] sm:$0xff]  ;;  %v655_v48 = vld [vmem:[%s4096_s22 + $0xdc0] sm:$0xff]  ;;  %v658_v4 = vld [vmem:[%s4096_s22 + $0xdd8] sm:$0xff] }
 0x186   : > { %3480 = vst.msk [vmem:[%s4626_s5 + $0x130] sm:$0xff] %vm2994_vm1, %v3416_v44  ;;  %v4916_v6 = vpop.f32.mrb[66].mxu0  ;;  %v4918_v7 = vpop.f32.mrb[66].mxu1 }
 0x187   : > { %v1754_v38 = vpop.f32.mrb[67].mxu0  ;;  %2016 = vmatmul.mubr.f32.gmra.mrb[172].mxu0 %v387_v32  ;;  %v2394_v37 = vpop.f32.mrb[67].mxu1  ;;  %2656 = vmatmul.mubr.f32.gmra.mrb[172].mxu1 %v643_v23  ;;  %v401_v32 = vld [vmem:[%s4096_s22 + $0x5d0] sm:$0xff] }
 0x188   : > { %3706 = vmatprep.mubr.msk.f32.mxu0 %vm752_vm0, %v390_v33  ;;  %3834 = vmatprep.mubr.msk.f32.mxu1 %vm752_vm0, %v646_v34  ;;  %v657_v23 = vld [vmem:[%s4096_s22 + $0xdd0] sm:$0xff]  ;;  %v404_v33 = vld [vmem:[%s4096_s22 + $0x5e8] sm:$0xff]  ;;  %v4993_v38 = vld [vmem:[%s5792_s2] ss:$0 sm:$0xff] }
 0x189   : > { %v660_v34 = vld [vmem:[%s4096_s22 + $0xde8] sm:$0xff]  ;;  %v1748_v37 = vadd.f32 %v4993_v38, %v4902_v43  ;;  %v403_v43 = vld [vmem:[%s4096_s22 + $0x5e0] sm:$0xff] }
 0x18a   : > { %v3137_v41 = vld [vmem:[#allocation2 + $0x70] ss:$2 sm:$0xff]  ;;  %v3265_v52 = vld [vmem:[#allocation2 + $0x71] ss:$2 sm:$0xff]  ;;  %v4926_v49 = vpop.f32.mrb[68].mxu0  ;;  %v4928_v50 = vpop.f32.mrb[68].mxu1 }
 0x18b   : > { %v3201_v42 = vld [vmem:[#allocation2 + $0x270] ss:$2 sm:$0xff]  ;;  %v3385_v45 = vmax.f32 %v3137_v41, %v3265_v52  ;;  %v3329_v53 = vld [vmem:[#allocation2 + $0x271] ss:$2 sm:$0xff]  ;;  %2021 = vmatmul.mubr.f32.gmra.mrb[174].mxu0 %v389_v39  ;;  %2661 = vmatmul.mubr.f32.gmra.mrb[174].mxu1 %v645_v13  ;;  %v1759_v15 = vpop.f32.mrb[69].mxu0  ;;  %v2399_v51 = vpop.f32.mrb[69].mxu1 }
 0x18c   : > { %v3417_v14 = vmax.f32 %v3201_v42, %v3329_v53  ;;  %3707 = vmatprep.mubr.msk.f32.mxu0 %vm752_vm0, %v392_v40  ;;  %3835 = vmatprep.mubr.msk.f32.mxu1 %vm752_vm0, %v648_v16  ;;  %v2388_v40 = vadd.f32 %v4993_v38, %v4904_v25  ;;  %v406_v15 = vld [vmem:[%s4096_s22 + $0x5f8] sm:$0xff]  ;;  %v1753_v25 = vadd.f32 %v4993_v38, %v4916_v6  ;;  %v405_v6 = vld [vmem:[%s4096_s22 + $0x5f0] sm:$0xff] }
 0x18d   : > { %3449 = vst.msk [vmem:[%s4626_s5 + $0x38] sm:$0xff] %vm2994_vm1, %v3385_v45  ;;  %v659_v45 = vld [vmem:[%s4096_s22 + $0xde0] sm:$0xff]  ;;  %v662_v51 = vld [vmem:[%s4096_s22 + $0xdf8] sm:$0xff] }
 0x18e   : > { %3481 = vst.msk [vmem:[%s4626_s5 + $0x138] sm:$0xff] %vm2994_vm1, %v3417_v14  ;;  %v4940_v58 = vpop.f32.mrb[70].mxu0  ;;  %v4942_v27 = vpop.f32.mrb[70].mxu1 }
 0x18f   : > { %v1764_v59 = vpop.f32.mrb[71].mxu0  ;;  %2026 = vmatmul.mubr.f32.gmra.mrb[176].mxu0 %v391_v56  ;;  %v2404_v60 = vpop.f32.mrb[71].mxu1  ;;  %2666 = vmatmul.mubr.f32.gmra.mrb[176].mxu1 %v647_v57 }
 0x190   : > { %3708 = vmatprep.mubr.msk.f32.mxu0 %vm752_vm0, %v394_v46  ;;  %3836 = vmatprep.mubr.msk.f32.mxu1 %vm752_vm0, %v650_v26  ;;  %v2393_v46 = vadd.f32 %v4993_v38, %v4918_v7 }
 0x192   : > { %v4950_v2 = vpop.f32.mrb[72].mxu0  ;;  %v4952_v54 = vpop.f32.mrb[72].mxu1 }
 0x193   : > { %v1769_v3 = vpop.f32.mrb[73].mxu0  ;;  %2031 = vmatmul.mubr.f32.gmra.mrb[178].mxu0 %v393_v47  ;;  %v2409_v22 = vpop.f32.mrb[73].mxu1  ;;  %2671 = vmatmul.mubr.f32.gmra.mrb[178].mxu1 %v649_v61  ;;  %v661_v61 = vld [vmem:[%s4096_s22 + $0xdf0] sm:$0xff] }
 0x194   : > { %3709 = vmatprep.mubr.msk.f32.mxu0 %vm752_vm0, %v396_v0  ;;  %3837 = vmatprep.mubr.msk.f32.mxu1 %vm752_vm0, %v652_v1  ;;  %v408_v1 = vld [vmem:[%s4096_s22 + $0x608] sm:$0xff]  ;;  %v1758_v22 = vadd.f32 %v4993_v38, %v4926_v49  ;;  %v407_v49 = vld [vmem:[%s4096_s22 + $0x600] sm:$0xff] }
 0x195   : > { %v664_v3 = vld [vmem:[%s4096_s22 + $0xe08] sm:$0xff] }
 0x196   : > { %v4960_v11 = vpop.f32.mrb[74].mxu0  ;;  %v4962_v36 = vpop.f32.mrb[74].mxu1 }
 0x197   : > { %v1774_v12 = vpop.f32.mrb[75].mxu0  ;;  %2036 = vmatmul.mubr.f32.gmra.mrb[180].mxu0 %v395_v8  ;;  %v2414_v17 = vpop.f32.mrb[75].mxu1  ;;  %2676 = vmatmul.mubr.f32.gmra.mrb[180].mxu1 %v651_v9 }
 0x198   : > { %3710 = vmatprep.mubr.msk.f32.mxu0 %vm752_vm0, %v398_v10  ;;  %3838 = vmatprep.mubr.msk.f32.mxu1 %vm752_vm0, %v654_v35  ;;  %v2398_v10 = vadd.f32 %v4993_v38, %v4928_v50 }
 0x19a   : > { %v4970_v55 = vpop.f32.mrb[76].mxu0  ;;  %v4972_v19 = vpop.f32.mrb[76].mxu1 }
 0x19b   : > { %v1779_v20 = vpop.f32.mrb[77].mxu0  ;;  %2041 = vmatmul.mubr.f32.gmra.mrb[182].mxu0 %v397_v62  ;;  %v2419_v30 = vpop.f32.mrb[77].mxu1  ;;  %2681 = vmatmul.mubr.f32.gmra.mrb[182].mxu1 %v653_v5  ;;  %v663_v5 = vld [vmem:[%s4096_s22 + $0xe00] sm:$0xff] }
 0x19c   : > { %3711 = vmatprep.mubr.msk.f32.mxu0 %vm752_vm0, %v400_v18  ;;  %3839 = vmatprep.mubr.msk.f32.mxu1 %vm752_vm0, %v656_v63  ;;  %v410_v63 = vld [vmem:[%s4096_s22 + $0x618] sm:$0xff]  ;;  %v1763_v30 = vadd.f32 %v4993_v38, %v4940_v58  ;;  %v409_v58 = vld [vmem:[%s4096_s22 + $0x610] sm:$0xff] }
 0x19d   : > { %v666_v20 = vld [vmem:[%s4096_s22 + $0xe18] sm:$0xff] }
 0x19e   : > { %v4980_v31 = vpop.f32.mrb[78].mxu0  ;;  %v4982_v44 = vpop.f32.mrb[78].mxu1 }
 0x19f   : > { %v1784_v28 = vpop.f32.mrb[79].mxu0  ;;  %2046 = vmatmul.mubr.f32.gmra.mrb[184].mxu0 %v399_v21  ;;  %v2424_v29 = vpop.f32.mrb[79].mxu1  ;;  %2686 = vmatmul.mubr.f32.gmra.mrb[184].mxu1 %v655_v48 }
 0x1a0   : > { %3712 = vmatprep.mubr.msk.f32.mxu0 %vm752_vm0, %v402_v24  ;;  %3840 = vmatprep.mubr.msk.f32.mxu1 %vm752_vm0, %v658_v4  ;;  %v2403_v24 = vadd.f32 %v4993_v38, %v4942_v27 }
 0x1a2   : > { %v1787_v39 = vpop.f32.mrb[80].mxu0  ;;  %v2427_v13 = vpop.f32.mrb[80].mxu1 }
 0x1a3   : > { %v1788_v16 = vadd.f32 %v4993_v38, %v1787_v39  ;;  %v2428_v41 = vadd.f32 %v4993_v38, %v2427_v13  ;;  %v1789_v52 = vpop.f32.mrb[81].mxu0  ;;  %2051 = vmatmul.mubr.f32.gmra.mrb[186].mxu0 %v401_v32  ;;  %v2429_v42 = vpop.f32.mrb[81].mxu1  ;;  %2691 = vmatmul.mubr.f32.gmra.mrb[186].mxu1 %v657_v23  ;;  %v665_v23 = vld [vmem:[%s4096_s22 + $0xe10] sm:$0xff] }
 0x1a4   : > { %3713 = vmatprep.mubr.msk.f32.mxu0 %vm752_vm0, %v404_v33  ;;  %3841 = vmatprep.mubr.msk.f32.mxu1 %vm752_vm0, %v660_v34  ;;  %v412_v34 = vld [vmem:[%s4096_s22 + $0x628] sm:$0xff] }
 0x1a5   : > { %v2882_v53 = vmax.f32 %v1748_v37, %v1788_v16  ;;  %v2946_v14 = vmax.f32 %v2388_v40, %v2428_v41  ;;  %v668_v37 = vld [vmem:[%s4096_s22 + $0xe28] sm:$0xff]  ;;  %v1768_v16 = vadd.f32 %v4993_v38, %v4950_v2  ;;  %v2408_v41 = vadd.f32 %v4993_v38, %v4952_v54 }
 0x1a6   : > { %v1792_v56 = vpop.f32.mrb[82].mxu0  ;;  %v2432_v57 = vpop.f32.mrb[82].mxu1 }
 0x1a7   : > { %3011 = vst.msk [vmem:[#allocation2 + $0x80] sm:$0xff] %vm2994_vm1, %v2882_v53  ;;  %3075 = vst.msk [vmem:[#allocation2 + $0x280] sm:$0xff] %vm2994_vm1, %v2946_v14  ;;  %v1793_v26 = vadd.f32 %v4993_v38, %v1792_v56  ;;  %v2433_v59 = vadd.f32 %v4993_v38, %v2432_v57  ;;  %v1794_v60 = vpop.f32.mrb[83].mxu0  ;;  %2056 = vmatmul.mubr.f32.gmra.mrb[188].mxu0 %v403_v43  ;;  %v2434_v47 = vpop.f32.mrb[83].mxu1  ;;  %2696 = vmatmul.mubr.f32.gmra.mrb[188].mxu1 %v659_v45  ;;  %v414_v56 = vld [vmem:[%s4096_s22 + $0x638] sm:$0xff] }
 0x1a8   : > { %3714 = vmatprep.mubr.msk.f32.mxu0 %vm752_vm0, %v406_v15  ;;  %3842 = vmatprep.mubr.msk.f32.mxu1 %vm752_vm0, %v662_v51  ;;  %v411_v51 = vld [vmem:[%s4096_s22 + $0x620] sm:$0xff]  ;;  %v670_v57 = vld [vmem:[%s4096_s22 + $0xe38] sm:$0xff] }
 0x1a9   : > { %v2883_v7 = vmax.f32 %v1753_v25, %v1793_v26  ;;  %v2947_v0 = vmax.f32 %v2393_v46, %v2433_v59  ;;  %v667_v25 = vld [vmem:[%s4096_s22 + $0xe20] sm:$0xff]  ;;  %v1773_v46 = vadd.f32 %v4993_v38, %v4960_v11 }
 0x1aa   : > { %v1797_v8 = vpop.f32.mrb[84].mxu0  ;;  %v2437_v9 = vpop.f32.mrb[84].mxu1 }
 0x1ab   : > { %3012 = vst.msk [vmem:[#allocation2 + $0x88] sm:$0xff] %vm2994_vm1, %v2883_v7  ;;  %3076 = vst.msk [vmem:[#allocation2 + $0x288] sm:$0xff] %vm2994_vm1, %v2947_v0  ;;  %v1798_v35 = vadd.f32 %v4993_v38, %v1797_v8  ;;  %v2438_v12 = vadd.f32 %v4993_v38, %v2437_v9  ;;  %v1799_v17 = vpop.f32.mrb[85].mxu0  ;;  %2061 = vmatmul.mubr.f32.gmra.mrb[190].mxu0 %v405_v6  ;;  %v2439_v62 = vpop.f32.mrb[85].mxu1  ;;  %2701 = vmatmul.mubr.f32.gmra.mrb[190].mxu1 %v661_v61  ;;  %v416_v8 = vld [vmem:[%s4096_s22 + $0x648] sm:$0xff] }
 0x1ac   : > { %3715 = vmatprep.mubr.msk.f32.mxu0 %vm752_vm0, %v408_v1  ;;  %3843 = vmatprep.mubr.msk.f32.mxu1 %vm752_vm0, %v664_v3  ;;  %v2413_v6 = vadd.f32 %v4993_v38, %v4962_v36  ;;  %v413_v1 = vld [vmem:[%s4096_s22 + $0x630] sm:$0xff]  ;;  %v672_v9 = vld [vmem:[%s4096_s22 + $0xe48] sm:$0xff]  ;;  %v1778_v17 = vadd.f32 %v4993_v38, %v4970_v55  ;;  %v2418_v62 = vadd.f32 %v4993_v38, %v4972_v19 }
 0x1ad   : > { %v2884_v50 = vmax.f32 %v1758_v22, %v1798_v35  ;;  %v2948_v18 = vmax.f32 %v2398_v10, %v2438_v12  ;;  %v669_v3 = vld [vmem:[%s4096_s22 + $0xe30] sm:$0xff] }
 0x1ae   : > { %v1802_v21 = vpop.f32.mrb[86].mxu0  ;;  %v2442_v48 = vpop.f32.mrb[86].mxu1 }
 0x1af   : > { %3013 = vst.msk [vmem:[#allocation2 + $0x90] sm:$0xff] %vm2994_vm1, %v2884_v50  ;;  %3077 = vst.msk [vmem:[#allocation2 + $0x290] sm:$0xff] %vm2994_vm1, %v2948_v18  ;;  %v1803_v4 = vadd.f32 %v4993_v38, %v1802_v21  ;;  %v2443_v28 = vadd.f32 %v4993_v38, %v2442_v48  ;;  %v1804_v29 = vpop.f32.mrb[87].mxu0  ;;  %2066 = vmatmul.mubr.f32.gmra.mrb[192].mxu0 %v407_v49  ;;  %v2444_v32 = vpop.f32.mrb[87].mxu1  ;;  %2706 = vmatmul.mubr.f32.gmra.mrb[192].mxu1 %v663_v5  ;;  %v415_v21 = vld [vmem:[%s4096_s22 + $0x640] sm:$0xff] }
 0x1b0   : > { %3716 = vmatprep.mubr.msk.f32.mxu0 %vm752_vm0, %v410_v63  ;;  %3844 = vmatprep.mubr.msk.f32.mxu1 %vm752_vm0, %v666_v20  ;;  %v671_v48 = vld [vmem:[%s4096_s22 + $0xe40] sm:$0xff] }
 0x1b1   : > { %v2885_v27 = vmax.f32 %v1763_v30, %v1803_v4  ;;  %v2949_v33 = vmax.f32 %v2403_v24, %v2443_v28  ;;  %v418_v24 = vld [vmem:[%s4096_s22 + $0x658] sm:$0xff]  ;;  %v1783_v28 = vadd.f32 %v4993_v38, %v4980_v31 }
 0x1b2   : > { %v3139_v39 = vld [vmem:[#allocation2 + $0x80] ss:$2 sm:$0xff]  ;;  %v3267_v13 = vld [vmem:[#allocation2 + $0x81] ss:$2 sm:$0xff]  ;;  %v1807_v43 = vpop.f32.mrb[88].mxu0  ;;  %v2447_v45 = vpop.f32.mrb[88].mxu1 }
 0x1b3   : > { %v3203_v40 = vld [vmem:[#allocation2 + $0x280] ss:$2 sm:$0xff]  ;;  %v3386_v52 = vmax.f32 %v3139_v39, %v3267_v13  ;;  %v3331_v42 = vld [vmem:[#allocation2 + $0x281] ss:$2 sm:$0xff]  ;;  %3014 = vst.msk [vmem:[#allocation2 + $0x98] sm:$0xff] %vm2994_vm1, %v2885_v27  ;;  %3078 = vst.msk [vmem:[#allocation2 + $0x298] sm:$0xff] %vm2994_vm1, %v2949_v33  ;;  %2071 = vmatmul.mubr.f32.gmra.mrb[194].mxu0 %v409_v58  ;;  %2711 = vmatmul.mubr.f32.gmra.mrb[194].mxu1 %v665_v23  ;;  %v1808_v53 = vadd.f32 %v4993_v38, %v1807_v43 }
 0x1b4   : > { %v3418_v2 = vmax.f32 %v3203_v40, %v3331_v42  ;;  %v2448_v54 = vadd.f32 %v4993_v38, %v2447_v45  ;;  %v1809_v14 = vpop.f32.mrb[89].mxu0  ;;  %v2449_v15 = vpop.f32.mrb[89].mxu1  ;;  %3717 = vmatprep.mubr.msk.f32.mxu0 %vm752_vm0, %v412_v34  ;;  %3845 = vmatprep.mubr.msk.f32.mxu1 %vm752_vm0, %v668_v37  ;;  %v674_v4 = vld [vmem:[%s4096_s22 + $0xe58] sm:$0xff]  ;;  %v2423_v27 = vadd.f32 %v4993_v38, %v4982_v44  ;;  %v417_v39 = vld [vmem:[%s4096_s22 + $0x650] sm:$0xff] }
 0x1b5   : > { %3450 = vst.msk [vmem:[%s4626_s5 + $0x40] sm:$0xff] %vm2994_vm1, %v3386_v52  ;;  %v2886_v26 = vmax.f32 %v1768_v16, %v1808_v53  ;;  %v673_v13 = vld [vmem:[%s4096_s22 + $0xe50] sm:$0xff]  ;;  %v420_v16 = vld [vmem:[%s4096_s22 + $0x668] sm:$0xff] }
 0x1b6   : > { %3482 = vst.msk [vmem:[%s4626_s5 + $0x140] sm:$0xff] %vm2994_vm1, %v3418_v2  ;;  %v2950_v59 = vmax.f32 %v2408_v41, %v2448_v54  ;;  %v1812_v60 = vpop.f32.mrb[90].mxu0  ;;  %v2452_v47 = vpop.f32.mrb[90].mxu1  ;;  %v676_v41 = vld [vmem:[%s4096_s22 + $0xe68] sm:$0xff] }
 0x1b7   : > { %v1813_v61 = vadd.f32 %v4993_v38, %v1812_v60  ;;  %v2453_v7 = vadd.f32 %v4993_v38, %v2452_v47  ;;  %v1814_v0 = vpop.f32.mrb[91].mxu0  ;;  %2076 = vmatmul.mubr.f32.gmra.mrb[196].mxu0 %v411_v51  ;;  %v2454_v11 = vpop.f32.mrb[91].mxu1  ;;  %2716 = vmatmul.mubr.f32.gmra.mrb[196].mxu1 %v667_v25  ;;  %3015 = vst.msk [vmem:[#allocation2 + $0xa0] sm:$0xff] %vm2994_vm1, %v2886_v26  ;;  %v419_v25 = vld [vmem:[%s4096_s22 + $0x660] sm:$0xff] }
 0x1b8   : > { %3079 = vst.msk [vmem:[#allocation2 + $0x2a0] sm:$0xff] %vm2994_vm1, %v2950_v59  ;;  %3718 = vmatprep.mubr.msk.f32.mxu0 %vm752_vm0, %v414_v56  ;;  %3846 = vmatprep.mubr.msk.f32.mxu1 %vm752_vm0, %v670_v57  ;;  %v675_v56 = vld [vmem:[%s4096_s22 + $0xe60] sm:$0xff]  ;;  %v422_v57 = vld [vmem:[%s4096_s22 + $0x678] sm:$0xff]  ;;  %v680_v0 = vld [vmem:[%s4096_s22 + $0xe88] sm:$0xff] }
 0x1b9   : > { %v2887_v36 = vmax.f32 %v1773_v46, %v1813_v61  ;;  %v2951_v22 = vmax.f32 %v2413_v6, %v2453_v7  ;;  %v678_v46 = vld [vmem:[%s4096_s22 + $0xe78] sm:$0xff]  ;;  %v421_v6 = vld [vmem:[%s4096_s22 + $0x670] sm:$0xff]  ;;  %v424_v7 = vld [vmem:[%s4096_s22 + $0x688] sm:$0xff] }
 0x1ba   : > { %v3141_v10 = vld [vmem:[#allocation2 + $0x90] ss:$2 sm:$0xff]  ;;  %v3269_v35 = vld [vmem:[#allocation2 + $0x91] ss:$2 sm:$0xff]  ;;  %v1817_v50 = vpop.f32.mrb[92].mxu0  ;;  %v2457_v18 = vpop.f32.mrb[92].mxu1 }
 0x1bb   : > { %v3205_v12 = vld [vmem:[#allocation2 + $0x290] ss:$2 sm:$0xff]  ;;  %v3387_v49 = vmax.f32 %v3141_v10, %v3269_v35  ;;  %v3333_v5 = vld [vmem:[#allocation2 + $0x291] ss:$2 sm:$0xff]  ;;  %3016 = vst.msk [vmem:[#allocation2 + $0xa8] sm:$0xff] %vm2994_vm1, %v2887_v36  ;;  %3080 = vst.msk [vmem:[#allocation2 + $0x2a8] sm:$0xff] %vm2994_vm1, %v2951_v22  ;;  %2081 = vmatmul.mubr.f32.gmra.mrb[198].mxu0 %v413_v1  ;;  %2721 = vmatmul.mubr.f32.gmra.mrb[198].mxu1 %v669_v3  ;;  %v1818_v63 = vadd.f32 %v4993_v38, %v1817_v50 }
 0x1bc   : > { %v3419_v55 = vmax.f32 %v3205_v12, %v3333_v5  ;;  %v2458_v19 = vadd.f32 %v4993_v38, %v2457_v18  ;;  %v1819_v20 = vpop.f32.mrb[93].mxu0  ;;  %v2459_v30 = vpop.f32.mrb[93].mxu1  ;;  %3719 = vmatprep.mubr.msk.f32.mxu0 %vm752_vm0, %v416_v8  ;;  %3847 = vmatprep.mubr.msk.f32.mxu1 %vm752_vm0, %v672_v9  ;;  %v677_v61 = vld [vmem:[%s4096_s22 + $0xe70] sm:$0xff]  ;;  %v682_v5 = vld [vmem:[%s4096_s22 + $0xe98] sm:$0xff] }
 0x1bd   : > { %3451 = vst.msk [vmem:[%s4626_s5 + $0x48] sm:$0xff] %vm2994_vm1, %v3387_v49  ;;  %v2888_v29 = vmax.f32 %v1778_v17, %v1818_v63  ;;  %v423_v17 = vld [vmem:[%s4096_s22 + $0x680] sm:$0xff]  ;;  %v426_v49 = vld [vmem:[%s4096_s22 + $0x698] sm:$0xff]  ;;  %v681_v20 = vld [vmem:[%s4096_s22 + $0xe90] sm:$0xff] }
 0x1be   : > { %3483 = vst.msk [vmem:[%s4626_s5 + $0x148] sm:$0xff] %vm2994_vm1, %v3419_v55  ;;  %v2952_v32 = vmax.f32 %v2418_v62, %v2458_v19  ;;  %v1822_v58 = vpop.f32.mrb[94].mxu0  ;;  %v2462_v23 = vpop.f32.mrb[94].mxu1  ;;  %v679_v62 = vld [vmem:[%s4096_s22 + $0xe80] sm:$0xff]  ;;  %v425_v19 = vld [vmem:[%s4096_s22 + $0x690] sm:$0xff]  ;;  %v428_v30 = vld [vmem:[%s4096_s22 + $0x6a8] sm:$0xff] }
 0x1bf   : > { %v1823_v33 = vadd.f32 %v4993_v38, %v1822_v58  ;;  %v2463_v34 = vadd.f32 %v4993_v38, %v2462_v23  ;;  %v1824_v37 = vpop.f32.mrb[95].mxu0  ;;  %2086 = vmatmul.mubr.f32.gmra.mrb[200].mxu0 %v415_v21  ;;  %v2464_v31 = vpop.f32.mrb[95].mxu1  ;;  %2726 = vmatmul.mubr.f32.gmra.mrb[200].mxu1 %v671_v48  ;;  %3017 = vst.msk [vmem:[#allocation2 + $0xb0] sm:$0xff] %vm2994_vm1, %v2888_v29  ;;  %v684_v21 = vld [vmem:[%s4096_s22 + $0xea8] sm:$0xff]  ;;  %v427_v29 = vld [vmem:[%s4096_s22 + $0x6a0] sm:$0xff]  ;;  %v430_v58 = vld [vmem:[%s4096_s22 + $0x6b8] sm:$0xff] }
 0x1c0   : > { %3081 = vst.msk [vmem:[#allocation2 + $0x2b0] sm:$0xff] %vm2994_vm1, %v2952_v32  ;;  %3720 = vmatprep.mubr.msk.f32.mxu0 %vm752_vm0, %v418_v24  ;;  %3848 = vmatprep.mubr.msk.f32.mxu1 %vm752_vm0, %v674_v4  ;;  %v683_v32 = vld [vmem:[%s4096_s22 + $0xea0] sm:$0xff]  ;;  %v686_v23 = vld [vmem:[%s4096_s22 + $0xeb8] sm:$0xff]  ;;  %v429_v31 = vld [vmem:[%s4096_s22 + $0x6b0] sm:$0xff] }
 0x1c1   : > { %v2889_v44 = vmax.f32 %v1783_v28, %v1823_v33  ;;  %v2953_v40 = vmax.f32 %v2423_v27, %v2463_v34 }
 0x1c2   : > { %v3143_v52 = vld [vmem:[#allocation2 + $0xa0] ss:$2 sm:$0xff]  ;;  %v3271_v42 = vld [vmem:[#allocation2 + $0xa1] ss:$2 sm:$0xff]  ;;  %v5115_v53 = vpop.f32.mrb[96].mxu0  ;;  %v5117_v54 = vpop.f32.mrb[96].mxu1 }
 0x1c3   : > { %v3207_v43 = vld [vmem:[#allocation2 + $0x2a0] ss:$2 sm:$0xff]  ;;  %v3388_v45 = vmax.f32 %v3143_v52, %v3271_v42  ;;  %v3335_v2 = vld [vmem:[#allocation2 + $0x2a1] ss:$2 sm:$0xff]  ;;  %3018 = vst.msk [vmem:[#allocation2 + $0xb8] sm:$0xff] %vm2994_vm1, %v2889_v44  ;;  %3082 = vst.msk [vmem:[#allocation2 + $0x2b8] sm:$0xff] %vm2994_vm1, %v2953_v40  ;;  %2091 = vmatmul.mubr.f32.gmra.mrb[202].mxu0 %v417_v39  ;;  %2731 = vmatmul.mubr.f32.gmra.mrb[202].mxu1 %v673_v13 }
 0x1c4   : > { %v3420_v14 = vmax.f32 %v3207_v43, %v3335_v2  ;;  %v1829_v15 = vpop.f32.mrb[97].mxu0  ;;  %v2469_v51 = vpop.f32.mrb[97].mxu1  ;;  %3721 = vmatprep.mubr.msk.f32.mxu0 %vm752_vm0, %v420_v16  ;;  %3849 = vmatprep.mubr.msk.f32.mxu1 %vm752_vm0, %v676_v41  ;;  %v685_v39 = vld [vmem:[%s4096_s22 + $0xeb0] sm:$0xff]  ;;  %v432_v13 = vld [vmem:[%s4096_s22 + $0x6c8] sm:$0xff]  ;;  %v431_v42 = vld [vmem:[%s4096_s22 + $0x6c0] sm:$0xff] }
 0x1c5   : > { %3452 = vst.msk [vmem:[%s4626_s5 + $0x50] sm:$0xff] %vm2994_vm1, %v3388_v45  ;;  %v688_v44 = vld [vmem:[%s4096_s22 + $0xec8] sm:$0xff]  ;;  %v687_v43 = vld [vmem:[%s4096_s22 + $0xec0] sm:$0xff]  ;;  %v434_v45 = vld [vmem:[%s4096_s22 + $0x6d8] sm:$0xff] }
 0x1c6   : > { %3484 = vst.msk [vmem:[%s4626_s5 + $0x150] sm:$0xff] %vm2994_vm1, %v3420_v14  ;;  %v5129_v26 = vpop.f32.mrb[98].mxu0  ;;  %v5131_v59 = vpop.f32.mrb[98].mxu1  ;;  %v690_v2 = vld [vmem:[%s4096_s22 + $0xed8] sm:$0xff] }
 0x1c7   : > { %v1834_v60 = vpop.f32.mrb[99].mxu0  ;;  %2096 = vmatmul.mubr.f32.gmra.mrb[204].mxu0 %v419_v25  ;;  %v2474_v47 = vpop.f32.mrb[99].mxu1  ;;  %2736 = vmatmul.mubr.f32.gmra.mrb[204].mxu1 %v675_v56  ;;  %v433_v56 = vld [vmem:[%s4096_s22 + $0x6d0] sm:$0xff] }
 0x1c8   : > { %3722 = vmatprep.mubr.msk.f32.mxu0 %vm752_vm0, %v422_v57  ;;  %3850 = vmatprep.mubr.msk.f32.mxu1 %vm752_vm0, %v678_v46  ;;  %v689_v57 = vld [vmem:[%s4096_s22 + $0xed0] sm:$0xff]  ;;  %v436_v46 = vld [vmem:[%s4096_s22 + $0x6e8] sm:$0xff]  ;;  %v1828_v47 = vadd.f32 %v4993_v38, %v5115_v53  ;;  %v435_v53 = vld [vmem:[%s4096_s22 + $0x6e0] sm:$0xff] }
 0x1c9   : > { %v692_v60 = vld [vmem:[%s4096_s22 + $0xee8] sm:$0xff] }
 0x1ca   : > { %v3145_v11 = vld [vmem:[#allocation2 + $0xb0] ss:$2 sm:$0xff]  ;;  %v3273_v1 = vld [vmem:[#allocation2 + $0xb1] ss:$2 sm:$0xff]  ;;  %v5139_v8 = vpop.f32.mrb[100].mxu0  ;;  %v5141_v9 = vpop.f32.mrb[100].mxu1 }
 0x1cb   : > { %v3209_v3 = vld [vmem:[#allocation2 + $0x2b0] ss:$2 sm:$0xff]  ;;  %v3389_v36 = vmax.f32 %v3145_v11, %v3273_v1  ;;  %v3337_v22 = vld [vmem:[#allocation2 + $0x2b1] ss:$2 sm:$0xff]  ;;  %2101 = vmatmul.mubr.f32.gmra.mrb[206].mxu0 %v421_v6  ;;  %2741 = vmatmul.mubr.f32.gmra.mrb[206].mxu1 %v677_v61  ;;  %v1839_v35 = vpop.f32.mrb[101].mxu0  ;;  %v2479_v12 = vpop.f32.mrb[101].mxu1 }
 0x1cc   : > { %v3421_v10 = vmax.f32 %v3209_v3, %v3337_v22  ;;  %3723 = vmatprep.mubr.msk.f32.mxu0 %vm752_vm0, %v424_v7  ;;  %3851 = vmatprep.mubr.msk.f32.mxu1 %vm752_vm0, %v680_v0  ;;  %v2468_v7 = vadd.f32 %v4993_v38, %v5117_v54  ;;  %v438_v35 = vld [vmem:[%s4096_s22 + $0x6f8] sm:$0xff]  ;;  %v1833_v54 = vadd.f32 %v4993_v38, %v5129_v26  ;;  %v437_v26 = vld [vmem:[%s4096_s22 + $0x6f0] sm:$0xff] }
 0x1cd   : > { %3453 = vst.msk [vmem:[%s4626_s5 + $0x58] sm:$0xff] %vm2994_vm1, %v3389_v36  ;;  %v691_v36 = vld [vmem:[%s4096_s22 + $0xee0] sm:$0xff]  ;;  %v694_v12 = vld [vmem:[%s4096_s22 + $0xef8] sm:$0xff] }
 0x1ce   : > { %3485 = vst.msk [vmem:[%s4626_s5 + $0x158] sm:$0xff] %vm2994_vm1, %v3421_v10  ;;  %v5153_v50 = vpop.f32.mrb[102].mxu0  ;;  %v5155_v18 = vpop.f32.mrb[102].mxu1 }
 0x1cf   : > { %v1844_v55 = vpop.f32.mrb[103].mxu0  ;;  %2106 = vmatmul.mubr.f32.gmra.mrb[208].mxu0 %v423_v17  ;;  %v2484_v63 = vpop.f32.mrb[103].mxu1  ;;  %2746 = vmatmul.mubr.f32.gmra.mrb[208].mxu1 %v679_v62 }
 0x1d0   : > { %3724 = vmatprep.mubr.msk.f32.mxu0 %vm752_vm0, %v426_v49  ;;  %3852 = vmatprep.mubr.msk.f32.mxu1 %vm752_vm0, %v682_v5  ;;  %v2473_v49 = vadd.f32 %v4993_v38, %v5131_v59 }
 0x1d2   : > { %v5163_v48 = vpop.f32.mrb[104].mxu0  ;;  %v5165_v24 = vpop.f32.mrb[104].mxu1 }
 0x1d3   : > { %v1849_v4 = vpop.f32.mrb[105].mxu0  ;;  %2111 = vmatmul.mubr.f32.gmra.mrb[210].mxu0 %v425_v19  ;;  %v2489_v28 = vpop.f32.mrb[105].mxu1  ;;  %2751 = vmatmul.mubr.f32.gmra.mrb[210].mxu1 %v681_v20  ;;  %v693_v20 = vld [vmem:[%s4096_s22 + $0xef0] sm:$0xff] }
 0x1d4   : > { %3725 = vmatprep.mubr.msk.f32.mxu0 %vm752_vm0, %v428_v30  ;;  %3853 = vmatprep.mubr.msk.f32.mxu1 %vm752_vm0, %v684_v21  ;;  %v440_v21 = vld [vmem:[%s4096_s22 + $0x708] sm:$0xff]  ;;  %v1838_v28 = vadd.f32 %v4993_v38, %v5139_v8  ;;  %v439_v8 = vld [vmem:[%s4096_s22 + $0x700] sm:$0xff] }
 0x1d5   : > { %v696_v4 = vld [vmem:[%s4096_s22 + $0xf08] sm:$0xff] }
 0x1d6   : > { %v5173_v27 = vpop.f32.mrb[106].mxu0  ;;  %v5175_v33 = vpop.f32.mrb[106].mxu1 }
 0x1d7   : > { %v1854_v34 = vpop.f32.mrb[107].mxu0  ;;  %2116 = vmatmul.mubr.f32.gmra.mrb[212].mxu0 %v427_v29  ;;  %v2494_v37 = vpop.f32.mrb[107].mxu1  ;;  %2756 = vmatmul.mubr.f32.gmra.mrb[212].mxu1 %v683_v32 }
 0x1d8   : > { %3726 = vmatprep.mubr.msk.f32.mxu0 %vm752_vm0, %v430_v58  ;;  %3854 = vmatprep.mubr.msk.f32.mxu1 %vm752_vm0, %v686_v23  ;;  %v2478_v58 = vadd.f32 %v4993_v38, %v5141_v9 }
 0x1da   : > { %v5183_v40 = vpop.f32.mrb[108].mxu0  ;;  %v5185_v16 = vpop.f32.mrb[108].mxu1 }
 0x1db   : > { %v1859_v41 = vpop.f32.mrb[109].mxu0  ;;  %2121 = vmatmul.mubr.f32.gmra.mrb[214].mxu0 %v429_v31  ;;  %v2499_v52 = vpop.f32.mrb[109].mxu1  ;;  %2761 = vmatmul.mubr.f32.gmra.mrb[214].mxu1 %v685_v39  ;;  %v695_v39 = vld [vmem:[%s4096_s22 + $0xf00] sm:$0xff] }
 0x1dc   : > { %3727 = vmatprep.mubr.msk.f32.mxu0 %vm752_vm0, %v432_v13  ;;  %3855 = vmatprep.mubr.msk.f32.mxu1 %vm752_vm0, %v688_v44  ;;  %v442_v44 = vld [vmem:[%s4096_s22 + $0x718] sm:$0xff]  ;;  %v1843_v52 = vadd.f32 %v4993_v38, %v5153_v50  ;;  %v441_v50 = vld [vmem:[%s4096_s22 + $0x710] sm:$0xff] }
 0x1dd   : > { %v698_v41 = vld [vmem:[%s4096_s22 + $0xf18] sm:$0xff] }
 0x1de   : > { %v5193_v14 = vpop.f32.mrb[110].mxu0  ;;  %v5195_v15 = vpop.f32.mrb[110].mxu1 }
 0x1df   : > { %v1864_v51 = vpop.f32.mrb[111].mxu0  ;;  %2126 = vmatmul.mubr.f32.gmra.mrb[216].mxu0 %v431_v42  ;;  %v2504_v25 = vpop.f32.mrb[111].mxu1  ;;  %2766 = vmatmul.mubr.f32.gmra.mrb[216].mxu1 %v687_v43 }
 0x1e0   : > { %3728 = vmatprep.mubr.msk.f32.mxu0 %vm752_vm0, %v434_v45  ;;  %3856 = vmatprep.mubr.msk.f32.mxu1 %vm752_vm0, %v690_v2  ;;  %v2483_v45 = vadd.f32 %v4993_v38, %v5155_v18 }
 0x1e2   : > { %v1867_v6 = vpop.f32.mrb[112].mxu0  ;;  %v2507_v61 = vpop.f32.mrb[112].mxu1 }
 0x1e3   : > { %v1868_v0 = vadd.f32 %v4993_v38, %v1867_v6  ;;  %v2508_v11 = vadd.f32 %v4993_v38, %v2507_v61  ;;  %v1869_v1 = vpop.f32.mrb[113].mxu0  ;;  %2131 = vmatmul.mubr.f32.gmra.mrb[218].mxu0 %v433_v56  ;;  %v2509_v3 = vpop.f32.mrb[113].mxu1  ;;  %2771 = vmatmul.mubr.f32.gmra.mrb[218].mxu1 %v689_v57  ;;  %v697_v57 = vld [vmem:[%s4096_s22 + $0xf10] sm:$0xff] }
 0x1e4   : > { %3729 = vmatprep.mubr.msk.f32.mxu0 %vm752_vm0, %v436_v46  ;;  %3857 = vmatprep.mubr.msk.f32.mxu1 %vm752_vm0, %v692_v60  ;;  %v444_v60 = vld [vmem:[%s4096_s22 + $0x728] sm:$0xff] }
 0x1e5   : > { %v2890_v22 = vmax.f32 %v1828_v47, %v1868_v0  ;;  %v2954_v10 = vmax.f32 %v2468_v7, %v2508_v11  ;;  %v700_v47 = vld [vmem:[%s4096_s22 + $0xf28] sm:$0xff]  ;;  %v1848_v0 = vadd.f32 %v4993_v38, %v5163_v48  ;;  %v2488_v11 = vadd.f32 %v4993_v38, %v5165_v24 }
 0x1e6   : > { %v1872_v17 = vpop.f32.mrb[114].mxu0  ;;  %v2512_v62 = vpop.f32.mrb[114].mxu1 }
 0x1e7   : > { %3019 = vst.msk [vmem:[#allocation2 + $0xc0] sm:$0xff] %vm2994_vm1, %v2890_v22  ;;  %3083 = vst.msk [vmem:[#allocation2 + $0x2c0] sm:$0xff] %vm2994_vm1, %v2954_v10  ;;  %v1873_v5 = vadd.f32 %v4993_v38, %v1872_v17  ;;  %v2513_v55 = vadd.f32 %v4993_v38, %v2512_v62  ;;  %v1874_v63 = vpop.f32.mrb[115].mxu0  ;;  %2136 = vmatmul.mubr.f32.gmra.mrb[220].mxu0 %v435_v53  ;;  %v2514_v19 = vpop.f32.mrb[115].mxu1  ;;  %2776 = vmatmul.mubr.f32.gmra.mrb[220].mxu1 %v691_v36  ;;  %v446_v17 = vld [vmem:[%s4096_s22 + $0x738] sm:$0xff] }
 0x1e8   : > { %3730 = vmatprep.mubr.msk.f32.mxu0 %vm752_vm0, %v438_v35  ;;  %3858 = vmatprep.mubr.msk.f32.mxu1 %vm752_vm0, %v694_v12  ;;  %v443_v12 = vld [vmem:[%s4096_s22 + $0x720] sm:$0xff]  ;;  %v702_v62 = vld [vmem:[%s4096_s22 + $0xf38] sm:$0xff] }
 0x1e9   : > { %v2891_v59 = vmax.f32 %v1833_v54, %v1873_v5  ;;  %v2955_v30 = vmax.f32 %v2473_v49, %v2513_v55  ;;  %v699_v54 = vld [vmem:[%s4096_s22 + $0xf20] sm:$0xff]  ;;  %v1853_v49 = vadd.f32 %v4993_v38, %v5173_v27 }
 0x1ea   : > { %v1877_v29 = vpop.f32.mrb[116].mxu0  ;;  %v2517_v32 = vpop.f32.mrb[116].mxu1 }
 0x1eb   : > { %3020 = vst.msk [vmem:[#allocation2 + $0xc8] sm:$0xff] %vm2994_vm1, %v2891_v59  ;;  %3084 = vst.msk [vmem:[#allocation2 + $0x2c8] sm:$0xff] %vm2994_vm1, %v2955_v30  ;;  %v1878_v23 = vadd.f32 %v4993_v38, %v1877_v29  ;;  %v2518_v34 = vadd.f32 %v4993_v38, %v2517_v32  ;;  %v1879_v37 = vpop.f32.mrb[117].mxu0  ;;  %2141 = vmatmul.mubr.f32.gmra.mrb[222].mxu0 %v437_v26  ;;  %v2519_v31 = vpop.f32.mrb[117].mxu1  ;;  %2781 = vmatmul.mubr.f32.gmra.mrb[222].mxu1 %v693_v20  ;;  %v448_v29 = vld [vmem:[%s4096_s22 + $0x748] sm:$0xff] }
 0x1ec   : > { %3731 = vmatprep.mubr.msk.f32.mxu0 %vm752_vm0, %v440_v21  ;;  %3859 = vmatprep.mubr.msk.f32.mxu1 %vm752_vm0, %v696_v4  ;;  %v2493_v26 = vadd.f32 %v4993_v38, %v5175_v33  ;;  %v445_v21 = vld [vmem:[%s4096_s22 + $0x730] sm:$0xff]  ;;  %v704_v32 = vld [vmem:[%s4096_s22 + $0xf48] sm:$0xff]  ;;  %v1858_v37 = vadd.f32 %v4993_v38, %v5183_v40  ;;  %v2498_v31 = vadd.f32 %v4993_v38, %v5185_v16 }
 0x1ed   : > { %v2892_v9 = vmax.f32 %v1838_v28, %v1878_v23  ;;  %v2956_v13 = vmax.f32 %v2478_v58, %v2518_v34  ;;  %v701_v4 = vld [vmem:[%s4096_s22 + $0xf30] sm:$0xff] }
 0x1ee   : > { %v1882_v42 = vpop.f32.mrb[118].mxu0  ;;  %v2522_v43 = vpop.f32.mrb[118].mxu1 }
 0x1ef   : > { %3021 = vst.msk [vmem:[#allocation2 + $0xd0] sm:$0xff] %vm2994_vm1, %v2892_v9  ;;  %3085 = vst.msk [vmem:[#allocation2 + $0x2d0] sm:$0xff] %vm2994_vm1, %v2956_v13  ;;  %v1883_v2 = vadd.f32 %v4993_v38, %v1882_v42  ;;  %v2523_v51 = vadd.f32 %v4993_v38, %v2522_v43  ;;  %v1884_v25 = vpop.f32.mrb[119].mxu0  ;;  %2146 = vmatmul.mubr.f32.gmra.mrb[224].mxu0 %v439_v8  ;;  %v2524_v56 = vpop.f32.mrb[119].mxu1  ;;  %2786 = vmatmul.mubr.f32.gmra.mrb[224].mxu1 %v695_v39  ;;  %v447_v42 = vld [vmem:[%s4096_s22 + $0x740] sm:$0xff] }
 0x1f0   : > { %3732 = vmatprep.mubr.msk.f32.mxu0 %vm752_vm0, %v442_v44  ;;  %3860 = vmatprep.mubr.msk.f32.mxu1 %vm752_vm0, %v698_v41  ;;  %v703_v43 = vld [vmem:[%s4096_s22 + $0xf40] sm:$0xff] }
 0x1f1   : > { %v2893_v18 = vmax.f32 %v1843_v52, %v1883_v2  ;;  %v2957_v46 = vmax.f32 %v2483_v45, %v2523_v51  ;;  %v450_v45 = vld [vmem:[%s4096_s22 + $0x758] sm:$0xff]  ;;  %v1863_v51 = vadd.f32 %v4993_v38, %v5193_v14 }
 0x1f2   : > { %v3147_v6 = vld [vmem:[#allocation2 + $0xc0] ss:$2 sm:$0xff]  ;;  %v3275_v61 = vld [vmem:[#allocation2 + $0xc1] ss:$2 sm:$0xff]  ;;  %v1887_v53 = vpop.f32.mrb[120].mxu0  ;;  %v2527_v36 = vpop.f32.mrb[120].mxu1 }
 0x1f3   : > { %v3211_v7 = vld [vmem:[#allocation2 + $0x2c0] ss:$2 sm:$0xff]  ;;  %v3390_v1 = vmax.f32 %v3147_v6, %v3275_v61  ;;  %v3339_v3 = vld [vmem:[#allocation2 + $0x2c1] ss:$2 sm:$0xff]  ;;  %3022 = vst.msk [vmem:[#allocation2 + $0xd8] sm:$0xff] %vm2994_vm1, %v2893_v18  ;;  %3086 = vst.msk [vmem:[#allocation2 + $0x2d8] sm:$0xff] %vm2994_vm1, %v2957_v46  ;;  %2151 = vmatmul.mubr.f32.gmra.mrb[226].mxu0 %v441_v50  ;;  %2791 = vmatmul.mubr.f32.gmra.mrb[226].mxu1 %v697_v57  ;;  %v1888_v22 = vadd.f32 %v4993_v38, %v1887_v53 }
 0x1f4   : > { %v3422_v48 = vmax.f32 %v3211_v7, %v3339_v3  ;;  %v2528_v24 = vadd.f32 %v4993_v38, %v2527_v36  ;;  %v1889_v10 = vpop.f32.mrb[121].mxu0  ;;  %v2529_v35 = vpop.f32.mrb[121].mxu1  ;;  %3733 = vmatprep.mubr.msk.f32.mxu0 %vm752_vm0, %v444_v60  ;;  %3861 = vmatprep.mubr.msk.f32.mxu1 %vm752_vm0, %v700_v47  ;;  %v706_v2 = vld [vmem:[%s4096_s22 + $0xf58] sm:$0xff]  ;;  %v2503_v18 = vadd.f32 %v4993_v38, %v5195_v15  ;;  %v449_v6 = vld [vmem:[%s4096_s22 + $0x750] sm:$0xff] }
 0x1f5   : > { %3454 = vst.msk [vmem:[%s4626_s5 + $0x60] sm:$0xff] %vm2994_vm1, %v3390_v1  ;;  %v2894_v5 = vmax.f32 %v1848_v0, %v1888_v22  ;;  %v705_v61 = vld [vmem:[%s4096_s22 + $0xf50] sm:$0xff]  ;;  %v452_v0 = vld [vmem:[%s4096_s22 + $0x768] sm:$0xff] }
 0x1f6   : > { %3486 = vst.msk [vmem:[%s4626_s5 + $0x160] sm:$0xff] %vm2994_vm1, %v3422_v48  ;;  %v2958_v55 = vmax.f32 %v2488_v11, %v2528_v24  ;;  %v1892_v63 = vpop.f32.mrb[122].mxu0  ;;  %v2532_v19 = vpop.f32.mrb[122].mxu1  ;;  %v708_v11 = vld [vmem:[%s4096_s22 + $0xf68] sm:$0xff] }
 0x1f7   : > { %v1893_v20 = vadd.f32 %v4993_v38, %v1892_v63  ;;  %v2533_v59 = vadd.f32 %v4993_v38, %v2532_v19  ;;  %v1894_v30 = vpop.f32.mrb[123].mxu0  ;;  %2156 = vmatmul.mubr.f32.gmra.mrb[228].mxu0 %v443_v12  ;;  %v2534_v27 = vpop.f32.mrb[123].mxu1  ;;  %2796 = vmatmul.mubr.f32.gmra.mrb[228].mxu1 %v699_v54  ;;  %3023 = vst.msk [vmem:[#allocation2 + $0xe0] sm:$0xff] %vm2994_vm1, %v2894_v5  ;;  %v451_v12 = vld [vmem:[%s4096_s22 + $0x760] sm:$0xff]  ;;  %v453_v19 = vld [vmem:[%s4096_s22 + $0x770] sm:$0xff] }
 0x1f8   : > { %3087 = vst.msk [vmem:[#allocation2 + $0x2e0] sm:$0xff] %vm2994_vm1, %v2958_v55  ;;  %3734 = vmatprep.mubr.msk.f32.mxu0 %vm752_vm0, %v446_v17  ;;  %3862 = vmatprep.mubr.msk.f32.mxu1 %vm752_vm0, %v702_v62  ;;  %v707_v54 = vld [vmem:[%s4096_s22 + $0xf60] sm:$0xff]  ;;  %v454_v17 = vld [vmem:[%s4096_s22 + $0x778] sm:$0xff] }
 0x1f9   : > { %v2895_v33 = vmax.f32 %v1853_v49, %v1893_v20  ;;  %v2959_v28 = vmax.f32 %v2493_v26, %v2533_v59  ;;  %v710_v62 = vld [vmem:[%s4096_s22 + $0xf78] sm:$0xff]  ;;  %v709_v26 = vld [vmem:[%s4096_s22 + $0xf70] sm:$0xff]  ;;  %v456_v20 = vld [vmem:[%s4096_s22 + $0x788] sm:$0xff] }
 0x1fa   : > { %v3149_v58 = vld [vmem:[#allocation2 + $0xd0] ss:$2 sm:$0xff]  ;;  %v3277_v23 = vld [vmem:[#allocation2 + $0xd1] ss:$2 sm:$0xff]  ;;  %v1897_v9 = vpop.f32.mrb[124].mxu0  ;;  %v2537_v13 = vpop.f32.mrb[124].mxu1 }
 0x1fb   : > { %v3213_v34 = vld [vmem:[#allocation2 + $0x2d0] ss:$2 sm:$0xff]  ;;  %v3391_v8 = vmax.f32 %v3149_v58, %v3277_v23  ;;  %v3341_v39 = vld [vmem:[#allocation2 + $0x2d1] ss:$2 sm:$0xff]  ;;  %3024 = vst.msk [vmem:[#allocation2 + $0xe8] sm:$0xff] %vm2994_vm1, %v2895_v33  ;;  %3088 = vst.msk [vmem:[#allocation2 + $0x2e8] sm:$0xff] %vm2994_vm1, %v2959_v28  ;;  %2161 = vmatmul.mubr.f32.gmra.mrb[230].mxu0 %v445_v21  ;;  %2801 = vmatmul.mubr.f32.gmra.mrb[230].mxu1 %v701_v4  ;;  %v1898_v44 = vadd.f32 %v4993_v38, %v1897_v9 }
 0x1fc   : > { %v3423_v40 = vmax.f32 %v3213_v34, %v3341_v39  ;;  %v2538_v16 = vadd.f32 %v4993_v38, %v2537_v13  ;;  %v1899_v41 = vpop.f32.mrb[125].mxu0  ;;  %v2539_v52 = vpop.f32.mrb[125].mxu1  ;;  %3735 = vmatprep.mubr.msk.f32.mxu0 %vm752_vm0, %v448_v29  ;;  %3863 = vmatprep.mubr.msk.f32.mxu1 %vm752_vm0, %v704_v32  ;;  %v712_v59 = vld [vmem:[%s4096_s22 + $0xf88] sm:$0xff]  ;;  %v455_v34 = vld [vmem:[%s4096_s22 + $0x780] sm:$0xff] }
 0x1fd   : > { %3455 = vst.msk [vmem:[%s4626_s5 + $0x68] sm:$0xff] %vm2994_vm1, %v3391_v8  ;;  %v2896_v25 = vmax.f32 %v1858_v37, %v1898_v44  ;;  %v711_v37 = vld [vmem:[%s4096_s22 + $0xf80] sm:$0xff]  ;;  %v714_v8 = vld [vmem:[%s4096_s22 + $0xf98] sm:$0xff]  ;;  %v457_v44 = vld [vmem:[%s4096_s22 + $0x790] sm:$0xff] }
 0x1fe   : > { %3487 = vst.msk [vmem:[%s4626_s5 + $0x168] sm:$0xff] %vm2994_vm1, %v3423_v40  ;;  %v2960_v56 = vmax.f32 %v2498_v31, %v2538_v16  ;;  %v1902_v50 = vpop.f32.mrb[126].mxu0  ;;  %v2542_v57 = vpop.f32.mrb[126].mxu1  ;;  %v458_v31 = vld [vmem:[%s4096_s22 + $0x798] sm:$0xff]  ;;  %v713_v16 = vld [vmem:[%s4096_s22 + $0xf90] sm:$0xff]  ;;  %v460_v41 = vld [vmem:[%s4096_s22 + $0x7a8] sm:$0xff] }
 0x1ff   : > { %v1903_v46 = vadd.f32 %v4993_v38, %v1902_v50  ;;  %v2543_v60 = vadd.f32 %v4993_v38, %v2542_v57  ;;  %v1904_v47 = vpop.f32.mrb[127].mxu0  ;;  %2166 = vmatmul.mubr.f32.gmra.mrb[232].mxu0 %v447_v42  ;;  %v2544_v14 = vpop.f32.mrb[127].mxu1  ;;  %2806 = vmatmul.mubr.f32.gmra.mrb[232].mxu1 %v703_v43  ;;  %3025 = vst.msk [vmem:[#allocation2 + $0xf0] sm:$0xff] %vm2994_vm1, %v2896_v25  ;;  %v716_v52 = vld [vmem:[%s4096_s22 + $0xfa8] sm:$0xff]  ;;  %v715_v25 = vld [vmem:[%s4096_s22 + $0xfa0] sm:$0xff]  ;;  %v718_v50 = vld [vmem:[%s4096_s22 + $0xfb8] sm:$0xff] }
 0x200   : > { %3089 = vst.msk [vmem:[#allocation2 + $0x2f0] sm:$0xff] %vm2994_vm1, %v2960_v56  ;;  %3736 = vmatprep.mubr.msk.f32.mxu0 %vm752_vm0, %v450_v45  ;;  %3864 = vmatprep.mubr.msk.f32.mxu1 %vm752_vm0, %v706_v2  ;;  %v462_v56 = vld [vmem:[%s4096_s22 + $0x7b8] sm:$0xff]  ;;  %v461_v47 = vld [vmem:[%s4096_s22 + $0x7b0] sm:$0xff] }
 0x201   : > { %v2897_v15 = vmax.f32 %v1863_v51, %v1903_v46  ;;  %v2961_v7 = vmax.f32 %v2503_v18, %v2543_v60  ;;  %v459_v51 = vld [vmem:[%s4096_s22 + $0x7a0] sm:$0xff]  ;;  %v717_v14 = vld [vmem:[%s4096_s22 + $0xfb0] sm:$0xff] }
 0x202   : > { %v3151_v1 = vld [vmem:[#allocation2 + $0xe0] ss:$2 sm:$0xff]  ;;  %v3279_v38 = vld [vmem:[#allocation2 + $0xe1] ss:$2 sm:$0xff]  ;;  %v5323_v48 = vpop.f32.mrb[128].mxu0  ;;  %v5325_v22 = vpop.f32.mrb[128].mxu1 }
 0x203   : > { %v3215_v3 = vld [vmem:[#allocation2 + $0x2e0] ss:$2 sm:$0xff]  ;;  %v3392_v53 = vmax.f32 %v3151_v1, %v3279_v38  ;;  %v3343_v36 = vld [vmem:[#allocation2 + $0x2e1] ss:$2 sm:$0xff]  ;;  %3026 = vst.msk [vmem:[#allocation2 + $0xf8] sm:$0xff] %vm2994_vm1, %v2897_v15  ;;  %3090 = vst.msk [vmem:[#allocation2 + $0x2f8] sm:$0xff] %vm2994_vm1, %v2961_v7  ;;  %2171 = vmatmul.mubr.f32.gmra.mrb[234].mxu0 %v449_v6  ;;  %2811 = vmatmul.mubr.f32.gmra.mrb[234].mxu1 %v705_v61 }
 0x204   : > { %v3424_v24 = vmax.f32 %v3215_v3, %v3343_v36  ;;  %v1909_v10 = vpop.f32.mrb[129].mxu0  ;;  %v2549_v35 = vpop.f32.mrb[129].mxu1  ;;  %3737 = vmatprep.mubr.msk.f32.mxu0 %vm752_vm0, %v452_v0  ;;  %3865 = vmatprep.mubr.msk.f32.mxu1 %vm752_vm0, %v708_v11  ;;  %v464_v6 = vld [vmem:[%s4096_s22 + $0x7c8] sm:$0xff]  ;;  %v463_v1 = vld [vmem:[%s4096_s22 + $0x7c0] sm:$0xff]  ;;  %v466_v3 = vld [vmem:[%s4096_s22 + $0x7d8] sm:$0xff] }
 0x205   : > { %3456 = vst.msk [vmem:[%s4626_s5 + $0x70] sm:$0xff] %vm2994_vm1, %v3392_v53  ;;  %v720_v61 = vld [vmem:[%s4096_s22 + $0xfc8] sm:$0xff]  ;;  %v719_v38 = vld [vmem:[%s4096_s22 + $0xfc0] sm:$0xff]  ;;  %v722_v53 = vld [vmem:[%s4096_s22 + $0xfd8] sm:$0xff] }
 0x206   : > { %3488 = vst.msk [vmem:[%s4626_s5 + $0x170] sm:$0xff] %vm2994_vm1, %v3424_v24  ;;  %v5337_v49 = vpop.f32.mrb[130].mxu0  ;;  %v5339_v5 = vpop.f32.mrb[130].mxu1 }
 0x207   : > { %v1914_v55 = vpop.f32.mrb[131].mxu0  ;;  %2176 = vmatmul.mubr.f32.gmra.mrb[236].mxu0 %v451_v12  ;;  %v2554_v63 = vpop.f32.mrb[131].mxu1  ;;  %2816 = vmatmul.mubr.f32.gmra.mrb[236].mxu1 %v707_v54  ;;  %v465_v12 = vld [vmem:[%s4096_s22 + $0x7d0] sm:$0xff] }
 0x208   : > { %3738 = vmatprep.mubr.msk.f32.mxu0 %vm752_vm0, %v454_v17  ;;  %3866 = vmatprep.mubr.msk.f32.mxu1 %vm752_vm0, %v710_v62  ;;  %v721_v54 = vld [vmem:[%s4096_s22 + $0xfd0] sm:$0xff]  ;;  %v468_v17 = vld [vmem:[%s4096_s22 + $0x7e8] sm:$0xff]  ;;  %v5414_v55 = vld [vmem:[%s5792_s2] ss:$0 sm:$0xff] }
 0x209   : > { %v724_v62 = vld [vmem:[%s4096_s22 + $0xfe8] sm:$0xff]  ;;  %v1908_v63 = vadd.f32 %v5414_v55, %v5323_v48  ;;  %v467_v48 = vld [vmem:[%s4096_s22 + $0x7e0] sm:$0xff] }
 0x20a   : > { %v3153_v30 = vld [vmem:[#allocation2 + $0xf0] ss:$2 sm:$0xff]  ;;  %v3281_v27 = vld [vmem:[#allocation2 + $0xf1] ss:$2 sm:$0xff]  ;;  %v5347_v28 = vpop.f32.mrb[132].mxu0  ;;  %v5349_v29 = vpop.f32.mrb[132].mxu1 }
 0x20b   : > { %v3217_v21 = vld [vmem:[#allocation2 + $0x2f0] ss:$2 sm:$0xff]  ;;  %v3393_v4 = vmax.f32 %v3153_v30, %v3281_v27  ;;  %v3345_v33 = vld [vmem:[#allocation2 + $0x2f1] ss:$2 sm:$0xff]  ;;  %2181 = vmatmul.mubr.f32.gmra.mrb[238].mxu0 %v453_v19  ;;  %2821 = vmatmul.mubr.f32.gmra.mrb[238].mxu1 %v709_v26  ;;  %v1919_v58 = vpop.f32.mrb[133].mxu0  ;;  %v2559_v23 = vpop.f32.mrb[133].mxu1 }
 0x20c   : > { %v3425_v32 = vmax.f32 %v3217_v21, %v3345_v33  ;;  %3739 = vmatprep.mubr.msk.f32.mxu0 %vm752_vm0, %v456_v20  ;;  %3867 = vmatprep.mubr.msk.f32.mxu1 %vm752_vm0, %v712_v59  ;;  %v2548_v20 = vadd.f32 %v5414_v55, %v5325_v22  ;;  %v470_v58 = vld [vmem:[%s4096_s22 + $0x7f8] sm:$0xff]  ;;  %v1913_v22 = vadd.f32 %v5414_v55, %v5337_v49  ;;  %v469_v49 = vld [vmem:[%s4096_s22 + $0x7f0] sm:$0xff] }
 0x20d   : > { %3457 = vst.msk [vmem:[%s4626_s5 + $0x78] sm:$0xff] %vm2994_vm1, %v3393_v4  ;;  %v723_v4 = vld [vmem:[%s4096_s22 + $0xfe0] sm:$0xff]  ;;  %v726_v23 = vld [vmem:[%s4096_s22 + $0xff8] sm:$0xff] }
 0x20e   : > { %3489 = vst.msk [vmem:[%s4626_s5 + $0x178] sm:$0xff] %vm2994_vm1, %v3425_v32  ;;  %v5361_v39 = vpop.f32.mrb[134].mxu0  ;;  %v5363_v9 = vpop.f32.mrb[134].mxu1 }
 0x20f   : > { %v1924_v13 = vpop.f32.mrb[135].mxu0  ;;  %2186 = vmatmul.mubr.f32.gmra.mrb[240].mxu0 %v455_v34  ;;  %v2564_v40 = vpop.f32.mrb[135].mxu1  ;;  %2826 = vmatmul.mubr.f32.gmra.mrb[240].mxu1 %v711_v37 }
 0x210   : > { %3740 = vmatprep.mubr.msk.f32.mxu0 %vm752_vm0, %v458_v31  ;;  %3868 = vmatprep.mubr.msk.f32.mxu1 %vm752_vm0, %v714_v8  ;;  %v2553_v31 = vadd.f32 %v5414_v55, %v5339_v5 }
 0x212   : > { %v5371_v42 = vpop.f32.mrb[136].mxu0  ;;  %v5373_v43 = vpop.f32.mrb[136].mxu1 }
 0x213   : > { %v1929_v45 = vpop.f32.mrb[137].mxu0  ;;  %2191 = vmatmul.mubr.f32.gmra.mrb[242].mxu0 %v457_v44  ;;  %v2569_v2 = vpop.f32.mrb[137].mxu1  ;;  %2831 = vmatmul.mubr.f32.gmra.mrb[242].mxu1 %v713_v16  ;;  %v725_v16 = vld [vmem:[%s4096_s22 + $0xff0] sm:$0xff] }
 0x214   : > { %3741 = vmatprep.mubr.msk.f32.mxu0 %vm752_vm0, %v460_v41  ;;  %3869 = vmatprep.mubr.msk.f32.mxu1 %vm752_vm0, %v716_v52  ;;  %v1918_v52 = vadd.f32 %v5414_v55, %v5347_v28 }
 0x216   : > { %v5381_v57 = vpop.f32.mrb[138].mxu0  ;;  %v5383_v18 = vpop.f32.mrb[138].mxu1 }
 0x217   : > { %v1934_v46 = vpop.f32.mrb[139].mxu0  ;;  %2196 = vmatmul.mubr.f32.gmra.mrb[244].mxu0 %v459_v51  ;;  %v2574_v60 = vpop.f32.mrb[139].mxu1  ;;  %2836 = vmatmul.mubr.f32.gmra.mrb[244].mxu1 %v715_v25  ;;  %v2558_v51 = vadd.f32 %v5414_v55, %v5349_v29  ;;  %v2563_v29 = vadd.f32 %v5414_v55, %v5363_v9  ;;  %v1928_v9 = vadd.f32 %v5414_v55, %v5371_v42 }
 0x218   : > { %3742 = vmatprep.mubr.msk.f32.mxu0 %vm752_vm0, %v462_v56  ;;  %3870 = vmatprep.mubr.msk.f32.mxu1 %vm752_vm0, %v718_v50 }
 0x21a   : > { %v5391_v15 = vpop.f32.mrb[140].mxu0  ;;  %v5393_v7 = vpop.f32.mrb[140].mxu1 }
 0x21b   : > { %v1939_v0 = vpop.f32.mrb[141].mxu0  ;;  %2201 = vmatmul.mubr.f32.gmra.mrb[246].mxu0 %v461_v47  ;;  %v2579_v11 = vpop.f32.mrb[141].mxu1  ;;  %2841 = vmatmul.mubr.f32.gmra.mrb[246].mxu1 %v717_v14 }
 0x21c   : > { %3743 = vmatprep.mubr.msk.f32.mxu0 %vm752_vm0, %v464_v6  ;;  %3871 = vmatprep.mubr.msk.f32.mxu1 %vm752_vm0, %v720_v61  ;;  %v1923_v6 = vadd.f32 %v5414_v55, %v5361_v39 }
 0x21e   : > { %v5401_v36 = vpop.f32.mrb[142].mxu0  ;;  %v5403_v24 = vpop.f32.mrb[142].mxu1 }
 0x21f   : > { %v1944_v10 = vpop.f32.mrb[143].mxu0  ;;  %2206 = vmatmul.mubr.f32.gmra.mrb[248].mxu0 %v463_v1  ;;  %v2584_v35 = vpop.f32.mrb[143].mxu1  ;;  %2846 = vmatmul.mubr.f32.gmra.mrb[248].mxu1 %v719_v38 }
 0x220   : > { %3744 = vmatprep.mubr.msk.f32.mxu0 %vm752_vm0, %v466_v3  ;;  %3872 = vmatprep.mubr.msk.f32.mxu1 %vm752_vm0, %v722_v53 }
 0x222   : > { %v1947_v19 = vpop.f32.mrb[144].mxu0  ;;  %v2587_v26 = vpop.f32.mrb[144].mxu1 }
 0x223   : > { %v1948_v59 = vadd.f32 %v5414_v55, %v1947_v19  ;;  %v2588_v30 = vadd.f32 %v5414_v55, %v2587_v26  ;;  %v1949_v27 = vpop.f32.mrb[145].mxu0  ;;  %2211 = vmatmul.mubr.f32.gmra.mrb[250].mxu0 %v465_v12  ;;  %v2589_v21 = vpop.f32.mrb[145].mxu1  ;;  %2851 = vmatmul.mubr.f32.gmra.mrb[250].mxu1 %v721_v54 }
 0x224   : > { %3745 = vmatprep.mubr.msk.f32.mxu0 %vm752_vm0, %v468_v17  ;;  %3873 = vmatprep.mubr.msk.f32.mxu1 %vm752_vm0, %v724_v62  ;;  %v2568_v62 = vadd.f32 %v5414_v55, %v5373_v43  ;;  %v2573_v43 = vadd.f32 %v5414_v55, %v5383_v18  ;;  %v1938_v18 = vadd.f32 %v5414_v55, %v5391_v15 }
 0x225   : > { %v2898_v33 = vmax.f32 %v1908_v63, %v1948_v59  ;;  %v2962_v32 = vmax.f32 %v2548_v20, %v2588_v30 }
 0x226   : > { %v1952_v34 = vpop.f32.mrb[146].mxu0  ;;  %v2592_v37 = vpop.f32.mrb[146].mxu1 }
 0x227   : > { %3027 = vst.msk [vmem:[#allocation2 + $0x100] sm:$0xff] %vm2994_vm1, %v2898_v33  ;;  %3091 = vst.msk [vmem:[#allocation2 + $0x300] sm:$0xff] %vm2994_vm1, %v2962_v32  ;;  %v1953_v8 = vadd.f32 %v5414_v55, %v1952_v34  ;;  %v2593_v13 = vadd.f32 %v5414_v55, %v2592_v37  ;;  %v1954_v40 = vpop.f32.mrb[147].mxu0  ;;  %2216 = vmatmul.mubr.f32.gmra.mrb[252].mxu0 %v467_v48  ;;  %v2594_v44 = vpop.f32.mrb[147].mxu1  ;;  %2856 = vmatmul.mubr.f32.gmra.mrb[252].mxu1 %v723_v4 }
 0x228   : > { %3746 = vmatprep.mubr.msk.f32.mxu0 %vm752_vm0, %v470_v58  ;;  %3874 = vmatprep.mubr.msk.f32.mxu1 %vm752_vm0, %v726_v23  ;;  %v1933_v48 = vadd.f32 %v5414_v55, %v5381_v57  ;;  %v2578_v44 = vadd.f32 %v5414_v55, %v5393_v7  ;;  %v2583_v7 = vadd.f32 %v5414_v55, %v5403_v24 }
 0x229   : > { %v2899_v41 = vmax.f32 %v1913_v22, %v1953_v8  ;;  %v2963_v5 = vmax.f32 %v2553_v31, %v2593_v13 }
 0x22a   : > { %v1957_v45 = vpop.f32.mrb[148].mxu0  ;;  %v2597_v2 = vpop.f32.mrb[148].mxu1 }
 0x22b   : > { %3028 = vst.msk [vmem:[#allocation2 + $0x108] sm:$0xff] %vm2994_vm1, %v2899_v41  ;;  %3092 = vst.msk [vmem:[#allocation2 + $0x308] sm:$0xff] %vm2994_vm1, %v2963_v5  ;;  %v1958_v25 = vadd.f32 %v5414_v55, %v1957_v45  ;;  %v2598_v56 = vadd.f32 %v5414_v55, %v2597_v2  ;;  %v1959_v50 = vpop.f32.mrb[149].mxu0  ;;  %2221 = vmatmul.mubr.f32.gmra.mrb[254].mxu0 %v469_v49  ;;  %v2599_v46 = vpop.f32.mrb[149].mxu1  ;;  %2861 = vmatmul.mubr.f32.gmra.mrb[254].mxu1 %v725_v16 }
 0x22d   : > { %v2900_v60 = vmax.f32 %v1918_v52, %v1958_v25  ;;  %v2964_v47 = vmax.f32 %v2558_v51, %v2598_v56  ;;  %v1943_v25 = vadd.f32 %v5414_v55, %v5401_v36 }
 0x22e   : > { %v1962_v28 = vpop.f32.mrb[150].mxu0  ;;  %v2602_v14 = vpop.f32.mrb[150].mxu1 }
 0x22f   : > { %3029 = vst.msk [vmem:[#allocation2 + $0x110] sm:$0xff] %vm2994_vm1, %v2900_v60  ;;  %3093 = vst.msk [vmem:[#allocation2 + $0x310] sm:$0xff] %vm2994_vm1, %v2964_v47  ;;  %v1963_v61 = vadd.f32 %v5414_v55, %v1962_v28  ;;  %v2603_v0 = vadd.f32 %v5414_v55, %v2602_v14  ;;  %v1964_v11 = vpop.f32.mrb[151].mxu0  ;;  %v2604_v1 = vpop.f32.mrb[151].mxu1 }
 0x231   : > { %v2901_v38 = vmax.f32 %v1923_v6, %v1963_v61  ;;  %v2965_v3 = vmax.f32 %v2563_v29, %v2603_v0 }
 0x232   : > { %v3155_v53 = vld [vmem:[#allocation2 + $0x100] ss:$2 sm:$0xff]  ;;  %v3283_v10 = vld [vmem:[#allocation2 + $0x101] ss:$2 sm:$0xff]  ;;  %v1967_v54 = vpop.f32.mrb[152].mxu0  ;;  %v2607_v17 = vpop.f32.mrb[152].mxu1 }
 0x233   : > { %v3219_v39 = vld [vmem:[#allocation2 + $0x300] ss:$2 sm:$0xff]  ;;  %v3394_v35 = vmax.f32 %v3155_v53, %v3283_v10  ;;  %v3347_v12 = vld [vmem:[#allocation2 + $0x301] ss:$2 sm:$0xff]  ;;  %3030 = vst.msk [vmem:[#allocation2 + $0x118] sm:$0xff] %vm2994_vm1, %v2901_v38  ;;  %3094 = vst.msk [vmem:[#allocation2 + $0x318] sm:$0xff] %vm2994_vm1, %v2965_v3  ;;  %v1968_v19 = vadd.f32 %v5414_v55, %v1967_v54  ;;  %v2608_v26 = vadd.f32 %v5414_v55, %v2607_v17 }
 0x234   : > { %v3426_v63 = vmax.f32 %v3219_v39, %v3347_v12  ;;  %v1969_v20 = vpop.f32.mrb[153].mxu0  ;;  %v2609_v59 = vpop.f32.mrb[153].mxu1 }
 0x235   : > { %3458 = vst.msk [vmem:[%s4626_s5 + $0x80] sm:$0xff] %vm2994_vm1, %v3394_v35  ;;  %v2902_v42 = vmax.f32 %v1928_v9, %v1968_v19  ;;  %v2966_v30 = vmax.f32 %v2568_v62, %v2608_v26 }
 0x236   : > { %3490 = vst.msk [vmem:[%s4626_s5 + $0x180] sm:$0xff] %vm2994_vm1, %v3426_v63  ;;  %v1972_v27 = vpop.f32.mrb[154].mxu0  ;;  %v2612_v21 = vpop.f32.mrb[154].mxu1 }
 0x237   : > { %v1973_v4 = vadd.f32 %v5414_v55, %v1972_v27  ;;  %v2613_v33 = vadd.f32 %v5414_v55, %v2612_v21  ;;  %v1974_v32 = vpop.f32.mrb[155].mxu0  ;;  %v2614_v58 = vpop.f32.mrb[155].mxu1  ;;  %3031 = vst.msk [vmem:[#allocation2 + $0x120] sm:$0xff] %vm2994_vm1, %v2902_v42  ;;  %3095 = vst.msk [vmem:[#allocation2 + $0x320] sm:$0xff] %vm2994_vm1, %v2966_v30 }
 0x239   : > { %v2903_v23 = vmax.f32 %v1933_v48, %v1973_v4  ;;  %v2967_v22 = vmax.f32 %v2573_v43, %v2613_v33 }
 0x23a   : > { %v3157_v34 = vld [vmem:[#allocation2 + $0x110] ss:$2 sm:$0xff]  ;;  %v3285_v37 = vld [vmem:[#allocation2 + $0x111] ss:$2 sm:$0xff]  ;;  %v1977_v13 = vpop.f32.mrb[156].mxu0  ;;  %v2617_v40 = vpop.f32.mrb[156].mxu1 }
 0x23b   : > { %v3221_v57 = vld [vmem:[#allocation2 + $0x310] ss:$2 sm:$0xff]  ;;  %v3395_v31 = vmax.f32 %v3157_v34, %v3285_v37  ;;  %v3349_v8 = vld [vmem:[#allocation2 + $0x311] ss:$2 sm:$0xff]  ;;  %3032 = vst.msk [vmem:[#allocation2 + $0x128] sm:$0xff] %vm2994_vm1, %v2903_v23  ;;  %3096 = vst.msk [vmem:[#allocation2 + $0x328] sm:$0xff] %vm2994_vm1, %v2967_v22  ;;  %v1978_v16 = vadd.f32 %v5414_v55, %v1977_v13  ;;  %v2618_v41 = vadd.f32 %v5414_v55, %v2617_v40 }
 0x23c   : > { %v3427_v49 = vmax.f32 %v3221_v57, %v3349_v8  ;;  %v1979_v5 = vpop.f32.mrb[157].mxu0  ;;  %v2619_v52 = vpop.f32.mrb[157].mxu1 }
 0x23d   : > { %3459 = vst.msk [vmem:[%s4626_s5 + $0x88] sm:$0xff] %vm2994_vm1, %v3395_v31  ;;  %v2904_v15 = vmax.f32 %v1938_v18, %v1978_v16  ;;  %v2968_v45 = vmax.f32 %v2578_v44, %v2618_v41 }
 0x23e   : > { %3491 = vst.msk [vmem:[%s4626_s5 + $0x188] sm:$0xff] %vm2994_vm1, %v3427_v49  ;;  %v1982_v2 = vpop.f32.mrb[158].mxu0  ;;  %v2622_v51 = vpop.f32.mrb[158].mxu1 }
 0x23f   : > { %v1983_v56 = vadd.f32 %v5414_v55, %v1982_v2  ;;  %v2623_v50 = vadd.f32 %v5414_v55, %v2622_v51  ;;  %v1984_v46 = vpop.f32.mrb[159].mxu0  ;;  %v2624_v60 = vpop.f32.mrb[159].mxu1  ;;  %3033 = vst.msk [vmem:[#allocation2 + $0x130] sm:$0xff] %vm2994_vm1, %v2904_v15  ;;  %3097 = vst.msk [vmem:[#allocation2 + $0x330] sm:$0xff] %vm2994_vm1, %v2968_v45 }
 0x241   : > { %v2905_v47 = vmax.f32 %v1943_v25, %v1983_v56  ;;  %v2969_v28 = vmax.f32 %v2583_v7, %v2623_v50 }
 0x242   : > { %v3159_v14 = vld [vmem:[#allocation2 + $0x120] ss:$2 sm:$0xff]  ;;  %v3287_v6 = vld [vmem:[#allocation2 + $0x121] ss:$2 sm:$0xff]  ;;  %v1987_v24 = vpop.f32.mrb[160].mxu0  ;;  %v2627_v0 = vpop.f32.mrb[160].mxu1 }
 0x243   : > { %v3223_v36 = vld [vmem:[#allocation2 + $0x320] ss:$2 sm:$0xff]  ;;  %v3396_v29 = vmax.f32 %v3159_v14, %v3287_v6  ;;  %v3351_v61 = vld [vmem:[#allocation2 + $0x321] ss:$2 sm:$0xff]  ;;  %3034 = vst.msk [vmem:[#allocation2 + $0x138] sm:$0xff] %vm2994_vm1, %v2905_v47  ;;  %3098 = vst.msk [vmem:[#allocation2 + $0x338] sm:$0xff] %vm2994_vm1, %v2969_v28  ;;  %v1988_v49 = vadd.f32 %v5414_v55, %v1987_v24  ;;  %v2628_v16 = vadd.f32 %v5414_v55, %v2627_v0 }
 0x244   : > { %v3428_v11 = vmax.f32 %v3223_v36, %v3351_v61  ;;  %v1989_v1 = vpop.f32.mrb[161].mxu0  ;;  %v2629_v38 = vpop.f32.mrb[161].mxu1 }
 0x245   : > { %3460 = vst.msk [vmem:[%s4626_s5 + $0x90] sm:$0xff] %vm2994_vm1, %v3396_v29 }
 0x246   : > { %3492 = vst.msk [vmem:[%s4626_s5 + $0x190] sm:$0xff] %vm2994_vm1, %v3428_v11  ;;  %v1992_v3 = vpop.f32.mrb[162].mxu0  ;;  %v2632_v53 = vpop.f32.mrb[162].mxu1 }
 0x247   : > { %v1994_v10 = vpop.f32.mrb[163].mxu0  ;;  %v2634_v39 = vpop.f32.mrb[163].mxu1  ;;  %v1993_v7 = vadd.f32 %v5414_v55, %v1992_v3  ;;  %v2633_v56 = vadd.f32 %v5414_v55, %v2632_v53 }
 0x24a   : > { %v3161_v9 = vld [vmem:[#allocation2 + $0x130] ss:$2 sm:$0xff]  ;;  %v3289_v35 = vld [vmem:[#allocation2 + $0x131] ss:$2 sm:$0xff]  ;;  %v1997_v62 = vpop.f32.mrb[164].mxu0  ;;  %v2637_v63 = vpop.f32.mrb[164].mxu1 }
 0x24b   : > { %v3225_v12 = vld [vmem:[#allocation2 + $0x330] ss:$2 sm:$0xff]  ;;  %v3397_v54 = vmax.f32 %v3161_v9, %v3289_v35  ;;  %v3353_v17 = vld [vmem:[#allocation2 + $0x331] ss:$2 sm:$0xff]  ;;  %v1999_v26 = vpop.f32.mrb[165].mxu0  ;;  %v2639_v20 = vpop.f32.mrb[165].mxu1  ;;  %v1998_v29 = vadd.f32 %v5414_v55, %v1997_v62  ;;  %v2638_v61 = vadd.f32 %v5414_v55, %v2637_v63 }
 0x24c   : > { %v3429_v19 = vmax.f32 %v3225_v12, %v3353_v17 }
 0x24d   : > { %3461 = vst.msk [vmem:[%s4626_s5 + $0x98] sm:$0xff] %vm2994_vm1, %v3397_v54 }
 0x24e   : > { %3493 = vst.msk [vmem:[%s4626_s5 + $0x198] sm:$0xff] %vm2994_vm1, %v3429_v19  ;;  %v2002_v59 = vpop.f32.mrb[166].mxu0  ;;  %v2642_v42 = vpop.f32.mrb[166].mxu1 }
 0x24f   : > { %v2004_v30 = vpop.f32.mrb[167].mxu0  ;;  %v2644_v27 = vpop.f32.mrb[167].mxu1  ;;  %v2003_v39 = vadd.f32 %v5414_v55, %v2002_v59  ;;  %v2643_v9 = vadd.f32 %v5414_v55, %v2642_v42 }
 0x252   : > { %v5506_v21 = vpop.f32.mrb[168].mxu0  ;;  %v5508_v48 = vpop.f32.mrb[168].mxu1 }
 0x253   : > { %v2009_v43 = vpop.f32.mrb[169].mxu0  ;;  %v2649_v4 = vpop.f32.mrb[169].mxu1  ;;  %v2008_v59 = vadd.f32 %v5414_v55, %v5506_v21 }
 0x254   : > { %v2648_v4 = vadd.f32 %v5414_v55, %v5508_v48 }
 0x256   : > { %v5510_v33 = vpop.f32.mrb[170].mxu0  ;;  %v5512_v32 = vpop.f32.mrb[170].mxu1 }
 0x257   : > { %v2014_v58 = vpop.f32.mrb[171].mxu0  ;;  %v2654_v23 = vpop.f32.mrb[171].mxu1  ;;  %v2653_v48 = vadd.f32 %v5414_v55, %v5512_v32 }
 0x25a   : > { %v5514_v22 = vpop.f32.mrb[172].mxu0  ;;  %v5516_v34 = vpop.f32.mrb[172].mxu1 }
 0x25b   : > { %v2019_v37 = vpop.f32.mrb[173].mxu0  ;;  %v2659_v57 = vpop.f32.mrb[173].mxu1  ;;  %v2018_v32 = vadd.f32 %v5414_v55, %v5514_v22 }
 0x25e   : > { %v5518_v18 = vpop.f32.mrb[174].mxu0  ;;  %v5520_v31 = vpop.f32.mrb[174].mxu1 }
 0x25f   : > { %v2024_v8 = vpop.f32.mrb[175].mxu0  ;;  %v2664_v13 = vpop.f32.mrb[175].mxu1 }
 0x262   : > { %v2027_v40 = vpop.f32.mrb[176].mxu0  ;;  %v2667_v44 = vpop.f32.mrb[176].mxu1 }
 0x263   : > { %v2028_v41 = vadd.f32 %v5414_v55, %v2027_v40  ;;  %v2668_v5 = vadd.f32 %v5414_v55, %v2667_v44  ;;  %v2029_v52 = vpop.f32.mrb[177].mxu0  ;;  %v2669_v15 = vpop.f32.mrb[177].mxu1 }
 0x265   : > { %v2906_v45 = vmax.f32 %v1988_v49, %v2028_v41  ;;  %v2970_v2 = vmax.f32 %v2628_v16, %v2668_v5  ;;  %v2013_v49 = vadd.f32 %v5414_v55, %v5510_v33 }
 0x266   : > { %v2032_v51 = vpop.f32.mrb[178].mxu0  ;;  %v2672_v25 = vpop.f32.mrb[178].mxu1 }
 0x267   : > { %3035 = vst.msk [vmem:[#allocation2 + $0x140] sm:$0xff] %vm2994_vm1, %v2906_v45  ;;  %3099 = vst.msk [vmem:[#allocation2 + $0x340] sm:$0xff] %vm2994_vm1, %v2970_v2  ;;  %v2033_v50 = vadd.f32 %v5414_v55, %v2032_v51  ;;  %v2673_v46 = vadd.f32 %v5414_v55, %v2672_v25  ;;  %v2034_v60 = vpop.f32.mrb[179].mxu0  ;;  %v2674_v47 = vpop.f32.mrb[179].mxu1 }
 0x269   : > { %v2907_v28 = vmax.f32 %v1993_v7, %v2033_v50  ;;  %v2971_v14 = vmax.f32 %v2633_v56, %v2673_v46  ;;  %v2658_v46 = vadd.f32 %v5414_v55, %v5516_v34  ;;  %v2663_v34 = vadd.f32 %v5414_v55, %v5520_v31 }
 0x26a   : > { %v2037_v6 = vpop.f32.mrb[180].mxu0  ;;  %v2677_v36 = vpop.f32.mrb[180].mxu1 }
 0x26b   : > { %3036 = vst.msk [vmem:[#allocation2 + $0x148] sm:$0xff] %vm2994_vm1, %v2907_v28  ;;  %3100 = vst.msk [vmem:[#allocation2 + $0x348] sm:$0xff] %vm2994_vm1, %v2971_v14  ;;  %v2038_v24 = vadd.f32 %v5414_v55, %v2037_v6  ;;  %v2678_v0 = vadd.f32 %v5414_v55, %v2677_v36  ;;  %v2039_v11 = vpop.f32.mrb[181].mxu0  ;;  %v2679_v1 = vpop.f32.mrb[181].mxu1 }
 0x26d   : > { %v2908_v38 = vmax.f32 %v1998_v29, %v2038_v24  ;;  %v2972_v3 = vmax.f32 %v2638_v61, %v2678_v0  ;;  %v2023_v24 = vadd.f32 %v5414_v55, %v5518_v18 }
 0x26e   : > { %v2042_v53 = vpop.f32.mrb[182].mxu0  ;;  %v2682_v10 = vpop.f32.mrb[182].mxu1 }
 0x26f   : > { %3037 = vst.msk [vmem:[#allocation2 + $0x150] sm:$0xff] %vm2994_vm1, %v2908_v38  ;;  %3101 = vst.msk [vmem:[#allocation2 + $0x350] sm:$0xff] %vm2994_vm1, %v2972_v3  ;;  %v2043_v35 = vadd.f32 %v5414_v55, %v2042_v53  ;;  %v2683_v12 = vadd.f32 %v5414_v55, %v2682_v10  ;;  %v2044_v54 = vpop.f32.mrb[183].mxu0  ;;  %v2684_v17 = vpop.f32.mrb[183].mxu1 }
 0x271   : > { %v2909_v62 = vmax.f32 %v2003_v39, %v2043_v35  ;;  %v2973_v63 = vmax.f32 %v2643_v9, %v2683_v12 }
 0x272   : > { %v3163_v19 = vld [vmem:[#allocation2 + $0x140] ss:$2 sm:$0xff]  ;;  %v3291_v26 = vld [vmem:[#allocation2 + $0x141] ss:$2 sm:$0xff]  ;;  %v2047_v27 = vpop.f32.mrb[184].mxu0  ;;  %v2687_v43 = vpop.f32.mrb[184].mxu1 }
 0x273   : > { %v3227_v20 = vld [vmem:[#allocation2 + $0x340] ss:$2 sm:$0xff]  ;;  %v3398_v42 = vmax.f32 %v3163_v19, %v3291_v26  ;;  %v3355_v30 = vld [vmem:[#allocation2 + $0x341] ss:$2 sm:$0xff]  ;;  %3038 = vst.msk [vmem:[#allocation2 + $0x158] sm:$0xff] %vm2994_vm1, %v2909_v62  ;;  %3102 = vst.msk [vmem:[#allocation2 + $0x358] sm:$0xff] %vm2994_vm1, %v2973_v63  ;;  %v2048_v23 = vadd.f32 %v5414_v55, %v2047_v27  ;;  %v2688_v37 = vadd.f32 %v5414_v55, %v2687_v43 }
 0x274   : > { %v3430_v58 = vmax.f32 %v3227_v20, %v3355_v30  ;;  %v2049_v57 = vpop.f32.mrb[185].mxu0  ;;  %v2689_v8 = vpop.f32.mrb[185].mxu1 }
 0x275   : > { %3462 = vst.msk [vmem:[%s4626_s5 + $0xa0] sm:$0xff] %vm2994_vm1, %v3398_v42  ;;  %v2910_v21 = vmax.f32 %v2008_v59, %v2048_v23  ;;  %v2974_v13 = vmax.f32 %v2648_v4, %v2688_v37 }
 0x276   : > { %3494 = vst.msk [vmem:[%s4626_s5 + $0x1a0] sm:$0xff] %vm2994_vm1, %v3430_v58  ;;  %v2052_v40 = vpop.f32.mrb[186].mxu0  ;;  %v2692_v44 = vpop.f32.mrb[186].mxu1 }
 0x277   : > { %v2053_v16 = vadd.f32 %v5414_v55, %v2052_v40  ;;  %v2693_v41 = vadd.f32 %v5414_v55, %v2692_v44  ;;  %v2054_v5 = vpop.f32.mrb[187].mxu0  ;;  %v2694_v52 = vpop.f32.mrb[187].mxu1  ;;  %3039 = vst.msk [vmem:[#allocation2 + $0x160] sm:$0xff] %vm2994_vm1, %v2910_v21  ;;  %3103 = vst.msk [vmem:[#allocation2 + $0x360] sm:$0xff] %vm2994_vm1, %v2974_v13 }
 0x279   : > { %v2911_v15 = vmax.f32 %v2013_v49, %v2053_v16  ;;  %v2975_v45 = vmax.f32 %v2653_v48, %v2693_v41 }
 0x27a   : > { %v3165_v2 = vld [vmem:[#allocation2 + $0x150] ss:$2 sm:$0xff]  ;;  %v3293_v51 = vld [vmem:[#allocation2 + $0x151] ss:$2 sm:$0xff]  ;;  %v2057_v56 = vpop.f32.mrb[188].mxu0  ;;  %v2697_v50 = vpop.f32.mrb[188].mxu1 }
 0x27b   : > { %v3229_v33 = vld [vmem:[#allocation2 + $0x350] ss:$2 sm:$0xff]  ;;  %v3399_v25 = vmax.f32 %v3165_v2, %v3293_v51  ;;  %v3357_v7 = vld [vmem:[#allocation2 + $0x351] ss:$2 sm:$0xff]  ;;  %3040 = vst.msk [vmem:[#allocation2 + $0x168] sm:$0xff] %vm2994_vm1, %v2911_v15  ;;  %3104 = vst.msk [vmem:[#allocation2 + $0x368] sm:$0xff] %vm2994_vm1, %v2975_v45  ;;  %v2058_v47 = vadd.f32 %v5414_v55, %v2057_v56  ;;  %v2698_v28 = vadd.f32 %v5414_v55, %v2697_v50 }
 0x27c   : > { %v3431_v60 = vmax.f32 %v3229_v33, %v3357_v7  ;;  %v2059_v14 = vpop.f32.mrb[189].mxu0  ;;  %v2699_v6 = vpop.f32.mrb[189].mxu1 }
 0x27d   : > { %3463 = vst.msk [vmem:[%s4626_s5 + $0xa8] sm:$0xff] %vm2994_vm1, %v3399_v25  ;;  %v2912_v22 = vmax.f32 %v2018_v32, %v2058_v47  ;;  %v2976_v36 = vmax.f32 %v2658_v46, %v2698_v28 }
 0x27e   : > { %3495 = vst.msk [vmem:[%s4626_s5 + $0x1a8] sm:$0xff] %vm2994_vm1, %v3431_v60  ;;  %v2062_v29 = vpop.f32.mrb[190].mxu0  ;;  %v2702_v61 = vpop.f32.mrb[190].mxu1 }
 0x27f   : > { %v2063_v0 = vadd.f32 %v5414_v55, %v2062_v29  ;;  %v2703_v11 = vadd.f32 %v5414_v55, %v2702_v61  ;;  %v2064_v1 = vpop.f32.mrb[191].mxu0  ;;  %v2704_v38 = vpop.f32.mrb[191].mxu1  ;;  %3041 = vst.msk [vmem:[#allocation2 + $0x170] sm:$0xff] %vm2994_vm1, %v2912_v22  ;;  %3105 = vst.msk [vmem:[#allocation2 + $0x370] sm:$0xff] %vm2994_vm1, %v2976_v36 }
 0x281   : > { %v2913_v3 = vmax.f32 %v2023_v24, %v2063_v0  ;;  %v2977_v53 = vmax.f32 %v2663_v34, %v2703_v11 }
 0x282   : > { %v3167_v10 = vld [vmem:[#allocation2 + $0x160] ss:$2 sm:$0xff]  ;;  %v3295_v39 = vld [vmem:[#allocation2 + $0x161] ss:$2 sm:$0xff]  ;;  %v2067_v31 = vpop.f32.mrb[192].mxu0  ;;  %v2707_v12 = vpop.f32.mrb[192].mxu1 }
 0x283   : > { %v3231_v18 = vld [vmem:[#allocation2 + $0x360] ss:$2 sm:$0xff]  ;;  %v3400_v9 = vmax.f32 %v3167_v10, %v3295_v39  ;;  %v3359_v35 = vld [vmem:[#allocation2 + $0x361] ss:$2 sm:$0xff]  ;;  %3042 = vst.msk [vmem:[#allocation2 + $0x178] sm:$0xff] %vm2994_vm1, %v2913_v3  ;;  %3106 = vst.msk [vmem:[#allocation2 + $0x378] sm:$0xff] %vm2994_vm1, %v2977_v53  ;;  %v2068_v60 = vadd.f32 %v5414_v55, %v2067_v31  ;;  %v2708_v47 = vadd.f32 %v5414_v55, %v2707_v12 }
 0x284   : > { %v3432_v54 = vmax.f32 %v3231_v18, %v3359_v35  ;;  %v2069_v17 = vpop.f32.mrb[193].mxu0  ;;  %v2709_v62 = vpop.f32.mrb[193].mxu1 }
 0x285   : > { %3464 = vst.msk [vmem:[%s4626_s5 + $0xb0] sm:$0xff] %vm2994_vm1, %v3400_v9 }
 0x286   : > { %3496 = vst.msk [vmem:[%s4626_s5 + $0x1b0] sm:$0xff] %vm2994_vm1, %v3432_v54  ;;  %v2072_v63 = vpop.f32.mrb[194].mxu0  ;;  %v2712_v19 = vpop.f32.mrb[194].mxu1 }
 0x287   : > { %v2074_v26 = vpop.f32.mrb[195].mxu0  ;;  %v2714_v20 = vpop.f32.mrb[195].mxu1  ;;  %v2073_v34 = vadd.f32 %v5414_v55, %v2072_v63  ;;  %v2713_v0 = vadd.f32 %v5414_v55, %v2712_v19 }
 0x28a   : > { %v3169_v59 = vld [vmem:[#allocation2 + $0x170] ss:$2 sm:$0xff]  ;;  %v3297_v42 = vld [vmem:[#allocation2 + $0x171] ss:$2 sm:$0xff]  ;;  %v2077_v4 = vpop.f32.mrb[196].mxu0  ;;  %v2717_v58 = vpop.f32.mrb[196].mxu1 }
 0x28b   : > { %v3233_v30 = vld [vmem:[#allocation2 + $0x370] ss:$2 sm:$0xff]  ;;  %v3401_v27 = vmax.f32 %v3169_v59, %v3297_v42  ;;  %v3361_v43 = vld [vmem:[#allocation2 + $0x371] ss:$2 sm:$0xff]  ;;  %v2079_v37 = vpop.f32.mrb[197].mxu0  ;;  %v2719_v57 = vpop.f32.mrb[197].mxu1  ;;  %v2078_v9 = vadd.f32 %v5414_v55, %v2077_v4  ;;  %v2718_v35 = vadd.f32 %v5414_v55, %v2717_v58 }
 0x28c   : > { %v3433_v23 = vmax.f32 %v3233_v30, %v3361_v43 }
 0x28d   : > { %3465 = vst.msk [vmem:[%s4626_s5 + $0xb8] sm:$0xff] %vm2994_vm1, %v3401_v27 }
 0x28e   : > { %3497 = vst.msk [vmem:[%s4626_s5 + $0x1b8] sm:$0xff] %vm2994_vm1, %v3433_v23  ;;  %v2082_v8 = vpop.f32.mrb[198].mxu0  ;;  %v2722_v21 = vpop.f32.mrb[198].mxu1 }
 0x28f   : > { %v2084_v13 = vpop.f32.mrb[199].mxu0  ;;  %v2724_v40 = vpop.f32.mrb[199].mxu1  ;;  %v2083_v20 = vadd.f32 %v5414_v55, %v2082_v8  ;;  %v2723_v59 = vadd.f32 %v5414_v55, %v2722_v21 }
 0x292   : > { %v5594_v44 = vpop.f32.mrb[200].mxu0  ;;  %v5596_v49 = vpop.f32.mrb[200].mxu1 }
 0x293   : > { %v2089_v48 = vpop.f32.mrb[201].mxu0  ;;  %v2729_v16 = vpop.f32.mrb[201].mxu1  ;;  %v2088_v8 = vadd.f32 %v5414_v55, %v5594_v44 }
 0x294   : > { %v2728_v16 = vadd.f32 %v5414_v55, %v5596_v49 }
 0x296   : > { %v5598_v41 = vpop.f32.mrb[202].mxu0  ;;  %v5600_v5 = vpop.f32.mrb[202].mxu1 }
 0x297   : > { %v2094_v52 = vpop.f32.mrb[203].mxu0  ;;  %v2734_v15 = vpop.f32.mrb[203].mxu1  ;;  %v2733_v49 = vadd.f32 %v5414_v55, %v5600_v5 }
 0x29a   : > { %v5602_v45 = vpop.f32.mrb[204].mxu0  ;;  %v5604_v2 = vpop.f32.mrb[204].mxu1 }
 0x29b   : > { %v2099_v51 = vpop.f32.mrb[205].mxu0  ;;  %v2739_v33 = vpop.f32.mrb[205].mxu1  ;;  %v2098_v5 = vadd.f32 %v5414_v55, %v5602_v45 }
 0x29e   : > { %v5606_v32 = vpop.f32.mrb[206].mxu0  ;;  %v5608_v25 = vpop.f32.mrb[206].mxu1 }
 0x29f   : > { %v2104_v7 = vpop.f32.mrb[207].mxu0  ;;  %v2744_v56 = vpop.f32.mrb[207].mxu1 }
 0x2a2   : > { %v2107_v50 = vpop.f32.mrb[208].mxu0  ;;  %v2747_v46 = vpop.f32.mrb[208].mxu1 }
 0x2a3   : > { %v2108_v28 = vadd.f32 %v5414_v55, %v2107_v50  ;;  %v2748_v14 = vadd.f32 %v5414_v55, %v2747_v46  ;;  %v2109_v6 = vpop.f32.mrb[209].mxu0  ;;  %v2749_v22 = vpop.f32.mrb[209].mxu1 }
 0x2a5   : > { %v2914_v36 = vmax.f32 %v2068_v60, %v2108_v28  ;;  %v2978_v29 = vmax.f32 %v2708_v47, %v2748_v14  ;;  %v2093_v60 = vadd.f32 %v5414_v55, %v5598_v41 }
 0x2a6   : > { %v2112_v61 = vpop.f32.mrb[210].mxu0  ;;  %v2752_v24 = vpop.f32.mrb[210].mxu1 }
 0x2a7   : > { %3043 = vst.msk [vmem:[#allocation2 + $0x180] sm:$0xff] %vm2994_vm1, %v2914_v36  ;;  %3107 = vst.msk [vmem:[#allocation2 + $0x380] sm:$0xff] %vm2994_vm1, %v2978_v29  ;;  %v2113_v11 = vadd.f32 %v5414_v55, %v2112_v61  ;;  %v2753_v1 = vadd.f32 %v5414_v55, %v2752_v24  ;;  %v2114_v38 = vpop.f32.mrb[211].mxu0  ;;  %v2754_v3 = vpop.f32.mrb[211].mxu1 }
 0x2a9   : > { %v2915_v53 = vmax.f32 %v2073_v34, %v2113_v11  ;;  %v2979_v10 = vmax.f32 %v2713_v0, %v2753_v1  ;;  %v2738_v1 = vadd.f32 %v5414_v55, %v5604_v2  ;;  %v2743_v2 = vadd.f32 %v5414_v55, %v5608_v25 }
 0x2aa   : > { %v2117_v39 = vpop.f32.mrb[212].mxu0  ;;  %v2757_v18 = vpop.f32.mrb[212].mxu1 }
 0x2ab   : > { %3044 = vst.msk [vmem:[#allocation2 + $0x188] sm:$0xff] %vm2994_vm1, %v2915_v53  ;;  %3108 = vst.msk [vmem:[#allocation2 + $0x388] sm:$0xff] %vm2994_vm1, %v2979_v10  ;;  %v2118_v31 = vadd.f32 %v5414_v55, %v2117_v39  ;;  %v2758_v12 = vadd.f32 %v5414_v55, %v2757_v18  ;;  %v2119_v54 = vpop.f32.mrb[213].mxu0  ;;  %v2759_v17 = vpop.f32.mrb[213].mxu1 }
 0x2ad   : > { %v2916_v62 = vmax.f32 %v2078_v9, %v2118_v31  ;;  %v2980_v63 = vmax.f32 %v2718_v35, %v2758_v12  ;;  %v2103_v31 = vadd.f32 %v5414_v55, %v5606_v32 }
 0x2ae   : > { %v2122_v19 = vpop.f32.mrb[214].mxu0  ;;  %v2762_v26 = vpop.f32.mrb[214].mxu1 }
 0x2af   : > { %3045 = vst.msk [vmem:[#allocation2 + $0x190] sm:$0xff] %vm2994_vm1, %v2916_v62  ;;  %3109 = vst.msk [vmem:[#allocation2 + $0x390] sm:$0xff] %vm2994_vm1, %v2980_v63  ;;  %v2123_v42 = vadd.f32 %v5414_v55, %v2122_v19  ;;  %v2763_v30 = vadd.f32 %v5414_v55, %v2762_v26  ;;  %v2124_v27 = vpop.f32.mrb[215].mxu0  ;;  %v2764_v43 = vpop.f32.mrb[215].mxu1 }
 0x2b1   : > { %v2917_v4 = vmax.f32 %v2083_v20, %v2123_v42  ;;  %v2981_v58 = vmax.f32 %v2723_v59, %v2763_v30 }
 0x2b2   : > { %v3171_v23 = vld [vmem:[#allocation2 + $0x180] ss:$2 sm:$0xff]  ;;  %v3299_v37 = vld [vmem:[#allocation2 + $0x181] ss:$2 sm:$0xff]  ;;  %v2127_v40 = vpop.f32.mrb[216].mxu0  ;;  %v2767_v48 = vpop.f32.mrb[216].mxu1 }
 0x2b3   : > { %v3235_v57 = vld [vmem:[#allocation2 + $0x380] ss:$2 sm:$0xff]  ;;  %v3402_v21 = vmax.f32 %v3171_v23, %v3299_v37  ;;  %v3363_v13 = vld [vmem:[#allocation2 + $0x381] ss:$2 sm:$0xff]  ;;  %3046 = vst.msk [vmem:[#allocation2 + $0x198] sm:$0xff] %vm2994_vm1, %v2917_v4  ;;  %3110 = vst.msk [vmem:[#allocation2 + $0x398] sm:$0xff] %vm2994_vm1, %v2981_v58  ;;  %v2128_v15 = vadd.f32 %v5414_v55, %v2127_v40  ;;  %v2768_v51 = vadd.f32 %v5414_v55, %v2767_v48 }
 0x2b4   : > { %v3434_v52 = vmax.f32 %v3235_v57, %v3363_v13  ;;  %v2129_v33 = vpop.f32.mrb[217].mxu0  ;;  %v2769_v7 = vpop.f32.mrb[217].mxu1 }
 0x2b5   : > { %3466 = vst.msk [vmem:[%s4626_s5 + $0xc0] sm:$0xff] %vm2994_vm1, %v3402_v21  ;;  %v2918_v44 = vmax.f32 %v2088_v8, %v2128_v15  ;;  %v2982_v56 = vmax.f32 %v2728_v16, %v2768_v51 }
 0x2b6   : > { %3498 = vst.msk [vmem:[%s4626_s5 + $0x1c0] sm:$0xff] %vm2994_vm1, %v3434_v52  ;;  %v2132_v50 = vpop.f32.mrb[218].mxu0  ;;  %v2772_v46 = vpop.f32.mrb[218].mxu1 }
 0x2b7   : > { %v2133_v47 = vadd.f32 %v5414_v55, %v2132_v50  ;;  %v2773_v28 = vadd.f32 %v5414_v55, %v2772_v46  ;;  %v2134_v14 = vpop.f32.mrb[219].mxu0  ;;  %v2774_v6 = vpop.f32.mrb[219].mxu1  ;;  %3047 = vst.msk [vmem:[#allocation2 + $0x1a0] sm:$0xff] %vm2994_vm1, %v2918_v44  ;;  %3111 = vst.msk [vmem:[#allocation2 + $0x3a0] sm:$0xff] %vm2994_vm1, %v2982_v56 }
 0x2b9   : > { %v2919_v22 = vmax.f32 %v2093_v60, %v2133_v47  ;;  %v2983_v36 = vmax.f32 %v2733_v49, %v2773_v28 }
 0x2ba   : > { %v3173_v29 = vld [vmem:[#allocation2 + $0x190] ss:$2 sm:$0xff]  ;;  %v3301_v61 = vld [vmem:[#allocation2 + $0x191] ss:$2 sm:$0xff]  ;;  %v2137_v0 = vpop.f32.mrb[220].mxu0  ;;  %v2777_v11 = vpop.f32.mrb[220].mxu1 }
 0x2bb   : > { %v3237_v41 = vld [vmem:[#allocation2 + $0x390] ss:$2 sm:$0xff]  ;;  %v3403_v24 = vmax.f32 %v3173_v29, %v3301_v61  ;;  %v3365_v34 = vld [vmem:[#allocation2 + $0x391] ss:$2 sm:$0xff]  ;;  %3048 = vst.msk [vmem:[#allocation2 + $0x1a8] sm:$0xff] %vm2994_vm1, %v2919_v22  ;;  %3112 = vst.msk [vmem:[#allocation2 + $0x3a8] sm:$0xff] %vm2994_vm1, %v2983_v36  ;;  %v2138_v3 = vadd.f32 %v5414_v55, %v2137_v0  ;;  %v2778_v53 = vadd.f32 %v5414_v55, %v2777_v11 }
 0x2bc   : > { %v3435_v38 = vmax.f32 %v3237_v41, %v3365_v34  ;;  %v2139_v10 = vpop.f32.mrb[221].mxu0  ;;  %v2779_v39 = vpop.f32.mrb[221].mxu1 }
 0x2bd   : > { %3467 = vst.msk [vmem:[%s4626_s5 + $0xc8] sm:$0xff] %vm2994_vm1, %v3403_v24  ;;  %v2920_v45 = vmax.f32 %v2098_v5, %v2138_v3  ;;  %v2984_v18 = vmax.f32 %v2738_v1, %v2778_v53 }
 0x2be   : > { %3499 = vst.msk [vmem:[%s4626_s5 + $0x1c8] sm:$0xff] %vm2994_vm1, %v3435_v38  ;;  %v2142_v9 = vpop.f32.mrb[222].mxu0  ;;  %v2782_v35 = vpop.f32.mrb[222].mxu1 }
 0x2bf   : > { %v2143_v12 = vadd.f32 %v5414_v55, %v2142_v9  ;;  %v2783_v54 = vadd.f32 %v5414_v55, %v2782_v35  ;;  %v2144_v17 = vpop.f32.mrb[223].mxu0  ;;  %v2784_v62 = vpop.f32.mrb[223].mxu1  ;;  %3049 = vst.msk [vmem:[#allocation2 + $0x1b0] sm:$0xff] %vm2994_vm1, %v2920_v45  ;;  %3113 = vst.msk [vmem:[#allocation2 + $0x3b0] sm:$0xff] %vm2994_vm1, %v2984_v18 }
 0x2c1   : > { %v2921_v63 = vmax.f32 %v2103_v31, %v2143_v12  ;;  %v2985_v19 = vmax.f32 %v2743_v2, %v2783_v54  ;;  %v5709_v54 = vld [vmem:[%s5792_s2] ss:$0 sm:$0xff] }
 0x2c2   : > { %v3175_v26 = vld [vmem:[#allocation2 + $0x1a0] ss:$2 sm:$0xff]  ;;  %v3303_v20 = vld [vmem:[#allocation2 + $0x1a1] ss:$2 sm:$0xff]  ;;  %v2147_v25 = vpop.f32.mrb[224].mxu0  ;;  %v2787_v30 = vpop.f32.mrb[224].mxu1 }
 0x2c3   : > { %v3239_v32 = vld [vmem:[#allocation2 + $0x3a0] ss:$2 sm:$0xff]  ;;  %v3404_v59 = vmax.f32 %v3175_v26, %v3303_v20  ;;  %v3367_v42 = vld [vmem:[#allocation2 + $0x3a1] ss:$2 sm:$0xff]  ;;  %3050 = vst.msk [vmem:[#allocation2 + $0x1b8] sm:$0xff] %vm2994_vm1, %v2921_v63  ;;  %3114 = vst.msk [vmem:[#allocation2 + $0x3b8] sm:$0xff] %vm2994_vm1, %v2985_v19  ;;  %v2148_v38 = vadd.f32 %v5414_v55, %v2147_v25  ;;  %v2788_v3 = vadd.f32 %v5414_v55, %v2787_v30 }
 0x2c4   : > { %v3436_v27 = vmax.f32 %v3239_v32, %v3367_v42  ;;  %v2149_v43 = vpop.f32.mrb[225].mxu0  ;;  %v2789_v4 = vpop.f32.mrb[225].mxu1 }
 0x2c5   : > { %3468 = vst.msk [vmem:[%s4626_s5 + $0xd0] sm:$0xff] %vm2994_vm1, %v3404_v59 }
 0x2c6   : > { %3500 = vst.msk [vmem:[%s4626_s5 + $0x1d0] sm:$0xff] %vm2994_vm1, %v3436_v27  ;;  %v2152_v58 = vpop.f32.mrb[226].mxu0  ;;  %v2792_v23 = vpop.f32.mrb[226].mxu1 }
 0x2c7   : > { %v2154_v37 = vpop.f32.mrb[227].mxu0  ;;  %v2794_v57 = vpop.f32.mrb[227].mxu1  ;;  %v2153_v2 = vadd.f32 %v5414_v55, %v2152_v58  ;;  %v2793_v12 = vadd.f32 %v5414_v55, %v2792_v23 }
 0x2ca   : > { %v3177_v8 = vld [vmem:[#allocation2 + $0x1b0] ss:$2 sm:$0xff]  ;;  %v3305_v21 = vld [vmem:[#allocation2 + $0x1b1] ss:$2 sm:$0xff]  ;;  %v2157_v16 = vpop.f32.mrb[228].mxu0  ;;  %v2797_v52 = vpop.f32.mrb[228].mxu1 }
 0x2cb   : > { %v3241_v13 = vld [vmem:[#allocation2 + $0x3b0] ss:$2 sm:$0xff]  ;;  %v3405_v40 = vmax.f32 %v3177_v8, %v3305_v21  ;;  %v3369_v48 = vld [vmem:[#allocation2 + $0x3b1] ss:$2 sm:$0xff]  ;;  %v2159_v51 = vpop.f32.mrb[229].mxu0  ;;  %v2799_v33 = vpop.f32.mrb[229].mxu1  ;;  %v2798_v42 = vadd.f32 %v5709_v54, %v2797_v52 }
 0x2cc   : > { %v3437_v15 = vmax.f32 %v3241_v13, %v3369_v48 }
 0x2cd   : > { %3469 = vst.msk [vmem:[%s4626_s5 + $0xd8] sm:$0xff] %vm2994_vm1, %v3405_v40 }
 0x2ce   : > { %3501 = vst.msk [vmem:[%s4626_s5 + $0x1d8] sm:$0xff] %vm2994_vm1, %v3437_v15  ;;  %v2162_v7 = vpop.f32.mrb[230].mxu0  ;;  %v2802_v44 = vpop.f32.mrb[230].mxu1 }
 0x2cf   : > { %v2164_v56 = vpop.f32.mrb[231].mxu0  ;;  %v2804_v50 = vpop.f32.mrb[231].mxu1  ;;  %v2163_v57 = vadd.f32 %v5709_v54, %v2162_v7  ;;  %v2803_v8 = vadd.f32 %v5709_v54, %v2802_v44 }
 0x2d2   : > { %v5682_v46 = vpop.f32.mrb[232].mxu0  ;;  %v5684_v60 = vpop.f32.mrb[232].mxu1 }
 0x2d3   : > { %v2169_v49 = vpop.f32.mrb[233].mxu0  ;;  %v2809_v47 = vpop.f32.mrb[233].mxu1  ;;  %v2168_v7 = vadd.f32 %v5709_v54, %v5682_v46 }
 0x2d4   : > { %v2808_v47 = vadd.f32 %v5709_v54, %v5684_v60 }
 0x2d6   : > { %v5686_v28 = vpop.f32.mrb[234].mxu0  ;;  %v5688_v14 = vpop.f32.mrb[234].mxu1 }
 0x2d7   : > { %v2174_v6 = vpop.f32.mrb[235].mxu0  ;;  %v2814_v22 = vpop.f32.mrb[235].mxu1  ;;  %v2813_v60 = vadd.f32 %v5709_v54, %v5688_v14 }
 0x2da   : > { %v5690_v36 = vpop.f32.mrb[236].mxu0  ;;  %v5692_v29 = vpop.f32.mrb[236].mxu1 }
 0x2db   : > { %v2179_v61 = vpop.f32.mrb[237].mxu0  ;;  %v2819_v41 = vpop.f32.mrb[237].mxu1  ;;  %v2178_v14 = vadd.f32 %v5709_v54, %v5690_v36 }
 0x2de   : > { %v5694_v5 = vpop.f32.mrb[238].mxu0  ;;  %v5696_v24 = vpop.f32.mrb[238].mxu1 }
 0x2df   : > { %v2184_v34 = vpop.f32.mrb[239].mxu0  ;;  %v2824_v0 = vpop.f32.mrb[239].mxu1 }
 0x2e2   : > { %v2187_v11 = vpop.f32.mrb[240].mxu0  ;;  %v2827_v1 = vpop.f32.mrb[240].mxu1 }
 0x2e3   : > { %v2188_v53 = vadd.f32 %v5414_v55, %v2187_v11  ;;  %v2828_v10 = vadd.f32 %v5414_v55, %v2827_v1  ;;  %v2189_v39 = vpop.f32.mrb[241].mxu0  ;;  %v2829_v45 = vpop.f32.mrb[241].mxu1  ;;  %v2158_v55 = vadd.f32 %v5709_v54, %v2157_v16 }
 0x2e5   : > { %v2922_v18 = vmax.f32 %v2148_v38, %v2188_v53  ;;  %v2986_v9 = vmax.f32 %v2788_v3, %v2828_v10  ;;  %v2173_v38 = vadd.f32 %v5709_v54, %v5686_v28 }
 0x2e6   : > { %v2192_v35 = vpop.f32.mrb[242].mxu0  ;;  %v2832_v31 = vpop.f32.mrb[242].mxu1 }
 0x2e7   : > { %3051 = vst.msk [vmem:[#allocation2 + $0x1c0] sm:$0xff] %vm2994_vm1, %v2922_v18  ;;  %3115 = vst.msk [vmem:[#allocation2 + $0x3c0] sm:$0xff] %vm2994_vm1, %v2986_v9  ;;  %v2193_v17 = vadd.f32 %v5709_v54, %v2192_v35  ;;  %v2833_v62 = vadd.f32 %v5709_v54, %v2832_v31  ;;  %v2194_v63 = vpop.f32.mrb[243].mxu0  ;;  %v2834_v19 = vpop.f32.mrb[243].mxu1 }
 0x2e9   : > { %v2923_v26 = vmax.f32 %v2153_v2, %v2193_v17  ;;  %v2987_v20 = vmax.f32 %v2793_v12, %v2833_v62  ;;  %v2818_v62 = vadd.f32 %v5709_v54, %v5692_v29  ;;  %v2823_v29 = vadd.f32 %v5709_v54, %v5696_v24 }
 0x2ea   : > { %v2197_v32 = vpop.f32.mrb[244].mxu0  ;;  %v2837_v59 = vpop.f32.mrb[244].mxu1 }
 0x2eb   : > { %3052 = vst.msk [vmem:[#allocation2 + $0x1c8] sm:$0xff] %vm2994_vm1, %v2923_v26  ;;  %3116 = vst.msk [vmem:[#allocation2 + $0x3c8] sm:$0xff] %vm2994_vm1, %v2987_v20  ;;  %v2198_v25 = vadd.f32 %v5709_v54, %v2197_v32  ;;  %v2838_v30 = vadd.f32 %v5709_v54, %v2837_v59  ;;  %v2199_v27 = vpop.f32.mrb[245].mxu0  ;;  %v2839_v43 = vpop.f32.mrb[245].mxu1 }
 0x2ed   : > { %v2924_v4 = vmax.f32 %v2158_v55, %v2198_v25  ;;  %v2988_v58 = vmax.f32 %v2798_v42, %v2838_v30  ;;  %v2183_v25 = vadd.f32 %v5709_v54, %v5694_v5 }
 0x2ee   : > { %v2202_v23 = vpop.f32.mrb[246].mxu0  ;;  %v2842_v37 = vpop.f32.mrb[246].mxu1 }
 0x2ef   : > { %3053 = vst.msk [vmem:[#allocation2 + $0x1d0] sm:$0xff] %vm2994_vm1, %v2924_v4  ;;  %3117 = vst.msk [vmem:[#allocation2 + $0x3d0] sm:$0xff] %vm2994_vm1, %v2988_v58  ;;  %v2203_v21 = vadd.f32 %v5709_v54, %v2202_v23  ;;  %v2843_v13 = vadd.f32 %v5709_v54, %v2842_v37  ;;  %v2204_v40 = vpop.f32.mrb[247].mxu0  ;;  %v2844_v48 = vpop.f32.mrb[247].mxu1 }
 0x2f1   : > { %v2925_v16 = vmax.f32 %v2163_v57, %v2203_v21  ;;  %v2989_v52 = vmax.f32 %v2803_v8, %v2843_v13 }
 0x2f2   : > { %v3179_v15 = vld [vmem:[#allocation2 + $0x1c0] ss:$2 sm:$0xff]  ;;  %v3307_v51 = vld [vmem:[#allocation2 + $0x1c1] ss:$2 sm:$0xff]  ;;  %v2207_v50 = vpop.f32.mrb[248].mxu0  ;;  %v2847_v49 = vpop.f32.mrb[248].mxu1 }
 0x2f3   : > { %v3243_v33 = vld [vmem:[#allocation2 + $0x3c0] ss:$2 sm:$0xff]  ;;  %v3406_v44 = vmax.f32 %v3179_v15, %v3307_v51  ;;  %v3371_v56 = vld [vmem:[#allocation2 + $0x3c1] ss:$2 sm:$0xff]  ;;  %3054 = vst.msk [vmem:[#allocation2 + $0x1d8] sm:$0xff] %vm2994_vm1, %v2925_v16  ;;  %3118 = vst.msk [vmem:[#allocation2 + $0x3d8] sm:$0xff] %vm2994_vm1, %v2989_v52  ;;  %v2208_v22 = vadd.f32 %v5709_v54, %v2207_v50  ;;  %v2848_v61 = vadd.f32 %v5709_v54, %v2847_v49 }
 0x2f4   : > { %v3438_v6 = vmax.f32 %v3243_v33, %v3371_v56  ;;  %v2209_v41 = vpop.f32.mrb[249].mxu0  ;;  %v2849_v34 = vpop.f32.mrb[249].mxu1 }
 0x2f5   : > { %3470 = vst.msk [vmem:[%s4626_s5 + $0xe0] sm:$0xff] %vm2994_vm1, %v3406_v44  ;;  %v2926_v46 = vmax.f32 %v2168_v7, %v2208_v22  ;;  %v2990_v0 = vmax.f32 %v2808_v47, %v2848_v61 }
 0x2f6   : > { %3502 = vst.msk [vmem:[%s4626_s5 + $0x1e0] sm:$0xff] %vm2994_vm1, %v3438_v6  ;;  %v2212_v11 = vpop.f32.mrb[250].mxu0  ;;  %v2852_v1 = vpop.f32.mrb[250].mxu1 }
 0x2f7   : > { %v2213_v3 = vadd.f32 %v5709_v54, %v2212_v11  ;;  %v2853_v53 = vadd.f32 %v5709_v54, %v2852_v1  ;;  %v2214_v10 = vpop.f32.mrb[251].mxu0  ;;  %v2854_v39 = vpop.f32.mrb[251].mxu1  ;;  %3055 = vst.msk [vmem:[#allocation2 + $0x1e0] sm:$0xff] %vm2994_vm1, %v2926_v46  ;;  %3119 = vst.msk [vmem:[#allocation2 + $0x3e0] sm:$0xff] %vm2994_vm1, %v2990_v0 }
 0x2f9   : > { %v2927_v45 = vmax.f32 %v2173_v38, %v2213_v3  ;;  %v2991_v18 = vmax.f32 %v2813_v60, %v2853_v53 }
 0x2fa   : > { %v3181_v9 = vld [vmem:[#allocation2 + $0x1d0] ss:$2 sm:$0xff]  ;;  %v3309_v35 = vld [vmem:[#allocation2 + $0x1d1] ss:$2 sm:$0xff]  ;;  %v2217_v12 = vpop.f32.mrb[252].mxu0  ;;  %v2857_v17 = vpop.f32.mrb[252].mxu1 }
 0x2fb   : > { %v3245_v28 = vld [vmem:[#allocation2 + $0x3d0] ss:$2 sm:$0xff]  ;;  %v3407_v31 = vmax.f32 %v3181_v9, %v3309_v35  ;;  %v3373_v2 = vld [vmem:[#allocation2 + $0x3d1] ss:$2 sm:$0xff]  ;;  %3056 = vst.msk [vmem:[#allocation2 + $0x1e8] sm:$0xff] %vm2994_vm1, %v2927_v45  ;;  %3120 = vst.msk [vmem:[#allocation2 + $0x3e8] sm:$0xff] %vm2994_vm1, %v2991_v18  ;;  %v2218_v19 = vadd.f32 %v5709_v54, %v2217_v12  ;;  %v2858_v26 = vadd.f32 %v5709_v54, %v2857_v17 }
 0x2fc   : > { %v3439_v63 = vmax.f32 %v3245_v28, %v3373_v2  ;;  %v2219_v20 = vpop.f32.mrb[253].mxu0  ;;  %v2859_v32 = vpop.f32.mrb[253].mxu1 }
 0x2fd   : > { %3471 = vst.msk [vmem:[%s4626_s5 + $0xe8] sm:$0xff] %vm2994_vm1, %v3407_v31  ;;  %v2928_v36 = vmax.f32 %v2178_v14, %v2218_v19  ;;  %v2992_v59 = vmax.f32 %v2818_v62, %v2858_v26 }
 0x2fe   : > { %3503 = vst.msk [vmem:[%s4626_s5 + $0x1e8] sm:$0xff] %vm2994_vm1, %v3439_v63  ;;  %v2222_v55 = vpop.f32.mrb[254].mxu0  ;;  %v2862_v42 = vpop.f32.mrb[254].mxu1 }
 0x2ff   : > { %v2223_v30 = vadd.f32 %v5709_v54, %v2222_v55  ;;  %v2863_v27 = vadd.f32 %v5709_v54, %v2862_v42  ;;  %v2224_v43 = vpop.f32.mrb[255].mxu0  ;;  %v2864_v4 = vpop.f32.mrb[255].mxu1  ;;  %3057 = vst.msk [vmem:[#allocation2 + $0x1f0] sm:$0xff] %vm2994_vm1, %v2928_v36  ;;  %3121 = vst.msk [vmem:[#allocation2 + $0x3f0] sm:$0xff] %vm2994_vm1, %v2992_v59 }
 0x301   : > { %v2929_v58 = vmax.f32 %v2183_v25, %v2223_v30  ;;  %v2993_v23 = vmax.f32 %v2823_v29, %v2863_v27 }
 0x302   : > { %v3183_v37 = vld [vmem:[#allocation2 + $0x1e0] ss:$2 sm:$0xff]  ;;  %v3311_v5 = vld [vmem:[#allocation2 + $0x1e1] ss:$2 sm:$0xff] }
 0x303   : > { %v3247_v57 = vld [vmem:[#allocation2 + $0x3e0] ss:$2 sm:$0xff]  ;;  %v3408_v24 = vmax.f32 %v3183_v37, %v3311_v5  ;;  %v3375_v8 = vld [vmem:[#allocation2 + $0x3e1] ss:$2 sm:$0xff]  ;;  %3058 = vst.msk [vmem:[#allocation2 + $0x1f8] sm:$0xff] %vm2994_vm1, %v2929_v58  ;;  %3122 = vst.msk [vmem:[#allocation2 + $0x3f8] sm:$0xff] %vm2994_vm1, %v2993_v23 }
 0x304   : > { %v3440_v54 = vmax.f32 %v3247_v57, %v3375_v8 }
 0x305   : > { %3472 = vst.msk [vmem:[%s4626_s5 + $0xf0] sm:$0xff] %vm2994_vm1, %v3408_v24 }
 0x306   : > { %3504 = vst.msk [vmem:[%s4626_s5 + $0x1f0] sm:$0xff] %vm2994_vm1, %v3440_v54 }
 0x30a   : > { %v3185_v21 = vld [vmem:[#allocation2 + $0x1f0] ss:$2 sm:$0xff]  ;;  %v3313_v13 = vld [vmem:[#allocation2 + $0x1f1] ss:$2 sm:$0xff] }
 0x30b   : > { %v3249_v40 = vld [vmem:[#allocation2 + $0x3f0] ss:$2 sm:$0xff]  ;;  %v3409_v48 = vmax.f32 %v3185_v21, %v3313_v13  ;;  %v3377_v16 = vld [vmem:[#allocation2 + $0x3f1] ss:$2 sm:$0xff] }
 0x30c   : > { %v3441_v52 = vmax.f32 %v3249_v40, %v3377_v16 }
 0x30d   : > { %3473 = vst.msk [vmem:[%s4626_s5 + $0xf8] sm:$0xff] %vm2994_vm1, %v3409_v48 }
 0x30e   : > { %3505 = vst.msk [vmem:[%s4626_s5 + $0x1f8] sm:$0xff] %vm2994_vm1, %v3441_v52 }
 0x30f PF: > { %s13_s16 = sadd.s32 1, %s4004_s16   ;;  %s5795_s12 = smov %s3996_s14 }
 0x310   : > { %p10_p8 = scmp.ge.s32.totalorder %s13_s16, 6   ;;  %s5796_s13 = smov %s4000_s15 }
 0x311   : > { %s5797_s14 = smov %s5800_s17  ;;  %s5798_s15 = smov %s5804_s18 }
 0x312   :  { %12 = sbr.rel (!%p10_p8) target bundleno = 3 (0x3), region = 189 }

// kernel: full_wav_model_forward.5
= control target key start
LH: loop header
LB: loop body
LE: loop exit
PB: predicated region body
PF: predicated region fallthrough
CT: control target
= control target key end

     0   :  { %s3098_s9 = smov 0   ;;  %s3100_s10 = smov 0   ;;  %s3279_s0 = inlined_call_operand.vmem [shape: f32[2,32768], index: 0, kind: input, shape index: {}]   ;;  %s3280_s1 = inlined_call_operand.vmem [shape: f32[8,32768], index: 1, kind: input, shape index: {}]   ;;  %s3281_s2 = inlined_call_operand.vmem [shape: f32[2,2,8], index: 2, kind: output, shape index: {}]  }
   0x1   :  { %s3102_s11 = smov 0   ;;  %s3104_s12 = smov 0  }
   0x2   :  { %s3106_s13 = smov 0  }
   0x3 LB: > { %s21_s14 = sadd.s32 1, %s3071_s11  ;;  %s24_s15 = sadd.s32 1, %s3075_s12  ;;  %s3079_s13 = sphi %s3106_s13, %s12_s13   ;;  %s3075_s12 = sphi %s3104_s12, %s3285_s12   ;;  %s3071_s11 = sphi %s3102_s11, %s3284_s11   ;;  %s3067_s10 = sphi %s3100_s10, %s3283_s10   ;;  %s3063_s9 = sphi %s3098_s9, %s3282_s9  }
   0x4   : > { %p22_p0 = scmp.ge.s32.totalorder %s21_s14, 2  ;;  %p2972_p1 = scmp.ge.s32.totalorder %s3079_s13, 1 }
   0x5   : > { %p152_p2 = scmp.lt.s32.totalorder %s3079_s13, 5 }
   0x6   : > { %s3287_s14 = smov (%p22_p0, %s21_s14), 0  ;;  %s3289_s15 = smov (!%p22_p0, %s24_s15), %s3075_s12 }
   0x7   : > { %p153_p3 = pnand %p2972_p1, %p152_p2  ;;  %p26_p4 = scmp.ge.s32.totalorder %s3289_s15, 2 }
   0x8   : > { %s2973_s16 = sshll.u32 (!%p153_p3), %s3067_s10, 1  ;;  %p202_p5 = scmp.lt.s32.totalorder (!%p153_p3), %s3067_s10, 1 }
   0x9   : > { %s3291_s15 = smov (%p26_p4, %s3289_s15), 0  ;;  %156 = sbr.rel (%p153_p3) target bundleno = 318 (0x13e), region = 28 }
   0xa   : > { %s183_s17 = sadd.s32 (!%p153_p3), %s3063_s9, %s2973_s16  ;;  %p2980_p7 = scmp.ne.s32.totalorder (!%p153_p3), %s3063_s9, 0 }
   0xb   : > { %s2974_s18 = sshll.u32 (!%p153_p3), %s183_s17, 6 }
   0xc   : > { %p185_p6 = scmp.lt.s32.totalorder (!%p153_p3), %s2974_s18, 255 }
  0x10   : > { %s3293_s10 = smov (!%p202_p5, %s3067_s10), 1  ;;  %s3295_s18 = smov (!%p185_p6, %s2974_s18), 255 }
  0x11   : > { %s2979_s19 = sshll.u32 %s3293_s10, 1  ;;  %s2975_s20 = sshll.u32 %s3295_s18, 1  ;;  %vm210_vm0 = vcmask (!%p2980_p7), 58368   ;;  %v3081_v0 = vmov (!%p2980_p7), 0.0  }
  0x12   : > { %s2978_s21 = sshll.u32 %s3295_s18, 3  ;;  %s3134_s24 = scalar_lea.vmem %s3279_s0, %s2975_s20 }
  0x13   : > { %s3139_s27 = scalar_lea.vmem %s3280_s1, %s2978_s21  ;;  %s3144_s30 = scalar_lea.vmem %s3281_s2, %s2979_s19 }
  0x14   : > { %209 = sbr.rel (%p2980_p7) target bundleno = 27 (0x1b), region = 32  ;;  %211 = vst.msk [vmem:[%s3144_s30] sm:$0x3] (!%p2980_p7), %vm210_vm0, %v3081_v0 }
  0x1b PF: > { %v230_v1 = vld [vmem:[%s3139_s27 + $0x8] sm:$0xff]  ;;  %v229_v2 = vld [vmem:[%s3139_s27] sm:$0xff]  ;;  %v232_v3 = vld [vmem:[%s3139_s27 + $0x18] sm:$0xff]  ;;  %v313_v4 = vlaneseq  ;;  %v3082_v7 = vmov 1983009808   ;;  %vm2886_vm1 = vcmask 58368  }
  0x1c   : > { %645 = vmatprep.subr.mxu0 %v230_v1  ;;  %715 = vmatprep.subr.mxu1 %v232_v3  ;;  %v231_v5 = vld [vmem:[%s3139_s27 + $0x10] sm:$0xff]  ;;  %v213_v6 = vld [vmem:[%s3134_s24] sm:$0xff]  ;;  %v311_v8 = vunpack.c.l.s4 %v3082_v7  ;;  %v234_v9 = vld [vmem:[%s3139_s27 + $0x28] sm:$0xff] }
  0x1d   : > { %646 = vmatpush1.xpose.msra.mxu0 %v229_v2  ;;  %716 = vmatpush1.xpose.msra.mxu1 %v231_v5  ;;  %v314_v10 = vshrl.u32 %v313_v4, 7  ;;  %v236_v11 = vld [vmem:[%s3139_s27 + $0x38] sm:$0xff]  ;;  %v309_v13 = vcombine.high %v213_v6, %v213_v6  ;;  %v214_v14 = vld [vmem:[%s3134_s24 + $0x8] sm:$0xff]  ;;  %v215_v16 = vld [vmem:[%s3134_s24 + $0x10] sm:$0xff] }
  0x1e   : > { %v312_v12 = vunpack.c.0.s8 %v311_v8  ;;  %785 = vmatprep.subr.mxu0 %v234_v9  ;;  %855 = vmatprep.subr.mxu1 %v236_v11  ;;  %v326_v15 = vcombine.high %v214_v14, %v214_v14  ;;  %v343_v18 = vcombine.high %v215_v16, %v215_v16  ;;  %v216_v23 = vld [vmem:[%s3134_s24 + $0x18] sm:$0xff]  ;;  %v233_v26 = vld [vmem:[%s3139_s27 + $0x20] sm:$0xff]  ;;  %v235_v27 = vld [vmem:[%s3139_s27 + $0x30] sm:$0xff] }
  0x1f   : > { %v238_v30 = vld [vmem:[%s3139_s27 + $0x48] sm:$0xff]  ;;  %v360_v33 = vcombine.high %v216_v23, %v216_v23  ;;  %v240_v34 = vld [vmem:[%s3139_s27 + $0x58] sm:$0xff]  ;;  %v217_v35 = vld [vmem:[%s3134_s24 + $0x20] sm:$0xff] }
  0x20   : > { %v3157_v17 = vsub.s32 %v312_v12, %v314_v10  ;;  %v237_v36 = vld [vmem:[%s3139_s27 + $0x40] sm:$0xff]  ;;  %v239_v37 = vld [vmem:[%s3139_s27 + $0x50] sm:$0xff]  ;;  %v242_v40 = vld [vmem:[%s3139_s27 + $0x68] sm:$0xff]  ;;  %v377_v43 = vcombine.high %v217_v35, %v217_v35 }
  0x21   : > { %v244_v44 = vld [vmem:[%s3139_s27 + $0x78] sm:$0xff]  ;;  %v218_v45 = vld [vmem:[%s3134_s24 + $0x28] sm:$0xff]  ;;  %v241_v46 = vld [vmem:[%s3139_s27 + $0x60] sm:$0xff] }
  0x22   : > { %v316_v19 = vrot.slane %v213_v6, %v3157_v17  ;;  %v323_v20 = vrot.slane %v309_v13, %v3157_v17  ;;  %v333_v21 = vrot.slane %v214_v14, %v3157_v17  ;;  %v340_v22 = vrot.slane %v326_v15, %v3157_v17  ;;  %v243_v47 = vld [vmem:[%s3139_s27 + $0x70] sm:$0xff]  ;;  %v246_v50 = vld [vmem:[%s3139_s27 + $0x88] sm:$0xff]  ;;  %v248_v54 = vld [vmem:[%s3139_s27 + $0x98] sm:$0xff] }
  0x23   : > { %v350_v29 = vrot.slane %v215_v16, %v3157_v17  ;;  %v357_v32 = vrot.slane %v343_v18, %v3157_v17  ;;  %v367_v39 = vrot.slane %v216_v23, %v3157_v17  ;;  %v374_v42 = vrot.slane %v360_v33, %v3157_v17  ;;  %v219_v55 = vld [vmem:[%s3134_s24 + $0x30] sm:$0xff]  ;;  %v245_v56 = vld [vmem:[%s3139_s27 + $0x80] sm:$0xff]  ;;  %v250_v60 = vld [vmem:[%s3139_s27 + $0xa8] sm:$0xff] }
  0x24   : > { %v324_v24 = vcombine.high %v316_v19, %v316_v19  ;;  %v325_v25 = vcombine.high %v323_v20, %v323_v20  ;;  %v341_v28 = vcombine.high %v333_v21, %v333_v21  ;;  %v342_v31 = vcombine.high %v340_v22, %v340_v22  ;;  %v247_v57 = vld [vmem:[%s3139_s27 + $0x90] sm:$0xff]  ;;  %v252_v0 = vld [vmem:[%s3139_s27 + $0xb8] sm:$0xff]  ;;  %v249_v2 = vld [vmem:[%s3139_s27 + $0xa0] sm:$0xff] }
  0x25   : > { %v358_v38 = vcombine.high %v350_v29, %v350_v29  ;;  %v359_v41 = vcombine.high %v357_v32, %v357_v32  ;;  %v375_v48 = vcombine.high %v367_v39, %v367_v39  ;;  %v384_v49 = vrot.slane %v217_v35, %v3157_v17  ;;  %v220_v1 = vld [vmem:[%s3134_s24 + $0x38] sm:$0xff]  ;;  %v251_v3 = vld [vmem:[%s3139_s27 + $0xb0] sm:$0xff]  ;;  %v254_v6 = vld [vmem:[%s3139_s27 + $0xc8] sm:$0xff] }
  0x26   : > { %709 = vmatprep.mubr.f32.mxu0 %v324_v24  ;;  %779 = vmatprep.mubr.f32.mxu1 %v325_v25  ;;  %v376_v51 = vcombine.high %v374_v42, %v374_v42  ;;  %v391_v52 = vrot.slane %v377_v43, %v3157_v17  ;;  %v394_v53 = vcombine.high %v218_v45, %v218_v45  ;;  %v256_v10 = vld [vmem:[%s3139_s27 + $0xd8] sm:$0xff]  ;;  %v221_v11 = vld [vmem:[%s3134_s24 + $0x40] sm:$0xff]  ;;  %v255_v13 = vld [vmem:[%s3139_s27 + $0xd0] sm:$0xff] }
  0x27   : > { %710 = vmatmul.mubr.f32.vlgmr.msra.gmra.mrb[0].mxu0 %v316_v19  ;;  %780 = vmatmul.mubr.f32.vlgmr.msra.gmra.mrb[0].mxu1 %v323_v20  ;;  %v392_v58 = vcombine.high %v384_v49, %v384_v49  ;;  %v401_v59 = vrot.slane %v218_v45, %v3157_v17  ;;  %v411_v63 = vcombine.high %v219_v55, %v219_v55  ;;  %v253_v12 = vld [vmem:[%s3139_s27 + $0xc0] sm:$0xff]  ;;  %v258_v16 = vld [vmem:[%s3139_s27 + $0xe8] sm:$0xff]  ;;  %v259_v24 = vld [vmem:[%s3139_s27 + $0xf0] sm:$0xff] }
  0x28   : > { %786 = vmatpush1.xpose.msra.mxu0 %v233_v26  ;;  %856 = vmatpush1.xpose.msra.mxu1 %v235_v27  ;;  %v393_v61 = vcombine.high %v391_v52, %v391_v52  ;;  %v408_v62 = vrot.slane %v394_v53, %v3157_v17  ;;  %v418_v5 = vrot.slane %v219_v55, %v3157_v17  ;;  %v257_v23 = vld [vmem:[%s3139_s27 + $0xe0] sm:$0xff]  ;;  %v262_v27 = vld [vmem:[%s3139_s27 + $0x108] sm:$0xff] }
  0x29   : > { %849 = vmatprep.mubr.f32.mxu0 %v341_v28  ;;  %925 = vmatprep.subr.mxu0 %v238_v30  ;;  %v409_v4 = vcombine.high %v401_v59, %v401_v59  ;;  %v425_v8 = vrot.slane %v411_v63, %v3157_v17  ;;  %v428_v9 = vcombine.high %v220_v1, %v220_v1  ;;  %v261_v33 = vld [vmem:[%s3139_s27 + $0x100] sm:$0xff] }
  0x2a   : > { %919 = vmatprep.mubr.f32.mxu1 %v342_v31  ;;  %995 = vmatprep.subr.mxu1 %v240_v34  ;;  %v410_v7 = vcombine.high %v408_v62, %v408_v62  ;;  %v426_v14 = vcombine.high %v418_v5, %v418_v5  ;;  %v435_v15 = vrot.slane %v220_v1, %v3157_v17  ;;  %v264_v31 = vld [vmem:[%s3139_s27 + $0x118] sm:$0xff]  ;;  %v263_v34 = vld [vmem:[%s3139_s27 + $0x110] sm:$0xff]  ;;  %v265_v43 = vld [vmem:[%s3139_s27 + $0x120] sm:$0xff] }
  0x2b   : > { %850 = vmatmul.mubr.f32.vlgmr.msra.gmra.mrb[2].mxu0 %v333_v21  ;;  %920 = vmatmul.mubr.f32.vlgmr.msra.gmra.mrb[2].mxu1 %v340_v22  ;;  %v427_v18 = vcombine.high %v425_v8, %v425_v8  ;;  %v442_v19 = vrot.slane %v428_v9, %v3157_v17  ;;  %v445_v20 = vcombine.high %v221_v11, %v221_v11  ;;  %v260_v21 = vld [vmem:[%s3139_s27 + $0xf8] sm:$0xff]  ;;  %v222_v22 = vld [vmem:[%s3134_s24 + $0x48] sm:$0xff]  ;;  %v269_v53 = vld [vmem:[%s3139_s27 + $0x140] sm:$0xff] }
  0x2c   : > { %926 = vmatpush1.xpose.msra.mxu0 %v237_v36  ;;  %996 = vmatpush1.xpose.msra.mxu1 %v239_v37  ;;  %v443_v25 = vcombine.high %v435_v15, %v435_v15  ;;  %v452_v26 = vrot.slane %v221_v11, %v3157_v17  ;;  %v462_v30 = vcombine.high %v222_v22, %v222_v22  ;;  %v266_v37 = vld [vmem:[%s3139_s27 + $0x128] sm:$0xff]  ;;  %v273_v63 = vld [vmem:[%s3139_s27 + $0x160] sm:$0xff] }
  0x2d   : > { %989 = vmatprep.mubr.f32.mxu0 %v358_v38  ;;  %1065 = vmatprep.subr.mxu0 %v242_v40  ;;  %v444_v28 = vcombine.high %v442_v19, %v442_v19  ;;  %v469_v36 = vrot.slane %v222_v22, %v3157_v17  ;;  %v277_v9 = vld [vmem:[%s3139_s27 + $0x180] sm:$0xff] }
  0x2e   : > { %1059 = vmatprep.mubr.f32.mxu1 %v359_v41  ;;  %1135 = vmatprep.subr.mxu1 %v244_v44  ;;  %v460_v35 = vcombine.high %v452_v26, %v452_v26  ;;  %v268_v41 = vld [vmem:[%s3139_s27 + $0x138] sm:$0xff]  ;;  %v267_v44 = vld [vmem:[%s3139_s27 + $0x130] sm:$0xff] }
  0x2f   : > { %990 = vmatmul.mubr.f32.vlgmr.msra.gmra.mrb[4].mxu0 %v350_v29  ;;  %1060 = vmatmul.mubr.f32.vlgmr.msra.gmra.mrb[4].mxu1 %v357_v32  ;;  %v459_v29 = vrot.slane %v445_v20, %v3157_v17  ;;  %v223_v32 = vld [vmem:[%s3134_s24 + $0x50] sm:$0xff]  ;;  %v477_v45 = vcombine.high %v469_v36, %v469_v36  ;;  %v281_v20 = vld [vmem:[%s3139_s27 + $0x1a0] sm:$0xff] }
  0x30   : > { %1066 = vmatpush1.xpose.msra.mxu0 %v241_v46  ;;  %1136 = vmatpush1.xpose.msra.mxu1 %v243_v47  ;;  %v479_v40 = vcombine.high %v223_v32, %v223_v32  ;;  %v486_v46 = vrot.slane %v223_v32, %v3157_v17  ;;  %v270_v47 = vld [vmem:[%s3139_s27 + $0x148] sm:$0xff] }
  0x31   : > { %1129 = vmatprep.mubr.f32.mxu0 %v375_v48  ;;  %1205 = vmatprep.subr.mxu0 %v246_v50  ;;  %v461_v38 = vcombine.high %v459_v29, %v459_v29 }
  0x32   : > { %1199 = vmatprep.mubr.f32.mxu1 %v376_v51  ;;  %1275 = vmatprep.subr.mxu1 %v248_v54  ;;  %v272_v51 = vld [vmem:[%s3139_s27 + $0x158] sm:$0xff]  ;;  %v271_v54 = vld [vmem:[%s3139_s27 + $0x150] sm:$0xff]  ;;  %v494_v55 = vcombine.high %v486_v46, %v486_v46 }
  0x33   : > { %1130 = vmatmul.mubr.f32.vlgmr.msra.gmra.mrb[6].mxu0 %v367_v39  ;;  %1200 = vmatmul.mubr.f32.vlgmr.msra.gmra.mrb[6].mxu1 %v374_v42  ;;  %v476_v39 = vrot.slane %v462_v30, %v3157_v17  ;;  %v224_v42 = vld [vmem:[%s3134_s24 + $0x58] sm:$0xff]  ;;  %v287_v30 = vld [vmem:[%s3139_s27 + $0x1d0] sm:$0xff] }
  0x34   : > { %1206 = vmatpush1.xpose.msra.mxu0 %v245_v56  ;;  %1276 = vmatpush1.xpose.msra.mxu1 %v247_v57  ;;  %v496_v50 = vcombine.high %v224_v42, %v224_v42  ;;  %v503_v56 = vrot.slane %v224_v42, %v3157_v17  ;;  %v274_v57 = vld [vmem:[%s3139_s27 + $0x168] sm:$0xff] }
  0x35   : > { %1269 = vmatprep.mubr.f32.mxu0 %v392_v58  ;;  %1345 = vmatprep.subr.mxu0 %v250_v60  ;;  %v478_v48 = vcombine.high %v476_v39, %v476_v39 }
  0x36   : > { %1339 = vmatprep.mubr.f32.mxu1 %v393_v61  ;;  %1415 = vmatprep.subr.mxu1 %v252_v0  ;;  %v276_v61 = vld [vmem:[%s3139_s27 + $0x178] sm:$0xff]  ;;  %v275_v0 = vld [vmem:[%s3139_s27 + $0x170] sm:$0xff]  ;;  %v511_v1 = vcombine.high %v503_v56, %v503_v56 }
  0x37   : > { %1270 = vmatmul.mubr.f32.vlgmr.msra.gmra.mrb[8].mxu0 %v384_v49  ;;  %1340 = vmatmul.mubr.f32.vlgmr.msra.gmra.mrb[8].mxu1 %v391_v52  ;;  %v493_v49 = vrot.slane %v479_v40, %v3157_v17  ;;  %v225_v52 = vld [vmem:[%s3134_s24 + $0x60] sm:$0xff] }
  0x38   : > { %1346 = vmatpush1.xpose.msra.mxu0 %v249_v2  ;;  %1416 = vmatpush1.xpose.msra.mxu1 %v251_v3  ;;  %v513_v60 = vcombine.high %v225_v52, %v225_v52  ;;  %v520_v2 = vrot.slane %v225_v52, %v3157_v17  ;;  %v278_v3 = vld [vmem:[%s3139_s27 + $0x188] sm:$0xff] }
  0x39   : > { %1409 = vmatprep.mubr.f32.mxu0 %v409_v4  ;;  %1485 = vmatprep.subr.mxu0 %v254_v6  ;;  %v495_v58 = vcombine.high %v493_v49, %v493_v49 }
  0x3a   : > { %1479 = vmatprep.mubr.f32.mxu1 %v410_v7  ;;  %1555 = vmatprep.subr.mxu1 %v256_v10  ;;  %v280_v7 = vld [vmem:[%s3139_s27 + $0x198] sm:$0xff]  ;;  %v279_v10 = vld [vmem:[%s3139_s27 + $0x190] sm:$0xff]  ;;  %v528_v11 = vcombine.high %v520_v2, %v520_v2 }
  0x3b   : > { %1410 = vmatmul.mubr.f32.vlgmr.msra.gmra.mrb[10].mxu0 %v401_v59  ;;  %1480 = vmatmul.mubr.f32.vlgmr.msra.gmra.mrb[10].mxu1 %v408_v62  ;;  %v510_v59 = vrot.slane %v496_v50, %v3157_v17  ;;  %v226_v62 = vld [vmem:[%s3134_s24 + $0x68] sm:$0xff] }
  0x3c   : > { %1486 = vmatpush1.xpose.msra.mxu0 %v253_v12  ;;  %1556 = vmatpush1.xpose.msra.mxu1 %v255_v13  ;;  %v530_v6 = vcombine.high %v226_v62, %v226_v62  ;;  %v537_v12 = vrot.slane %v226_v62, %v3157_v17  ;;  %v282_v13 = vld [vmem:[%s3139_s27 + $0x1a8] sm:$0xff] }
  0x3d   : > { %1549 = vmatprep.mubr.f32.mxu0 %v426_v14  ;;  %1625 = vmatprep.subr.mxu0 %v258_v16  ;;  %v512_v4 = vcombine.high %v510_v59, %v510_v59 }
  0x3e   : > { %1619 = vmatprep.mubr.f32.mxu1 %v427_v18  ;;  %1695 = vmatprep.subr.mxu1 %v260_v21  ;;  %v228_v18 = vld [vmem:[%s3134_s24 + $0x78] sm:$0xff]  ;;  %v283_v21 = vld [vmem:[%s3139_s27 + $0x1b0] sm:$0xff]  ;;  %v545_v22 = vcombine.high %v537_v12, %v537_v12 }
  0x3f   : > { %1550 = vmatmul.mubr.f32.vlgmr.msra.gmra.mrb[12].mxu0 %v418_v5  ;;  %1620 = vmatmul.mubr.f32.vlgmr.msra.gmra.mrb[12].mxu1 %v425_v8  ;;  %v527_v5 = vrot.slane %v513_v60, %v3157_v17  ;;  %v227_v8 = vld [vmem:[%s3134_s24 + $0x70] sm:$0xff]  ;;  %v571_v32 = vrot.slane %v228_v18, %v3157_v17 }
  0x40   : > { %1626 = vmatpush1.xpose.msra.mxu0 %v257_v23  ;;  %1696 = vmatpush1.xpose.msra.mxu1 %v259_v24  ;;  %v547_v16 = vcombine.high %v227_v8, %v227_v8  ;;  %v554_v23 = vrot.slane %v227_v8, %v3157_v17  ;;  %v564_v24 = vcombine.high %v228_v18, %v228_v18 }
  0x41   : > { %1689 = vmatprep.mubr.f32.mxu0 %v443_v25  ;;  %1765 = vmatprep.subr.mxu0 %v262_v27  ;;  %v529_v14 = vcombine.high %v527_v5, %v527_v5  ;;  %v286_v25 = vld [vmem:[%s3139_s27 + $0x1c8] sm:$0xff] }
  0x42   : > { %1759 = vmatprep.mubr.f32.mxu1 %v444_v28  ;;  %1835 = vmatprep.subr.mxu1 %v264_v31  ;;  %v561_v27 = vrot.slane %v547_v16, %v3157_v17  ;;  %v288_v28 = vld [vmem:[%s3139_s27 + $0x1d8] sm:$0xff]  ;;  %v562_v31 = vcombine.high %v554_v23, %v554_v23 }
  0x43   : > { %1690 = vmatmul.mubr.f32.vlgmr.msra.gmra.mrb[14].mxu0 %v435_v15  ;;  %1760 = vmatmul.mubr.f32.vlgmr.msra.gmra.mrb[14].mxu1 %v442_v19  ;;  %v544_v15 = vrot.slane %v530_v6, %v3157_v17  ;;  %v284_v19 = vld [vmem:[%s3139_s27 + $0x1b8] sm:$0xff] }
  0x44   : > { %1766 = vmatpush1.xpose.msra.mxu0 %v261_v33  ;;  %1836 = vmatpush1.xpose.msra.mxu1 %v263_v34  ;;  %v578_v33 = vrot.slane %v564_v24, %v3157_v17  ;;  %v290_v34 = vld [vmem:[%s3139_s27 + $0x1e8] sm:$0xff] }
  0x45   : > { %1829 = vmatprep.mubr.f32.mxu0 %v460_v35  ;;  %1905 = vmatprep.subr.mxu0 %v266_v37  ;;  %v563_v35 = vcombine.high %v561_v27, %v561_v27  ;;  %v289_v37 = vld [vmem:[%s3139_s27 + $0x1e0] sm:$0xff] }
  0x46   : > { %1899 = vmatprep.mubr.f32.mxu1 %v461_v38  ;;  %1975 = vmatprep.subr.mxu1 %v268_v41  ;;  %v291_v38 = vld [vmem:[%s3139_s27 + $0x1f0] sm:$0xff]  ;;  %v580_v40 = vcombine.high %v578_v33, %v578_v33 }
  0x47   : > { %1830 = vmatmul.mubr.f32.vlgmr.msra.gmra.mrb[16].mxu0 %v452_v26  ;;  %1900 = vmatmul.mubr.f32.vlgmr.msra.gmra.mrb[16].mxu1 %v459_v29  ;;  %v546_v26 = vcombine.high %v544_v15, %v544_v15  ;;  %v285_v29 = vld [vmem:[%s3139_s27 + $0x1c0] sm:$0xff] }
  0x48   : > { %1906 = vmatpush1.xpose.msra.mxu0 %v265_v43  ;;  %1976 = vmatpush1.xpose.msra.mxu1 %v267_v44 }
  0x49   : > { %1969 = vmatprep.mubr.f32.mxu0 %v477_v45  ;;  %2045 = vmatprep.subr.mxu0 %v270_v47 }
  0x4a   : > { %2039 = vmatprep.mubr.f32.mxu1 %v478_v48  ;;  %2115 = vmatprep.subr.mxu1 %v272_v51 }
  0x4b   : > { %1970 = vmatmul.mubr.f32.vlgmr.msra.gmra.mrb[18].mxu0 %v469_v36  ;;  %2040 = vmatmul.mubr.f32.vlgmr.msra.gmra.mrb[18].mxu1 %v476_v39  ;;  %v292_v36 = vld [vmem:[%s3139_s27 + $0x1f8] sm:$0xff]  ;;  %v579_v39 = vcombine.high %v571_v32, %v571_v32 }
  0x4c   : > { %2046 = vmatpush1.xpose.msra.mxu0 %v269_v53  ;;  %2116 = vmatpush1.xpose.msra.mxu1 %v271_v54 }
  0x4d   : > { %2109 = vmatprep.mubr.f32.mxu0 %v494_v55  ;;  %2185 = vmatprep.subr.mxu0 %v274_v57 }
  0x4e   : > { %2179 = vmatprep.mubr.f32.mxu1 %v495_v58  ;;  %2255 = vmatprep.subr.mxu1 %v276_v61 }
  0x4f   : > { %2110 = vmatmul.mubr.f32.vlgmr.msra.gmra.mrb[20].mxu0 %v486_v46  ;;  %2180 = vmatmul.mubr.f32.vlgmr.msra.gmra.mrb[20].mxu1 %v493_v49 }
  0x50   : > { %2186 = vmatpush1.xpose.msra.mxu0 %v273_v63  ;;  %2256 = vmatpush1.xpose.msra.mxu1 %v275_v0 }
  0x51   : > { %2249 = vmatprep.mubr.f32.mxu0 %v511_v1  ;;  %2325 = vmatprep.subr.mxu0 %v278_v3 }
  0x52   : > { %2319 = vmatprep.mubr.f32.mxu1 %v512_v4  ;;  %2395 = vmatprep.subr.mxu1 %v280_v7 }
  0x53   : > { %2250 = vmatmul.mubr.f32.vlgmr.msra.gmra.mrb[22].mxu0 %v503_v56  ;;  %2320 = vmatmul.mubr.f32.vlgmr.msra.gmra.mrb[22].mxu1 %v510_v59 }
  0x54   : > { %2326 = vmatpush1.xpose.msra.mxu0 %v277_v9  ;;  %2396 = vmatpush1.xpose.msra.mxu1 %v279_v10 }
  0x55   : > { %2389 = vmatprep.mubr.f32.mxu0 %v528_v11  ;;  %2465 = vmatprep.subr.mxu0 %v282_v13 }
  0x56   : > { %2459 = vmatprep.mubr.f32.mxu1 %v529_v14  ;;  %2535 = vmatprep.subr.mxu1 %v284_v19 }
  0x57   : > { %2390 = vmatmul.mubr.f32.vlgmr.msra.gmra.mrb[24].mxu0 %v520_v2  ;;  %2460 = vmatmul.mubr.f32.vlgmr.msra.gmra.mrb[24].mxu1 %v527_v5 }
  0x58   : > { %2466 = vmatpush1.xpose.msra.mxu0 %v281_v20  ;;  %2536 = vmatpush1.xpose.msra.mxu1 %v283_v21 }
  0x59   : > { %2529 = vmatprep.mubr.f32.mxu0 %v545_v22  ;;  %2605 = vmatprep.subr.mxu0 %v286_v25 }
  0x5a   : > { %2599 = vmatprep.mubr.f32.mxu1 %v546_v26  ;;  %2675 = vmatprep.subr.mxu1 %v288_v28 }
  0x5b   : > { %2530 = vmatmul.mubr.f32.vlgmr.msra.gmra.mrb[26].mxu0 %v537_v12  ;;  %2600 = vmatmul.mubr.f32.vlgmr.msra.gmra.mrb[26].mxu1 %v544_v15 }
  0x5c   : > { %2606 = vmatpush1.xpose.msra.mxu0 %v285_v29  ;;  %2676 = vmatpush1.xpose.msra.mxu1 %v287_v30 }
  0x5d   : > { %2669 = vmatprep.mubr.f32.mxu0 %v562_v31  ;;  %2745 = vmatprep.subr.mxu0 %v290_v34 }
  0x5e   : > { %2739 = vmatprep.mubr.f32.mxu1 %v563_v35  ;;  %2815 = vmatprep.subr.mxu1 %v292_v36 }
  0x5f   : > { %2670 = vmatmul.mubr.f32.vlgmr.msra.gmra.mrb[28].mxu0 %v554_v23  ;;  %2740 = vmatmul.mubr.f32.vlgmr.msra.gmra.mrb[28].mxu1 %v561_v27 }
  0x60   : > { %2746 = vmatpush1.xpose.msra.mxu0 %v289_v37  ;;  %2816 = vmatpush1.xpose.msra.mxu1 %v291_v38 }
  0x61   : > { %2809 = vmatprep.mubr.f32.mxu0 %v579_v39  ;;  %2879 = vmatprep.mubr.f32.mxu1 %v580_v40 }
  0x63   : > { %2810 = vmatmul.mubr.f32.vlgmr.msra.gmra.mrb[30].mxu0 %v571_v32  ;;  %2880 = vmatmul.mubr.f32.vlgmr.msra.gmra.mrb[30].mxu1 %v578_v33 }
  0xfa   : > { %v711_v17 = vpop.f32.mrb[0].mxu0  ;;  %v781_v41 = vpop.f32.mrb[0].mxu1 }
  0xfb   : > { %v782_v42 = vadd.f32 %v781_v41, %v711_v17  ;;  %v713_v43 = vpop.f32.mrb[1].mxu0  ;;  %v783_v44 = vpop.f32.mrb[1].mxu1 }
  0xfe   : > { %v851_v45 = vpop.f32.mrb[2].mxu0  ;;  %v921_v46 = vpop.f32.mrb[2].mxu1 }
  0xff   : > { %v852_v47 = vadd.f32 %v851_v45, %v782_v42  ;;  %v853_v48 = vpop.f32.mrb[3].mxu0  ;;  %v923_v49 = vpop.f32.mrb[3].mxu1 }
 0x101   : > { %v922_v50 = vadd.f32 %v921_v46, %v852_v47 }
 0x102   : > { %v991_v51 = vpop.f32.mrb[4].mxu0  ;;  %v1061_v52 = vpop.f32.mrb[4].mxu1 }
 0x103   : > { %v992_v53 = vadd.f32 %v991_v51, %v922_v50  ;;  %v993_v54 = vpop.f32.mrb[5].mxu0  ;;  %v1063_v55 = vpop.f32.mrb[5].mxu1 }
 0x105   : > { %v1062_v56 = vadd.f32 %v1061_v52, %v992_v53 }
 0x106   : > { %v1131_v57 = vpop.f32.mrb[6].mxu0  ;;  %v1201_v58 = vpop.f32.mrb[6].mxu1 }
 0x107   : > { %v1132_v59 = vadd.f32 %v1131_v57, %v1062_v56  ;;  %v1133_v60 = vpop.f32.mrb[7].mxu0  ;;  %v1203_v61 = vpop.f32.mrb[7].mxu1 }
 0x109   : > { %v1202_v62 = vadd.f32 %v1201_v58, %v1132_v59 }
 0x10a   : > { %v1271_v63 = vpop.f32.mrb[8].mxu0  ;;  %v1341_v0 = vpop.f32.mrb[8].mxu1 }
 0x10b   : > { %v1272_v1 = vadd.f32 %v1271_v63, %v1202_v62  ;;  %v1273_v2 = vpop.f32.mrb[9].mxu0  ;;  %v1343_v3 = vpop.f32.mrb[9].mxu1 }
 0x10d   : > { %v1342_v4 = vadd.f32 %v1341_v0, %v1272_v1 }
 0x10e   : > { %v1411_v5 = vpop.f32.mrb[10].mxu0  ;;  %v1481_v6 = vpop.f32.mrb[10].mxu1 }
 0x10f   : > { %v1412_v7 = vadd.f32 %v1411_v5, %v1342_v4  ;;  %v1413_v8 = vpop.f32.mrb[11].mxu0  ;;  %v1483_v9 = vpop.f32.mrb[11].mxu1 }
 0x111   : > { %v1482_v10 = vadd.f32 %v1481_v6, %v1412_v7  ;;  %v212_v6 = vld [vmem:[%s3144_s30] sm:$0x3] }
 0x112   : > { %v1551_v11 = vpop.f32.mrb[12].mxu0  ;;  %v1621_v12 = vpop.f32.mrb[12].mxu1 }
 0x113   : > { %v1552_v13 = vadd.f32 %v1551_v11, %v1482_v10  ;;  %v1553_v14 = vpop.f32.mrb[13].mxu0  ;;  %v1623_v15 = vpop.f32.mrb[13].mxu1 }
 0x115   : > { %v1622_v16 = vadd.f32 %v1621_v12, %v1552_v13 }
 0x116   : > { %v1691_v18 = vpop.f32.mrb[14].mxu0  ;;  %v1761_v19 = vpop.f32.mrb[14].mxu1 }
 0x117   : > { %v1692_v20 = vadd.f32 %v1691_v18, %v1622_v16  ;;  %v1693_v21 = vpop.f32.mrb[15].mxu0  ;;  %v1763_v22 = vpop.f32.mrb[15].mxu1 }
 0x119   : > { %v1762_v23 = vadd.f32 %v1761_v19, %v1692_v20 }
 0x11a   : > { %v1831_v24 = vpop.f32.mrb[16].mxu0  ;;  %v1901_v25 = vpop.f32.mrb[16].mxu1 }
 0x11b   : > { %v1832_v26 = vadd.f32 %v1831_v24, %v1762_v23  ;;  %v1833_v27 = vpop.f32.mrb[17].mxu0  ;;  %v1903_v28 = vpop.f32.mrb[17].mxu1 }
 0x11d   : > { %v1902_v29 = vadd.f32 %v1901_v25, %v1832_v26 }
 0x11e   : > { %v1971_v30 = vpop.f32.mrb[18].mxu0  ;;  %v2041_v31 = vpop.f32.mrb[18].mxu1 }
 0x11f   : > { %v1972_v32 = vadd.f32 %v1971_v30, %v1902_v29  ;;  %v1973_v33 = vpop.f32.mrb[19].mxu0  ;;  %v2043_v34 = vpop.f32.mrb[19].mxu1 }
 0x121   : > { %v2042_v35 = vadd.f32 %v2041_v31, %v1972_v32 }
 0x122   : > { %v2111_v36 = vpop.f32.mrb[20].mxu0  ;;  %v2181_v37 = vpop.f32.mrb[20].mxu1 }
 0x123   : > { %v2112_v38 = vadd.f32 %v2111_v36, %v2042_v35  ;;  %v2113_v39 = vpop.f32.mrb[21].mxu0  ;;  %v2183_v40 = vpop.f32.mrb[21].mxu1 }
 0x125   : > { %v2182_v17 = vadd.f32 %v2181_v37, %v2112_v38 }
 0x126   : > { %v2251_v41 = vpop.f32.mrb[22].mxu0  ;;  %v2321_v42 = vpop.f32.mrb[22].mxu1 }
 0x127   : > { %v2252_v43 = vadd.f32 %v2251_v41, %v2182_v17  ;;  %v2253_v44 = vpop.f32.mrb[23].mxu0  ;;  %v2323_v45 = vpop.f32.mrb[23].mxu1 }
 0x129   : > { %v2322_v46 = vadd.f32 %v2321_v42, %v2252_v43 }
 0x12a   : > { %v2391_v47 = vpop.f32.mrb[24].mxu0  ;;  %v2461_v48 = vpop.f32.mrb[24].mxu1 }
 0x12b   : > { %v2392_v49 = vadd.f32 %v2391_v47, %v2322_v46  ;;  %v2393_v50 = vpop.f32.mrb[25].mxu0  ;;  %v2463_v51 = vpop.f32.mrb[25].mxu1 }
 0x12d   : > { %v2462_v52 = vadd.f32 %v2461_v48, %v2392_v49 }
 0x12e   : > { %v2531_v53 = vpop.f32.mrb[26].mxu0  ;;  %v2601_v54 = vpop.f32.mrb[26].mxu1 }
 0x12f   : > { %v2532_v55 = vadd.f32 %v2531_v53, %v2462_v52  ;;  %v2533_v56 = vpop.f32.mrb[27].mxu0  ;;  %v2603_v57 = vpop.f32.mrb[27].mxu1 }
 0x131   : > { %v2602_v58 = vadd.f32 %v2601_v54, %v2532_v55 }
 0x132   : > { %v2671_v59 = vpop.f32.mrb[28].mxu0  ;;  %v2741_v60 = vpop.f32.mrb[28].mxu1 }
 0x133   : > { %v2672_v61 = vadd.f32 %v2671_v59, %v2602_v58  ;;  %v2673_v62 = vpop.f32.mrb[29].mxu0  ;;  %v2743_v63 = vpop.f32.mrb[29].mxu1 }
 0x135   : > { %v2742_v0 = vadd.f32 %v2741_v60, %v2672_v61 }
 0x136   : > { %v2811_v1 = vpop.f32.mrb[30].mxu0  ;;  %v2881_v2 = vpop.f32.mrb[30].mxu1 }
 0x137   : > { %v2812_v3 = vadd.f32 %v2811_v1, %v2742_v0  ;;  %v2813_v4 = vpop.f32.mrb[31].mxu0  ;;  %v2883_v5 = vpop.f32.mrb[31].mxu1 }
 0x139   : > { %v2882_v7 = vadd.f32 %v2881_v2, %v2812_v3 }
 0x13b   : > { %v2885_v8 = vadd.f32 %v2882_v7, %v212_v6 }
 0x13d   : > { %2887 = vst.msk [vmem:[%s3144_s30] sm:$0x3] %vm2886_vm1, %v2885_v8 }
 0x13e PF: > { %s12_s13 = sadd.s32 1, %s3079_s13   ;;  %s3282_s9 = smov %s3071_s11 }
 0x13f   : > { %p9_p8 = scmp.ge.s32.totalorder %s12_s13, 6   ;;  %s3283_s10 = smov %s3075_s12 }
 0x140   : > { %s3284_s11 = smov %s3287_s14  ;;  %s3285_s12 = smov %s3291_s15 }
 0x141   :  { %11 = sbr.rel (!%p9_p8) target bundleno = 3 (0x3), region = 65 }

</bundles_post_ra>
